<compile_context>
chip_gen: v6e
topology: v6e:2x2x1
jax: 0.10.0
libtpu: 0.0.40
codegen_flags: <defaults>
</compile_context>

<pallas_src>
import functools

import numpy as np
import jax
import jax.numpy as jnp
from jax.experimental import pallas as pl
from jax.experimental.pallas import tpu as pltpu

# ----------------------------- model configuration ---------------------------
CONVM_DIM = 64      # convM_dim
CONVM_DEPTH = 2     # convM_depth
KERNEL_SIZE = 3     # depthwise kernel size
PATCH_SIZE = 2      # patch size / stride
HIDDEN_SIZE1 = 16   # hidden_size1
N_VARS = 4          # n_vars
MAX_LAGS = 2        # max_lags
EPS = 1e-5          # BatchNorm eps (torch default)

BATCH = 2
SEQ_LEN = 16        # T

N_OUT = N_VARS * N_VARS * MAX_LAGS
PP = PATCH_SIZE * PATCH_SIZE
KK = KERNEL_SIZE * KERNEL_SIZE

MATMUL_PRECISION = jax.lax.Precision.HIGHEST   # match torch fp32 matmuls


def _align8(n):
    return (n + 7) // 8 * 8


# --- packed parameter-slab row offsets (sections 8-row aligned so the large
#     MXU operands slice out at sublane-tile boundaries) -----------------------
ROW_WPATCH = 0                                     # (p*p, C)
ROW_BPATCH = ROW_WPATCH + PP                       # (1, C)
ROW_G0 = ROW_BPATCH + 1
ROW_BETA0 = ROW_G0 + 1
ROW_DWW = _align8(ROW_BETA0 + 1)                   # (D*K*K, C)
ROW_DWB = ROW_DWW + CONVM_DEPTH * KK               # (D, C)
ROW_G1 = ROW_DWB + CONVM_DEPTH
ROW_B1 = ROW_G1 + CONVM_DEPTH
ROW_PWW = _align8(ROW_B1 + CONVM_DEPTH)            # (D*C, C), blocks 8-aligned
ROW_PWB = ROW_PWW + CONVM_DEPTH * CONVM_DIM
ROW_G2 = ROW_PWB + CONVM_DEPTH
ROW_B2 = ROW_G2 + CONVM_DEPTH
ROW_WFC1 = _align8(ROW_B2 + CONVM_DEPTH)           # (C, H1) in cols [:H1]
ROW_BFC1 = ROW_WFC1 + CONVM_DIM
ROW_GBN = ROW_BFC1 + 1
ROW_BETABN = ROW_GBN + 1
ROW_WFC2 = _align8(ROW_BETABN + 1)                 # (H1, N_OUT) in cols [:N_OUT]
ROW_BFC2 = ROW_WFC2 + HIDDEN_SIZE1
PARAM_ROWS = _align8(ROW_BFC2 + 1)


# ----------------------------- in-kernel math helpers -------------------------
def _erf(x):
    # Abramowitz & Stegun 7.1.26 polynomial approximation of erf, |err| < 1.5e-7.
    p = 0.3275911
    a1, a2, a3, a4, a5 = (0.254829592, -0.284496736, 1.421413741,
                          -1.453152027, 1.061405429)
    sgn = jnp.where(x >= 0.0, 1.0, -1.0)
    a = jnp.abs(x)
    t = 1.0 / (1.0 + p * a)
    poly = t * (a1 + t * (a2 + t * (a3 + t * (a4 + t * a5))))
    return sgn * (1.0 - poly * jnp.exp(-a * a))


def _gelu(x):
    # exact GELU, matching torch.nn.GELU() default
    return 0.5 * x * (1.0 + _erf(x * 0.7071067811865476))


def _bn_train(y2d, gamma, beta):
    """Training-mode BatchNorm over rows of y2d:(M,C), folded to one apply.

    Single full-slab traversal for the stats (mu and E[x^2] together), then
    cheap (1,C) work for scale/shift, then one full-slab FMA.
    """
    mu = jnp.mean(y2d, axis=0, keepdims=True)
    ex2 = jnp.mean(y2d * y2d, axis=0, keepdims=True)
    var = ex2 - mu * mu                                  # biased variance
    scale = gamma * jax.lax.rsqrt(var + EPS)             # (1, C)
    shift = beta - mu * scale                            # (1, C)
    return y2d * scale + shift


def _row_rotate(x, s, use_roll):
    """Rotate rows so out[m] = x[(m + s) mod M]; the caller masks invalid rows."""
    m = x.shape[0]
    s = s % m
    if s == 0:
        return x
    if use_roll:
        # jnp.roll semantics: roll(x, t)[i] = x[(i - t) mod m]; want t = -s.
        return pltpu.roll(x, m - s, axis=0)
    # numerically identical fallback (slice + concat rotation)
    return jnp.concatenate([x[s:, :], x[:s, :]], axis=0)


# --------------------------------- fused kernel -------------------------------
def _fused_forward_kernel(act_ref, p_ref, o_ref, *,
                          depth, ksize, batch, h_out, w_out, fast_ops):
    K = ksize
    B, Ho, Wo = batch, h_out, w_out
    HW = Ho * Wo
    M = B * HW
    C = CONVM_DIM
    pad = (K - 1) // 2
    center = (K * K) // 2
    precision = MATMUL_PRECISION

    # composed (H, W) shift per depthwise tap -> ONE row rotation per tap
    shifts = [(iy - pad) * Wo + (ix - pad) for iy in range(K) for ix in range(K)]

    # ---- patch embedding: Conv2d(1,C,p,stride=p) as p*p VPU broadcast-FMAs ---
    patches = act_ref[:, 0:PP]                                   # (M, p*p)
    wp = p_ref[ROW_WPATCH:ROW_WPATCH + PP, :]                    # (p*p, C)
    y = p_ref[ROW_BPATCH:ROW_BPATCH + 1, :] + patches[:, 0:1] * wp[0:1, :]
    for t in range(1, PP):
        y = y + patches[:, t:t + 1] * wp[t:t + 1, :]
    y = _gelu(y)
    y = _bn_train(y, p_ref[ROW_G0:ROW_G0 + 1, :],
                  p_ref[ROW_BETA0:ROW_BETA0 + 1, :])             # (M, C) slab

    # ---- per-tap 'same'-pad masks, lane-broadcast to (M, C) ONCE (hoisted
    #      out of the depth loop; JAX does not CSE broadcast_in_dim) -----------
    tap_masks = []
    for r in range(K * K):
        if r == center:
            tap_masks.append(None)                               # no mask needed
        else:
            tap_masks.append(
                jnp.broadcast_to(act_ref[:, PP + r:PP + r + 1], (M, C)))

    # ---- depth x [Residual(dw conv -> GELU -> BN) -> 1x1 conv -> GELU -> BN] -
    for d in range(depth):
        dww = p_ref[ROW_DWW + d * K * K:ROW_DWW + (d + 1) * K * K, :]   # (K*K, C)
        # center tap seeds the accumulator: no shift, no mask, no zeros init
        acc = y * dww[center:center + 1, :]
        for r in range(K * K):
            if r == center:
                continue
            acc = acc + (_row_rotate(y, shifts[r], fast_ops)
                         * tap_masks[r] * dww[r:r + 1, :])
        z = _gelu(acc + p_ref[ROW_DWB + d:ROW_DWB + d + 1, :])
        z = _bn_train(z, p_ref[ROW_G1 + d:ROW_G1 + d + 1, :],
                      p_ref[ROW_B1 + d:ROW_B1 + d + 1, :])
        y = y + z                                                # Residual

        # pointwise 1x1 conv = channel matmul on the MXU (8-aligned slab slice)
        pww = p_ref[ROW_PWW + d * C:ROW_PWW + (d + 1) * C, :]    # (C, C)
        z = jnp.dot(y, pww, preferred_element_type=jnp.float32,
                    precision=precision) + p_ref[ROW_PWB + d:ROW_PWB + d + 1, :]
        z = _gelu(z)
        y = _bn_train(z, p_ref[ROW_G2 + d:ROW_G2 + d + 1, :],
                      p_ref[ROW_B2 + d:ROW_B2 + d + 1, :])

    # ---- AdaptiveAvgPool2d((1,1)) + Flatten: per-batch mean over HW rows -----
    if fast_ops:
        pooled = jnp.mean(y.reshape(B, HW, C), axis=1)           # (B, C)
    else:
        pooled = jnp.concatenate(
            [jnp.mean(y[b * HW:(b + 1) * HW, :], axis=0, keepdims=True)
             for b in range(B)], axis=0)

    # ---- fc1 -> BatchNorm1d (training stats) -> fc2 --------------------------
    H1, NO = HIDDEN_SIZE1, N_OUT
    h = jnp.dot(pooled, p_ref[ROW_WFC1:ROW_WFC1 + CONVM_DIM, 0:H1],
                preferred_element_type=jnp.float32, precision=precision)
    h = h + p_ref[ROW_BFC1:ROW_BFC1 + 1, 0:H1]
    h = _bn_train(h, p_ref[ROW_GBN:ROW_GBN + 1, 0:H1],
                  p_ref[ROW_BETABN:ROW_BETABN + 1, 0:H1])
    o_ref[...] = (jnp.dot(h, p_ref[ROW_WFC2:ROW_WFC2 + H1, 0:NO],
                          preferred_element_type=jnp.float32,
                          precision=precision)
                  + p_ref[ROW_BFC2:ROW_BFC2 + 1, 0:NO])


# ------------------------------ parameters ------------------------------------
def init_params(key):
    def nrm(k, shape, scale):
        return (scale * jax.random.normal(k, shape)).astype(jnp.float32)

    keys = iter(jax.random.split(key, 32))
    dim, p, K, D = CONVM_DIM, PATCH_SIZE, KERNEL_SIZE, CONVM_DEPTH
    return {
        "w_patch": nrm(next(keys), (p * p, dim), 0.2),
        "b_patch": nrm(next(keys), (1, dim), 0.1),
        "g0": 1.0 + nrm(next(keys), (1, dim), 0.1),
        "beta0": nrm(next(keys), (1, dim), 0.1),
        "dw_w": nrm(next(keys), (D, K * K, dim), 0.2),
        "dw_b": nrm(next(keys), (D, 1, dim), 0.1),
        "g1": 1.0 + nrm(next(keys), (D, 1, dim), 0.1),
        "b1": nrm(next(keys), (D, 1, dim), 0.1),
        "pw_w": nrm(next(keys), (D, dim, dim), 0.1),
        "pw_b": nrm(next(keys), (D, 1, dim), 0.1),
        "g2": 1.0 + nrm(next(keys), (D, 1, dim), 0.1),
        "b2": nrm(next(keys), (D, 1, dim), 0.1),
        "w_fc1": nrm(next(keys), (dim, HIDDEN_SIZE1), 0.1),
        "b_fc1": nrm(next(keys), (1, HIDDEN_SIZE1), 0.1),
        "g_bn": 1.0 + nrm(next(keys), (1, HIDDEN_SIZE1), 0.1),
        "beta_bn": nrm(next(keys), (1, HIDDEN_SIZE1), 0.1),
        "w_fc2": nrm(next(keys), (HIDDEN_SIZE1, N_OUT), 0.1),
        "b_fc2": nrm(next(keys), (1, N_OUT), 0.1),
    }


def pack_params(params):
    """Pack every weight/bias/BN parameter into ONE (PARAM_ROWS, 64) f32 slab.

    Done once, outside jit -- inside the kernel each piece is a static,
    8-row-aligned-where-it-matters slice of a single VMEM ref.
    """
    C = CONVM_DIM
    slab = np.zeros((PARAM_ROWS, C), np.float32)

    def put(row, a):
        a = np.asarray(a, np.float32)
        a = a.reshape(-1, a.shape[-1])
        slab[row:row + a.shape[0], :a.shape[-1]] = a

    put(ROW_WPATCH, params["w_patch"])
    put(ROW_BPATCH, params["b_patch"])
    put(ROW_G0, params["g0"])
    put(ROW_BETA0, params["beta0"])
    put(ROW_DWW, params["dw_w"])
    put(ROW_DWB, params["dw_b"])
    put(ROW_G1, params["g1"])
    put(ROW_B1, params["b1"])
    put(ROW_PWW, params["pw_w"])
    put(ROW_PWB, params["pw_b"])
    put(ROW_G2, params["g2"])
    put(ROW_B2, params["b2"])
    put(ROW_WFC1, params["w_fc1"])
    put(ROW_BFC1, params["b_fc1"])
    put(ROW_GBN, params["g_bn"])
    put(ROW_BETABN, params["beta_bn"])
    put(ROW_WFC2, params["w_fc2"])
    put(ROW_BFC2, params["b_fc2"])
    return jnp.asarray(slab)


# ------------------------------ forward (wrapper) ------------------------------
@functools.partial(jax.jit, static_argnames=("fast_ops",))
def conv_mixer_forward(x, param_slab, fast_ops=True):
    # x: (B, T, n_vars) float32
    B, T, nv = x.shape
    p, K = PATCH_SIZE, KERNEL_SIZE
    Ho, Wo = nv // p, T // p
    HW = Ho * Wo
    M = B * HW

    # torch: unsqueeze(x.swapaxes(1,2), 1) -> NCHW (B,1,H=n_vars,W=T).  The
    # strided p x p patch extraction is a tiny (B*T*n_vars = 128 element)
    # relayout left to XLA; the contraction itself runs as VPU FMAs in-kernel.
    img = jnp.swapaxes(x, 1, 2).astype(jnp.float32)[:, :Ho * p, :Wo * p]
    patches = img.reshape(B, Ho, p, Wo, p).transpose(0, 1, 3, 2, 4)
    patches = patches.reshape(M, p * p)

    # Static combined per-tap 'same'-padding masks (trace-time numpy constants).
    # tap r = iy*K+ix is valid at row m iff ho+dy in [0,Ho) AND wo+dx in [0,Wo);
    # applied AFTER the composed roll it also zeroes wrap-around/batch-crossing.
    padk = (K - 1) // 2
    offs = np.arange(K) - padk
    mi = np.arange(M)
    wo_idx = (mi % Wo)[:, None]
    ho_idx = ((mi // Wo) % Ho)[:, None]
    wvalid = (wo_idx + offs >= 0) & (wo_idx + offs < Wo)           # (M, K)
    hvalid = (ho_idx + offs >= 0) & (ho_idx + offs < Ho)           # (M, K)
    tapmask = (hvalid[:, :, None] & wvalid[:, None, :]).reshape(M, K * K)

    # One lane-dense activation-side slab: [patches | per-tap masks]
    act_slab = jnp.concatenate(
        [patches, jnp.asarray(tapmask, jnp.float32)], axis=1)      # (M, p*p+K*K)

    kernel = functools.partial(
        _fused_forward_kernel, depth=CONVM_DEPTH, ksize=K,
        batch=B, h_out=Ho, w_out=Wo, fast_ops=fast_ops)

    # Single launch, two input DMAs; all intermediates stay VMEM-resident
    # (whole problem is ~200 KiB here, so no grid / vmem_limit override needed).
    out = pl.pallas_call(
        kernel,
        in_specs=[pl.BlockSpec(memory_space=pltpu.MemorySpace.VMEM)] * 2,
        out_specs=pl.BlockSpec(memory_space=pltpu.MemorySpace.VMEM),
        out_shape=jax.ShapeDtypeStruct((B, N_OUT), jnp.float32),
    )(act_slab, param_slab)

    # reformat: (B, n_vars, n_vars, max_lags)
    return out.reshape(B, N_VARS, N_VARS, MAX_LAGS)


# ---------------------------------- main ---------------------------------------
if __name__ == "__main__":
    key = jax.random.PRNGKey(0)
    k_x, k_p = jax.random.split(key)
    x = jax.random.normal(k_x, (BATCH, SEQ_LEN, N_VARS), dtype=jnp.float32)
    params = init_params(k_p)
    param_slab = pack_params(params)

    try:
        out = jax.block_until_ready(
            conv_mixer_forward(x, param_slab, fast_ops=True))
    except Exception:
        # Numerically IDENTICAL fallback (rotation via slice+concat, pooling via
        # per-batch reductions) for Mosaic builds that reject sublane
        # pltpu.roll or the 3-D reshape-mean; matmul precision is unchanged.
        out = jax.block_until_ready(
            conv_mixer_forward(x, param_slab, fast_ops=False))

    assert out.shape == (BATCH, N_VARS, N_VARS, MAX_LAGS), out.shape
    assert bool(jnp.all(jnp.isfinite(out)))
    print("KERNEL_OK")
</pallas_src>

<mosaic_0001>
module attributes {stable_mosaic.version = 11 : i64} {
  func.func @_fused_forward_kernel(%arg0: memref<32x13xf32, #tpu.memory_space<vmem>>, %arg1: memref<264x64xf32, #tpu.memory_space<vmem>>, %arg2: memref<2x32xf32, #tpu.memory_space<vmem>>) attributes {dimension_semantics = [], scalar_prefetch = 0 : i64, scratch_operands = 0 : i64, tpu.core_type = #tpu.core_type<tc>} {
    %c0 = arith.constant 0 : index
    %c0_0 = arith.constant 0 : index
    %0 = vector.load %arg0[%c0, %c0_0] : memref<32x13xf32, #tpu.memory_space<vmem>>, vector<32x4xf32>
    %c0_1 = arith.constant 0 : index
    %c0_2 = arith.constant 0 : index
    %1 = vector.load %arg1[%c0_1, %c0_2] : memref<264x64xf32, #tpu.memory_space<vmem>>, vector<4x64xf32>
    %c4 = arith.constant 4 : index
    %c0_3 = arith.constant 0 : index
    %2 = vector.load %arg1[%c4, %c0_3] : memref<264x64xf32, #tpu.memory_space<vmem>>, vector<1x64xf32>
    %3 = vector.extract_strided_slice %0 {offsets = [0, 0], sizes = [32, 1], strides = [1, 1]} : vector<32x4xf32> to vector<32x1xf32>
    %4 = vector.extract_strided_slice %1 {offsets = [0, 0], sizes = [1, 64], strides = [1, 1]} : vector<4x64xf32> to vector<1x64xf32>
    %5 = vector.broadcast %3 : vector<32x1xf32> to vector<32x64xf32>
    %6 = vector.broadcast %4 : vector<1x64xf32> to vector<32x64xf32>
    %7 = arith.mulf %5, %6 : vector<32x64xf32>
    %8 = vector.broadcast %2 : vector<1x64xf32> to vector<32x64xf32>
    %9 = arith.addf %8, %7 : vector<32x64xf32>
    %10 = vector.extract_strided_slice %0 {offsets = [0, 1], sizes = [32, 1], strides = [1, 1]} : vector<32x4xf32> to vector<32x1xf32>
    %11 = vector.extract_strided_slice %1 {offsets = [1, 0], sizes = [1, 64], strides = [1, 1]} : vector<4x64xf32> to vector<1x64xf32>
    %12 = vector.broadcast %10 : vector<32x1xf32> to vector<32x64xf32>
    %13 = vector.broadcast %11 : vector<1x64xf32> to vector<32x64xf32>
    %14 = arith.mulf %12, %13 : vector<32x64xf32>
    %15 = arith.addf %9, %14 : vector<32x64xf32>
    %16 = vector.extract_strided_slice %0 {offsets = [0, 2], sizes = [32, 1], strides = [1, 1]} : vector<32x4xf32> to vector<32x1xf32>
    %17 = vector.extract_strided_slice %1 {offsets = [2, 0], sizes = [1, 64], strides = [1, 1]} : vector<4x64xf32> to vector<1x64xf32>
    %18 = vector.broadcast %16 : vector<32x1xf32> to vector<32x64xf32>
    %19 = vector.broadcast %17 : vector<1x64xf32> to vector<32x64xf32>
    %20 = arith.mulf %18, %19 : vector<32x64xf32>
    %21 = arith.addf %15, %20 : vector<32x64xf32>
    %22 = vector.extract_strided_slice %0 {offsets = [0, 3], sizes = [32, 1], strides = [1, 1]} : vector<32x4xf32> to vector<32x1xf32>
    %23 = vector.extract_strided_slice %1 {offsets = [3, 0], sizes = [1, 64], strides = [1, 1]} : vector<4x64xf32> to vector<1x64xf32>
    %24 = vector.broadcast %22 : vector<32x1xf32> to vector<32x64xf32>
    %25 = vector.broadcast %23 : vector<1x64xf32> to vector<32x64xf32>
    %26 = arith.mulf %24, %25 : vector<32x64xf32>
    %27 = arith.addf %21, %26 : vector<32x64xf32>
    %cst = arith.constant 5.000000e-01 : f32
    %28 = vector.broadcast %cst : f32 to vector<32x64xf32>
    %29 = arith.mulf %28, %27 : vector<32x64xf32>
    %cst_4 = arith.constant 0.707106769 : f32
    %30 = vector.broadcast %cst_4 : f32 to vector<32x64xf32>
    %31 = arith.mulf %27, %30 : vector<32x64xf32>
    %cst_5 = arith.constant 0.000000e+00 : f32
    %32 = vector.broadcast %cst_5 : f32 to vector<32x64xf32>
    %33 = arith.cmpf oge, %31, %32 : vector<32x64xf32>
    %cst_6 = arith.constant 1.000000e+00 : f32
    %cst_7 = arith.constant -1.000000e+00 : f32
    %34 = vector.broadcast %cst_6 : f32 to vector<32x64xf32>
    %35 = vector.broadcast %cst_7 : f32 to vector<32x64xf32>
    %36 = arith.select %33, %34, %35 : vector<32x64xi1>, vector<32x64xf32>
    %37 = math.absf %31 : vector<32x64xf32>
    %cst_8 = arith.constant 0.327591091 : f32
    %38 = vector.broadcast %cst_8 : f32 to vector<32x64xf32>
    %39 = arith.mulf %38, %37 : vector<32x64xf32>
    %cst_9 = arith.constant 1.000000e+00 : f32
    %40 = vector.broadcast %cst_9 : f32 to vector<32x64xf32>
    %41 = arith.addf %40, %39 : vector<32x64xf32>
    %cst_10 = arith.constant 1.000000e+00 : f32
    %42 = vector.broadcast %cst_10 : f32 to vector<32x64xf32>
    %43 = arith.divf %42, %41 : vector<32x64xf32>
    %cst_11 = arith.constant 1.06140542 : f32
    %44 = vector.broadcast %cst_11 : f32 to vector<32x64xf32>
    %45 = arith.mulf %43, %44 : vector<32x64xf32>
    %cst_12 = arith.constant -1.45315206 : f32
    %46 = vector.broadcast %cst_12 : f32 to vector<32x64xf32>
    %47 = arith.addf %46, %45 : vector<32x64xf32>
    %48 = arith.mulf %43, %47 : vector<32x64xf32>
    %cst_13 = arith.constant 1.42141378 : f32
    %49 = vector.broadcast %cst_13 : f32 to vector<32x64xf32>
    %50 = arith.addf %49, %48 : vector<32x64xf32>
    %51 = arith.mulf %43, %50 : vector<32x64xf32>
    %cst_14 = arith.constant -0.284496725 : f32
    %52 = vector.broadcast %cst_14 : f32 to vector<32x64xf32>
    %53 = arith.addf %52, %51 : vector<32x64xf32>
    %54 = arith.mulf %43, %53 : vector<32x64xf32>
    %cst_15 = arith.constant 0.254829586 : f32
    %55 = vector.broadcast %cst_15 : f32 to vector<32x64xf32>
    %56 = arith.addf %55, %54 : vector<32x64xf32>
    %57 = arith.mulf %43, %56 : vector<32x64xf32>
    %cst_16 = arith.constant 0.000000e+00 : f32
    %58 = vector.broadcast %cst_16 : f32 to vector<32x64xf32>
    %59 = arith.subf %58, %37 : vector<32x64xf32>
    %60 = arith.mulf %59, %37 : vector<32x64xf32>
    %61 = math.exp %60 : vector<32x64xf32>
    %62 = arith.mulf %57, %61 : vector<32x64xf32>
    %cst_17 = arith.constant 1.000000e+00 : f32
    %63 = vector.broadcast %cst_17 : f32 to vector<32x64xf32>
    %64 = arith.subf %63, %62 : vector<32x64xf32>
    %65 = arith.mulf %36, %64 : vector<32x64xf32>
    %cst_18 = arith.constant 1.000000e+00 : f32
    %66 = vector.broadcast %cst_18 : f32 to vector<32x64xf32>
    %67 = arith.addf %66, %65 : vector<32x64xf32>
    %68 = arith.mulf %29, %67 : vector<32x64xf32>
    %c5 = arith.constant 5 : index
    %c0_19 = arith.constant 0 : index
    %69 = vector.load %arg1[%c5, %c0_19] : memref<264x64xf32, #tpu.memory_space<vmem>>, vector<1x64xf32>
    %c6 = arith.constant 6 : index
    %c0_20 = arith.constant 0 : index
    %70 = vector.load %arg1[%c6, %c0_20] : memref<264x64xf32, #tpu.memory_space<vmem>>, vector<1x64xf32>
    %cst_21 = arith.constant dense<0.000000e+00> : vector<64xf32>
    %71 = vector.multi_reduction <add>, %68, %cst_21 [0] : vector<32x64xf32> to vector<64xf32>
    %72 = vector.shape_cast %71 : vector<64xf32> to vector<1x64xf32>
    %cst_22 = arith.constant 3.200000e+01 : f32
    %73 = vector.broadcast %cst_22 : f32 to vector<1x64xf32>
    %74 = arith.divf %72, %73 : vector<1x64xf32>
    %75 = arith.mulf %68, %68 : vector<32x64xf32>
    %cst_23 = arith.constant dense<0.000000e+00> : vector<64xf32>
    %76 = vector.multi_reduction <add>, %75, %cst_23 [0] : vector<32x64xf32> to vector<64xf32>
    %77 = vector.shape_cast %76 : vector<64xf32> to vector<1x64xf32>
    %cst_24 = arith.constant 3.200000e+01 : f32
    %78 = vector.broadcast %cst_24 : f32 to vector<1x64xf32>
    %79 = arith.divf %77, %78 : vector<1x64xf32>
    %80 = arith.mulf %74, %74 : vector<1x64xf32>
    %81 = arith.subf %79, %80 : vector<1x64xf32>
    %cst_25 = arith.constant 9.99999974E-6 : f32
    %82 = vector.broadcast %cst_25 : f32 to vector<1x64xf32>
    %83 = arith.addf %81, %82 : vector<1x64xf32>
    %84 = math.rsqrt %83 : vector<1x64xf32>
    %85 = arith.mulf %69, %84 : vector<1x64xf32>
    %86 = arith.mulf %74, %85 : vector<1x64xf32>
    %87 = arith.subf %70, %86 : vector<1x64xf32>
    %88 = vector.broadcast %85 : vector<1x64xf32> to vector<32x64xf32>
    %89 = arith.mulf %68, %88 : vector<32x64xf32>
    %90 = vector.broadcast %87 : vector<1x64xf32> to vector<32x64xf32>
    %91 = arith.addf %89, %90 : vector<32x64xf32>
    %c0_26 = arith.constant 0 : index
    %c4_27 = arith.constant 4 : index
    %92 = vector.load %arg0[%c0_26, %c4_27] : memref<32x13xf32, #tpu.memory_space<vmem>>, vector<32x1xf32>
    %93 = vector.shape_cast %92 : vector<32x1xf32> to vector<32x1xf32>
    %94 = vector.broadcast %93 : vector<32x1xf32> to vector<32x64xf32>
    %c0_28 = arith.constant 0 : index
    %c5_29 = arith.constant 5 : index
    %95 = vector.load %arg0[%c0_28, %c5_29] : memref<32x13xf32, #tpu.memory_space<vmem>>, vector<32x1xf32>
    %96 = vector.shape_cast %95 : vector<32x1xf32> to vector<32x1xf32>
    %97 = vector.broadcast %96 : vector<32x1xf32> to vector<32x64xf32>
    %c0_30 = arith.constant 0 : index
    %c6_31 = arith.constant 6 : index
    %98 = vector.load %arg0[%c0_30, %c6_31] : memref<32x13xf32, #tpu.memory_space<vmem>>, vector<32x1xf32>
    %99 = vector.shape_cast %98 : vector<32x1xf32> to vector<32x1xf32>
    %100 = vector.broadcast %99 : vector<32x1xf32> to vector<32x64xf32>
    %c0_32 = arith.constant 0 : index
    %c7 = arith.constant 7 : index
    %101 = vector.load %arg0[%c0_32, %c7] : memref<32x13xf32, #tpu.memory_space<vmem>>, vector<32x1xf32>
    %102 = vector.shape_cast %101 : vector<32x1xf32> to vector<32x1xf32>
    %103 = vector.broadcast %102 : vector<32x1xf32> to vector<32x64xf32>
    %c0_33 = arith.constant 0 : index
    %c9 = arith.constant 9 : index
    %104 = vector.load %arg0[%c0_33, %c9] : memref<32x13xf32, #tpu.memory_space<vmem>>, vector<32x1xf32>
    %105 = vector.shape_cast %104 : vector<32x1xf32> to vector<32x1xf32>
    %106 = vector.broadcast %105 : vector<32x1xf32> to vector<32x64xf32>
    %c0_34 = arith.constant 0 : index
    %c10 = arith.constant 10 : index
    %107 = vector.load %arg0[%c0_34, %c10] : memref<32x13xf32, #tpu.memory_space<vmem>>, vector<32x1xf32>
    %108 = vector.shape_cast %107 : vector<32x1xf32> to vector<32x1xf32>
    %109 = vector.broadcast %108 : vector<32x1xf32> to vector<32x64xf32>
    %c0_35 = arith.constant 0 : index
    %c11 = arith.constant 11 : index
    %110 = vector.load %arg0[%c0_35, %c11] : memref<32x13xf32, #tpu.memory_space<vmem>>, vector<32x1xf32>
    %111 = vector.shape_cast %110 : vector<32x1xf32> to vector<32x1xf32>
    %112 = vector.broadcast %111 : vector<32x1xf32> to vector<32x64xf32>
    %c0_36 = arith.constant 0 : index
    %c12 = arith.constant 12 : index
    %113 = vector.load %arg0[%c0_36, %c12] : memref<32x13xf32, #tpu.memory_space<vmem>>, vector<32x1xf32>
    %114 = vector.shape_cast %113 : vector<32x1xf32> to vector<32x1xf32>
    %115 = vector.broadcast %114 : vector<32x1xf32> to vector<32x64xf32>
    %c8 = arith.constant 8 : index
    %c0_37 = arith.constant 0 : index
    %116 = vector.load %arg1[%c8, %c0_37] : memref<264x64xf32, #tpu.memory_space<vmem>>, vector<9x64xf32>
    %117 = vector.extract_strided_slice %116 {offsets = [4, 0], sizes = [1, 64], strides = [1, 1]} : vector<9x64xf32> to vector<1x64xf32>
    %118 = vector.broadcast %117 : vector<1x64xf32> to vector<32x64xf32>
    %119 = arith.mulf %91, %118 : vector<32x64xf32>
    %c9_i32 = arith.constant 9 : i32
    %120 = tpu.dynamic_rotate %91 by %c9_i32 dim 0 : vector<32x64xf32>, i32 -> vector<32x64xf32>
    %121 = arith.mulf %120, %94 : vector<32x64xf32>
    %122 = vector.extract_strided_slice %116 {offsets = [0, 0], sizes = [1, 64], strides = [1, 1]} : vector<9x64xf32> to vector<1x64xf32>
    %123 = vector.broadcast %122 : vector<1x64xf32> to vector<32x64xf32>
    %124 = arith.mulf %121, %123 : vector<32x64xf32>
    %125 = arith.addf %119, %124 : vector<32x64xf32>
    %c8_i32 = arith.constant 8 : i32
    %126 = tpu.dynamic_rotate %91 by %c8_i32 dim 0 : vector<32x64xf32>, i32 -> vector<32x64xf32>
    %127 = arith.mulf %126, %97 : vector<32x64xf32>
    %128 = vector.extract_strided_slice %116 {offsets = [1, 0], sizes = [1, 64], strides = [1, 1]} : vector<9x64xf32> to vector<1x64xf32>
    %129 = vector.broadcast %128 : vector<1x64xf32> to vector<32x64xf32>
    %130 = arith.mulf %127, %129 : vector<32x64xf32>
    %131 = arith.addf %125, %130 : vector<32x64xf32>
    %c7_i32 = arith.constant 7 : i32
    %132 = tpu.dynamic_rotate %91 by %c7_i32 dim 0 : vector<32x64xf32>, i32 -> vector<32x64xf32>
    %133 = arith.mulf %132, %100 : vector<32x64xf32>
    %134 = vector.extract_strided_slice %116 {offsets = [2, 0], sizes = [1, 64], strides = [1, 1]} : vector<9x64xf32> to vector<1x64xf32>
    %135 = vector.broadcast %134 : vector<1x64xf32> to vector<32x64xf32>
    %136 = arith.mulf %133, %135 : vector<32x64xf32>
    %137 = arith.addf %131, %136 : vector<32x64xf32>
    %c1_i32 = arith.constant 1 : i32
    %138 = tpu.dynamic_rotate %91 by %c1_i32 dim 0 : vector<32x64xf32>, i32 -> vector<32x64xf32>
    %139 = arith.mulf %138, %103 : vector<32x64xf32>
    %140 = vector.extract_strided_slice %116 {offsets = [3, 0], sizes = [1, 64], strides = [1, 1]} : vector<9x64xf32> to vector<1x64xf32>
    %141 = vector.broadcast %140 : vector<1x64xf32> to vector<32x64xf32>
    %142 = arith.mulf %139, %141 : vector<32x64xf32>
    %143 = arith.addf %137, %142 : vector<32x64xf32>
    %c31_i32 = arith.constant 31 : i32
    %144 = tpu.dynamic_rotate %91 by %c31_i32 dim 0 : vector<32x64xf32>, i32 -> vector<32x64xf32>
    %145 = arith.mulf %144, %106 : vector<32x64xf32>
    %146 = vector.extract_strided_slice %116 {offsets = [5, 0], sizes = [1, 64], strides = [1, 1]} : vector<9x64xf32> to vector<1x64xf32>
    %147 = vector.broadcast %146 : vector<1x64xf32> to vector<32x64xf32>
    %148 = arith.mulf %145, %147 : vector<32x64xf32>
    %149 = arith.addf %143, %148 : vector<32x64xf32>
    %c25_i32 = arith.constant 25 : i32
    %150 = tpu.dynamic_rotate %91 by %c25_i32 dim 0 : vector<32x64xf32>, i32 -> vector<32x64xf32>
    %151 = arith.mulf %150, %109 : vector<32x64xf32>
    %152 = vector.extract_strided_slice %116 {offsets = [6, 0], sizes = [1, 64], strides = [1, 1]} : vector<9x64xf32> to vector<1x64xf32>
    %153 = vector.broadcast %152 : vector<1x64xf32> to vector<32x64xf32>
    %154 = arith.mulf %151, %153 : vector<32x64xf32>
    %155 = arith.addf %149, %154 : vector<32x64xf32>
    %c24_i32 = arith.constant 24 : i32
    %156 = tpu.dynamic_rotate %91 by %c24_i32 dim 0 : vector<32x64xf32>, i32 -> vector<32x64xf32>
    %157 = arith.mulf %156, %112 : vector<32x64xf32>
    %158 = vector.extract_strided_slice %116 {offsets = [7, 0], sizes = [1, 64], strides = [1, 1]} : vector<9x64xf32> to vector<1x64xf32>
    %159 = vector.broadcast %158 : vector<1x64xf32> to vector<32x64xf32>
    %160 = arith.mulf %157, %159 : vector<32x64xf32>
    %161 = arith.addf %155, %160 : vector<32x64xf32>
    %c23_i32 = arith.constant 23 : i32
    %162 = tpu.dynamic_rotate %91 by %c23_i32 dim 0 : vector<32x64xf32>, i32 -> vector<32x64xf32>
    %163 = arith.mulf %162, %115 : vector<32x64xf32>
    %164 = vector.extract_strided_slice %116 {offsets = [8, 0], sizes = [1, 64], strides = [1, 1]} : vector<9x64xf32> to vector<1x64xf32>
    %165 = vector.broadcast %164 : vector<1x64xf32> to vector<32x64xf32>
    %166 = arith.mulf %163, %165 : vector<32x64xf32>
    %167 = arith.addf %161, %166 : vector<32x64xf32>
    %c26 = arith.constant 26 : index
    %c0_38 = arith.constant 0 : index
    %168 = vector.load %arg1[%c26, %c0_38] : memref<264x64xf32, #tpu.memory_space<vmem>>, vector<1x64xf32>
    %169 = vector.broadcast %168 : vector<1x64xf32> to vector<32x64xf32>
    %170 = arith.addf %167, %169 : vector<32x64xf32>
    %cst_39 = arith.constant 5.000000e-01 : f32
    %171 = vector.broadcast %cst_39 : f32 to vector<32x64xf32>
    %172 = arith.mulf %171, %170 : vector<32x64xf32>
    %cst_40 = arith.constant 0.707106769 : f32
    %173 = vector.broadcast %cst_40 : f32 to vector<32x64xf32>
    %174 = arith.mulf %170, %173 : vector<32x64xf32>
    %cst_41 = arith.constant 0.000000e+00 : f32
    %175 = vector.broadcast %cst_41 : f32 to vector<32x64xf32>
    %176 = arith.cmpf oge, %174, %175 : vector<32x64xf32>
    %cst_42 = arith.constant 1.000000e+00 : f32
    %cst_43 = arith.constant -1.000000e+00 : f32
    %177 = vector.broadcast %cst_42 : f32 to vector<32x64xf32>
    %178 = vector.broadcast %cst_43 : f32 to vector<32x64xf32>
    %179 = arith.select %176, %177, %178 : vector<32x64xi1>, vector<32x64xf32>
    %180 = math.absf %174 : vector<32x64xf32>
    %cst_44 = arith.constant 0.327591091 : f32
    %181 = vector.broadcast %cst_44 : f32 to vector<32x64xf32>
    %182 = arith.mulf %181, %180 : vector<32x64xf32>
    %cst_45 = arith.constant 1.000000e+00 : f32
    %183 = vector.broadcast %cst_45 : f32 to vector<32x64xf32>
    %184 = arith.addf %183, %182 : vector<32x64xf32>
    %cst_46 = arith.constant 1.000000e+00 : f32
    %185 = vector.broadcast %cst_46 : f32 to vector<32x64xf32>
    %186 = arith.divf %185, %184 : vector<32x64xf32>
    %cst_47 = arith.constant 1.06140542 : f32
    %187 = vector.broadcast %cst_47 : f32 to vector<32x64xf32>
    %188 = arith.mulf %186, %187 : vector<32x64xf32>
    %cst_48 = arith.constant -1.45315206 : f32
    %189 = vector.broadcast %cst_48 : f32 to vector<32x64xf32>
    %190 = arith.addf %189, %188 : vector<32x64xf32>
    %191 = arith.mulf %186, %190 : vector<32x64xf32>
    %cst_49 = arith.constant 1.42141378 : f32
    %192 = vector.broadcast %cst_49 : f32 to vector<32x64xf32>
    %193 = arith.addf %192, %191 : vector<32x64xf32>
    %194 = arith.mulf %186, %193 : vector<32x64xf32>
    %cst_50 = arith.constant -0.284496725 : f32
    %195 = vector.broadcast %cst_50 : f32 to vector<32x64xf32>
    %196 = arith.addf %195, %194 : vector<32x64xf32>
    %197 = arith.mulf %186, %196 : vector<32x64xf32>
    %cst_51 = arith.constant 0.254829586 : f32
    %198 = vector.broadcast %cst_51 : f32 to vector<32x64xf32>
    %199 = arith.addf %198, %197 : vector<32x64xf32>
    %200 = arith.mulf %186, %199 : vector<32x64xf32>
    %cst_52 = arith.constant 0.000000e+00 : f32
    %201 = vector.broadcast %cst_52 : f32 to vector<32x64xf32>
    %202 = arith.subf %201, %180 : vector<32x64xf32>
    %203 = arith.mulf %202, %180 : vector<32x64xf32>
    %204 = math.exp %203 : vector<32x64xf32>
    %205 = arith.mulf %200, %204 : vector<32x64xf32>
    %cst_53 = arith.constant 1.000000e+00 : f32
    %206 = vector.broadcast %cst_53 : f32 to vector<32x64xf32>
    %207 = arith.subf %206, %205 : vector<32x64xf32>
    %208 = arith.mulf %179, %207 : vector<32x64xf32>
    %cst_54 = arith.constant 1.000000e+00 : f32
    %209 = vector.broadcast %cst_54 : f32 to vector<32x64xf32>
    %210 = arith.addf %209, %208 : vector<32x64xf32>
    %211 = arith.mulf %172, %210 : vector<32x64xf32>
    %c28 = arith.constant 28 : index
    %c0_55 = arith.constant 0 : index
    %212 = vector.load %arg1[%c28, %c0_55] : memref<264x64xf32, #tpu.memory_space<vmem>>, vector<1x64xf32>
    %c30 = arith.constant 30 : index
    %c0_56 = arith.constant 0 : index
    %213 = vector.load %arg1[%c30, %c0_56] : memref<264x64xf32, #tpu.memory_space<vmem>>, vector<1x64xf32>
    %cst_57 = arith.constant dense<0.000000e+00> : vector<64xf32>
    %214 = vector.multi_reduction <add>, %211, %cst_57 [0] : vector<32x64xf32> to vector<64xf32>
    %215 = vector.shape_cast %214 : vector<64xf32> to vector<1x64xf32>
    %cst_58 = arith.constant 3.200000e+01 : f32
    %216 = vector.broadcast %cst_58 : f32 to vector<1x64xf32>
    %217 = arith.divf %215, %216 : vector<1x64xf32>
    %218 = arith.mulf %211, %211 : vector<32x64xf32>
    %cst_59 = arith.constant dense<0.000000e+00> : vector<64xf32>
    %219 = vector.multi_reduction <add>, %218, %cst_59 [0] : vector<32x64xf32> to vector<64xf32>
    %220 = vector.shape_cast %219 : vector<64xf32> to vector<1x64xf32>
    %cst_60 = arith.constant 3.200000e+01 : f32
    %221 = vector.broadcast %cst_60 : f32 to vector<1x64xf32>
    %222 = arith.divf %220, %221 : vector<1x64xf32>
    %223 = arith.mulf %217, %217 : vector<1x64xf32>
    %224 = arith.subf %222, %223 : vector<1x64xf32>
    %cst_61 = arith.constant 9.99999974E-6 : f32
    %225 = vector.broadcast %cst_61 : f32 to vector<1x64xf32>
    %226 = arith.addf %224, %225 : vector<1x64xf32>
    %227 = math.rsqrt %226 : vector<1x64xf32>
    %228 = arith.mulf %212, %227 : vector<1x64xf32>
    %229 = arith.mulf %217, %228 : vector<1x64xf32>
    %230 = arith.subf %213, %229 : vector<1x64xf32>
    %231 = vector.broadcast %228 : vector<1x64xf32> to vector<32x64xf32>
    %232 = arith.mulf %211, %231 : vector<32x64xf32>
    %233 = vector.broadcast %230 : vector<1x64xf32> to vector<32x64xf32>
    %234 = arith.addf %232, %233 : vector<32x64xf32>
    %235 = arith.addf %91, %234 : vector<32x64xf32>
    %c32 = arith.constant 32 : index
    %c0_62 = arith.constant 0 : index
    %236 = vector.load %arg1[%c32, %c0_62] : memref<264x64xf32, #tpu.memory_space<vmem>>, vector<64x64xf32>
    %cst_63 = arith.constant dense<0.000000e+00> : vector<32x64xf32>
    %237 = tpu.matmul %235, %236, %cst_63 {dimension_numbers = #tpu.dot_dimension_numbers<[1], [0], [0], [1], [0, 0, 1, 1], [], []>, precision = #tpu.contract_precision<fp32>} : vector<32x64xf32>, vector<64x64xf32>, vector<32x64xf32> -> vector<32x64xf32>
    %c160 = arith.constant 160 : index
    %c0_64 = arith.constant 0 : index
    %238 = vector.load %arg1[%c160, %c0_64] : memref<264x64xf32, #tpu.memory_space<vmem>>, vector<1x64xf32>
    %239 = vector.broadcast %238 : vector<1x64xf32> to vector<32x64xf32>
    %240 = arith.addf %237, %239 : vector<32x64xf32>
    %cst_65 = arith.constant 5.000000e-01 : f32
    %241 = vector.broadcast %cst_65 : f32 to vector<32x64xf32>
    %242 = arith.mulf %241, %240 : vector<32x64xf32>
    %cst_66 = arith.constant 0.707106769 : f32
    %243 = vector.broadcast %cst_66 : f32 to vector<32x64xf32>
    %244 = arith.mulf %240, %243 : vector<32x64xf32>
    %cst_67 = arith.constant 0.000000e+00 : f32
    %245 = vector.broadcast %cst_67 : f32 to vector<32x64xf32>
    %246 = arith.cmpf oge, %244, %245 : vector<32x64xf32>
    %cst_68 = arith.constant 1.000000e+00 : f32
    %cst_69 = arith.constant -1.000000e+00 : f32
    %247 = vector.broadcast %cst_68 : f32 to vector<32x64xf32>
    %248 = vector.broadcast %cst_69 : f32 to vector<32x64xf32>
    %249 = arith.select %246, %247, %248 : vector<32x64xi1>, vector<32x64xf32>
    %250 = math.absf %244 : vector<32x64xf32>
    %cst_70 = arith.constant 0.327591091 : f32
    %251 = vector.broadcast %cst_70 : f32 to vector<32x64xf32>
    %252 = arith.mulf %251, %250 : vector<32x64xf32>
    %cst_71 = arith.constant 1.000000e+00 : f32
    %253 = vector.broadcast %cst_71 : f32 to vector<32x64xf32>
    %254 = arith.addf %253, %252 : vector<32x64xf32>
    %cst_72 = arith.constant 1.000000e+00 : f32
    %255 = vector.broadcast %cst_72 : f32 to vector<32x64xf32>
    %256 = arith.divf %255, %254 : vector<32x64xf32>
    %cst_73 = arith.constant 1.06140542 : f32
    %257 = vector.broadcast %cst_73 : f32 to vector<32x64xf32>
    %258 = arith.mulf %256, %257 : vector<32x64xf32>
    %cst_74 = arith.constant -1.45315206 : f32
    %259 = vector.broadcast %cst_74 : f32 to vector<32x64xf32>
    %260 = arith.addf %259, %258 : vector<32x64xf32>
    %261 = arith.mulf %256, %260 : vector<32x64xf32>
    %cst_75 = arith.constant 1.42141378 : f32
    %262 = vector.broadcast %cst_75 : f32 to vector<32x64xf32>
    %263 = arith.addf %262, %261 : vector<32x64xf32>
    %264 = arith.mulf %256, %263 : vector<32x64xf32>
    %cst_76 = arith.constant -0.284496725 : f32
    %265 = vector.broadcast %cst_76 : f32 to vector<32x64xf32>
    %266 = arith.addf %265, %264 : vector<32x64xf32>
    %267 = arith.mulf %256, %266 : vector<32x64xf32>
    %cst_77 = arith.constant 0.254829586 : f32
    %268 = vector.broadcast %cst_77 : f32 to vector<32x64xf32>
    %269 = arith.addf %268, %267 : vector<32x64xf32>
    %270 = arith.mulf %256, %269 : vector<32x64xf32>
    %cst_78 = arith.constant 0.000000e+00 : f32
    %271 = vector.broadcast %cst_78 : f32 to vector<32x64xf32>
    %272 = arith.subf %271, %250 : vector<32x64xf32>
    %273 = arith.mulf %272, %250 : vector<32x64xf32>
    %274 = math.exp %273 : vector<32x64xf32>
    %275 = arith.mulf %270, %274 : vector<32x64xf32>
    %cst_79 = arith.constant 1.000000e+00 : f32
    %276 = vector.broadcast %cst_79 : f32 to vector<32x64xf32>
    %277 = arith.subf %276, %275 : vector<32x64xf32>
    %278 = arith.mulf %249, %277 : vector<32x64xf32>
    %cst_80 = arith.constant 1.000000e+00 : f32
    %279 = vector.broadcast %cst_80 : f32 to vector<32x64xf32>
    %280 = arith.addf %279, %278 : vector<32x64xf32>
    %281 = arith.mulf %242, %280 : vector<32x64xf32>
    %c162 = arith.constant 162 : index
    %c0_81 = arith.constant 0 : index
    %282 = vector.load %arg1[%c162, %c0_81] : memref<264x64xf32, #tpu.memory_space<vmem>>, vector<1x64xf32>
    %c164 = arith.constant 164 : index
    %c0_82 = arith.constant 0 : index
    %283 = vector.load %arg1[%c164, %c0_82] : memref<264x64xf32, #tpu.memory_space<vmem>>, vector<1x64xf32>
    %cst_83 = arith.constant dense<0.000000e+00> : vector<64xf32>
    %284 = vector.multi_reduction <add>, %281, %cst_83 [0] : vector<32x64xf32> to vector<64xf32>
    %285 = vector.shape_cast %284 : vector<64xf32> to vector<1x64xf32>
    %cst_84 = arith.constant 3.200000e+01 : f32
    %286 = vector.broadcast %cst_84 : f32 to vector<1x64xf32>
    %287 = arith.divf %285, %286 : vector<1x64xf32>
    %288 = arith.mulf %281, %281 : vector<32x64xf32>
    %cst_85 = arith.constant dense<0.000000e+00> : vector<64xf32>
    %289 = vector.multi_reduction <add>, %288, %cst_85 [0] : vector<32x64xf32> to vector<64xf32>
    %290 = vector.shape_cast %289 : vector<64xf32> to vector<1x64xf32>
    %cst_86 = arith.constant 3.200000e+01 : f32
    %291 = vector.broadcast %cst_86 : f32 to vector<1x64xf32>
    %292 = arith.divf %290, %291 : vector<1x64xf32>
    %293 = arith.mulf %287, %287 : vector<1x64xf32>
    %294 = arith.subf %292, %293 : vector<1x64xf32>
    %cst_87 = arith.constant 9.99999974E-6 : f32
    %295 = vector.broadcast %cst_87 : f32 to vector<1x64xf32>
    %296 = arith.addf %294, %295 : vector<1x64xf32>
    %297 = math.rsqrt %296 : vector<1x64xf32>
    %298 = arith.mulf %282, %297 : vector<1x64xf32>
    %299 = arith.mulf %287, %298 : vector<1x64xf32>
    %300 = arith.subf %283, %299 : vector<1x64xf32>
    %301 = vector.broadcast %298 : vector<1x64xf32> to vector<32x64xf32>
    %302 = arith.mulf %281, %301 : vector<32x64xf32>
    %303 = vector.broadcast %300 : vector<1x64xf32> to vector<32x64xf32>
    %304 = arith.addf %302, %303 : vector<32x64xf32>
    %c17 = arith.constant 17 : index
    %c0_88 = arith.constant 0 : index
    %305 = vector.load %arg1[%c17, %c0_88] : memref<264x64xf32, #tpu.memory_space<vmem>>, vector<9x64xf32>
    %306 = vector.extract_strided_slice %305 {offsets = [4, 0], sizes = [1, 64], strides = [1, 1]} : vector<9x64xf32> to vector<1x64xf32>
    %307 = vector.broadcast %306 : vector<1x64xf32> to vector<32x64xf32>
    %308 = arith.mulf %304, %307 : vector<32x64xf32>
    %c9_i32_89 = arith.constant 9 : i32
    %309 = tpu.dynamic_rotate %304 by %c9_i32_89 dim 0 : vector<32x64xf32>, i32 -> vector<32x64xf32>
    %310 = arith.mulf %309, %94 : vector<32x64xf32>
    %311 = vector.extract_strided_slice %305 {offsets = [0, 0], sizes = [1, 64], strides = [1, 1]} : vector<9x64xf32> to vector<1x64xf32>
    %312 = vector.broadcast %311 : vector<1x64xf32> to vector<32x64xf32>
    %313 = arith.mulf %310, %312 : vector<32x64xf32>
    %314 = arith.addf %308, %313 : vector<32x64xf32>
    %c8_i32_90 = arith.constant 8 : i32
    %315 = tpu.dynamic_rotate %304 by %c8_i32_90 dim 0 : vector<32x64xf32>, i32 -> vector<32x64xf32>
    %316 = arith.mulf %315, %97 : vector<32x64xf32>
    %317 = vector.extract_strided_slice %305 {offsets = [1, 0], sizes = [1, 64], strides = [1, 1]} : vector<9x64xf32> to vector<1x64xf32>
    %318 = vector.broadcast %317 : vector<1x64xf32> to vector<32x64xf32>
    %319 = arith.mulf %316, %318 : vector<32x64xf32>
    %320 = arith.addf %314, %319 : vector<32x64xf32>
    %c7_i32_91 = arith.constant 7 : i32
    %321 = tpu.dynamic_rotate %304 by %c7_i32_91 dim 0 : vector<32x64xf32>, i32 -> vector<32x64xf32>
    %322 = arith.mulf %321, %100 : vector<32x64xf32>
    %323 = vector.extract_strided_slice %305 {offsets = [2, 0], sizes = [1, 64], strides = [1, 1]} : vector<9x64xf32> to vector<1x64xf32>
    %324 = vector.broadcast %323 : vector<1x64xf32> to vector<32x64xf32>
    %325 = arith.mulf %322, %324 : vector<32x64xf32>
    %326 = arith.addf %320, %325 : vector<32x64xf32>
    %c1_i32_92 = arith.constant 1 : i32
    %327 = tpu.dynamic_rotate %304 by %c1_i32_92 dim 0 : vector<32x64xf32>, i32 -> vector<32x64xf32>
    %328 = arith.mulf %327, %103 : vector<32x64xf32>
    %329 = vector.extract_strided_slice %305 {offsets = [3, 0], sizes = [1, 64], strides = [1, 1]} : vector<9x64xf32> to vector<1x64xf32>
    %330 = vector.broadcast %329 : vector<1x64xf32> to vector<32x64xf32>
    %331 = arith.mulf %328, %330 : vector<32x64xf32>
    %332 = arith.addf %326, %331 : vector<32x64xf32>
    %c31_i32_93 = arith.constant 31 : i32
    %333 = tpu.dynamic_rotate %304 by %c31_i32_93 dim 0 : vector<32x64xf32>, i32 -> vector<32x64xf32>
    %334 = arith.mulf %333, %106 : vector<32x64xf32>
    %335 = vector.extract_strided_slice %305 {offsets = [5, 0], sizes = [1, 64], strides = [1, 1]} : vector<9x64xf32> to vector<1x64xf32>
    %336 = vector.broadcast %335 : vector<1x64xf32> to vector<32x64xf32>
    %337 = arith.mulf %334, %336 : vector<32x64xf32>
    %338 = arith.addf %332, %337 : vector<32x64xf32>
    %c25_i32_94 = arith.constant 25 : i32
    %339 = tpu.dynamic_rotate %304 by %c25_i32_94 dim 0 : vector<32x64xf32>, i32 -> vector<32x64xf32>
    %340 = arith.mulf %339, %109 : vector<32x64xf32>
    %341 = vector.extract_strided_slice %305 {offsets = [6, 0], sizes = [1, 64], strides = [1, 1]} : vector<9x64xf32> to vector<1x64xf32>
    %342 = vector.broadcast %341 : vector<1x64xf32> to vector<32x64xf32>
    %343 = arith.mulf %340, %342 : vector<32x64xf32>
    %344 = arith.addf %338, %343 : vector<32x64xf32>
    %c24_i32_95 = arith.constant 24 : i32
    %345 = tpu.dynamic_rotate %304 by %c24_i32_95 dim 0 : vector<32x64xf32>, i32 -> vector<32x64xf32>
    %346 = arith.mulf %345, %112 : vector<32x64xf32>
    %347 = vector.extract_strided_slice %305 {offsets = [7, 0], sizes = [1, 64], strides = [1, 1]} : vector<9x64xf32> to vector<1x64xf32>
    %348 = vector.broadcast %347 : vector<1x64xf32> to vector<32x64xf32>
    %349 = arith.mulf %346, %348 : vector<32x64xf32>
    %350 = arith.addf %344, %349 : vector<32x64xf32>
    %c23_i32_96 = arith.constant 23 : i32
    %351 = tpu.dynamic_rotate %304 by %c23_i32_96 dim 0 : vector<32x64xf32>, i32 -> vector<32x64xf32>
    %352 = arith.mulf %351, %115 : vector<32x64xf32>
    %353 = vector.extract_strided_slice %305 {offsets = [8, 0], sizes = [1, 64], strides = [1, 1]} : vector<9x64xf32> to vector<1x64xf32>
    %354 = vector.broadcast %353 : vector<1x64xf32> to vector<32x64xf32>
    %355 = arith.mulf %352, %354 : vector<32x64xf32>
    %356 = arith.addf %350, %355 : vector<32x64xf32>
    %c27 = arith.constant 27 : index
    %c0_97 = arith.constant 0 : index
    %357 = vector.load %arg1[%c27, %c0_97] : memref<264x64xf32, #tpu.memory_space<vmem>>, vector<1x64xf32>
    %358 = vector.broadcast %357 : vector<1x64xf32> to vector<32x64xf32>
    %359 = arith.addf %356, %358 : vector<32x64xf32>
    %cst_98 = arith.constant 5.000000e-01 : f32
    %360 = vector.broadcast %cst_98 : f32 to vector<32x64xf32>
    %361 = arith.mulf %360, %359 : vector<32x64xf32>
    %cst_99 = arith.constant 0.707106769 : f32
    %362 = vector.broadcast %cst_99 : f32 to vector<32x64xf32>
    %363 = arith.mulf %359, %362 : vector<32x64xf32>
    %cst_100 = arith.constant 0.000000e+00 : f32
    %364 = vector.broadcast %cst_100 : f32 to vector<32x64xf32>
    %365 = arith.cmpf oge, %363, %364 : vector<32x64xf32>
    %cst_101 = arith.constant 1.000000e+00 : f32
    %cst_102 = arith.constant -1.000000e+00 : f32
    %366 = vector.broadcast %cst_101 : f32 to vector<32x64xf32>
    %367 = vector.broadcast %cst_102 : f32 to vector<32x64xf32>
    %368 = arith.select %365, %366, %367 : vector<32x64xi1>, vector<32x64xf32>
    %369 = math.absf %363 : vector<32x64xf32>
    %cst_103 = arith.constant 0.327591091 : f32
    %370 = vector.broadcast %cst_103 : f32 to vector<32x64xf32>
    %371 = arith.mulf %370, %369 : vector<32x64xf32>
    %cst_104 = arith.constant 1.000000e+00 : f32
    %372 = vector.broadcast %cst_104 : f32 to vector<32x64xf32>
    %373 = arith.addf %372, %371 : vector<32x64xf32>
    %cst_105 = arith.constant 1.000000e+00 : f32
    %374 = vector.broadcast %cst_105 : f32 to vector<32x64xf32>
    %375 = arith.divf %374, %373 : vector<32x64xf32>
    %cst_106 = arith.constant 1.06140542 : f32
    %376 = vector.broadcast %cst_106 : f32 to vector<32x64xf32>
    %377 = arith.mulf %375, %376 : vector<32x64xf32>
    %cst_107 = arith.constant -1.45315206 : f32
    %378 = vector.broadcast %cst_107 : f32 to vector<32x64xf32>
    %379 = arith.addf %378, %377 : vector<32x64xf32>
    %380 = arith.mulf %375, %379 : vector<32x64xf32>
    %cst_108 = arith.constant 1.42141378 : f32
    %381 = vector.broadcast %cst_108 : f32 to vector<32x64xf32>
    %382 = arith.addf %381, %380 : vector<32x64xf32>
    %383 = arith.mulf %375, %382 : vector<32x64xf32>
    %cst_109 = arith.constant -0.284496725 : f32
    %384 = vector.broadcast %cst_109 : f32 to vector<32x64xf32>
    %385 = arith.addf %384, %383 : vector<32x64xf32>
    %386 = arith.mulf %375, %385 : vector<32x64xf32>
    %cst_110 = arith.constant 0.254829586 : f32
    %387 = vector.broadcast %cst_110 : f32 to vector<32x64xf32>
    %388 = arith.addf %387, %386 : vector<32x64xf32>
    %389 = arith.mulf %375, %388 : vector<32x64xf32>
    %cst_111 = arith.constant 0.000000e+00 : f32
    %390 = vector.broadcast %cst_111 : f32 to vector<32x64xf32>
    %391 = arith.subf %390, %369 : vector<32x64xf32>
    %392 = arith.mulf %391, %369 : vector<32x64xf32>
    %393 = math.exp %392 : vector<32x64xf32>
    %394 = arith.mulf %389, %393 : vector<32x64xf32>
    %cst_112 = arith.constant 1.000000e+00 : f32
    %395 = vector.broadcast %cst_112 : f32 to vector<32x64xf32>
    %396 = arith.subf %395, %394 : vector<32x64xf32>
    %397 = arith.mulf %368, %396 : vector<32x64xf32>
    %cst_113 = arith.constant 1.000000e+00 : f32
    %398 = vector.broadcast %cst_113 : f32 to vector<32x64xf32>
    %399 = arith.addf %398, %397 : vector<32x64xf32>
    %400 = arith.mulf %361, %399 : vector<32x64xf32>
    %c29 = arith.constant 29 : index
    %c0_114 = arith.constant 0 : index
    %401 = vector.load %arg1[%c29, %c0_114] : memref<264x64xf32, #tpu.memory_space<vmem>>, vector<1x64xf32>
    %c31 = arith.constant 31 : index
    %c0_115 = arith.constant 0 : index
    %402 = vector.load %arg1[%c31, %c0_115] : memref<264x64xf32, #tpu.memory_space<vmem>>, vector<1x64xf32>
    %cst_116 = arith.constant dense<0.000000e+00> : vector<64xf32>
    %403 = vector.multi_reduction <add>, %400, %cst_116 [0] : vector<32x64xf32> to vector<64xf32>
    %404 = vector.shape_cast %403 : vector<64xf32> to vector<1x64xf32>
    %cst_117 = arith.constant 3.200000e+01 : f32
    %405 = vector.broadcast %cst_117 : f32 to vector<1x64xf32>
    %406 = arith.divf %404, %405 : vector<1x64xf32>
    %407 = arith.mulf %400, %400 : vector<32x64xf32>
    %cst_118 = arith.constant dense<0.000000e+00> : vector<64xf32>
    %408 = vector.multi_reduction <add>, %407, %cst_118 [0] : vector<32x64xf32> to vector<64xf32>
    %409 = vector.shape_cast %408 : vector<64xf32> to vector<1x64xf32>
    %cst_119 = arith.constant 3.200000e+01 : f32
    %410 = vector.broadcast %cst_119 : f32 to vector<1x64xf32>
    %411 = arith.divf %409, %410 : vector<1x64xf32>
    %412 = arith.mulf %406, %406 : vector<1x64xf32>
    %413 = arith.subf %411, %412 : vector<1x64xf32>
    %cst_120 = arith.constant 9.99999974E-6 : f32
    %414 = vector.broadcast %cst_120 : f32 to vector<1x64xf32>
    %415 = arith.addf %413, %414 : vector<1x64xf32>
    %416 = math.rsqrt %415 : vector<1x64xf32>
    %417 = arith.mulf %401, %416 : vector<1x64xf32>
    %418 = arith.mulf %406, %417 : vector<1x64xf32>
    %419 = arith.subf %402, %418 : vector<1x64xf32>
    %420 = vector.broadcast %417 : vector<1x64xf32> to vector<32x64xf32>
    %421 = arith.mulf %400, %420 : vector<32x64xf32>
    %422 = vector.broadcast %419 : vector<1x64xf32> to vector<32x64xf32>
    %423 = arith.addf %421, %422 : vector<32x64xf32>
    %424 = arith.addf %304, %423 : vector<32x64xf32>
    %c96 = arith.constant 96 : index
    %c0_121 = arith.constant 0 : index
    %425 = vector.load %arg1[%c96, %c0_121] : memref<264x64xf32, #tpu.memory_space<vmem>>, vector<64x64xf32>
    %cst_122 = arith.constant dense<0.000000e+00> : vector<32x64xf32>
    %426 = tpu.matmul %424, %425, %cst_122 {dimension_numbers = #tpu.dot_dimension_numbers<[1], [0], [0], [1], [0, 0, 1, 1], [], []>, precision = #tpu.contract_precision<fp32>} : vector<32x64xf32>, vector<64x64xf32>, vector<32x64xf32> -> vector<32x64xf32>
    %c161 = arith.constant 161 : index
    %c0_123 = arith.constant 0 : index
    %427 = vector.load %arg1[%c161, %c0_123] : memref<264x64xf32, #tpu.memory_space<vmem>>, vector<1x64xf32>
    %428 = vector.broadcast %427 : vector<1x64xf32> to vector<32x64xf32>
    %429 = arith.addf %426, %428 : vector<32x64xf32>
    %cst_124 = arith.constant 5.000000e-01 : f32
    %430 = vector.broadcast %cst_124 : f32 to vector<32x64xf32>
    %431 = arith.mulf %430, %429 : vector<32x64xf32>
    %cst_125 = arith.constant 0.707106769 : f32
    %432 = vector.broadcast %cst_125 : f32 to vector<32x64xf32>
    %433 = arith.mulf %429, %432 : vector<32x64xf32>
    %cst_126 = arith.constant 0.000000e+00 : f32
    %434 = vector.broadcast %cst_126 : f32 to vector<32x64xf32>
    %435 = arith.cmpf oge, %433, %434 : vector<32x64xf32>
    %cst_127 = arith.constant 1.000000e+00 : f32
    %cst_128 = arith.constant -1.000000e+00 : f32
    %436 = vector.broadcast %cst_127 : f32 to vector<32x64xf32>
    %437 = vector.broadcast %cst_128 : f32 to vector<32x64xf32>
    %438 = arith.select %435, %436, %437 : vector<32x64xi1>, vector<32x64xf32>
    %439 = math.absf %433 : vector<32x64xf32>
    %cst_129 = arith.constant 0.327591091 : f32
    %440 = vector.broadcast %cst_129 : f32 to vector<32x64xf32>
    %441 = arith.mulf %440, %439 : vector<32x64xf32>
    %cst_130 = arith.constant 1.000000e+00 : f32
    %442 = vector.broadcast %cst_130 : f32 to vector<32x64xf32>
    %443 = arith.addf %442, %441 : vector<32x64xf32>
    %cst_131 = arith.constant 1.000000e+00 : f32
    %444 = vector.broadcast %cst_131 : f32 to vector<32x64xf32>
    %445 = arith.divf %444, %443 : vector<32x64xf32>
    %cst_132 = arith.constant 1.06140542 : f32
    %446 = vector.broadcast %cst_132 : f32 to vector<32x64xf32>
    %447 = arith.mulf %445, %446 : vector<32x64xf32>
    %cst_133 = arith.constant -1.45315206 : f32
    %448 = vector.broadcast %cst_133 : f32 to vector<32x64xf32>
    %449 = arith.addf %448, %447 : vector<32x64xf32>
    %450 = arith.mulf %445, %449 : vector<32x64xf32>
    %cst_134 = arith.constant 1.42141378 : f32
    %451 = vector.broadcast %cst_134 : f32 to vector<32x64xf32>
    %452 = arith.addf %451, %450 : vector<32x64xf32>
    %453 = arith.mulf %445, %452 : vector<32x64xf32>
    %cst_135 = arith.constant -0.284496725 : f32
    %454 = vector.broadcast %cst_135 : f32 to vector<32x64xf32>
    %455 = arith.addf %454, %453 : vector<32x64xf32>
    %456 = arith.mulf %445, %455 : vector<32x64xf32>
    %cst_136 = arith.constant 0.254829586 : f32
    %457 = vector.broadcast %cst_136 : f32 to vector<32x64xf32>
    %458 = arith.addf %457, %456 : vector<32x64xf32>
    %459 = arith.mulf %445, %458 : vector<32x64xf32>
    %cst_137 = arith.constant 0.000000e+00 : f32
    %460 = vector.broadcast %cst_137 : f32 to vector<32x64xf32>
    %461 = arith.subf %460, %439 : vector<32x64xf32>
    %462 = arith.mulf %461, %439 : vector<32x64xf32>
    %463 = math.exp %462 : vector<32x64xf32>
    %464 = arith.mulf %459, %463 : vector<32x64xf32>
    %cst_138 = arith.constant 1.000000e+00 : f32
    %465 = vector.broadcast %cst_138 : f32 to vector<32x64xf32>
    %466 = arith.subf %465, %464 : vector<32x64xf32>
    %467 = arith.mulf %438, %466 : vector<32x64xf32>
    %cst_139 = arith.constant 1.000000e+00 : f32
    %468 = vector.broadcast %cst_139 : f32 to vector<32x64xf32>
    %469 = arith.addf %468, %467 : vector<32x64xf32>
    %470 = arith.mulf %431, %469 : vector<32x64xf32>
    %c163 = arith.constant 163 : index
    %c0_140 = arith.constant 0 : index
    %471 = vector.load %arg1[%c163, %c0_140] : memref<264x64xf32, #tpu.memory_space<vmem>>, vector<1x64xf32>
    %c165 = arith.constant 165 : index
    %c0_141 = arith.constant 0 : index
    %472 = vector.load %arg1[%c165, %c0_141] : memref<264x64xf32, #tpu.memory_space<vmem>>, vector<1x64xf32>
    %cst_142 = arith.constant dense<0.000000e+00> : vector<64xf32>
    %473 = vector.multi_reduction <add>, %470, %cst_142 [0] : vector<32x64xf32> to vector<64xf32>
    %474 = vector.shape_cast %473 : vector<64xf32> to vector<1x64xf32>
    %cst_143 = arith.constant 3.200000e+01 : f32
    %475 = vector.broadcast %cst_143 : f32 to vector<1x64xf32>
    %476 = arith.divf %474, %475 : vector<1x64xf32>
    %477 = arith.mulf %470, %470 : vector<32x64xf32>
    %cst_144 = arith.constant dense<0.000000e+00> : vector<64xf32>
    %478 = vector.multi_reduction <add>, %477, %cst_144 [0] : vector<32x64xf32> to vector<64xf32>
    %479 = vector.shape_cast %478 : vector<64xf32> to vector<1x64xf32>
    %cst_145 = arith.constant 3.200000e+01 : f32
    %480 = vector.broadcast %cst_145 : f32 to vector<1x64xf32>
    %481 = arith.divf %479, %480 : vector<1x64xf32>
    %482 = arith.mulf %476, %476 : vector<1x64xf32>
    %483 = arith.subf %481, %482 : vector<1x64xf32>
    %cst_146 = arith.constant 9.99999974E-6 : f32
    %484 = vector.broadcast %cst_146 : f32 to vector<1x64xf32>
    %485 = arith.addf %483, %484 : vector<1x64xf32>
    %486 = math.rsqrt %485 : vector<1x64xf32>
    %487 = arith.mulf %471, %486 : vector<1x64xf32>
    %488 = arith.mulf %476, %487 : vector<1x64xf32>
    %489 = arith.subf %472, %488 : vector<1x64xf32>
    %490 = vector.broadcast %487 : vector<1x64xf32> to vector<32x64xf32>
    %491 = arith.mulf %470, %490 : vector<32x64xf32>
    %492 = vector.broadcast %489 : vector<1x64xf32> to vector<32x64xf32>
    %493 = arith.addf %491, %492 : vector<32x64xf32>
    %494 = vector.shape_cast %493 : vector<32x64xf32> to vector<2x16x64xf32>
    %cst_147 = arith.constant dense<0.000000e+00> : vector<2x64xf32>
    %495 = vector.multi_reduction <add>, %494, %cst_147 [1] : vector<2x16x64xf32> to vector<2x64xf32>
    %cst_148 = arith.constant 1.600000e+01 : f32
    %496 = vector.broadcast %cst_148 : f32 to vector<2x64xf32>
    %497 = arith.divf %495, %496 : vector<2x64xf32>
    %c168 = arith.constant 168 : index
    %c0_149 = arith.constant 0 : index
    %498 = vector.load %arg1[%c168, %c0_149] : memref<264x64xf32, #tpu.memory_space<vmem>>, vector<64x16xf32>
    %cst_150 = arith.constant dense<0.000000e+00> : vector<2x16xf32>
    %499 = tpu.matmul %497, %498, %cst_150 {dimension_numbers = #tpu.dot_dimension_numbers<[1], [0], [0], [1], [0, 0, 1, 1], [], []>, precision = #tpu.contract_precision<fp32>} : vector<2x64xf32>, vector<64x16xf32>, vector<2x16xf32> -> vector<2x16xf32>
    %c232 = arith.constant 232 : index
    %c0_151 = arith.constant 0 : index
    %500 = vector.load %arg1[%c232, %c0_151] : memref<264x64xf32, #tpu.memory_space<vmem>>, vector<1x16xf32>
    %501 = vector.broadcast %500 : vector<1x16xf32> to vector<2x16xf32>
    %502 = arith.addf %499, %501 : vector<2x16xf32>
    %c233 = arith.constant 233 : index
    %c0_152 = arith.constant 0 : index
    %503 = vector.load %arg1[%c233, %c0_152] : memref<264x64xf32, #tpu.memory_space<vmem>>, vector<1x16xf32>
    %c234 = arith.constant 234 : index
    %c0_153 = arith.constant 0 : index
    %504 = vector.load %arg1[%c234, %c0_153] : memref<264x64xf32, #tpu.memory_space<vmem>>, vector<1x16xf32>
    %cst_154 = arith.constant dense<0.000000e+00> : vector<16xf32>
    %505 = vector.multi_reduction <add>, %502, %cst_154 [0] : vector<2x16xf32> to vector<16xf32>
    %506 = vector.shape_cast %505 : vector<16xf32> to vector<1x16xf32>
    %cst_155 = arith.constant 2.000000e+00 : f32
    %507 = vector.broadcast %cst_155 : f32 to vector<1x16xf32>
    %508 = arith.divf %506, %507 : vector<1x16xf32>
    %509 = arith.mulf %502, %502 : vector<2x16xf32>
    %cst_156 = arith.constant dense<0.000000e+00> : vector<16xf32>
    %510 = vector.multi_reduction <add>, %509, %cst_156 [0] : vector<2x16xf32> to vector<16xf32>
    %511 = vector.shape_cast %510 : vector<16xf32> to vector<1x16xf32>
    %cst_157 = arith.constant 2.000000e+00 : f32
    %512 = vector.broadcast %cst_157 : f32 to vector<1x16xf32>
    %513 = arith.divf %511, %512 : vector<1x16xf32>
    %514 = arith.mulf %508, %508 : vector<1x16xf32>
    %515 = arith.subf %513, %514 : vector<1x16xf32>
    %cst_158 = arith.constant 9.99999974E-6 : f32
    %516 = vector.broadcast %cst_158 : f32 to vector<1x16xf32>
    %517 = arith.addf %515, %516 : vector<1x16xf32>
    %518 = math.rsqrt %517 : vector<1x16xf32>
    %519 = arith.mulf %503, %518 : vector<1x16xf32>
    %520 = arith.mulf %508, %519 : vector<1x16xf32>
    %521 = arith.subf %504, %520 : vector<1x16xf32>
    %522 = vector.broadcast %519 : vector<1x16xf32> to vector<2x16xf32>
    %523 = arith.mulf %502, %522 : vector<2x16xf32>
    %524 = vector.broadcast %521 : vector<1x16xf32> to vector<2x16xf32>
    %525 = arith.addf %523, %524 : vector<2x16xf32>
    %c240 = arith.constant 240 : index
    %c0_159 = arith.constant 0 : index
    %526 = vector.load %arg1[%c240, %c0_159] : memref<264x64xf32, #tpu.memory_space<vmem>>, vector<16x32xf32>
    %cst_160 = arith.constant dense<0.000000e+00> : vector<2x32xf32>
    %527 = tpu.matmul %525, %526, %cst_160 {dimension_numbers = #tpu.dot_dimension_numbers<[1], [0], [0], [1], [0, 0, 1, 1], [], []>, precision = #tpu.contract_precision<fp32>} : vector<2x16xf32>, vector<16x32xf32>, vector<2x32xf32> -> vector<2x32xf32>
    %c256 = arith.constant 256 : index
    %c0_161 = arith.constant 0 : index
    %528 = vector.load %arg1[%c256, %c0_161] : memref<264x64xf32, #tpu.memory_space<vmem>>, vector<1x32xf32>
    %529 = vector.broadcast %528 : vector<1x32xf32> to vector<2x32xf32>
    %530 = arith.addf %527, %529 : vector<2x32xf32>
    %c0_162 = arith.constant 0 : index
    %c0_163 = arith.constant 0 : index
    %531 = vector.load %arg2[%c0_162, %c0_163] : memref<2x32xf32, #tpu.memory_space<vmem>>, vector<2x32xf32>
    tpu.vector_store %arg2[%c0_162, %c0_163], %530 {strides = array<i32>} : memref<2x32xf32, #tpu.memory_space<vmem>>, vector<2x32xf32>,
    return
  }
}

module attributes {stable_mosaic.version = 11 : i64} {
  func.func @_fused_forward_kernel(%arg0: memref<32x13xf32, #tpu.memory_space<vmem>>, %arg1: memref<264x64xf32, #tpu.memory_space<vmem>>, %arg2: memref<2x32xf32, #tpu.memory_space<vmem>>) attributes {dimension_semantics = [], scalar_prefetch = 0 : i64, scratch_operands = 0 : i64, tpu.core_type = #tpu.core_type<tc>} {
    %c0 = arith.constant 0 : index
    %c0_0 = arith.constant 0 : index
    %0 = vector.load %arg0[%c0, %c0_0] : memref<32x13xf32, #tpu.memory_space<vmem>>, vector<32x4xf32>
    %c0_1 = arith.constant 0 : index
    %c0_2 = arith.constant 0 : index
    %1 = vector.load %arg1[%c0_1, %c0_2] : memref<264x64xf32, #tpu.memory_space<vmem>>, vector<4x64xf32>
    %c4 = arith.constant 4 : index
    %c0_3 = arith.constant 0 : index
    %2 = vector.load %arg1[%c4, %c0_3] : memref<264x64xf32, #tpu.memory_space<vmem>>, vector<1x64xf32>
    %3 = vector.extract_strided_slice %0 {offsets = [0, 0], sizes = [32, 1], strides = [1, 1]} : vector<32x4xf32> to vector<32x1xf32>
    %4 = vector.extract_strided_slice %1 {offsets = [0, 0], sizes = [1, 64], strides = [1, 1]} : vector<4x64xf32> to vector<1x64xf32>
    %5 = vector.broadcast %3 : vector<32x1xf32> to vector<32x64xf32>
    %6 = vector.broadcast %4 : vector<1x64xf32> to vector<32x64xf32>
    %7 = arith.mulf %5, %6 : vector<32x64xf32>
    %8 = vector.broadcast %2 : vector<1x64xf32> to vector<32x64xf32>
    %9 = arith.addf %8, %7 : vector<32x64xf32>
    %10 = vector.extract_strided_slice %0 {offsets = [0, 1], sizes = [32, 1], strides = [1, 1]} : vector<32x4xf32> to vector<32x1xf32>
    %11 = vector.extract_strided_slice %1 {offsets = [1, 0], sizes = [1, 64], strides = [1, 1]} : vector<4x64xf32> to vector<1x64xf32>
    %12 = vector.broadcast %10 : vector<32x1xf32> to vector<32x64xf32>
    %13 = vector.broadcast %11 : vector<1x64xf32> to vector<32x64xf32>
    %14 = arith.mulf %12, %13 : vector<32x64xf32>
    %15 = arith.addf %9, %14 : vector<32x64xf32>
    %16 = vector.extract_strided_slice %0 {offsets = [0, 2], sizes = [32, 1], strides = [1, 1]} : vector<32x4xf32> to vector<32x1xf32>
    %17 = vector.extract_strided_slice %1 {offsets = [2, 0], sizes = [1, 64], strides = [1, 1]} : vector<4x64xf32> to vector<1x64xf32>
    %18 = vector.broadcast %16 : vector<32x1xf32> to vector<32x64xf32>
    %19 = vector.broadcast %17 : vector<1x64xf32> to vector<32x64xf32>
    %20 = arith.mulf %18, %19 : vector<32x64xf32>
    %21 = arith.addf %15, %20 : vector<32x64xf32>
    %22 = vector.extract_strided_slice %0 {offsets = [0, 3], sizes = [32, 1], strides = [1, 1]} : vector<32x4xf32> to vector<32x1xf32>
    %23 = vector.extract_strided_slice %1 {offsets = [3, 0], sizes = [1, 64], strides = [1, 1]} : vector<4x64xf32> to vector<1x64xf32>
    %24 = vector.broadcast %22 : vector<32x1xf32> to vector<32x64xf32>
    %25 = vector.broadcast %23 : vector<1x64xf32> to vector<32x64xf32>
    %26 = arith.mulf %24, %25 : vector<32x64xf32>
    %27 = arith.addf %21, %26 : vector<32x64xf32>
    %cst = arith.constant 5.000000e-01 : f32
    %28 = vector.broadcast %cst : f32 to vector<32x64xf32>
    %29 = arith.mulf %28, %27 : vector<32x64xf32>
    %cst_4 = arith.constant 0.707106769 : f32
    %30 = vector.broadcast %cst_4 : f32 to vector<32x64xf32>
    %31 = arith.mulf %27, %30 : vector<32x64xf32>
    %cst_5 = arith.constant 0.000000e+00 : f32
    %32 = vector.broadcast %cst_5 : f32 to vector<32x64xf32>
    %33 = arith.cmpf oge, %31, %32 : vector<32x64xf32>
    %cst_6 = arith.constant 1.000000e+00 : f32
    %cst_7 = arith.constant -1.000000e+00 : f32
    %34 = vector.broadcast %cst_6 : f32 to vector<32x64xf32>
    %35 = vector.broadcast %cst_7 : f32 to vector<32x64xf32>
    %36 = arith.select %33, %34, %35 : vector<32x64xi1>, vector<32x64xf32>
    %37 = math.absf %31 : vector<32x64xf32>
    %cst_8 = arith.constant 0.327591091 : f32
    %38 = vector.broadcast %cst_8 : f32 to vector<32x64xf32>
    %39 = arith.mulf %38, %37 : vector<32x64xf32>
    %cst_9 = arith.constant 1.000000e+00 : f32
    %40 = vector.broadcast %cst_9 : f32 to vector<32x64xf32>
    %41 = arith.addf %40, %39 : vector<32x64xf32>
    %cst_10 = arith.constant 1.000000e+00 : f32
    %42 = vector.broadcast %cst_10 : f32 to vector<32x64xf32>
    %43 = arith.divf %42, %41 : vector<32x64xf32>
    %cst_11 = arith.constant 1.06140542 : f32
    %44 = vector.broadcast %cst_11 : f32 to vector<32x64xf32>
    %45 = arith.mulf %43, %44 : vector<32x64xf32>
    %cst_12 = arith.constant -1.45315206 : f32
    %46 = vector.broadcast %cst_12 : f32 to vector<32x64xf32>
    %47 = arith.addf %46, %45 : vector<32x64xf32>
    %48 = arith.mulf %43, %47 : vector<32x64xf32>
    %cst_13 = arith.constant 1.42141378 : f32
    %49 = vector.broadcast %cst_13 : f32 to vector<32x64xf32>
    %50 = arith.addf %49, %48 : vector<32x64xf32>
    %51 = arith.mulf %43, %50 : vector<32x64xf32>
    %cst_14 = arith.constant -0.284496725 : f32
    %52 = vector.broadcast %cst_14 : f32 to vector<32x64xf32>
    %53 = arith.addf %52, %51 : vector<32x64xf32>
    %54 = arith.mulf %43, %53 : vector<32x64xf32>
    %cst_15 = arith.constant 0.254829586 : f32
    %55 = vector.broadcast %cst_15 : f32 to vector<32x64xf32>
    %56 = arith.addf %55, %54 : vector<32x64xf32>
    %57 = arith.mulf %43, %56 : vector<32x64xf32>
    %cst_16 = arith.constant 0.000000e+00 : f32
    %58 = vector.broadcast %cst_16 : f32 to vector<32x64xf32>
    %59 = arith.subf %58, %37 : vector<32x64xf32>
    %60 = arith.mulf %59, %37 : vector<32x64xf32>
    %61 = math.exp %60 : vector<32x64xf32>
    %62 = arith.mulf %57, %61 : vector<32x64xf32>
    %cst_17 = arith.constant 1.000000e+00 : f32
    %63 = vector.broadcast %cst_17 : f32 to vector<32x64xf32>
    %64 = arith.subf %63, %62 : vector<32x64xf32>
    %65 = arith.mulf %36, %64 : vector<32x64xf32>
    %cst_18 = arith.constant 1.000000e+00 : f32
    %66 = vector.broadcast %cst_18 : f32 to vector<32x64xf32>
    %67 = arith.addf %66, %65 : vector<32x64xf32>
    %68 = arith.mulf %29, %67 : vector<32x64xf32>
    %c5 = arith.constant 5 : index
    %c0_19 = arith.constant 0 : index
    %69 = vector.load %arg1[%c5, %c0_19] : memref<264x64xf32, #tpu.memory_space<vmem>>, vector<1x64xf32>
    %c6 = arith.constant 6 : index
    %c0_20 = arith.constant 0 : index
    %70 = vector.load %arg1[%c6, %c0_20] : memref<264x64xf32, #tpu.memory_space<vmem>>, vector<1x64xf32>
    %cst_21 = arith.constant dense<0.000000e+00> : vector<64xf32>
    %71 = vector.multi_reduction <add>, %68, %cst_21 [0] : vector<32x64xf32> to vector<64xf32>
    %72 = vector.shape_cast %71 : vector<64xf32> to vector<1x64xf32>
    %cst_22 = arith.constant 3.200000e+01 : f32
    %73 = vector.broadcast %cst_22 : f32 to vector<1x64xf32>
    %74 = arith.divf %72, %73 : vector<1x64xf32>
    %75 = arith.mulf %68, %68 : vector<32x64xf32>
    %cst_23 = arith.constant dense<0.000000e+00> : vector<64xf32>
    %76 = vector.multi_reduction <add>, %75, %cst_23 [0] : vector<32x64xf32> to vector<64xf32>
    %77 = vector.shape_cast %76 : vector<64xf32> to vector<1x64xf32>
    %cst_24 = arith.constant 3.200000e+01 : f32
    %78 = vector.broadcast %cst_24 : f32 to vector<1x64xf32>
    %79 = arith.divf %77, %78 : vector<1x64xf32>
    %80 = arith.mulf %74, %74 : vector<1x64xf32>
    %81 = arith.subf %79, %80 : vector<1x64xf32>
    %cst_25 = arith.constant 9.99999974E-6 : f32
    %82 = vector.broadcast %cst_25 : f32 to vector<1x64xf32>
    %83 = arith.addf %81, %82 : vector<1x64xf32>
    %84 = math.rsqrt %83 : vector<1x64xf32>
    %85 = arith.mulf %69, %84 : vector<1x64xf32>
    %86 = arith.mulf %74, %85 : vector<1x64xf32>
    %87 = arith.subf %70, %86 : vector<1x64xf32>
    %88 = vector.broadcast %85 : vector<1x64xf32> to vector<32x64xf32>
    %89 = arith.mulf %68, %88 : vector<32x64xf32>
    %90 = vector.broadcast %87 : vector<1x64xf32> to vector<32x64xf32>
    %91 = arith.addf %89, %90 : vector<32x64xf32>
    %c0_26 = arith.constant 0 : index
    %c4_27 = arith.constant 4 : index
    %92 = vector.load %arg0[%c0_26, %c4_27] : memref<32x13xf32, #tpu.memory_space<vmem>>, vector<32x1xf32>
    %93 = vector.shape_cast %92 : vector<32x1xf32> to vector<32x1xf32>
    %94 = vector.broadcast %93 : vector<32x1xf32> to vector<32x64xf32>
    %c0_28 = arith.constant 0 : index
    %c5_29 = arith.constant 5 : index
    %95 = vector.load %arg0[%c0_28, %c5_29] : memref<32x13xf32, #tpu.memory_space<vmem>>, vector<32x1xf32>
    %96 = vector.shape_cast %95 : vector<32x1xf32> to vector<32x1xf32>
    %97 = vector.broadcast %96 : vector<32x1xf32> to vector<32x64xf32>
    %c0_30 = arith.constant 0 : index
    %c6_31 = arith.constant 6 : index
    %98 = vector.load %arg0[%c0_30, %c6_31] : memref<32x13xf32, #tpu.memory_space<vmem>>, vector<32x1xf32>
    %99 = vector.shape_cast %98 : vector<32x1xf32> to vector<32x1xf32>
    %100 = vector.broadcast %99 : vector<32x1xf32> to vector<32x64xf32>
    %c0_32 = arith.constant 0 : index
    %c7 = arith.constant 7 : index
    %101 = vector.load %arg0[%c0_32, %c7] : memref<32x13xf32, #tpu.memory_space<vmem>>, vector<32x1xf32>
    %102 = vector.shape_cast %101 : vector<32x1xf32> to vector<32x1xf32>
    %103 = vector.broadcast %102 : vector<32x1xf32> to vector<32x64xf32>
    %c0_33 = arith.constant 0 : index
    %c9 = arith.constant 9 : index
    %104 = vector.load %arg0[%c0_33, %c9] : memref<32x13xf32, #tpu.memory_space<vmem>>, vector<32x1xf32>
    %105 = vector.shape_cast %104 : vector<32x1xf32> to vector<32x1xf32>
    %106 = vector.broadcast %105 : vector<32x1xf32> to vector<32x64xf32>
    %c0_34 = arith.constant 0 : index
    %c10 = arith.constant 10 : index
    %107 = vector.load %arg0[%c0_34, %c10] : memref<32x13xf32, #tpu.memory_space<vmem>>, vector<32x1xf32>
    %108 = vector.shape_cast %107 : vector<32x1xf32> to vector<32x1xf32>
    %109 = vector.broadcast %108 : vector<32x1xf32> to vector<32x64xf32>
    %c0_35 = arith.constant 0 : index
    %c11 = arith.constant 11 : index
    %110 = vector.load %arg0[%c0_35, %c11] : memref<32x13xf32, #tpu.memory_space<vmem>>, vector<32x1xf32>
    %111 = vector.shape_cast %110 : vector<32x1xf32> to vector<32x1xf32>
    %112 = vector.broadcast %111 : vector<32x1xf32> to vector<32x64xf32>
    %c0_36 = arith.constant 0 : index
    %c12 = arith.constant 12 : index
    %113 = vector.load %arg0[%c0_36, %c12] : memref<32x13xf32, #tpu.memory_space<vmem>>, vector<32x1xf32>
    %114 = vector.shape_cast %113 : vector<32x1xf32> to vector<32x1xf32>
    %115 = vector.broadcast %114 : vector<32x1xf32> to vector<32x64xf32>
    %c8 = arith.constant 8 : index
    %c0_37 = arith.constant 0 : index
    %116 = vector.load %arg1[%c8, %c0_37] : memref<264x64xf32, #tpu.memory_space<vmem>>, vector<9x64xf32>
    %117 = vector.extract_strided_slice %116 {offsets = [4, 0], sizes = [1, 64], strides = [1, 1]} : vector<9x64xf32> to vector<1x64xf32>
    %118 = vector.broadcast %117 : vector<1x64xf32> to vector<32x64xf32>
    %119 = arith.mulf %91, %118 : vector<32x64xf32>
    %120 = vector.extract_strided_slice %91 {offsets = [23, 0], sizes = [9, 64], strides = [1, 1]} : vector<32x64xf32> to vector<9x64xf32>
    %121 = vector.extract_strided_slice %91 {offsets = [0, 0], sizes = [23, 64], strides = [1, 1]} : vector<32x64xf32> to vector<23x64xf32>
    %122 = tpu.concatenate %120, %121 in 0 : vector<9x64xf32>, vector<23x64xf32> -> vector<32x64xf32>
    %123 = arith.mulf %122, %94 : vector<32x64xf32>
    %124 = vector.extract_strided_slice %116 {offsets = [0, 0], sizes = [1, 64], strides = [1, 1]} : vector<9x64xf32> to vector<1x64xf32>
    %125 = vector.broadcast %124 : vector<1x64xf32> to vector<32x64xf32>
    %126 = arith.mulf %123, %125 : vector<32x64xf32>
    %127 = arith.addf %119, %126 : vector<32x64xf32>
    %128 = vector.extract_strided_slice %91 {offsets = [24, 0], sizes = [8, 64], strides = [1, 1]} : vector<32x64xf32> to vector<8x64xf32>
    %129 = vector.extract_strided_slice %91 {offsets = [0, 0], sizes = [24, 64], strides = [1, 1]} : vector<32x64xf32> to vector<24x64xf32>
    %130 = tpu.concatenate %128, %129 in 0 : vector<8x64xf32>, vector<24x64xf32> -> vector<32x64xf32>
    %131 = arith.mulf %130, %97 : vector<32x64xf32>
    %132 = vector.extract_strided_slice %116 {offsets = [1, 0], sizes = [1, 64], strides = [1, 1]} : vector<9x64xf32> to vector<1x64xf32>
    %133 = vector.broadcast %132 : vector<1x64xf32> to vector<32x64xf32>
    %134 = arith.mulf %131, %133 : vector<32x64xf32>
    %135 = arith.addf %127, %134 : vector<32x64xf32>
    %136 = vector.extract_strided_slice %91 {offsets = [25, 0], sizes = [7, 64], strides = [1, 1]} : vector<32x64xf32> to vector<7x64xf32>
    %137 = vector.extract_strided_slice %91 {offsets = [0, 0], sizes = [25, 64], strides = [1, 1]} : vector<32x64xf32> to vector<25x64xf32>
    %138 = tpu.concatenate %136, %137 in 0 : vector<7x64xf32>, vector<25x64xf32> -> vector<32x64xf32>
    %139 = arith.mulf %138, %100 : vector<32x64xf32>
    %140 = vector.extract_strided_slice %116 {offsets = [2, 0], sizes = [1, 64], strides = [1, 1]} : vector<9x64xf32> to vector<1x64xf32>
    %141 = vector.broadcast %140 : vector<1x64xf32> to vector<32x64xf32>
    %142 = arith.mulf %139, %141 : vector<32x64xf32>
    %143 = arith.addf %135, %142 : vector<32x64xf32>
    %144 = vector.extract_strided_slice %91 {offsets = [31, 0], sizes = [1, 64], strides = [1, 1]} : vector<32x64xf32> to vector<1x64xf32>
    %145 = vector.extract_strided_slice %91 {offsets = [0, 0], sizes = [31, 64], strides = [1, 1]} : vector<32x64xf32> to vector<31x64xf32>
    %146 = tpu.concatenate %144, %145 in 0 : vector<1x64xf32>, vector<31x64xf32> -> vector<32x64xf32>
    %147 = arith.mulf %146, %103 : vector<32x64xf32>
    %148 = vector.extract_strided_slice %116 {offsets = [3, 0], sizes = [1, 64], strides = [1, 1]} : vector<9x64xf32> to vector<1x64xf32>
    %149 = vector.broadcast %148 : vector<1x64xf32> to vector<32x64xf32>
    %150 = arith.mulf %147, %149 : vector<32x64xf32>
    %151 = arith.addf %143, %150 : vector<32x64xf32>
    %152 = vector.extract_strided_slice %91 {offsets = [1, 0], sizes = [31, 64], strides = [1, 1]} : vector<32x64xf32> to vector<31x64xf32>
    %153 = vector.extract_strided_slice %91 {offsets = [0, 0], sizes = [1, 64], strides = [1, 1]} : vector<32x64xf32> to vector<1x64xf32>
    %154 = tpu.concatenate %152, %153 in 0 : vector<31x64xf32>, vector<1x64xf32> -> vector<32x64xf32>
    %155 = arith.mulf %154, %106 : vector<32x64xf32>
    %156 = vector.extract_strided_slice %116 {offsets = [5, 0], sizes = [1, 64], strides = [1, 1]} : vector<9x64xf32> to vector<1x64xf32>
    %157 = vector.broadcast %156 : vector<1x64xf32> to vector<32x64xf32>
    %158 = arith.mulf %155, %157 : vector<32x64xf32>
    %159 = arith.addf %151, %158 : vector<32x64xf32>
    %160 = vector.extract_strided_slice %91 {offsets = [7, 0], sizes = [25, 64], strides = [1, 1]} : vector<32x64xf32> to vector<25x64xf32>
    %161 = vector.extract_strided_slice %91 {offsets = [0, 0], sizes = [7, 64], strides = [1, 1]} : vector<32x64xf32> to vector<7x64xf32>
    %162 = tpu.concatenate %160, %161 in 0 : vector<25x64xf32>, vector<7x64xf32> -> vector<32x64xf32>
    %163 = arith.mulf %162, %109 : vector<32x64xf32>
    %164 = vector.extract_strided_slice %116 {offsets = [6, 0], sizes = [1, 64], strides = [1, 1]} : vector<9x64xf32> to vector<1x64xf32>
    %165 = vector.broadcast %164 : vector<1x64xf32> to vector<32x64xf32>
    %166 = arith.mulf %163, %165 : vector<32x64xf32>
    %167 = arith.addf %159, %166 : vector<32x64xf32>
    %168 = vector.extract_strided_slice %91 {offsets = [8, 0], sizes = [24, 64], strides = [1, 1]} : vector<32x64xf32> to vector<24x64xf32>
    %169 = vector.extract_strided_slice %91 {offsets = [0, 0], sizes = [8, 64], strides = [1, 1]} : vector<32x64xf32> to vector<8x64xf32>
    %170 = tpu.concatenate %168, %169 in 0 : vector<24x64xf32>, vector<8x64xf32> -> vector<32x64xf32>
    %171 = arith.mulf %170, %112 : vector<32x64xf32>
    %172 = vector.extract_strided_slice %116 {offsets = [7, 0], sizes = [1, 64], strides = [1, 1]} : vector<9x64xf32> to vector<1x64xf32>
    %173 = vector.broadcast %172 : vector<1x64xf32> to vector<32x64xf32>
    %174 = arith.mulf %171, %173 : vector<32x64xf32>
    %175 = arith.addf %167, %174 : vector<32x64xf32>
    %176 = vector.extract_strided_slice %91 {offsets = [9, 0], sizes = [23, 64], strides = [1, 1]} : vector<32x64xf32> to vector<23x64xf32>
    %177 = vector.extract_strided_slice %91 {offsets = [0, 0], sizes = [9, 64], strides = [1, 1]} : vector<32x64xf32> to vector<9x64xf32>
    %178 = tpu.concatenate %176, %177 in 0 : vector<23x64xf32>, vector<9x64xf32> -> vector<32x64xf32>
    %179 = arith.mulf %178, %115 : vector<32x64xf32>
    %180 = vector.extract_strided_slice %116 {offsets = [8, 0], sizes = [1, 64], strides = [1, 1]} : vector<9x64xf32> to vector<1x64xf32>
    %181 = vector.broadcast %180 : vector<1x64xf32> to vector<32x64xf32>
    %182 = arith.mulf %179, %181 : vector<32x64xf32>
    %183 = arith.addf %175, %182 : vector<32x64xf32>
    %c26 = arith.constant 26 : index
    %c0_38 = arith.constant 0 : index
    %184 = vector.load %arg1[%c26, %c0_38] : memref<264x64xf32, #tpu.memory_space<vmem>>, vector<1x64xf32>
    %185 = vector.broadcast %184 : vector<1x64xf32> to vector<32x64xf32>
    %186 = arith.addf %183, %185 : vector<32x64xf32>
    %cst_39 = arith.constant 5.000000e-01 : f32
    %187 = vector.broadcast %cst_39 : f32 to vector<32x64xf32>
    %188 = arith.mulf %187, %186 : vector<32x64xf32>
    %cst_40 = arith.constant 0.707106769 : f32
    %189 = vector.broadcast %cst_40 : f32 to vector<32x64xf32>
    %190 = arith.mulf %186, %189 : vector<32x64xf32>
    %cst_41 = arith.constant 0.000000e+00 : f32
    %191 = vector.broadcast %cst_41 : f32 to vector<32x64xf32>
    %192 = arith.cmpf oge, %190, %191 : vector<32x64xf32>
    %cst_42 = arith.constant 1.000000e+00 : f32
    %cst_43 = arith.constant -1.000000e+00 : f32
    %193 = vector.broadcast %cst_42 : f32 to vector<32x64xf32>
    %194 = vector.broadcast %cst_43 : f32 to vector<32x64xf32>
    %195 = arith.select %192, %193, %194 : vector<32x64xi1>, vector<32x64xf32>
    %196 = math.absf %190 : vector<32x64xf32>
    %cst_44 = arith.constant 0.327591091 : f32
    %197 = vector.broadcast %cst_44 : f32 to vector<32x64xf32>
    %198 = arith.mulf %197, %196 : vector<32x64xf32>
    %cst_45 = arith.constant 1.000000e+00 : f32
    %199 = vector.broadcast %cst_45 : f32 to vector<32x64xf32>
    %200 = arith.addf %199, %198 : vector<32x64xf32>
    %cst_46 = arith.constant 1.000000e+00 : f32
    %201 = vector.broadcast %cst_46 : f32 to vector<32x64xf32>
    %202 = arith.divf %201, %200 : vector<32x64xf32>
    %cst_47 = arith.constant 1.06140542 : f32
    %203 = vector.broadcast %cst_47 : f32 to vector<32x64xf32>
    %204 = arith.mulf %202, %203 : vector<32x64xf32>
    %cst_48 = arith.constant -1.45315206 : f32
    %205 = vector.broadcast %cst_48 : f32 to vector<32x64xf32>
    %206 = arith.addf %205, %204 : vector<32x64xf32>
    %207 = arith.mulf %202, %206 : vector<32x64xf32>
    %cst_49 = arith.constant 1.42141378 : f32
    %208 = vector.broadcast %cst_49 : f32 to vector<32x64xf32>
    %209 = arith.addf %208, %207 : vector<32x64xf32>
    %210 = arith.mulf %202, %209 : vector<32x64xf32>
    %cst_50 = arith.constant -0.284496725 : f32
    %211 = vector.broadcast %cst_50 : f32 to vector<32x64xf32>
    %212 = arith.addf %211, %210 : vector<32x64xf32>
    %213 = arith.mulf %202, %212 : vector<32x64xf32>
    %cst_51 = arith.constant 0.254829586 : f32
    %214 = vector.broadcast %cst_51 : f32 to vector<32x64xf32>
    %215 = arith.addf %214, %213 : vector<32x64xf32>
    %216 = arith.mulf %202, %215 : vector<32x64xf32>
    %cst_52 = arith.constant 0.000000e+00 : f32
    %217 = vector.broadcast %cst_52 : f32 to vector<32x64xf32>
    %218 = arith.subf %217, %196 : vector<32x64xf32>
    %219 = arith.mulf %218, %196 : vector<32x64xf32>
    %220 = math.exp %219 : vector<32x64xf32>
    %221 = arith.mulf %216, %220 : vector<32x64xf32>
    %cst_53 = arith.constant 1.000000e+00 : f32
    %222 = vector.broadcast %cst_53 : f32 to vector<32x64xf32>
    %223 = arith.subf %222, %221 : vector<32x64xf32>
    %224 = arith.mulf %195, %223 : vector<32x64xf32>
    %cst_54 = arith.constant 1.000000e+00 : f32
    %225 = vector.broadcast %cst_54 : f32 to vector<32x64xf32>
    %226 = arith.addf %225, %224 : vector<32x64xf32>
    %227 = arith.mulf %188, %226 : vector<32x64xf32>
    %c28 = arith.constant 28 : index
    %c0_55 = arith.constant 0 : index
    %228 = vector.load %arg1[%c28, %c0_55] : memref<264x64xf32, #tpu.memory_space<vmem>>, vector<1x64xf32>
    %c30 = arith.constant 30 : index
    %c0_56 = arith.constant 0 : index
    %229 = vector.load %arg1[%c30, %c0_56] : memref<264x64xf32, #tpu.memory_space<vmem>>, vector<1x64xf32>
    %cst_57 = arith.constant dense<0.000000e+00> : vector<64xf32>
    %230 = vector.multi_reduction <add>, %227, %cst_57 [0] : vector<32x64xf32> to vector<64xf32>
    %231 = vector.shape_cast %230 : vector<64xf32> to vector<1x64xf32>
    %cst_58 = arith.constant 3.200000e+01 : f32
    %232 = vector.broadcast %cst_58 : f32 to vector<1x64xf32>
    %233 = arith.divf %231, %232 : vector<1x64xf32>
    %234 = arith.mulf %227, %227 : vector<32x64xf32>
    %cst_59 = arith.constant dense<0.000000e+00> : vector<64xf32>
    %235 = vector.multi_reduction <add>, %234, %cst_59 [0] : vector<32x64xf32> to vector<64xf32>
    %236 = vector.shape_cast %235 : vector<64xf32> to vector<1x64xf32>
    %cst_60 = arith.constant 3.200000e+01 : f32
    %237 = vector.broadcast %cst_60 : f32 to vector<1x64xf32>
    %238 = arith.divf %236, %237 : vector<1x64xf32>
    %239 = arith.mulf %233, %233 : vector<1x64xf32>
    %240 = arith.subf %238, %239 : vector<1x64xf32>
    %cst_61 = arith.constant 9.99999974E-6 : f32
    %241 = vector.broadcast %cst_61 : f32 to vector<1x64xf32>
    %242 = arith.addf %240, %241 : vector<1x64xf32>
    %243 = math.rsqrt %242 : vector<1x64xf32>
    %244 = arith.mulf %228, %243 : vector<1x64xf32>
    %245 = arith.mulf %233, %244 : vector<1x64xf32>
    %246 = arith.subf %229, %245 : vector<1x64xf32>
    %247 = vector.broadcast %244 : vector<1x64xf32> to vector<32x64xf32>
    %248 = arith.mulf %227, %247 : vector<32x64xf32>
    %249 = vector.broadcast %246 : vector<1x64xf32> to vector<32x64xf32>
    %250 = arith.addf %248, %249 : vector<32x64xf32>
    %251 = arith.addf %91, %250 : vector<32x64xf32>
    %c32 = arith.constant 32 : index
    %c0_62 = arith.constant 0 : index
    %252 = vector.load %arg1[%c32, %c0_62] : memref<264x64xf32, #tpu.memory_space<vmem>>, vector<64x64xf32>
    %cst_63 = arith.constant dense<0.000000e+00> : vector<32x64xf32>
    %253 = tpu.matmul %251, %252, %cst_63 {dimension_numbers = #tpu.dot_dimension_numbers<[1], [0], [0], [1], [0, 0, 1, 1], [], []>, precision = #tpu.contract_precision<fp32>} : vector<32x64xf32>, vector<64x64xf32>, vector<32x64xf32> -> vector<32x64xf32>
    %c160 = arith.constant 160 : index
    %c0_64 = arith.constant 0 : index
    %254 = vector.load %arg1[%c160, %c0_64] : memref<264x64xf32, #tpu.memory_space<vmem>>, vector<1x64xf32>
    %255 = vector.broadcast %254 : vector<1x64xf32> to vector<32x64xf32>
    %256 = arith.addf %253, %255 : vector<32x64xf32>
    %cst_65 = arith.constant 5.000000e-01 : f32
    %257 = vector.broadcast %cst_65 : f32 to vector<32x64xf32>
    %258 = arith.mulf %257, %256 : vector<32x64xf32>
    %cst_66 = arith.constant 0.707106769 : f32
    %259 = vector.broadcast %cst_66 : f32 to vector<32x64xf32>
    %260 = arith.mulf %256, %259 : vector<32x64xf32>
    %cst_67 = arith.constant 0.000000e+00 : f32
    %261 = vector.broadcast %cst_67 : f32 to vector<32x64xf32>
    %262 = arith.cmpf oge, %260, %261 : vector<32x64xf32>
    %cst_68 = arith.constant 1.000000e+00 : f32
    %cst_69 = arith.constant -1.000000e+00 : f32
    %263 = vector.broadcast %cst_68 : f32 to vector<32x64xf32>
    %264 = vector.broadcast %cst_69 : f32 to vector<32x64xf32>
    %265 = arith.select %262, %263, %264 : vector<32x64xi1>, vector<32x64xf32>
    %266 = math.absf %260 : vector<32x64xf32>
    %cst_70 = arith.constant 0.327591091 : f32
    %267 = vector.broadcast %cst_70 : f32 to vector<32x64xf32>
    %268 = arith.mulf %267, %266 : vector<32x64xf32>
    %cst_71 = arith.constant 1.000000e+00 : f32
    %269 = vector.broadcast %cst_71 : f32 to vector<32x64xf32>
    %270 = arith.addf %269, %268 : vector<32x64xf32>
    %cst_72 = arith.constant 1.000000e+00 : f32
    %271 = vector.broadcast %cst_72 : f32 to vector<32x64xf32>
    %272 = arith.divf %271, %270 : vector<32x64xf32>
    %cst_73 = arith.constant 1.06140542 : f32
    %273 = vector.broadcast %cst_73 : f32 to vector<32x64xf32>
    %274 = arith.mulf %272, %273 : vector<32x64xf32>
    %cst_74 = arith.constant -1.45315206 : f32
    %275 = vector.broadcast %cst_74 : f32 to vector<32x64xf32>
    %276 = arith.addf %275, %274 : vector<32x64xf32>
    %277 = arith.mulf %272, %276 : vector<32x64xf32>
    %cst_75 = arith.constant 1.42141378 : f32
    %278 = vector.broadcast %cst_75 : f32 to vector<32x64xf32>
    %279 = arith.addf %278, %277 : vector<32x64xf32>
    %280 = arith.mulf %272, %279 : vector<32x64xf32>
    %cst_76 = arith.constant -0.284496725 : f32
    %281 = vector.broadcast %cst_76 : f32 to vector<32x64xf32>
    %282 = arith.addf %281, %280 : vector<32x64xf32>
    %283 = arith.mulf %272, %282 : vector<32x64xf32>
    %cst_77 = arith.constant 0.254829586 : f32
    %284 = vector.broadcast %cst_77 : f32 to vector<32x64xf32>
    %285 = arith.addf %284, %283 : vector<32x64xf32>
    %286 = arith.mulf %272, %285 : vector<32x64xf32>
    %cst_78 = arith.constant 0.000000e+00 : f32
    %287 = vector.broadcast %cst_78 : f32 to vector<32x64xf32>
    %288 = arith.subf %287, %266 : vector<32x64xf32>
    %289 = arith.mulf %288, %266 : vector<32x64xf32>
    %290 = math.exp %289 : vector<32x64xf32>
    %291 = arith.mulf %286, %290 : vector<32x64xf32>
    %cst_79 = arith.constant 1.000000e+00 : f32
    %292 = vector.broadcast %cst_79 : f32 to vector<32x64xf32>
    %293 = arith.subf %292, %291 : vector<32x64xf32>
    %294 = arith.mulf %265, %293 : vector<32x64xf32>
    %cst_80 = arith.constant 1.000000e+00 : f32
    %295 = vector.broadcast %cst_80 : f32 to vector<32x64xf32>
    %296 = arith.addf %295, %294 : vector<32x64xf32>
    %297 = arith.mulf %258, %296 : vector<32x64xf32>
    %c162 = arith.constant 162 : index
    %c0_81 = arith.constant 0 : index
    %298 = vector.load %arg1[%c162, %c0_81] : memref<264x64xf32, #tpu.memory_space<vmem>>, vector<1x64xf32>
    %c164 = arith.constant 164 : index
    %c0_82 = arith.constant 0 : index
    %299 = vector.load %arg1[%c164, %c0_82] : memref<264x64xf32, #tpu.memory_space<vmem>>, vector<1x64xf32>
    %cst_83 = arith.constant dense<0.000000e+00> : vector<64xf32>
    %300 = vector.multi_reduction <add>, %297, %cst_83 [0] : vector<32x64xf32> to vector<64xf32>
    %301 = vector.shape_cast %300 : vector<64xf32> to vector<1x64xf32>
    %cst_84 = arith.constant 3.200000e+01 : f32
    %302 = vector.broadcast %cst_84 : f32 to vector<1x64xf32>
    %303 = arith.divf %301, %302 : vector<1x64xf32>
    %304 = arith.mulf %297, %297 : vector<32x64xf32>
    %cst_85 = arith.constant dense<0.000000e+00> : vector<64xf32>
    %305 = vector.multi_reduction <add>, %304, %cst_85 [0] : vector<32x64xf32> to vector<64xf32>
    %306 = vector.shape_cast %305 : vector<64xf32> to vector<1x64xf32>
    %cst_86 = arith.constant 3.200000e+01 : f32
    %307 = vector.broadcast %cst_86 : f32 to vector<1x64xf32>
    %308 = arith.divf %306, %307 : vector<1x64xf32>
    %309 = arith.mulf %303, %303 : vector<1x64xf32>
    %310 = arith.subf %308, %309 : vector<1x64xf32>
    %cst_87 = arith.constant 9.99999974E-6 : f32
    %311 = vector.broadcast %cst_87 : f32 to vector<1x64xf32>
    %312 = arith.addf %310, %311 : vector<1x64xf32>
    %313 = math.rsqrt %312 : vector<1x64xf32>
    %314 = arith.mulf %298, %313 : vector<1x64xf32>
    %315 = arith.mulf %303, %314 : vector<1x64xf32>
    %316 = arith.subf %299, %315 : vector<1x64xf32>
    %317 = vector.broadcast %314 : vector<1x64xf32> to vector<32x64xf32>
    %318 = arith.mulf %297, %317 : vector<32x64xf32>
    %319 = vector.broadcast %316 : vector<1x64xf32> to vector<32x64xf32>
    %320 = arith.addf %318, %319 : vector<32x64xf32>
    %c17 = arith.constant 17 : index
    %c0_88 = arith.constant 0 : index
    %321 = vector.load %arg1[%c17, %c0_88] : memref<264x64xf32, #tpu.memory_space<vmem>>, vector<9x64xf32>
    %322 = vector.extract_strided_slice %321 {offsets = [4, 0], sizes = [1, 64], strides = [1, 1]} : vector<9x64xf32> to vector<1x64xf32>
    %323 = vector.broadcast %322 : vector<1x64xf32> to vector<32x64xf32>
    %324 = arith.mulf %320, %323 : vector<32x64xf32>
    %325 = vector.extract_strided_slice %320 {offsets = [23, 0], sizes = [9, 64], strides = [1, 1]} : vector<32x64xf32> to vector<9x64xf32>
    %326 = vector.extract_strided_slice %320 {offsets = [0, 0], sizes = [23, 64], strides = [1, 1]} : vector<32x64xf32> to vector<23x64xf32>
    %327 = tpu.concatenate %325, %326 in 0 : vector<9x64xf32>, vector<23x64xf32> -> vector<32x64xf32>
    %328 = arith.mulf %327, %94 : vector<32x64xf32>
    %329 = vector.extract_strided_slice %321 {offsets = [0, 0], sizes = [1, 64], strides = [1, 1]} : vector<9x64xf32> to vector<1x64xf32>
    %330 = vector.broadcast %329 : vector<1x64xf32> to vector<32x64xf32>
    %331 = arith.mulf %328, %330 : vector<32x64xf32>
    %332 = arith.addf %324, %331 : vector<32x64xf32>
    %333 = vector.extract_strided_slice %320 {offsets = [24, 0], sizes = [8, 64], strides = [1, 1]} : vector<32x64xf32> to vector<8x64xf32>
    %334 = vector.extract_strided_slice %320 {offsets = [0, 0], sizes = [24, 64], strides = [1, 1]} : vector<32x64xf32> to vector<24x64xf32>
    %335 = tpu.concatenate %333, %334 in 0 : vector<8x64xf32>, vector<24x64xf32> -> vector<32x64xf32>
    %336 = arith.mulf %335, %97 : vector<32x64xf32>
    %337 = vector.extract_strided_slice %321 {offsets = [1, 0], sizes = [1, 64], strides = [1, 1]} : vector<9x64xf32> to vector<1x64xf32>
    %338 = vector.broadcast %337 : vector<1x64xf32> to vector<32x64xf32>
    %339 = arith.mulf %336, %338 : vector<32x64xf32>
    %340 = arith.addf %332, %339 : vector<32x64xf32>
    %341 = vector.extract_strided_slice %320 {offsets = [25, 0], sizes = [7, 64], strides = [1, 1]} : vector<32x64xf32> to vector<7x64xf32>
    %342 = vector.extract_strided_slice %320 {offsets = [0, 0], sizes = [25, 64], strides = [1, 1]} : vector<32x64xf32> to vector<25x64xf32>
    %343 = tpu.concatenate %341, %342 in 0 : vector<7x64xf32>, vector<25x64xf32> -> vector<32x64xf32>
    %344 = arith.mulf %343, %100 : vector<32x64xf32>
    %345 = vector.extract_strided_slice %321 {offsets = [2, 0], sizes = [1, 64], strides = [1, 1]} : vector<9x64xf32> to vector<1x64xf32>
    %346 = vector.broadcast %345 : vector<1x64xf32> to vector<32x64xf32>
    %347 = arith.mulf %344, %346 : vector<32x64xf32>
    %348 = arith.addf %340, %347 : vector<32x64xf32>
    %349 = vector.extract_strided_slice %320 {offsets = [31, 0], sizes = [1, 64], strides = [1, 1]} : vector<32x64xf32> to vector<1x64xf32>
    %350 = vector.extract_strided_slice %320 {offsets = [0, 0], sizes = [31, 64], strides = [1, 1]} : vector<32x64xf32> to vector<31x64xf32>
    %351 = tpu.concatenate %349, %350 in 0 : vector<1x64xf32>, vector<31x64xf32> -> vector<32x64xf32>
    %352 = arith.mulf %351, %103 : vector<32x64xf32>
    %353 = vector.extract_strided_slice %321 {offsets = [3, 0], sizes = [1, 64], strides = [1, 1]} : vector<9x64xf32> to vector<1x64xf32>
    %354 = vector.broadcast %353 : vector<1x64xf32> to vector<32x64xf32>
    %355 = arith.mulf %352, %354 : vector<32x64xf32>
    %356 = arith.addf %348, %355 : vector<32x64xf32>
    %357 = vector.extract_strided_slice %320 {offsets = [1, 0], sizes = [31, 64], strides = [1, 1]} : vector<32x64xf32> to vector<31x64xf32>
    %358 = vector.extract_strided_slice %320 {offsets = [0, 0], sizes = [1, 64], strides = [1, 1]} : vector<32x64xf32> to vector<1x64xf32>
    %359 = tpu.concatenate %357, %358 in 0 : vector<31x64xf32>, vector<1x64xf32> -> vector<32x64xf32>
    %360 = arith.mulf %359, %106 : vector<32x64xf32>
    %361 = vector.extract_strided_slice %321 {offsets = [5, 0], sizes = [1, 64], strides = [1, 1]} : vector<9x64xf32> to vector<1x64xf32>
    %362 = vector.broadcast %361 : vector<1x64xf32> to vector<32x64xf32>
    %363 = arith.mulf %360, %362 : vector<32x64xf32>
    %364 = arith.addf %356, %363 : vector<32x64xf32>
    %365 = vector.extract_strided_slice %320 {offsets = [7, 0], sizes = [25, 64], strides = [1, 1]} : vector<32x64xf32> to vector<25x64xf32>
    %366 = vector.extract_strided_slice %320 {offsets = [0, 0], sizes = [7, 64], strides = [1, 1]} : vector<32x64xf32> to vector<7x64xf32>
    %367 = tpu.concatenate %365, %366 in 0 : vector<25x64xf32>, vector<7x64xf32> -> vector<32x64xf32>
    %368 = arith.mulf %367, %109 : vector<32x64xf32>
    %369 = vector.extract_strided_slice %321 {offsets = [6, 0], sizes = [1, 64], strides = [1, 1]} : vector<9x64xf32> to vector<1x64xf32>
    %370 = vector.broadcast %369 : vector<1x64xf32> to vector<32x64xf32>
    %371 = arith.mulf %368, %370 : vector<32x64xf32>
    %372 = arith.addf %364, %371 : vector<32x64xf32>
    %373 = vector.extract_strided_slice %320 {offsets = [8, 0], sizes = [24, 64], strides = [1, 1]} : vector<32x64xf32> to vector<24x64xf32>
    %374 = vector.extract_strided_slice %320 {offsets = [0, 0], sizes = [8, 64], strides = [1, 1]} : vector<32x64xf32> to vector<8x64xf32>
    %375 = tpu.concatenate %373, %374 in 0 : vector<24x64xf32>, vector<8x64xf32> -> vector<32x64xf32>
    %376 = arith.mulf %375, %112 : vector<32x64xf32>
    %377 = vector.extract_strided_slice %321 {offsets = [7, 0], sizes = [1, 64], strides = [1, 1]} : vector<9x64xf32> to vector<1x64xf32>
    %378 = vector.broadcast %377 : vector<1x64xf32> to vector<32x64xf32>
    %379 = arith.mulf %376, %378 : vector<32x64xf32>
    %380 = arith.addf %372, %379 : vector<32x64xf32>
    %381 = vector.extract_strided_slice %320 {offsets = [9, 0], sizes = [23, 64], strides = [1, 1]} : vector<32x64xf32> to vector<23x64xf32>
    %382 = vector.extract_strided_slice %320 {offsets = [0, 0], sizes = [9, 64], strides = [1, 1]} : vector<32x64xf32> to vector<9x64xf32>
    %383 = tpu.concatenate %381, %382 in 0 : vector<23x64xf32>, vector<9x64xf32> -> vector<32x64xf32>
    %384 = arith.mulf %383, %115 : vector<32x64xf32>
    %385 = vector.extract_strided_slice %321 {offsets = [8, 0], sizes = [1, 64], strides = [1, 1]} : vector<9x64xf32> to vector<1x64xf32>
    %386 = vector.broadcast %385 : vector<1x64xf32> to vector<32x64xf32>
    %387 = arith.mulf %384, %386 : vector<32x64xf32>
    %388 = arith.addf %380, %387 : vector<32x64xf32>
    %c27 = arith.constant 27 : index
    %c0_89 = arith.constant 0 : index
    %389 = vector.load %arg1[%c27, %c0_89] : memref<264x64xf32, #tpu.memory_space<vmem>>, vector<1x64xf32>
    %390 = vector.broadcast %389 : vector<1x64xf32> to vector<32x64xf32>
    %391 = arith.addf %388, %390 : vector<32x64xf32>
    %cst_90 = arith.constant 5.000000e-01 : f32
    %392 = vector.broadcast %cst_90 : f32 to vector<32x64xf32>
    %393 = arith.mulf %392, %391 : vector<32x64xf32>
    %cst_91 = arith.constant 0.707106769 : f32
    %394 = vector.broadcast %cst_91 : f32 to vector<32x64xf32>
    %395 = arith.mulf %391, %394 : vector<32x64xf32>
    %cst_92 = arith.constant 0.000000e+00 : f32
    %396 = vector.broadcast %cst_92 : f32 to vector<32x64xf32>
    %397 = arith.cmpf oge, %395, %396 : vector<32x64xf32>
    %cst_93 = arith.constant 1.000000e+00 : f32
    %cst_94 = arith.constant -1.000000e+00 : f32
    %398 = vector.broadcast %cst_93 : f32 to vector<32x64xf32>
    %399 = vector.broadcast %cst_94 : f32 to vector<32x64xf32>
    %400 = arith.select %397, %398, %399 : vector<32x64xi1>, vector<32x64xf32>
    %401 = math.absf %395 : vector<32x64xf32>
    %cst_95 = arith.constant 0.327591091 : f32
    %402 = vector.broadcast %cst_95 : f32 to vector<32x64xf32>
    %403 = arith.mulf %402, %401 : vector<32x64xf32>
    %cst_96 = arith.constant 1.000000e+00 : f32
    %404 = vector.broadcast %cst_96 : f32 to vector<32x64xf32>
    %405 = arith.addf %404, %403 : vector<32x64xf32>
    %cst_97 = arith.constant 1.000000e+00 : f32
    %406 = vector.broadcast %cst_97 : f32 to vector<32x64xf32>
    %407 = arith.divf %406, %405 : vector<32x64xf32>
    %cst_98 = arith.constant 1.06140542 : f32
    %408 = vector.broadcast %cst_98 : f32 to vector<32x64xf32>
    %409 = arith.mulf %407, %408 : vector<32x64xf32>
    %cst_99 = arith.constant -1.45315206 : f32
    %410 = vector.broadcast %cst_99 : f32 to vector<32x64xf32>
    %411 = arith.addf %410, %409 : vector<32x64xf32>
    %412 = arith.mulf %407, %411 : vector<32x64xf32>
    %cst_100 = arith.constant 1.42141378 : f32
    %413 = vector.broadcast %cst_100 : f32 to vector<32x64xf32>
    %414 = arith.addf %413, %412 : vector<32x64xf32>
    %415 = arith.mulf %407, %414 : vector<32x64xf32>
    %cst_101 = arith.constant -0.284496725 : f32
    %416 = vector.broadcast %cst_101 : f32 to vector<32x64xf32>
    %417 = arith.addf %416, %415 : vector<32x64xf32>
    %418 = arith.mulf %407, %417 : vector<32x64xf32>
    %cst_102 = arith.constant 0.254829586 : f32
    %419 = vector.broadcast %cst_102 : f32 to vector<32x64xf32>
    %420 = arith.addf %419, %418 : vector<32x64xf32>
    %421 = arith.mulf %407, %420 : vector<32x64xf32>
    %cst_103 = arith.constant 0.000000e+00 : f32
    %422 = vector.broadcast %cst_103 : f32 to vector<32x64xf32>
    %423 = arith.subf %422, %401 : vector<32x64xf32>
    %424 = arith.mulf %423, %401 : vector<32x64xf32>
    %425 = math.exp %424 : vector<32x64xf32>
    %426 = arith.mulf %421, %425 : vector<32x64xf32>
    %cst_104 = arith.constant 1.000000e+00 : f32
    %427 = vector.broadcast %cst_104 : f32 to vector<32x64xf32>
    %428 = arith.subf %427, %426 : vector<32x64xf32>
    %429 = arith.mulf %400, %428 : vector<32x64xf32>
    %cst_105 = arith.constant 1.000000e+00 : f32
    %430 = vector.broadcast %cst_105 : f32 to vector<32x64xf32>
    %431 = arith.addf %430, %429 : vector<32x64xf32>
    %432 = arith.mulf %393, %431 : vector<32x64xf32>
    %c29 = arith.constant 29 : index
    %c0_106 = arith.constant 0 : index
    %433 = vector.load %arg1[%c29, %c0_106] : memref<264x64xf32, #tpu.memory_space<vmem>>, vector<1x64xf32>
    %c31 = arith.constant 31 : index
    %c0_107 = arith.constant 0 : index
    %434 = vector.load %arg1[%c31, %c0_107] : memref<264x64xf32, #tpu.memory_space<vmem>>, vector<1x64xf32>
    %cst_108 = arith.constant dense<0.000000e+00> : vector<64xf32>
    %435 = vector.multi_reduction <add>, %432, %cst_108 [0] : vector<32x64xf32> to vector<64xf32>
    %436 = vector.shape_cast %435 : vector<64xf32> to vector<1x64xf32>
    %cst_109 = arith.constant 3.200000e+01 : f32
    %437 = vector.broadcast %cst_109 : f32 to vector<1x64xf32>
    %438 = arith.divf %436, %437 : vector<1x64xf32>
    %439 = arith.mulf %432, %432 : vector<32x64xf32>
    %cst_110 = arith.constant dense<0.000000e+00> : vector<64xf32>
    %440 = vector.multi_reduction <add>, %439, %cst_110 [0] : vector<32x64xf32> to vector<64xf32>
    %441 = vector.shape_cast %440 : vector<64xf32> to vector<1x64xf32>
    %cst_111 = arith.constant 3.200000e+01 : f32
    %442 = vector.broadcast %cst_111 : f32 to vector<1x64xf32>
    %443 = arith.divf %441, %442 : vector<1x64xf32>
    %444 = arith.mulf %438, %438 : vector<1x64xf32>
    %445 = arith.subf %443, %444 : vector<1x64xf32>
    %cst_112 = arith.constant 9.99999974E-6 : f32
    %446 = vector.broadcast %cst_112 : f32 to vector<1x64xf32>
    %447 = arith.addf %445, %446 : vector<1x64xf32>
    %448 = math.rsqrt %447 : vector<1x64xf32>
    %449 = arith.mulf %433, %448 : vector<1x64xf32>
    %450 = arith.mulf %438, %449 : vector<1x64xf32>
    %451 = arith.subf %434, %450 : vector<1x64xf32>
    %452 = vector.broadcast %449 : vector<1x64xf32> to vector<32x64xf32>
    %453 = arith.mulf %432, %452 : vector<32x64xf32>
    %454 = vector.broadcast %451 : vector<1x64xf32> to vector<32x64xf32>
    %455 = arith.addf %453, %454 : vector<32x64xf32>
    %456 = arith.addf %320, %455 : vector<32x64xf32>
    %c96 = arith.constant 96 : index
    %c0_113 = arith.constant 0 : index
    %457 = vector.load %arg1[%c96, %c0_113] : memref<264x64xf32, #tpu.memory_space<vmem>>, vector<64x64xf32>
    %cst_114 = arith.constant dense<0.000000e+00> : vector<32x64xf32>
    %458 = tpu.matmul %456, %457, %cst_114 {dimension_numbers = #tpu.dot_dimension_numbers<[1], [0], [0], [1], [0, 0, 1, 1], [], []>, precision = #tpu.contract_precision<fp32>} : vector<32x64xf32>, vector<64x64xf32>, vector<32x64xf32> -> vector<32x64xf32>
    %c161 = arith.constant 161 : index
    %c0_115 = arith.constant 0 : index
    %459 = vector.load %arg1[%c161, %c0_115] : memref<264x64xf32, #tpu.memory_space<vmem>>, vector<1x64xf32>
    %460 = vector.broadcast %459 : vector<1x64xf32> to vector<32x64xf32>
    %461 = arith.addf %458, %460 : vector<32x64xf32>
    %cst_116 = arith.constant 5.000000e-01 : f32
    %462 = vector.broadcast %cst_116 : f32 to vector<32x64xf32>
    %463 = arith.mulf %462, %461 : vector<32x64xf32>
    %cst_117 = arith.constant 0.707106769 : f32
    %464 = vector.broadcast %cst_117 : f32 to vector<32x64xf32>
    %465 = arith.mulf %461, %464 : vector<32x64xf32>
    %cst_118 = arith.constant 0.000000e+00 : f32
    %466 = vector.broadcast %cst_118 : f32 to vector<32x64xf32>
    %467 = arith.cmpf oge, %465, %466 : vector<32x64xf32>
    %cst_119 = arith.constant 1.000000e+00 : f32
    %cst_120 = arith.constant -1.000000e+00 : f32
    %468 = vector.broadcast %cst_119 : f32 to vector<32x64xf32>
    %469 = vector.broadcast %cst_120 : f32 to vector<32x64xf32>
    %470 = arith.select %467, %468, %469 : vector<32x64xi1>, vector<32x64xf32>
    %471 = math.absf %465 : vector<32x64xf32>
    %cst_121 = arith.constant 0.327591091 : f32
    %472 = vector.broadcast %cst_121 : f32 to vector<32x64xf32>
    %473 = arith.mulf %472, %471 : vector<32x64xf32>
    %cst_122 = arith.constant 1.000000e+00 : f32
    %474 = vector.broadcast %cst_122 : f32 to vector<32x64xf32>
    %475 = arith.addf %474, %473 : vector<32x64xf32>
    %cst_123 = arith.constant 1.000000e+00 : f32
    %476 = vector.broadcast %cst_123 : f32 to vector<32x64xf32>
    %477 = arith.divf %476, %475 : vector<32x64xf32>
    %cst_124 = arith.constant 1.06140542 : f32
    %478 = vector.broadcast %cst_124 : f32 to vector<32x64xf32>
    %479 = arith.mulf %477, %478 : vector<32x64xf32>
    %cst_125 = arith.constant -1.45315206 : f32
    %480 = vector.broadcast %cst_125 : f32 to vector<32x64xf32>
    %481 = arith.addf %480, %479 : vector<32x64xf32>
    %482 = arith.mulf %477, %481 : vector<32x64xf32>
    %cst_126 = arith.constant 1.42141378 : f32
    %483 = vector.broadcast %cst_126 : f32 to vector<32x64xf32>
    %484 = arith.addf %483, %482 : vector<32x64xf32>
    %485 = arith.mulf %477, %484 : vector<32x64xf32>
    %cst_127 = arith.constant -0.284496725 : f32
    %486 = vector.broadcast %cst_127 : f32 to vector<32x64xf32>
    %487 = arith.addf %486, %485 : vector<32x64xf32>
    %488 = arith.mulf %477, %487 : vector<32x64xf32>
    %cst_128 = arith.constant 0.254829586 : f32
    %489 = vector.broadcast %cst_128 : f32 to vector<32x64xf32>
    %490 = arith.addf %489, %488 : vector<32x64xf32>
    %491 = arith.mulf %477, %490 : vector<32x64xf32>
    %cst_129 = arith.constant 0.000000e+00 : f32
    %492 = vector.broadcast %cst_129 : f32 to vector<32x64xf32>
    %493 = arith.subf %492, %471 : vector<32x64xf32>
    %494 = arith.mulf %493, %471 : vector<32x64xf32>
    %495 = math.exp %494 : vector<32x64xf32>
    %496 = arith.mulf %491, %495 : vector<32x64xf32>
    %cst_130 = arith.constant 1.000000e+00 : f32
    %497 = vector.broadcast %cst_130 : f32 to vector<32x64xf32>
    %498 = arith.subf %497, %496 : vector<32x64xf32>
    %499 = arith.mulf %470, %498 : vector<32x64xf32>
    %cst_131 = arith.constant 1.000000e+00 : f32
    %500 = vector.broadcast %cst_131 : f32 to vector<32x64xf32>
    %501 = arith.addf %500, %499 : vector<32x64xf32>
    %502 = arith.mulf %463, %501 : vector<32x64xf32>
    %c163 = arith.constant 163 : index
    %c0_132 = arith.constant 0 : index
    %503 = vector.load %arg1[%c163, %c0_132] : memref<264x64xf32, #tpu.memory_space<vmem>>, vector<1x64xf32>
    %c165 = arith.constant 165 : index
    %c0_133 = arith.constant 0 : index
    %504 = vector.load %arg1[%c165, %c0_133] : memref<264x64xf32, #tpu.memory_space<vmem>>, vector<1x64xf32>
    %cst_134 = arith.constant dense<0.000000e+00> : vector<64xf32>
    %505 = vector.multi_reduction <add>, %502, %cst_134 [0] : vector<32x64xf32> to vector<64xf32>
    %506 = vector.shape_cast %505 : vector<64xf32> to vector<1x64xf32>
    %cst_135 = arith.constant 3.200000e+01 : f32
    %507 = vector.broadcast %cst_135 : f32 to vector<1x64xf32>
    %508 = arith.divf %506, %507 : vector<1x64xf32>
    %509 = arith.mulf %502, %502 : vector<32x64xf32>
    %cst_136 = arith.constant dense<0.000000e+00> : vector<64xf32>
    %510 = vector.multi_reduction <add>, %509, %cst_136 [0] : vector<32x64xf32> to vector<64xf32>
    %511 = vector.shape_cast %510 : vector<64xf32> to vector<1x64xf32>
    %cst_137 = arith.constant 3.200000e+01 : f32
    %512 = vector.broadcast %cst_137 : f32 to vector<1x64xf32>
    %513 = arith.divf %511, %512 : vector<1x64xf32>
    %514 = arith.mulf %508, %508 : vector<1x64xf32>
    %515 = arith.subf %513, %514 : vector<1x64xf32>
    %cst_138 = arith.constant 9.99999974E-6 : f32
    %516 = vector.broadcast %cst_138 : f32 to vector<1x64xf32>
    %517 = arith.addf %515, %516 : vector<1x64xf32>
    %518 = math.rsqrt %517 : vector<1x64xf32>
    %519 = arith.mulf %503, %518 : vector<1x64xf32>
    %520 = arith.mulf %508, %519 : vector<1x64xf32>
    %521 = arith.subf %504, %520 : vector<1x64xf32>
    %522 = vector.broadcast %519 : vector<1x64xf32> to vector<32x64xf32>
    %523 = arith.mulf %502, %522 : vector<32x64xf32>
    %524 = vector.broadcast %521 : vector<1x64xf32> to vector<32x64xf32>
    %525 = arith.addf %523, %524 : vector<32x64xf32>
    %526 = vector.extract_strided_slice %525 {offsets = [0, 0], sizes = [16, 64], strides = [1, 1]} : vector<32x64xf32> to vector<16x64xf32>
    %cst_139 = arith.constant dense<0.000000e+00> : vector<64xf32>
    %527 = vector.multi_reduction <add>, %526, %cst_139 [0] : vector<16x64xf32> to vector<64xf32>
    %528 = vector.shape_cast %527 : vector<64xf32> to vector<1x64xf32>
    %cst_140 = arith.constant 1.600000e+01 : f32
    %529 = vector.broadcast %cst_140 : f32 to vector<1x64xf32>
    %530 = arith.divf %528, %529 : vector<1x64xf32>
    %531 = vector.extract_strided_slice %525 {offsets = [16, 0], sizes = [16, 64], strides = [1, 1]} : vector<32x64xf32> to vector<16x64xf32>
    %cst_141 = arith.constant dense<0.000000e+00> : vector<64xf32>
    %532 = vector.multi_reduction <add>, %531, %cst_141 [0] : vector<16x64xf32> to vector<64xf32>
    %533 = vector.shape_cast %532 : vector<64xf32> to vector<1x64xf32>
    %cst_142 = arith.constant 1.600000e+01 : f32
    %534 = vector.broadcast %cst_142 : f32 to vector<1x64xf32>
    %535 = arith.divf %533, %534 : vector<1x64xf32>
    %536 = tpu.concatenate %530, %535 in 0 : vector<1x64xf32>, vector<1x64xf32> -> vector<2x64xf32>
    %c168 = arith.constant 168 : index
    %c0_143 = arith.constant 0 : index
    %537 = vector.load %arg1[%c168, %c0_143] : memref<264x64xf32, #tpu.memory_space<vmem>>, vector<64x16xf32>
    %cst_144 = arith.constant dense<0.000000e+00> : vector<2x16xf32>
    %538 = tpu.matmul %536, %537, %cst_144 {dimension_numbers = #tpu.dot_dimension_numbers<[1], [0], [0], [1], [0, 0, 1, 1], [], []>, precision = #tpu.contract_precision<fp32>} : vector<2x64xf32>, vector<64x16xf32>, vector<2x16xf32> -> vector<2x16xf32>
    %c232 = arith.constant 232 : index
    %c0_145 = arith.constant 0 : index
    %539 = vector.load %arg1[%c232, %c0_145] : memref<264x64xf32, #tpu.memory_space<vmem>>, vector<1x16xf32>
    %540 = vector.broadcast %539 : vector<1x16xf32> to vector<2x16xf32>
    %541 = arith.addf %538, %540 : vector<2x16xf32>
    %c233 = arith.constant 233 : index
    %c0_146 = arith.constant 0 : index
    %542 = vector.load %arg1[%c233, %c0_146] : memref<264x64xf32, #tpu.memory_space<vmem>>, vector<1x16xf32>
    %c234 = arith.constant 234 : index
    %c0_147 = arith.constant 0 : index
    %543 = vector.load %arg1[%c234, %c0_147] : memref<264x64xf32, #tpu.memory_space<vmem>>, vector<1x16xf32>
    %cst_148 = arith.constant dense<0.000000e+00> : vector<16xf32>
    %544 = vector.multi_reduction <add>, %541, %cst_148 [0] : vector<2x16xf32> to vector<16xf32>
    %545 = vector.shape_cast %544 : vector<16xf32> to vector<1x16xf32>
    %cst_149 = arith.constant 2.000000e+00 : f32
    %546 = vector.broadcast %cst_149 : f32 to vector<1x16xf32>
    %547 = arith.divf %545, %546 : vector<1x16xf32>
    %548 = arith.mulf %541, %541 : vector<2x16xf32>
    %cst_150 = arith.constant dense<0.000000e+00> : vector<16xf32>
    %549 = vector.multi_reduction <add>, %548, %cst_150 [0] : vector<2x16xf32> to vector<16xf32>
    %550 = vector.shape_cast %549 : vector<16xf32> to vector<1x16xf32>
    %cst_151 = arith.constant 2.000000e+00 : f32
    %551 = vector.broadcast %cst_151 : f32 to vector<1x16xf32>
    %552 = arith.divf %550, %551 : vector<1x16xf32>
    %553 = arith.mulf %547, %547 : vector<1x16xf32>
    %554 = arith.subf %552, %553 : vector<1x16xf32>
    %cst_152 = arith.constant 9.99999974E-6 : f32
    %555 = vector.broadcast %cst_152 : f32 to vector<1x16xf32>
    %556 = arith.addf %554, %555 : vector<1x16xf32>
    %557 = math.rsqrt %556 : vector<1x16xf32>
    %558 = arith.mulf %542, %557 : vector<1x16xf32>
    %559 = arith.mulf %547, %558 : vector<1x16xf32>
    %560 = arith.subf %543, %559 : vector<1x16xf32>
    %561 = vector.broadcast %558 : vector<1x16xf32> to vector<2x16xf32>
    %562 = arith.mulf %541, %561 : vector<2x16xf32>
    %563 = vector.broadcast %560 : vector<1x16xf32> to vector<2x16xf32>
    %564 = arith.addf %562, %563 : vector<2x16xf32>
    %c240 = arith.constant 240 : index
    %c0_153 = arith.constant 0 : index
    %565 = vector.load %arg1[%c240, %c0_153] : memref<264x64xf32, #tpu.memory_space<vmem>>, vector<16x32xf32>
    %cst_154 = arith.constant dense<0.000000e+00> : vector<2x32xf32>
    %566 = tpu.matmul %564, %565, %cst_154 {dimension_numbers = #tpu.dot_dimension_numbers<[1], [0], [0], [1], [0, 0, 1, 1], [], []>, precision = #tpu.contract_precision<fp32>} : vector<2x16xf32>, vector<16x32xf32>, vector<2x32xf32> -> vector<2x32xf32>
    %c256 = arith.constant 256 : index
    %c0_155 = arith.constant 0 : index
    %567 = vector.load %arg1[%c256, %c0_155] : memref<264x64xf32, #tpu.memory_space<vmem>>, vector<1x32xf32>
    %568 = vector.broadcast %567 : vector<1x32xf32> to vector<2x32xf32>
    %569 = arith.addf %566, %568 : vector<2x32xf32>
    %c0_156 = arith.constant 0 : index
    %c0_157 = arith.constant 0 : index
    %570 = vector.load %arg2[%c0_156, %c0_157] : memref<2x32xf32, #tpu.memory_space<vmem>>, vector<2x32xf32>
    tpu.vector_store %arg2[%c0_156, %c0_157], %569 {strides = array<i32>} : memref<2x32xf32, #tpu.memory_space<vmem>>, vector<2x32xf32>,
    return
  }
}

</mosaic_0001>

<bundles_post_ra>
// kernel: conv_mixer_forward.1
= control target key start
LH: loop header
LB: loop body
LE: loop exit
PB: predicated region body
PF: predicated region fallthrough
CT: control target
= control target key end

     0   :  { %v4695_v0 = vmov 0   ;;  %v4696_v4 = vmov 1   ;;  %v4697_v6 = vmov 2   ;;  %v4698_v7 = vmov 3   ;;  %s6281_s0 = inlined_call_operand.vmem [shape: f32[32,13], index: 0, kind: input, shape index: {}]   ;;  %s6282_s1 = inlined_call_operand.vmem [shape: f32[264,64], index: 1, kind: input, shape index: {}]   ;;  %s6283_s2 = inlined_call_operand.vmem [shape: f32[2,32], index: 2, kind: output, shape index: {}]  }
   0x1   :  { %4564 = vset.pattern.permute.xlu1 %v4695_v0  ;;  %4563 = vset.pattern.permute.xlu0 %v4695_v0  ;;  %v4728_v1 = vld [vmem:[%s6281_s0 + $0x10] sm:$0xff]  ;;  %v4733_v2 = vld [vmem:[%s6281_s0] sm:$0xff]  ;;  %v4740_v3 = vld [vmem:[%s6281_s0 + $0x8] sm:$0xff]  ;;  %v4699_v8 = vmov 4   ;;  %v4700_v9 = vmov 5   ;;  %v4701_v10 = vmov 6   ;;  %v37_v16 = vlaneseq }
   0x2   :  { %29 = vperm.xlu1 %4564, %v4728_v1   ;;  %19 = vperm.xlu0 %4563, %v4733_v2   ;;  %v4747_v5 = vld [vmem:[%s6281_s0 + $0x18] sm:$0xff]  ;;  %v4702_v11 = vmov 7   ;;  %v4703_v12 = vmov 9   ;;  %v4704_v13 = vmov 10   ;;  %v4705_v14 = vmov 11  }
   0x3   :  { %v4706_v15 = vmov 12   ;;  %v4789_v19 = vshrl.u32 %v37_v16, 7  ;;  %v15_v23 = vld [vmem:[%s6282_s1] sm:$0xf]  ;;  %v3903_v30 = vld [vmem:[%s6282_s1 + $0x4] ss:$0 sm:$0xff] }
   0x4   :  { %vm247_vm4 = vcmask 523264  }
   0x5   :  { %v4793_v21 = vsub.s32 0, %v4789_v19  ;;  %v4801_v25 = vsub.s32 1, %v4789_v19  ;;  %v4809_v34 = vsub.s32 2, %v4789_v19  ;;  %v4813_v36 = vsub.s32 3, %v4789_v19 }
   0x6   :  { %4565 = vset.pattern.permute.xlu1 %v4696_v4  ;;  %24 = vperm.xlu0 %4563, %v4740_v3   ;;  %vm448_vm5 = vcmp.lt.s32.totalorder %v4789_v19, 1  ;;  %vm489_vm6 = vcmp.lt.s32.totalorder %v4789_v19, 7 }
   0x7   :  { %54 = vperm.xlu1 %4565, %v4733_v2   ;;  %6387 = vst [vmem:[#allocation2_spill] sm:$0xff] %v4793_v21  ;;  %v40_v24 = vrot.slane %v15_v23, %v4793_v21  ;;  %6388 = vst [vmem:[#allocation3_spill] sm:$0xff] %v4801_v25  ;;  %v72_v29 = vrot.slane %v15_v23, %v4801_v25  ;;  %v100_v39 = vrot.slane %v15_v23, %v4809_v34 }
   0x8   :  { %6389 = vst [vmem:[#allocation4_spill] sm:$0xff] %v4809_v34  ;;  %6390 = vst [vmem:[#allocation5_spill] sm:$0xff] %v4813_v36  ;;  %v128_v41 = vrot.slane %v15_v23, %v4813_v36 }
   0xa   :  { %4566 = vset.pattern.permute.xlu0 %v4696_v4 }
   0xb   :  { %4567 = vset.pattern.permute.xlu1 %v4695_v0  ;;  %58 = vperm.xlu0 %4566, %v4740_v3  }
   0xc   :  { %34 = vperm.xlu1 %4567, %v4747_v5  }
   0xf   :  { %4569 = vset.pattern.permute.xlu0 %v4697_v6 }
  0x10   :  { %4568 = vset.pattern.permute.xlu1 %v4696_v4  ;;  %82 = vperm.xlu0 %4569, %v4733_v2  }
  0x11   :  { %62 = vperm.xlu1 %4568, %v4728_v1  }
  0x14   :  { %90 = vperm.xlu0 %4569, %v4728_v1  }
  0x15   :  { %4570 = vset.pattern.permute.xlu1 %v4697_v6 }
  0x16   :  { %86 = vperm.xlu1 %4570, %v4740_v3  }
  0x18   :  { %4573 = vset.pattern.permute.xlu0 %v4698_v7 }
  0x19   :  { %114 = vperm.xlu0 %4573, %v4740_v3  }
  0x1a   :  { %4571 = vset.pattern.permute.xlu1 %v4696_v4 }
  0x1b   :  { %66 = vperm.xlu1 %4571, %v4747_v5  }
  0x1d   :  { %122 = vperm.xlu0 %4573, %v4747_v5  }
  0x1f   :  { %4572 = vset.pattern.permute.xlu1 %v4698_v7 }
  0x20   :  { %110 = vperm.xlu1 %4572, %v4733_v2  }
  0x21   :  { %4577 = vset.pattern.permute.xlu0 %v4699_v8 }
  0x22   :  { %309 = vperm.xlu0 %4577, %v4740_v3  }
  0x24   :  { %4574 = vset.pattern.permute.xlu1 %v4697_v6 }
  0x25   :  { %94 = vperm.xlu1 %4574, %v4747_v5  }
  0x26   :  { %4579 = vset.pattern.permute.xlu0 %v4700_v9 }
  0x27   :  { %325 = vperm.xlu0 %4579, %v4740_v3  }
  0x29   :  { %4575 = vset.pattern.permute.xlu1 %v4698_v7 }
  0x2a   :  { %118 = vperm.xlu1 %4575, %v4728_v1  }
  0x2b   :  { %4582 = vset.pattern.permute.xlu0 %v4701_v10 }
  0x2c   :  { %337 = vperm.xlu0 %4582, %v4733_v2  }
  0x2e   :  { %4576 = vset.pattern.permute.xlu1 %v4699_v8 }
  0x2f   :  { %305 = vperm.xlu1 %4576, %v4733_v2  }
  0x30   :  { %345 = vperm.xlu0 %4582, %v4728_v1  }
  0x33   :  { %313 = vperm.xlu1 %4576, %v4728_v1  }
  0x34   :  { %4586 = vset.pattern.permute.xlu0 %v4702_v11 }
  0x35   :  { %357 = vperm.xlu0 %4586, %v4740_v3  }
  0x37   :  { %4578 = vset.pattern.permute.xlu1 %v4700_v9 }
  0x38   :  { %321 = vperm.xlu1 %4578, %v4733_v2  }
  0x39   :  { %4589 = vset.pattern.permute.xlu0 %v4703_v12 }
  0x3a   :  { %369 = vperm.xlu0 %4589, %v4733_v2  }
  0x3c   :  { %4580 = vset.pattern.permute.xlu1 %v4699_v8 }
  0x3d   :  { %317 = vperm.xlu1 %4580, %v4747_v5  }
  0x3e   :  { %377 = vperm.xlu0 %4589, %v4728_v1  }
  0x41   :  { %4581 = vset.pattern.permute.xlu1 %v4700_v9 }
  0x42   :  { %329 = vperm.xlu1 %4581, %v4728_v1   ;;  %4593 = vset.pattern.permute.xlu0 %v4704_v13 }
  0x43   :  { %389 = vperm.xlu0 %4593, %v4740_v3  }
  0x46   :  { %4583 = vset.pattern.permute.xlu1 %v4701_v10 }
  0x47   :  { %341 = vperm.xlu1 %4583, %v4740_v3   ;;  %4596 = vset.pattern.permute.xlu0 %v4705_v14 }
  0x48   :  { %401 = vperm.xlu0 %4596, %v4733_v2  }
  0x4b   :  { %4584 = vset.pattern.permute.xlu1 %v4700_v9 }
  0x4c   :  { %333 = vperm.xlu1 %4584, %v4747_v5   ;;  %409 = vperm.xlu0 %4596, %v4728_v1  }
  0x50   :  { %4585 = vset.pattern.permute.xlu1 %v4702_v11  ;;  %4600 = vset.pattern.permute.xlu0 %v4706_v15 }
  0x51   :  { %353 = vperm.xlu1 %4585, %v4733_v2   ;;  %421 = vperm.xlu0 %4600, %v4740_v3  }
  0x55   :  { %4587 = vset.pattern.permute.xlu1 %v4701_v10  ;;  %429 = vperm.xlu0 %4600, %v4747_v5  }
  0x56   :  { %349 = vperm.xlu1 %4587, %v4747_v5  }
  0x5a   :  { %4588 = vset.pattern.permute.xlu1 %v4702_v11 }
  0x5b   :  { %361 = vperm.xlu1 %4588, %v4728_v1  }
  0x5f   :  { %4590 = vset.pattern.permute.xlu1 %v4703_v12 }
  0x60   :  { %373 = vperm.xlu1 %4590, %v4740_v3  }
  0x64   :  { %4591 = vset.pattern.permute.xlu1 %v4702_v11 }
  0x65   :  { %365 = vperm.xlu1 %4591, %v4747_v5  }
  0x69   :  { %4592 = vset.pattern.permute.xlu1 %v4704_v13 }
  0x6a   :  { %385 = vperm.xlu1 %4592, %v4733_v2  }
  0x6e   :  { %4594 = vset.pattern.permute.xlu1 %v4703_v12 }
  0x6f   :  { %381 = vperm.xlu1 %4594, %v4747_v5  }
  0x73   :  { %4595 = vset.pattern.permute.xlu1 %v4704_v13 }
  0x74   :  { %393 = vperm.xlu1 %4595, %v4728_v1  }
  0x78   :  { %4597 = vset.pattern.permute.xlu1 %v4705_v14 }
  0x79   :  { %405 = vperm.xlu1 %4597, %v4740_v3  }
  0x7d   :  { %v30_v17 = vpop.permute.xlu1 %29  ;;  %v20_v18 = vpop.permute.xlu0 %19  ;;  %4598 = vset.pattern.permute.xlu1 %v4704_v13 }
  0x7e   :  { %397 = vperm.xlu1 %4598, %v4747_v5   ;;  %v41_v42 = vmul.f32 %v40_v24, %v20_v18  ;;  %v43_v57 = vmul.f32 %v40_v24, %v30_v17 }
  0x80   :  { %v49_v47 = vadd.f32 %v3903_v30, %v41_v42  ;;  %v51_v3 = vadd.f32 %v3903_v30, %v43_v57 }
  0x81   :  { %v25_v20 = vpop.permute.xlu0 %24 }
  0x82   :  { %v55_v22 = vpop.permute.xlu1 %54  ;;  %4599 = vset.pattern.permute.xlu1 %v4706_v15  ;;  %v42_v28 = vmul.f32 %v40_v24, %v25_v20 }
  0x83   :  { %417 = vperm.xlu1 %4599, %v4733_v2   ;;  %v73_v48 = vmul.f32 %v72_v29, %v55_v22 }
  0x84   :  { %v50_v32 = vadd.f32 %v3903_v30, %v42_v28 }
  0x85   :  { %v77_v53 = vadd.f32 %v73_v48, %v49_v47 }
  0x86   :  { %v59_v26 = vpop.permute.xlu0 %58 }
  0x87   :  { %v35_v27 = vpop.permute.xlu1 %34  ;;  %4601 = vset.pattern.permute.xlu1 %v4705_v14  ;;  %v74_v33 = vmul.f32 %v72_v29, %v59_v26 }
  0x88   :  { %413 = vperm.xlu1 %4601, %v4747_v5   ;;  %v44_v54 = vmul.f32 %v40_v24, %v35_v27 }
  0x89   :  { %v78_v38 = vadd.f32 %v74_v33, %v50_v32 }
  0x8b   :  { %v83_v31 = vpop.permute.xlu0 %82 }
  0x8c   :  { %v63_v35 = vpop.permute.xlu1 %62  ;;  %4602 = vset.pattern.permute.xlu1 %v4706_v15  ;;  %v101_v51 = vmul.f32 %v100_v39, %v83_v31 }
  0x8d   :  { %425 = vperm.xlu1 %4602, %v4728_v1   ;;  %v75_v62 = vmul.f32 %v72_v29, %v63_v35  ;;  %v52_v1 = vadd.f32 %v3903_v30, %v44_v54 }
  0x8e   :  { %v105_v58 = vadd.f32 %v101_v51, %v77_v53 }
  0x8f   :  { %v91_v37 = vpop.permute.xlu0 %90  ;;  %v79_v9 = vadd.f32 %v75_v62, %v51_v3 }
  0x90   :  { %v103_v10 = vmul.f32 %v100_v39, %v91_v37 }
  0x91   :  { %v87_v40 = vpop.permute.xlu1 %86 }
  0x92   :  { %v102_v43 = vmul.f32 %v100_v39, %v87_v40  ;;  %v107_v16 = vadd.f32 %v103_v10, %v79_v9 }
  0x94   :  { %v106_v44 = vadd.f32 %v102_v43, %v78_v38  ;;  %v115_v45 = vpop.permute.xlu0 %114 }
  0x95   :  { %v130_v46 = vmul.f32 %v128_v41, %v115_v45 }
  0x96   :  { %v67_v49 = vpop.permute.xlu1 %66 }
  0x97   :  { %v4817_v50 = vadd.f32 %v130_v46, %v106_v44  ;;  %v76_v61 = vmul.f32 %v72_v29, %v67_v49 }
  0x98   :  { %v123_v0 = vpop.permute.xlu0 %122 }
  0x99   :  { %v4820_v52 = vmul.f32 0.70710677, %v4817_v50  ;;  %v80_v6 = vadd.f32 %v76_v61, %v52_v1  ;;  %v132_v8 = vmul.f32 %v128_v41, %v123_v0 }
  0x9b   :  { %v154_v55 = vand.u32 2147483647, %v4820_v52  ;;  %v111_v56 = vpop.permute.xlu1 %110  ;;  %vm146_vm0 = vcmp.ge.f32.partialorder %v4820_v52, 0.0 }
  0x9c   :  { %v129_v59 = vmul.f32 %v128_v41, %v111_v56 }
  0x9d   :  { %v158_v60 = vmul.f32 0.3275911, %v154_v55  ;;  %v210_v24 = vsub.f32 0.0, %v154_v55 }
  0x9e   :  { %v4823_v63 = vadd.f32 %v129_v59, %v105_v58 }
  0x9f   :  { %v162_v2 = vadd.f32 1.0, %v158_v60  ;;  %v214_v31 = vmul.f32 %v210_v24, %v154_v55 }
  0xa0   :  { %v4826_v4 = vmul.f32 0.70710677, %v4823_v63  ;;  %v95_v5 = vpop.permute.xlu1 %94 }
  0xa1   :  { %4603 = vrcp.f32 %v162_v2  ;;  %v104_v7 = vmul.f32 %v100_v39, %v95_v5  ;;  %v219_v39 = vmul.f32 1.442695, %v214_v31 }
  0xa2   :  { %v153_v11 = vand.u32 2147483647, %v4826_v4  ;;  %vm145_vm1 = vcmp.ge.f32.partialorder %v4826_v4, 0.0 }
  0xa3   :  { %v108_v12 = vadd.f32 %v104_v7, %v80_v6 }
  0xa4   :  { %v157_v13 = vmul.f32 0.3275911, %v153_v11  ;;  %v209_v32 = vsub.f32 0.0, %v153_v11 }
  0xa5   :  { %v4829_v14 = vadd.f32 %v132_v8, %v108_v12  ;;  %v119_v15 = vpop.permute.xlu1 %118 }
  0xa6   :  { %v161_v17 = vadd.f32 1.0, %v157_v13  ;;  %v131_v18 = vmul.f32 %v128_v41, %v119_v15  ;;  %v213_v40 = vmul.f32 %v209_v32, %v153_v11 }
  0xa7   :  { %v4832_v20 = vmul.f32 0.70710677, %v4829_v14 }
  0xa8   :  { %4605 = vrcp.f32 %v161_v17  ;;  %v4834_v22 = vadd.f32 %v131_v18, %v107_v16  ;;  %v217_v47 = vmul.f32 1.442695, %v213_v40  ;;  %v6285_v40 = vmov -1.0  }
  0xa9   :  { %v156_v23 = vand.u32 2147483647, %v4832_v20  ;;  %vm148_vm2 = vcmp.ge.f32.partialorder %v4832_v20, 0.0 }
  0xaa   :  { %v4838_v26 = vmul.f32 0.70710677, %v4834_v22  ;;  %v4841_v42 = vpop.permute.xlu1 %305 }
  0xab   :  { %v160_v27 = vmul.f32 0.3275911, %v156_v23  ;;  %6391 = vst [vmem:[#allocation6_spill] sm:$0xff] %v4841_v42  ;;  %v212_v45 = vsub.f32 0.0, %v156_v23 }
  0xac   :  { %v155_v28 = vand.u32 2147483647, %v4838_v26  ;;  %vm147_vm3 = vcmp.ge.f32.partialorder %v4838_v26, 0.0 }
  0xad   :  { %v164_v29 = vadd.f32 1.0, %v160_v27  ;;  %v216_v54 = vmul.f32 %v212_v45, %v156_v23 }
  0xae   :  { %v4604_v30 = vpop.eup %4603  ;;  %v159_v33 = vmul.f32 0.3275911, %v155_v28  ;;  %v211_v51 = vsub.f32 0.0, %v155_v28  ;;  %v4843_v56 = vpop.permute.xlu1 %313 }
  0xaf   :  { %v174_v35 = vmul.f32 1.0614054, %v4604_v30  ;;  %4607 = vrcp.f32 %v164_v29  ;;  %6392 = vst [vmem:[#allocation7_spill] sm:$0xff] %v4843_v56  ;;  %v223_v0 = vmul.f32 1.442695, %v216_v54  ;;  %v137_v54 = vmul.f32 0.5, %v4823_v63 }
  0xb0   :  { %v163_v37 = vadd.f32 1.0, %v159_v33  ;;  %v215_v60 = vmul.f32 %v211_v51, %v155_v28  ;;  %v151_v63 = vsel %vm147_vm3, 1.0, %v6285_v40  ;;  %vm4709_vm3 = vmmov 0  }
  0xb1   :  { %v178_v38 = vadd.f32 -1.4531521, %v174_v35 }
  0xb2   :  { %4609 = vrcp.f32 %v163_v37  ;;  %v221_v9 = vmul.f32 1.442695, %v215_v60  ;;  %v138_v60 = vmul.f32 0.5, %v4817_v50  ;;  %v140_v50 = vmul.f32 0.5, %v4829_v14 }
  0xb3   :  { %v182_v41 = vmul.f32 %v4604_v30, %v178_v38  ;;  %4611 = vpow2.f32 %v219_v39  ;;  %v4845_v2 = vpop.permute.xlu1 %321 }
  0xb4   :  { %4613 = vpow2.f32 %v217_v47  ;;  %6393 = vst [vmem:[#allocation8_spill] sm:$0xff] %v4845_v2 }
  0xb5   :  { %v4606_v43 = vpop.eup %4605  ;;  %v186_v44 = vadd.f32 1.4214138, %v182_v41  ;;  %4615 = vpow2.f32 %v223_v0  ;;  %v150_v41 = vsel %vm146_vm0, 1.0, %v6285_v40 }
  0xb6   :  { %v173_v46 = vmul.f32 1.0614054, %v4606_v43  ;;  %4617 = vpow2.f32 %v221_v9  ;;  %v139_v9 = vmul.f32 0.5, %v4834_v22 }
  0xb7   :  { %v190_v48 = vmul.f32 %v4604_v30, %v186_v44 }
  0xb8   :  { %v177_v49 = vadd.f32 -1.4531521, %v173_v46  ;;  %v4847_v23 = vpop.permute.xlu1 %317 }
  0xb9   :  { %v194_v53 = vadd.f32 -0.28449672, %v190_v48  ;;  %6394 = vst [vmem:[#allocation9_spill] sm:$0xff] %v4847_v23 }
  0xba   :  { %v181_v55 = vmul.f32 %v4606_v43, %v177_v49 }
  0xbb   :  { %v198_v57 = vmul.f32 %v4604_v30, %v194_v53 }
  0xbc   :  { %v4608_v58 = vpop.eup %4607  ;;  %v185_v59 = vadd.f32 1.4214138, %v181_v55 }
  0xbd   :  { %v202_v61 = vadd.f32 0.2548296, %v198_v57  ;;  %v176_v62 = vmul.f32 1.0614054, %v4608_v58  ;;  %v4851_v39 = vpop.permute.xlu1 %329 }
  0xbe   :  { %v189_v1 = vmul.f32 %v4606_v43, %v185_v59  ;;  %6395 = vst [vmem:[#allocation10_spill] sm:$0xff] %v4851_v39 }
  0xbf   :  { %v4610_v3 = vpop.eup %4609  ;;  %v180_v5 = vadd.f32 -1.4531521, %v176_v62  ;;  %v206_v6 = vmul.f32 %v4604_v30, %v202_v61 }
  0xc0   :  { %v193_v7 = vadd.f32 -0.28449672, %v189_v1  ;;  %v175_v8 = vmul.f32 1.0614054, %v4610_v3  ;;  %v4612_v13 = vpop.eup %4611 }
  0xc1   :  { %v184_v10 = vmul.f32 %v4608_v58, %v180_v5  ;;  %v226_v16 = vmul.f32 %v4612_v13, %v206_v6  ;;  %v4614_v29 = vpop.eup %4613 }
  0xc2   :  { %v197_v11 = vmul.f32 %v4606_v43, %v193_v7  ;;  %v179_v12 = vadd.f32 -1.4531521, %v175_v8  ;;  %v4616_v48 = vpop.eup %4615  ;;  %v4857_v57 = vpop.permute.xlu1 %341 }
  0xc3   :  { %v188_v15 = vadd.f32 1.4214138, %v184_v10  ;;  %v230_v31 = vsub.f32 1.0, %v226_v16  ;;  %6396 = vst [vmem:[#allocation11_spill] sm:$0xff] %v4857_v57  ;;  %v4618_v59 = vpop.eup %4617 }
  0xc4   :  { %v201_v17 = vadd.f32 0.2548296, %v197_v11  ;;  %v183_v18 = vmul.f32 %v4610_v3, %v179_v12 }
  0xc5   :  { %v192_v24 = vmul.f32 %v4608_v58, %v188_v15  ;;  %v234_v45 = vmul.f32 %v230_v31, %v150_v41 }
  0xc6   :  { %v205_v27 = vmul.f32 %v4606_v43, %v201_v17  ;;  %v187_v28 = vadd.f32 1.4214138, %v183_v18  ;;  %v149_v43 = vsel %vm145_vm1, 1.0, %v6285_v40 }
  0xc7   :  { %v196_v30 = vadd.f32 -0.28449672, %v192_v24  ;;  %v238_v53 = vadd.f32 1.0, %v234_v45  ;;  %v4870_v8 = vpop.permute.xlu1 %333 }
  0xc8   :  { %v225_v32 = vmul.f32 %v4614_v29, %v205_v27  ;;  %v191_v33 = vmul.f32 %v4610_v3, %v187_v28  ;;  %6397 = vst [vmem:[#allocation12_spill] sm:$0xff] %v4870_v8 }
  0xc9   :  { %v200_v35 = vmul.f32 %v4608_v58, %v196_v30  ;;  %v4864_v20 = vmul.f32 %v238_v53, %v138_v60 }
  0xca   :  { %v229_v37 = vsub.f32 1.0, %v225_v32  ;;  %v195_v38 = vadd.f32 -0.28449672, %v191_v33 }
  0xcb   :  { %v204_v44 = vadd.f32 0.2548296, %v200_v35  ;;  %v264_v26 = vmul.f32 %v4864_v20, %v4864_v20  ;;  %v249_v13 = vsel %vm247_vm4, %v4864_v20, 0.0 }
  0xcc   :  { %v233_v46 = vmul.f32 %v229_v37, %v149_v43  ;;  %v199_v52 = vmul.f32 %v4610_v3, %v195_v38  ;;  %v4891_v27 = vpop.permute.xlu1 %353  ;;  %v4899_v43 = vpop.permute.xlu0 %309 }
  0xcd   :  { %v208_v47 = vmul.f32 %v4608_v58, %v204_v44  ;;  %v152_v58 = vsel %vm148_vm2, 1.0, %v6285_v40  ;;  %v268_v17 = vsel %vm247_vm4, %v264_v26, 0.0  ;;  %6398 = vst [vmem:[#allocation13_spill] sm:$0xff] %v4891_v27 }
  0xce   :  { %v237_v49 = vadd.f32 1.0, %v233_v46  ;;  %v203_v4 = vadd.f32 0.2548296, %v199_v52 }
  0xcf   :  { %v228_v51 = vmul.f32 %v4616_v48, %v208_v47 }
  0xd0   :  { %v207_v55 = vmul.f32 %v4610_v3, %v203_v4  ;;  %v4860_v62 = vmul.f32 %v237_v49, %v137_v54  ;;  %v4903_v4 = vpop.permute.xlu0 %325 }
  0xd1   :  { %v232_v61 = vsub.f32 1.0, %v228_v51  ;;  %v4897_v41 = vpop.permute.xlu1 %349 }
  0xd2   :  { %v227_v0 = vmul.f32 %v4618_v59, %v207_v55  ;;  %v263_v3 = vmul.f32 %v4860_v62, %v4860_v62  ;;  %v248_v10 = vsel %vm247_vm4, %v4860_v62, 0.0 }
  0xd3   :  { %v236_v1 = vmul.f32 %v232_v61, %v152_v58  ;;  %v250_v16 = vadd.f32 %v249_v13, %v248_v10  ;;  %v775_v10 = vld [vmem:[%s6282_s1 + $0x58] sm:$0xff]  ;;  %v773_v13 = vld [vmem:[%s6282_s1 + $0x48] sm:$0xff] }
  0xd4   :  { %v231_v5 = vsub.f32 1.0, %v227_v0  ;;  %v267_v14 = vsel %vm247_vm4, %v263_v3, 0.0  ;;  %v4909_v58 = vpop.permute.xlu0 %337 }
  0xd5   :  { %v240_v6 = vadd.f32 1.0, %v236_v1  ;;  %v269_v28 = vadd.f32 %v268_v17, %v267_v14 }
  0xd6   :  { %v235_v7 = vmul.f32 %v231_v5, %v151_v63  ;;  %v4901_v49 = vpop.permute.xlu1 %361 }
  0xd7   :  { %v4877_v11 = vmul.f32 %v240_v6, %v140_v50  ;;  %v6284_v50 = vsub.s32 4, %v4789_v19 }
  0xd8   :  { %v239_v12 = vadd.f32 1.0, %v235_v7  ;;  %v4915_v3 = vpop.permute.xlu0 %345  ;;  %v4921_v7 = vld [vmem:[%s6282_s1 + $0x8] sm:$0xff] }
  0xd9   :  { %v266_v22 = vmul.f32 %v4877_v11, %v4877_v11  ;;  %v253_v30 = vsel %vm247_vm4, %v4877_v11, 0.0  ;;  %v4939_v14 = vrot.slane %v4921_v7, %v6284_v50  ;;  %v246_v50 = vld [vmem:[%s6282_s1 + $0x6] sm:$0x1] }
  0xda   :  { %v4882_v15 = vmul.f32 %v239_v12, %v139_v9  ;;  %v774_v12 = vld [vmem:[%s6282_s1 + $0x50] sm:$0xff] }
  0xdb   :  { %v272_v35 = vsel %vm247_vm4, %v266_v22, 0.0  ;;  %v4907_v61 = vpop.permute.xlu1 %373  ;;  %v4943_v17 = vand.u32 4294901760, %v774_v12  ;;  %v4945_v22 = vand.u32 4294901760, %v773_v13 }
  0xdc   :  { %v251_v18 = vsel %vm247_vm4, %v4882_v15, 0.0  ;;  %v265_v24 = vmul.f32 %v4882_v15, %v4882_v15  ;;  %6399 = vst [vmem:[#allocation14_spill] sm:$0xff] %v4907_v61  ;;  %v4925_v26 = vpop.permute.xlu0 %357 }
  0xdd   :  { %v252_v29 = vadd.f32 %v251_v18, %v250_v16  ;;  %v4941_v16 = vand.u32 4294901760, %v775_v10  ;;  %6401 = vst [vmem:[#allocation16_spill] sm:$0xff] %v4943_v17  ;;  %6402 = vst [vmem:[#allocation17_spill] sm:$0xff] %v4945_v22  ;;  %v772_v18 = vld [vmem:[%s6282_s1 + $0x40] sm:$0xff] }
  0xde   :  { %v270_v31 = vsel %vm247_vm4, %v265_v24, 0.0  ;;  %v771_v24 = vld [vmem:[%s6282_s1 + $0x38] sm:$0xff] }
  0xdf   :  { %v254_v32 = vadd.f32 %v253_v30, %v252_v29  ;;  %v271_v33 = vadd.f32 %v270_v31, %v269_v28  ;;  %v770_v28 = vld [vmem:[%s6282_s1 + $0x30] sm:$0xff]  ;;  %v4958_v29 = vrot.slane %v4921_v7, %v4793_v21  ;;  %v4960_v30 = vand.u32 4294901760, %v772_v18  ;;  %4128 = vmatprep.subr.mxu0 %v4941_v16 }
  0xe0   :  { %v4913_v63 = vpop.permute.xlu1 %365  ;;  %v4962_v31 = vand.u32 4294901760, %v771_v24  ;;  %4129 = vmatpush3.msra.mxu0 %v4941_v16 }
  0xe1   :  { %v255_v37 = vrot.slane %v254_v32, 4  ;;  %v273_v38 = vadd.f32 %v272_v35, %v271_v33  ;;  %6403 = vst [vmem:[#allocation18_spill] sm:$0xff] %v4960_v30  ;;  %v769_v33 = vld [vmem:[%s6282_s1 + $0x28] sm:$0xff]  ;;  %v768_v35 = vld [vmem:[%s6282_s1 + $0x20] sm:$0xff]  ;;  %4130 = vmatprep.subr.mxu0 %v4943_v17 }
  0xe2   :  { %6404 = vst [vmem:[#allocation19_spill] sm:$0xff] %v4962_v31  ;;  %4131 = vmatpush3.msra.mxu0 %v4943_v17 }
  0xe3   :  { %v256_v44 = vadd.f32 %v255_v37, %v254_v32  ;;  %v274_v45 = vrot.slane %v273_v38, 4  ;;  %v4964_v32 = vand.u32 4294901760, %v770_v28  ;;  %v4973_v37 = vsub.f32 %v775_v10, %v4941_v16  ;;  %4132 = vmatprep.subr.mxu0 %v4945_v22 }
  0xe4   :  { %4133 = vmatpush3.msra.mxu0 %v4945_v22 }
  0xe5   :  { %v257_v46 = vrot.slane %v256_v44, 2  ;;  %v275_v52 = vadd.f32 %v274_v45, %v273_v38  ;;  %v4923_v9 = vpop.permute.xlu1 %385  ;;  %6405 = vst [vmem:[#allocation20_spill] sm:$0xff] %v4964_v32  ;;  %v4976_v38 = vsub.f32 %v774_v12, %v4943_v17  ;;  %v4982_v45 = vand.u32 4294901760, %v769_v33  ;;  %4134 = vmatprep.subr.mxu0 %v4960_v30 }
  0xe6   :  { %6400 = vst [vmem:[#allocation15_spill] sm:$0xff] %v4923_v9  ;;  %4135 = vmatpush3.msra.mxu0 %v4960_v30 }
  0xe7   :  { %v258_v47 = vadd.f32 %v257_v46, %v256_v44  ;;  %v276_v48 = vrot.slane %v275_v52, 2  ;;  %6406 = vst [vmem:[#allocation21_spill] sm:$0xff] %v4976_v38  ;;  %v4979_v44 = vsub.f32 %v773_v13, %v4945_v22  ;;  %6408 = vst [vmem:[#allocation23_spill] sm:$0xff] %v4982_v45  ;;  %v245_v46 = vld [vmem:[%s6282_s1 + $0x5] sm:$0x1]  ;;  %4136 = vmatprep.subr.mxu0 %v4962_v31 }
  0xe8   :  { %4137 = vmatpush3.msra.mxu0 %v4962_v31 }
  0xe9   :  { %v259_v51 = vrot.slane %v258_v47, 1  ;;  %v277_v53 = vadd.f32 %v276_v48, %v275_v52  ;;  %6407 = vst [vmem:[#allocation22_spill] sm:$0xff] %v4979_v44  ;;  %v4992_v48 = vsub.f32 %v772_v18, %v4960_v30  ;;  %4138 = vmatprep.subr.mxu0 %v4964_v32 }
  0xea   :  { %v4987_v52 = vpop.permute.xlu1 %381  ;;  %4139 = vmatpush3.msra.mxu0 %v4964_v32 }
  0xeb   :  { %v260_v54 = vadd.f32 %v259_v51, %v258_v47  ;;  %v278_v55 = vrot.slane %v277_v53, 1  ;;  %v4989_v47 = vpop.permute.xlu0 %369  ;;  %6409 = vst [vmem:[#allocation24_spill] sm:$0xff] %v4992_v48  ;;  %v4995_v51 = vsub.f32 %v771_v24, %v4962_v31  ;;  %v5021_v10 = vand.u32 4294901760, %v4992_v48  ;;  %4140 = vmatprep.subr.mxu0 %v4982_v45 }
  0xec   :  { %4141 = vmatpush3.msra.mxu0 %v4982_v45 }
  0xed   :  { %v4905_v59 = vmul.f32 0.03125, %v260_v54  ;;  %v279_v60 = vadd.f32 %v278_v55, %v277_v53  ;;  %6410 = vst [vmem:[#allocation25_spill] sm:$0xff] %v4995_v51  ;;  %v4999_v53 = vsub.f32 %v770_v28, %v4964_v32  ;;  %v5001_v54 = vand.u32 4294901760, %v768_v35  ;;  %6416 = vst [vmem:[#allocation31_spill] sm:$0xff] %v5021_v10 }
  0xee   :  { %v5004_v55 = vand.u32 4294901760, %v4973_v37  ;;  %v5024_v12 = vand.u32 4294901760, %v4995_v51 }
  0xef   :  { %v280_v0 = vmul.f32 0.03125, %v279_v60  ;;  %v281_v1 = vmul.f32 %v4905_v59, %v4905_v59  ;;  %6411 = vst [vmem:[#allocation26_spill] sm:$0xff] %v4999_v53  ;;  %v5007_v60 = vand.u32 4294901760, %v4976_v38  ;;  %v5027_v13 = vand.u32 4294901760, %v4999_v53  ;;  %4142 = vmatprep.subr.mxu0 %v5001_v54 }
  0xf0   :  { %6412 = vst [vmem:[#allocation27_spill] sm:$0xff] %v5004_v55  ;;  %6417 = vst [vmem:[#allocation32_spill] sm:$0xff] %v5024_v12  ;;  %v926_v24 = vsub.f32 %v4973_v37, %v5004_v55  ;;  %4143 = vmatpush3.msra.mxu0 %v5001_v54 }
  0xf1   :  { %v282_v5 = vsub.f32 %v280_v0, %v281_v1  ;;  %6413 = vst [vmem:[#allocation28_spill] sm:$0xff] %v5007_v60  ;;  %v5010_v0 = vand.u32 4294901760, %v4979_v44  ;;  %v5014_v1 = vsub.f32 %v769_v33, %v4982_v45  ;;  %6418 = vst [vmem:[#allocation33_spill] sm:$0xff] %v5027_v13  ;;  %v933_v28 = vsub.f32 %v4976_v38, %v5007_v60  ;;  %v5066_v38 = vpop.permute.xlu0 %377 }
  0xf2   :  { %v927_v55 = vand.u32 4294901760, %v926_v24  ;;  %4172 = vmatprep.subr.mxu0 %v4973_v37 }
  0xf3   :  { %v283_v6 = vadd.f32 1e-05, %v282_v5  ;;  %6414 = vst [vmem:[#allocation29_spill] sm:$0xff] %v5010_v0  ;;  %6415 = vst [vmem:[#allocation30_spill] sm:$0xff] %v5014_v1  ;;  %v940_v33 = vsub.f32 %v4979_v44, %v5010_v0  ;;  %v5048_v40 = vand.u32 4294901760, %v5014_v1  ;;  %v934_v44 = vand.u32 4294901760, %v933_v28 }
  0xf4   :  { %4150 = vmatprep.subr.mxu1 %v927_v55 }
  0xf5   :  { %4619 = vrsqrt.f32 %v283_v6  ;;  %v5018_v6 = vrot.slane %v4921_v7, %v4801_v25  ;;  %6419 = vst [vmem:[#allocation34_spill] sm:$0xff] %v5048_v40  ;;  %v5052_v25 = vsub.f32 %v768_v35, %v5001_v54  ;;  %v5064_v35 = vpop.permute.xlu1 %393  ;;  %v941_v28 = vand.u32 4294901760, %v940_v33  ;;  %4151 = vmatpush3.msra.mxu1 %v927_v55 }
  0xf6   :  { %v968_v22 = vsub.f32 %v5014_v1, %v5048_v40  ;;  %4152 = vmatprep.subr.mxu1 %v934_v44  ;;  %v6423_v55 = vsub.s32 6, %v4789_v19 }
  0xf7   :  { %6420 = vst [vmem:[#allocation35_spill] sm:$0xff] %v5052_v25  ;;  %4153 = vmatpush3.msra.mxu1 %v934_v44 }
  0xf8   :  { %v5094_v40 = vrot.slane %v4921_v7, %v6423_v55  ;;  %4154 = vmatprep.subr.mxu1 %v941_v28 }
  0xf9   :  { %v5112_v44 = vpop.permute.xlu1 %405  ;;  %4155 = vmatpush3.msra.mxu1 %v941_v28 }
 0x102   :  { %v4620_v5 = vpop.eup %4619 }
 0x103   :  { %v285_v18 = vmul.f32 %v4620_v5, %v245_v46  ;;  %v5043_v46 = vrot.slane %v4921_v7, %v4809_v34  ;;  %v947_v5 = vsub.f32 %v4992_v48, %v5021_v10  ;;  %v5060_v34 = vrot.slane %v4921_v7, %v4813_v36 }
 0x104   :  { %v961_v36 = vsub.f32 %v4999_v53, %v5027_v13  ;;  %v6424_v13 = vsub.s32 7, %v4789_v19 }
 0x105   :  { %v286_v0 = vmul.f32 %v285_v18, %v4905_v59  ;;  %v291_v60 = vrot.slane %v285_v18, %v4793_v21  ;;  %v954_v59 = vsub.f32 %v4995_v51, %v5024_v12  ;;  %v5079_v12 = vand.u32 4294901760, %v5052_v25 }
 0x106   :  { %v948_v24 = vand.u32 4294901760, %v947_v5  ;;  %v5110_v55 = vrot.slane %v4921_v7, %v6424_v13 }
 0x107   :  { %v287_v18 = vsub.f32 %v246_v50, %v286_v0  ;;  %v294_v10 = vmul.f32 %v291_v60, %v4882_v15  ;;  %v292_v48 = vmul.f32 %v291_v60, %v4860_v62  ;;  %6421 = vst [vmem:[#allocation36_spill] sm:$0xff] %v5079_v12  ;;  %v295_v0 = vmul.f32 %v291_v60, %v4877_v11 }
 0x108   :  { %v293_v33 = vmul.f32 %v291_v60, %v4864_v20  ;;  %v6422_v62 = vsub.s32 5, %v4789_v19  ;;  %v975_v11 = vsub.f32 %v5052_v25, %v5079_v12  ;;  %v962_v12 = vand.u32 4294901760, %v961_v36  ;;  %4156 = vmatprep.subr.mxu1 %v948_v24 }
 0x109   :  { %v299_v50 = vrot.slane %v287_v18, %v4793_v21  ;;  %v955_v18 = vand.u32 4294901760, %v954_v59  ;;  %v5114_v59 = vpop.permute.xlu0 %389  ;;  %4157 = vmatpush3.msra.mxu1 %v948_v24 }
 0x10a   :  { %v5089_v15 = vrot.slane %v4921_v7, %v6422_v62  ;;  %v976_v25 = vand.u32 4294901760, %v975_v11 }
 0x10b   :  { %v5099_v20 = vadd.f32 %v299_v50, %v294_v10  ;;  %v5101_v60 = vadd.f32 %v299_v50, %v292_v48  ;;  %v5103_v5 = vadd.f32 %v299_v50, %v295_v0  ;;  %v5105_v62 = vadd.f32 %v299_v50, %v293_v33  ;;  %4158 = vmatprep.subr.mxu1 %v955_v18 }
 0x10c   :  { %v969_v10 = vand.u32 4294901760, %v968_v22  ;;  %4159 = vmatpush3.msra.mxu1 %v955_v18 }
 0x10d   :  { %v438_v48 = vmul.f32 %v4939_v14, %v5101_v60  ;;  %v444_v50 = vrot.slane %v5099_v20, 7  ;;  %v445_v0 = vrot.slane %v5103_v5, 7  ;;  %v440_v7 = vmul.f32 %v4939_v14, %v5099_v20  ;;  %4160 = vmatprep.subr.mxu1 %v962_v12 }
 0x10e   :  { %v442_v13 = vrot.slane %v5101_v60, 7  ;;  %v443_v36 = vrot.slane %v5105_v62, 7  ;;  %v469_v22 = vmul.f32 %v4845_v2, %v5103_v5  ;;  %v441_v28 = vmul.f32 %v4939_v14, %v5103_v5  ;;  %4161 = vmatpush3.msra.mxu1 %v962_v12 }
 0x10f   :  { %v5133_v33 = vsel %vm448_vm5, %v444_v50, %v445_v0  ;;  %v471_v11 = vmul.f32 %v4851_v39, %v5105_v62  ;;  %v485_v1 = vrot.slane %v5101_v60, 1  ;;  %v486_v53 = vrot.slane %v5105_v62, 1  ;;  %4162 = vmatprep.subr.mxu1 %v969_v10 }
 0x110   :  { %v453_v2 = vmul.f32 %v5133_v33, %v4841_v42  ;;  %v451_v24 = vsel %vm448_vm5, %v442_v13, %v443_v36  ;;  %v477_v51 = vmul.f32 %v5018_v6, %v469_v22  ;;  %v5147_v45 = vsel %vm448_vm5, %v443_v36, %v444_v50  ;;  %v5166_v36 = vpop.permute.xlu1 %397  ;;  %4163 = vmatpush3.msra.mxu1 %v969_v10 }
 0x111   :  { %v455_v39 = vmul.f32 %v451_v24, %v4843_v56  ;;  %v456_v32 = vmul.f32 %v5147_v45, %v4847_v23  ;;  %v479_v31 = vmul.f32 %v5018_v6, %v471_v11  ;;  %v5155_v42 = vsel %vm489_vm6, %v485_v1, %v486_v53  ;;  %v5168_v11 = vpop.permute.xlu0 %401  ;;  %4164 = vmatprep.subr.mxu1 %v976_v25 }
 0x112   :  { %v461_v30 = vmul.f32 %v4958_v29, %v453_v2  ;;  %v495_v22 = vmul.f32 %v5155_v42, %v4857_v57  ;;  %v472_v18 = vmul.f32 %v4870_v8, %v5099_v20  ;;  %v5164_v50 = vsel %vm448_vm5, %v445_v0, %v442_v13  ;;  %4165 = vmatpush3.msra.mxu1 %v976_v25 }
 0x113   :  { %v463_v56 = vmul.f32 %v4958_v29, %v455_v39  ;;  %v464_v23 = vmul.f32 %v4958_v29, %v456_v32  ;;  %v510_v2 = vmul.f32 %v5164_v50, %v4891_v27  ;;  %v487_v57 = vrot.slane %v5099_v20, 1  ;;  %4194 = vmatprep.subr.mxu1 %v4941_v16 }
 0x114   :  { %v465_v8 = vadd.f32 %v461_v30, %v438_v48  ;;  %v503_v0 = vmul.f32 %v5043_v46, %v495_v22  ;;  %v480_v13 = vmul.f32 %v5018_v6, %v472_v18  ;;  %v488_v17 = vrot.slane %v5103_v5, 1 }
 0x115   :  { %v467_v39 = vadd.f32 %v463_v56, %v440_v7  ;;  %v468_v32 = vadd.f32 %v464_v23, %v441_v28  ;;  %v518_v12 = vmul.f32 %v5060_v34, %v510_v2  ;;  %v439_v27 = vmul.f32 %v4939_v14, %v5105_v62  ;;  %v5206_v22 = vpop.permute.xlu0 %409 }
 0x116   :  { %v481_v21 = vadd.f32 %v477_v51, %v465_v8  ;;  %v5185_v30 = vsel %vm489_vm6, %v487_v57, %v488_v17  ;;  %v454_v48 = vmul.f32 %v5164_v50, %v4899_v43  ;;  %v512_v10 = vmul.f32 %v5147_v45, %v4901_v49 }
 0x117   :  { %v483_v56 = vadd.f32 %v479_v31, %v467_v39  ;;  %v484_v23 = vadd.f32 %v480_v13, %v468_v32  ;;  %v497_v7 = vmul.f32 %v5185_v30, %v4897_v41  ;;  %v470_v14 = vmul.f32 %v4903_v4, %v5101_v60  ;;  %v5204_v31 = vpop.permute.xlu1 %417 }
 0x118   :  { %v462_v8 = vmul.f32 %v4958_v29, %v454_v48  ;;  %v520_v51 = vmul.f32 %v5060_v34, %v512_v10  ;;  %v491_v28 = vsel %vm489_vm6, %v486_v53, %v487_v57  ;;  %v5202_v25 = vsel %vm489_vm6, %v488_v17, %v485_v1 }
 0x119   :  { %v505_v18 = vmul.f32 %v5043_v46, %v497_v7  ;;  %v478_v2 = vmul.f32 %v5018_v6, %v470_v14  ;;  %v527_v13 = vmul.f32 %v491_v28, %v4907_v61  ;;  %v494_v29 = vmul.f32 %v5202_v25, %v4909_v58 }
 0x11a   :  { %v466_v39 = vadd.f32 %v462_v8, %v439_v27  ;;  %v513_v57 = vmul.f32 %v5133_v33, %v4913_v63  ;;  %v496_v17 = vmul.f32 %v491_v28, %v4915_v3  ;;  %v542_v53 = vmul.f32 %v451_v24, %v4923_v9 }
 0x11b   :  { %v509_v1 = vadd.f32 %v505_v18, %v484_v23  ;;  %v535_v32 = vmul.f32 %v5089_v15, %v527_v13  ;;  %v502_v48 = vmul.f32 %v5043_v46, %v494_v29  ;;  %v511_v6 = vmul.f32 %v451_v24, %v4925_v26 }
 0x11c   :  { %v482_v10 = vadd.f32 %v478_v2, %v466_v39  ;;  %v521_v7 = vmul.f32 %v5060_v34, %v513_v57  ;;  %v504_v14 = vmul.f32 %v5043_v46, %v496_v17  ;;  %v550_v27 = vmul.f32 %v5094_v40, %v542_v53  ;;  %v5230_v2 = vpop.permute.xlu1 %413  ;;  %v5232_v46 = vpop.permute.xlu0 %421 }
 0x11d   :  { %v506_v8 = vadd.f32 %v502_v48, %v481_v21  ;;  %v519_v61 = vmul.f32 %v5060_v34, %v511_v6  ;;  %v529_v9 = vmul.f32 %v5202_v25, %v4987_v52  ;;  %v526_v23 = vmul.f32 %v5155_v42, %v4989_v47 }
 0x11e   :  { %v525_v18 = vadd.f32 %v521_v7, %v509_v1  ;;  %v508_v13 = vadd.f32 %v504_v14, %v483_v56  ;;  %v507_v29 = vadd.f32 %v503_v0, %v482_v10  ;;  %v544_v24 = vmul.f32 %v5133_v33, %v5064_v35 }
 0x11f   :  { %v537_v21 = vmul.f32 %v5089_v15, %v529_v9  ;;  %v522_v39 = vadd.f32 %v518_v12, %v506_v8  ;;  %v534_v34 = vmul.f32 %v5089_v15, %v526_v23  ;;  %v528_v57 = vmul.f32 %v5185_v30, %v5066_v38 }
 0x120   :  { %v523_v17 = vadd.f32 %v519_v61, %v507_v29  ;;  %v552_v53 = vmul.f32 %v5094_v40, %v544_v24  ;;  %v524_v56 = vadd.f32 %v520_v51, %v508_v13  ;;  %v559_v0 = vmul.f32 %v5112_v44, %v5099_v20  ;;  %v3904_v51 = vld [vmem:[%s6282_s1 + $0x10] ss:$0 sm:$0xff]  ;;  %v5262_v13 = vpop.permute.xlu0 %429 }
 0x121   :  { %v541_v33 = vadd.f32 %v537_v21, %v525_v18  ;;  %v538_v1 = vadd.f32 %v534_v34, %v522_v39  ;;  %v536_v48 = vmul.f32 %v5089_v15, %v528_v57  ;;  %v543_v9 = vmul.f32 %v5147_v45, %v5114_v59  ;;  %v5260_v18 = vpop.permute.xlu1 %425  ;;  %6426 = vst [vmem:[#allocation38_spill] sm:$0xff] %v5262_v13  ;;  %v3905_v57 = vld [vmem:[%s6282_s1 + $0x1a] ss:$0 sm:$0xff] }
 0x122   :  { %v567_v12 = vmul.f32 %v5110_v55, %v559_v0  ;;  %v539_v6 = vadd.f32 %v535_v32, %v523_v17  ;;  %v545_v10 = vmul.f32 %v5164_v50, %v5166_v36  ;;  %v558_v61 = vmul.f32 %v5168_v11, %v5105_v62  ;;  %6425 = vst [vmem:[#allocation37_spill] sm:$0xff] %v5260_v18 }
 0x123   :  { %v540_v7 = vadd.f32 %v536_v48, %v524_v56  ;;  %v551_v14 = vmul.f32 %v5094_v40, %v543_v9  ;;  %v554_v15 = vadd.f32 %v550_v27, %v538_v1  ;;  %v574_v8 = vmul.f32 %v491_v28, %v5204_v31 }
 0x124   :  { %v553_v45 = vmul.f32 %v5094_v40, %v545_v10  ;;  %v566_v32 = vmul.f32 %v5110_v55, %v558_v61  ;;  %v560_v50 = vmul.f32 %v5206_v22, %v5103_v5  ;;  %v561_v23 = vmul.f32 %v5230_v2, %v5101_v60 }
 0x125   :  { %v555_v29 = vadd.f32 %v551_v14, %v539_v6  ;;  %v582_v24 = vmul.f32 %v3904_v51, %v574_v8  ;;  %v556_v21 = vadd.f32 %v552_v53, %v540_v7  ;;  %v575_v28 = vmul.f32 %v5185_v30, %v5232_v46 }
 0x126   :  { %v557_v27 = vadd.f32 %v553_v45, %v541_v33  ;;  %v570_v40 = vadd.f32 %v566_v32, %v554_v15  ;;  %v568_v39 = vmul.f32 %v5110_v55, %v560_v50  ;;  %v569_v34 = vmul.f32 %v5110_v55, %v561_v23 }
 0x127   :  { %v571_v17 = vadd.f32 %v567_v12, %v555_v29  ;;  %v583_v56 = vmul.f32 %v3904_v51, %v575_v28  ;;  %v576_v0 = vmul.f32 %v5202_v25, %v5260_v18  ;;  %v577_v53 = vmul.f32 %v5155_v42, %v5262_v13 }
 0x128   :  { %v586_v1 = vadd.f32 %v582_v24, %v570_v40  ;;  %v572_v30 = vadd.f32 %v568_v39, %v556_v21  ;;  %v573_v33 = vadd.f32 %v569_v34, %v557_v27 }
 0x129   :  { %v587_v48 = vadd.f32 %v583_v56, %v571_v17  ;;  %v584_v9 = vmul.f32 %v3904_v51, %v576_v0  ;;  %v585_v6 = vmul.f32 %v3904_v51, %v577_v53 }
 0x12a   :  { %v5275_v10 = vadd.f32 %v3905_v57, %v586_v1 }
 0x12b   :  { %v5277_v55 = vadd.f32 %v3905_v57, %v587_v48  ;;  %v588_v61 = vadd.f32 %v584_v9, %v572_v30  ;;  %v589_v7 = vadd.f32 %v585_v6, %v573_v33 }
 0x12c   :  { %v5280_v12 = vmul.f32 0.70710677, %v5275_v10 }
 0x12d   :  { %v5283_v25 = vmul.f32 0.70710677, %v5277_v55  ;;  %v5285_v14 = vadd.f32 %v3905_v57, %v588_v61  ;;  %v5287_v42 = vadd.f32 %v3905_v57, %v589_v7 }
 0x12e   :  { %v615_v15 = vand.u32 2147483647, %v5280_v12  ;;  %vm607_vm7 = vcmp.ge.f32.partialorder %v5280_v12, 0.0 }
 0x12f   :  { %v616_v51 = vand.u32 2147483647, %v5283_v25  ;;  %v5292_v45 = vmul.f32 0.70710677, %v5285_v14  ;;  %v5295_v50 = vmul.f32 0.70710677, %v5287_v42 }
 0x130   :  { %v619_v8 = vmul.f32 0.3275911, %v615_v15  ;;  %v671_v34 = vsub.f32 0.0, %v615_v15  ;;  %vm608_vm8 = vcmp.ge.f32.partialorder %v5283_v25, 0.0  ;;  %v599_v25 = vmul.f32 0.5, %v5275_v10 }
 0x131   :  { %v620_v32 = vmul.f32 0.3275911, %v616_v51  ;;  %v617_v29 = vand.u32 2147483647, %v5292_v45  ;;  %v618_v28 = vand.u32 2147483647, %v5295_v50 }
 0x132   :  { %v623_v23 = vadd.f32 1.0, %v619_v8  ;;  %v672_v57 = vsub.f32 0.0, %v616_v51  ;;  %v675_v17 = vmul.f32 %v671_v34, %v615_v15  ;;  %vm609_vm9 = vcmp.ge.f32.partialorder %v5292_v45, 0.0 }
 0x133   :  { %v624_v24 = vadd.f32 1.0, %v620_v32  ;;  %v621_v21 = vmul.f32 0.3275911, %v617_v29  ;;  %v622_v40 = vmul.f32 0.3275911, %v618_v28  ;;  %v673_v56 = vsub.f32 0.0, %v617_v29 }
 0x134   :  { %4621 = vrcp.f32 %v623_v23  ;;  %v676_v0 = vmul.f32 %v672_v57, %v616_v51  ;;  %v674_v1 = vsub.f32 0.0, %v618_v28  ;;  %v679_v48 = vmul.f32 1.442695, %v675_v17 }
 0x135   :  { %4623 = vrcp.f32 %v624_v24  ;;  %v625_v27 = vadd.f32 1.0, %v621_v21  ;;  %v626_v39 = vadd.f32 1.0, %v622_v40  ;;  %v677_v9 = vmul.f32 %v673_v56, %v617_v29 }
 0x136   :  { %v681_v61 = vmul.f32 1.442695, %v676_v0  ;;  %v678_v23 = vmul.f32 %v674_v1, %v618_v28  ;;  %vm610_vm10 = vcmp.ge.f32.partialorder %v5295_v50, 0.0  ;;  %v601_v45 = vmul.f32 0.5, %v5285_v14 }
 0x137   :  { %4625 = vrcp.f32 %v625_v27  ;;  %v683_v27 = vmul.f32 1.442695, %v677_v9 }
 0x138   :  { %4627 = vrcp.f32 %v626_v39  ;;  %v685_v13 = vmul.f32 1.442695, %v678_v23 }
 0x139   :  { %4629 = vpow2.f32 %v679_v48 }
 0x13a   :  { %4631 = vpow2.f32 %v681_v61 }
 0x13b   :  { %4633 = vpow2.f32 %v683_v27 }
 0x13c   :  { %4635 = vpow2.f32 %v685_v13 }
 0x141   :  { %v4622_v53 = vpop.eup %4621 }
 0x142   :  { %v4624_v30 = vpop.eup %4623  ;;  %v635_v33 = vmul.f32 1.0614054, %v4622_v53 }
 0x143   :  { %v636_v6 = vmul.f32 1.0614054, %v4624_v30 }
 0x144   :  { %v639_v7 = vadd.f32 -1.4531521, %v635_v33  ;;  %v4626_v8 = vpop.eup %4625 }
 0x145   :  { %v640_v32 = vadd.f32 -1.4531521, %v636_v6  ;;  %v637_v21 = vmul.f32 1.0614054, %v4626_v8  ;;  %v4628_v15 = vpop.eup %4627 }
 0x146   :  { %v643_v24 = vmul.f32 %v4622_v53, %v639_v7  ;;  %v638_v57 = vmul.f32 1.0614054, %v4628_v15 }
 0x147   :  { %v644_v40 = vmul.f32 %v4624_v30, %v640_v32  ;;  %v641_v39 = vadd.f32 -1.4531521, %v637_v21 }
 0x148   :  { %v647_v51 = vadd.f32 1.4214138, %v643_v24  ;;  %v642_v0 = vadd.f32 -1.4531521, %v638_v57 }
 0x149   :  { %v648_v34 = vadd.f32 1.4214138, %v644_v40  ;;  %v645_v29 = vmul.f32 %v4626_v8, %v641_v39 }
 0x14a   :  { %v651_v17 = vmul.f32 %v4622_v53, %v647_v51  ;;  %v646_v1 = vmul.f32 %v4628_v15, %v642_v0  ;;  %v4630_v51 = vpop.eup %4629 }
 0x14b   :  { %v652_v56 = vmul.f32 %v4624_v30, %v648_v34  ;;  %v649_v6 = vadd.f32 1.4214138, %v645_v29  ;;  %v4632_v34 = vpop.eup %4631 }
 0x14c   :  { %v655_v33 = vadd.f32 -0.28449672, %v651_v17  ;;  %v650_v61 = vadd.f32 1.4214138, %v646_v1 }
 0x14d   :  { %v656_v28 = vadd.f32 -0.28449672, %v652_v56  ;;  %v653_v9 = vmul.f32 %v4626_v8, %v649_v6  ;;  %v6427_v6 = vmov -1.0  }
 0x14e   :  { %v659_v48 = vmul.f32 %v4622_v53, %v655_v33  ;;  %v654_v40 = vmul.f32 %v4628_v15, %v650_v61  ;;  %v4634_v33 = vpop.eup %4633 }
 0x14f   :  { %v660_v7 = vmul.f32 %v4624_v30, %v656_v28  ;;  %v657_v24 = vadd.f32 -0.28449672, %v653_v9  ;;  %v611_v28 = vsel %vm607_vm7, 1.0, %v6427_v6 }
 0x150   :  { %v663_v32 = vadd.f32 0.2548296, %v659_v48  ;;  %v658_v27 = vadd.f32 -0.28449672, %v654_v40 }
 0x151   :  { %v664_v21 = vadd.f32 0.2548296, %v660_v7  ;;  %v661_v23 = vmul.f32 %v4626_v8, %v657_v24  ;;  %v4636_v7 = vpop.eup %4635 }
 0x152   :  { %v667_v18 = vmul.f32 %v4622_v53, %v663_v32  ;;  %v662_v29 = vmul.f32 %v4628_v15, %v658_v27  ;;  %v600_v32 = vmul.f32 0.5, %v5277_v55 }
 0x153   :  { %v668_v39 = vmul.f32 %v4624_v30, %v664_v21  ;;  %v665_v17 = vadd.f32 0.2548296, %v661_v23  ;;  %v612_v30 = vsel %vm608_vm8, 1.0, %v6427_v6  ;;  %v613_v21 = vsel %vm609_vm9, 1.0, %v6427_v6 }
 0x154   :  { %v687_v57 = vmul.f32 %v4630_v51, %v667_v18  ;;  %v666_v53 = vadd.f32 0.2548296, %v662_v29  ;;  %vm2848_vm9 = vcmask 1041409  }
 0x155   :  { %v688_v13 = vmul.f32 %v4632_v34, %v668_v39  ;;  %v669_v0 = vmul.f32 %v4626_v8, %v665_v17 }
 0x156   :  { %v691_v56 = vsub.f32 1.0, %v687_v57  ;;  %v670_v18 = vmul.f32 %v4628_v15, %v666_v53  ;;  %v614_v57 = vsel %vm610_vm10, 1.0, %v6427_v6  ;;  %vm3434_vm10 = vcmask 130048  }
 0x157   :  { %v692_v1 = vsub.f32 1.0, %v688_v13  ;;  %v689_v9 = vmul.f32 %v4634_v33, %v669_v0  ;;  %v602_v33 = vmul.f32 0.5, %v5287_v42 }
 0x158   :  { %v695_v48 = vmul.f32 %v691_v56, %v611_v28  ;;  %v690_v40 = vmul.f32 %v4636_v7, %v670_v18 }
 0x159   :  { %v696_v12 = vmul.f32 %v692_v1, %v612_v30  ;;  %v693_v8 = vsub.f32 1.0, %v689_v9 }
 0x15a   :  { %v699_v61 = vadd.f32 1.0, %v695_v48  ;;  %v694_v27 = vsub.f32 1.0, %v690_v40 }
 0x15b   :  { %v700_v24 = vadd.f32 1.0, %v696_v12  ;;  %v697_v51 = vmul.f32 %v693_v8, %v613_v21 }
 0x15c   :  { %v703_v23 = vmul.f32 %v699_v61, %v599_v25  ;;  %v698_v13 = vmul.f32 %v694_v27, %v614_v57 }
 0x15d   :  { %v704_v39 = vmul.f32 %v700_v24, %v600_v32  ;;  %v701_v10 = vadd.f32 1.0, %v697_v51 }
 0x15e   :  { %v709_v15 = vsel %vm247_vm4, %v703_v23, 0.0  ;;  %v723_v34 = vmul.f32 %v703_v23, %v703_v23  ;;  %v702_v14 = vadd.f32 1.0, %v698_v13 }
 0x15f   :  { %v710_v55 = vsel %vm247_vm4, %v704_v39, 0.0  ;;  %v724_v17 = vmul.f32 %v704_v39, %v704_v39  ;;  %v705_v56 = vmul.f32 %v701_v10, %v601_v45 }
 0x160   :  { %v727_v29 = vsel %vm247_vm4, %v723_v34, 0.0  ;;  %v711_v50 = vadd.f32 %v710_v55, %v709_v15  ;;  %v706_v30 = vmul.f32 %v702_v14, %v602_v33 }
 0x161   :  { %v728_v0 = vsel %vm247_vm4, %v724_v17, 0.0  ;;  %v712_v1 = vsel %vm247_vm4, %v705_v56, 0.0  ;;  %v725_v53 = vmul.f32 %v705_v56, %v705_v56 }
 0x162   :  { %v729_v28 = vadd.f32 %v728_v0, %v727_v29  ;;  %v713_v48 = vadd.f32 %v712_v1, %v711_v50  ;;  %v714_v18 = vsel %vm247_vm4, %v706_v30, 0.0  ;;  %v726_v7 = vmul.f32 %v706_v30, %v706_v30  ;;  %v707_v0 = vld [vmem:[%s6282_s1 + $0x1c] sm:$0x1] }
 0x163   :  { %v730_v9 = vsel %vm247_vm4, %v725_v53, 0.0  ;;  %v6428_v53 = vld [vmem:[#allocation2_spill] sm:$0xff] }
 0x164   :  { %v731_v12 = vadd.f32 %v730_v9, %v729_v28  ;;  %v715_v25 = vadd.f32 %v714_v18, %v713_v48  ;;  %v732_v61 = vsel %vm247_vm4, %v726_v7, 0.0  ;;  %v708_v28 = vld [vmem:[%s6282_s1 + $0x1e] sm:$0x1] }
 0x166   :  { %v716_v32 = vrot.slane %v715_v25, 4  ;;  %v733_v8 = vadd.f32 %v732_v61, %v731_v12 }
 0x168   :  { %v717_v24 = vadd.f32 %v716_v32, %v715_v25  ;;  %v734_v42 = vrot.slane %v733_v8, 4 }
 0x16a   :  { %v718_v21 = vrot.slane %v717_v24, 2  ;;  %v735_v40 = vadd.f32 %v734_v42, %v733_v8 }
 0x16c   :  { %v719_v51 = vadd.f32 %v718_v21, %v717_v24  ;;  %v736_v45 = vrot.slane %v735_v40, 2 }
 0x16e   :  { %v720_v27 = vrot.slane %v719_v51, 1  ;;  %v737_v15 = vadd.f32 %v736_v45, %v735_v40 }
 0x170   :  { %v721_v34 = vadd.f32 %v720_v27, %v719_v51  ;;  %v738_v10 = vrot.slane %v737_v15, 1 }
 0x172   :  { %v722_v57 = vmul.f32 0.03125, %v721_v34  ;;  %v739_v55 = vadd.f32 %v738_v10, %v737_v15 }
 0x174   :  { %v740_v17 = vmul.f32 0.03125, %v739_v55  ;;  %v741_v13 = vmul.f32 %v722_v57, %v722_v57 }
 0x176   :  { %v742_v29 = vsub.f32 %v740_v17, %v741_v13  ;;  %v6429_v13 = vld [vmem:[#allocation16_spill] sm:$0xff] }
 0x178   :  { %v743_v50 = vadd.f32 1e-05, %v742_v29 }
 0x17a   :  { %4637 = vrsqrt.f32 %v743_v50 }
 0x187   :  { %v4638_v33 = vpop.eup %4637 }
 0x188   :  { %v745_v14 = vmul.f32 %v4638_v33, %v707_v0  ;;  %v6430_v33 = vld [vmem:[#allocation17_spill] sm:$0xff] }
 0x18a   :  { %v746_v1 = vmul.f32 %v745_v14, %v722_v57  ;;  %v751_v48 = vrot.slane %v745_v14, %v6428_v53 }
 0x18c   :  { %v747_v9 = vsub.f32 %v708_v28, %v746_v1  ;;  %v752_v12 = vmul.f32 %v751_v48, %v703_v23  ;;  %v753_v7 = vmul.f32 %v751_v48, %v704_v39  ;;  %v754_v25 = vmul.f32 %v751_v48, %v705_v56 }
 0x18d   :  { %v755_v61 = vmul.f32 %v751_v48, %v706_v30  ;;  %v6431_v48 = vld [vmem:[#allocation18_spill] sm:$0xff] }
 0x18e   :  { %v759_v18 = vrot.slane %v747_v9, %v6428_v53 }
 0x190   :  { %v760_v32 = vadd.f32 %v759_v18, %v752_v12  ;;  %v761_v8 = vadd.f32 %v759_v18, %v753_v7  ;;  %v762_v24 = vadd.f32 %v759_v18, %v754_v25  ;;  %v763_v42 = vadd.f32 %v759_v18, %v755_v61  ;;  %v6432_v12 = vld [vmem:[#allocation19_spill] sm:$0xff]  ;;  %v6433_v7 = vld [vmem:[#allocation21_spill] sm:$0xff]  ;;  %v6434_v25 = vld [vmem:[#allocation20_spill] sm:$0xff] }
 0x192   :  { %v764_v21 = vadd.f32 %v760_v32, %v5101_v60  ;;  %v765_v40 = vadd.f32 %v761_v8, %v5105_v62  ;;  %v766_v51 = vadd.f32 %v762_v24, %v5099_v20  ;;  %v767_v45 = vadd.f32 %v763_v42, %v5103_v5  ;;  %v6435_v32 = vld [vmem:[#allocation22_spill] sm:$0xff]  ;;  %v6436_v8 = vld [vmem:[#allocation23_spill] sm:$0xff]  ;;  %v6438_v24 = vld [vmem:[#allocation25_spill] sm:$0xff] }
 0x193   :  { %v6439_v42 = vld [vmem:[#allocation26_spill] sm:$0xff] }
 0x194   :  { %v782_v27 = vsel %vm247_vm4, %v764_v21, 0  ;;  %v785_v23 = vsel %vm247_vm4, %v765_v40, 0  ;;  %v788_v39 = vsel %vm247_vm4, %v766_v51, 0  ;;  %v791_v56 = vsel %vm247_vm4, %v767_v45, 0  ;;  %v6440_v21 = vld [vmem:[#allocation30_spill] sm:$0xff]  ;;  %v6442_v40 = vld [vmem:[#allocation27_spill] sm:$0xff] }
 0x195   :  { %v5335_v30 = vand.u32 4294901760, %v782_v27  ;;  %v5337_v15 = vand.u32 4294901760, %v785_v23  ;;  %v5339_v34 = vand.u32 4294901760, %v788_v39  ;;  %v5341_v60 = vand.u32 4294901760, %v791_v56  ;;  %v6443_v51 = vld [vmem:[#allocation28_spill] sm:$0xff]  ;;  %v6444_v45 = vld [vmem:[#allocation29_spill] sm:$0xff] }
 0x197   :  { %4166 = vmatprep.mubr.f32.mxu1 %v5335_v30  ;;  %v867_v20 = vsub.f32 %v782_v27, %v5335_v30  ;;  %v5346_v5 = vsub.f32 %v785_v23, %v5337_v15  ;;  %v5349_v62 = vsub.f32 %v788_v39, %v5339_v34  ;;  %v5352_v10 = vsub.f32 %v791_v56, %v5341_v60  ;;  %v6445_v27 = vld [vmem:[#allocation31_spill] sm:$0xff]  ;;  %v6446_v23 = vld [vmem:[#allocation32_spill] sm:$0xff]  ;;  %v6447_v39 = vld [vmem:[#allocation33_spill] sm:$0xff] }
 0x198   :  { %4167 = vmatmul.mubr.f32.vlgmr.msra.gmra.mxu1 %v5337_v15  ;;  %v6448_v56 = vld [vmem:[#allocation34_spill] sm:$0xff] }
 0x199   :  { %4195 = vmatpush3.msra.mxu1 %v4941_v16  ;;  %4169 = vmatprep.mubr.f32.mxu1 %v5339_v34  ;;  %v868_v57 = vand.u32 4294901760, %v867_v20  ;;  %v878_v55 = vand.u32 4294901760, %v5346_v5  ;;  %v888_v17 = vand.u32 4294901760, %v5349_v62  ;;  %v898_v0 = vand.u32 4294901760, %v5352_v10 }
 0x19a   :  { %4196 = vmatprep.subr.mxu1 %v6429_v13 }
 0x19b   :  { %4197 = vmatpush3.msra.mxu1 %v6429_v13  ;;  %v869_v29 = vsub.f32 %v867_v20, %v868_v57  ;;  %v879_v50 = vsub.f32 %v5346_v5, %v878_v55  ;;  %v889_v14 = vsub.f32 %v5349_v62, %v888_v17  ;;  %v899_v9 = vsub.f32 %v5352_v10, %v898_v0 }
 0x19c   :  { %4198 = vmatprep.subr.mxu1 %v6430_v33  ;;  %4170 = vmatmul.mubr.f32.gmra.mxu1 %v5341_v60 }
 0x19d   :  { %4199 = vmatpush3.msra.mxu1 %v6430_v33  ;;  %4210 = vmatprep.mubr.f32.mxu1 %v868_v57  ;;  %v870_v28 = vand.u32 4294901760, %v869_v29  ;;  %v880_v1 = vand.u32 4294901760, %v879_v50  ;;  %v890_v18 = vand.u32 4294901760, %v889_v14  ;;  %v900_v61 = vand.u32 4294901760, %v899_v9  ;;  %v3906_v29 = vld [vmem:[%s6282_s1 + $0xa0] ss:$0 sm:$0xff] }
 0x19e   :  { %4200 = vmatprep.subr.mxu1 %v6431_v48 }
 0x19f   :  { %4201 = vmatpush3.msra.mxu1 %v6431_v48  ;;  %4144 = vmatprep.mubr.f32.mxu0 %v870_v28 }
 0x1a0   :  { %4202 = vmatprep.subr.mxu1 %v6432_v12  ;;  %4145 = vmatmul.mubr.f32.vlgmr.msra.gmra.mxu0 %v880_v1 }
 0x1a1   :  { %4173 = vmatpush3.msra.mxu0 %v4973_v37  ;;  %4203 = vmatpush3.msra.mxu1 %v6432_v12  ;;  %v6437_v37 = vld [vmem:[#allocation24_spill] sm:$0xff] }
 0x1a2   :  { %4147 = vmatprep.mubr.f32.mxu0 %v890_v18  ;;  %4174 = vmatprep.subr.mxu0 %v6433_v7 }
 0x1a3   :  { %4204 = vmatprep.subr.mxu1 %v6434_v25  ;;  %4175 = vmatpush3.msra.mxu0 %v6433_v7 }
 0x1a4   :  { %4205 = vmatpush3.msra.mxu1 %v6434_v25  ;;  %4176 = vmatprep.subr.mxu0 %v6435_v32 }
 0x1a5   :  { %4206 = vmatprep.subr.mxu1 %v6436_v8  ;;  %4148 = vmatmul.mubr.f32.gmra.mxu0 %v900_v61 }
 0x1a6   :  { %4177 = vmatpush3.msra.mxu0 %v6435_v32  ;;  %4207 = vmatpush3.msra.mxu1 %v6436_v8 }
 0x1a7   :  { %4178 = vmatprep.subr.mxu0 %v6437_v37  ;;  %4188 = vmatprep.mubr.f32.mxu0 %v867_v20 }
 0x1a8   :  { %4208 = vmatprep.subr.mxu1 %v5001_v54  ;;  %4179 = vmatpush3.msra.mxu0 %v6437_v37  ;;  %v1962_v37 = vld [vmem:[%s6282_s1 + $0x90] sm:$0xff] }
 0x1a9   :  { %4209 = vmatpush3.msra.mxu1 %v5001_v54  ;;  %4180 = vmatprep.subr.mxu0 %v6438_v24 }
 0x1aa   :  { %4211 = vmatmul.mubr.f32.vlgmr.msra.gmra.mxu1 %v878_v55  ;;  %4238 = vmatprep.subr.mxu1 %v4941_v16 }
 0x1ab   :  { %4181 = vmatpush3.msra.mxu0 %v6438_v24  ;;  %4213 = vmatprep.mubr.f32.mxu1 %v888_v17  ;;  %v1961_v24 = vld [vmem:[%s6282_s1 + $0x88] sm:$0xff] }
 0x1ac   :  { %4239 = vmatpush3.msra.mxu1 %v4941_v16  ;;  %4182 = vmatprep.subr.mxu0 %v6439_v42  ;;  %v6441_v16 = vld [vmem:[#allocation35_spill] sm:$0xff] }
 0x1ad   :  { %4240 = vmatprep.subr.mxu1 %v6429_v13  ;;  %4183 = vmatpush3.msra.mxu0 %v6439_v42 }
 0x1ae   :  { %4241 = vmatpush3.msra.mxu1 %v6429_v13  ;;  %4184 = vmatprep.subr.mxu0 %v6440_v21 }
 0x1af   :  { %4214 = vmatmul.mubr.f32.gmra.mxu1 %v898_v0  ;;  %4242 = vmatprep.subr.mxu1 %v6430_v33 }
 0x1b0   :  { %4185 = vmatpush3.msra.mxu0 %v6440_v21  ;;  %4243 = vmatpush3.msra.mxu1 %v6430_v33 }
 0x1b1   :  { %4254 = vmatprep.mubr.f32.mxu1 %v5335_v30  ;;  %4186 = vmatprep.subr.mxu0 %v6441_v16 }
 0x1b2   :  { %4244 = vmatprep.subr.mxu1 %v6431_v48  ;;  %4187 = vmatpush3.msra.mxu0 %v6441_v16 }
 0x1b3   :  { %4245 = vmatpush3.msra.mxu1 %v6431_v48  ;;  %4189 = vmatmul.mubr.f32.vlgmr.msra.gmra.mxu0 %v5346_v5 }
 0x1b4   :  { %4216 = vmatprep.subr.mxu0 %v6442_v40  ;;  %4246 = vmatprep.subr.mxu1 %v6432_v12 }
 0x1b5   :  { %4191 = vmatprep.mubr.f32.mxu0 %v5349_v62  ;;  %4217 = vmatpush3.msra.mxu0 %v6442_v40  ;;  %v1960_v40 = vld [vmem:[%s6282_s1 + $0x80] sm:$0xff] }
 0x1b6   :  { %4247 = vmatpush3.msra.mxu1 %v6432_v12  ;;  %4218 = vmatprep.subr.mxu0 %v6443_v51 }
 0x1b7   :  { %4248 = vmatprep.subr.mxu1 %v6434_v25  ;;  %4219 = vmatpush3.msra.mxu0 %v6443_v51 }
 0x1b8   :  { %4249 = vmatpush3.msra.mxu1 %v6434_v25  ;;  %4192 = vmatmul.mubr.f32.gmra.mxu0 %v5352_v10 }
 0x1b9   :  { %4220 = vmatprep.subr.mxu0 %v6444_v45  ;;  %4250 = vmatprep.subr.mxu1 %v6436_v8 }
 0x1ba   :  { %4221 = vmatpush3.msra.mxu0 %v6444_v45  ;;  %4232 = vmatprep.mubr.f32.mxu0 %v5335_v30  ;;  %v6449_v30 = vld [vmem:[#allocation36_spill] sm:$0xff] }
 0x1bb   :  { %4251 = vmatpush3.msra.mxu1 %v6436_v8  ;;  %4222 = vmatprep.subr.mxu0 %v6445_v27  ;;  %v1963_v8 = vld [vmem:[%s6282_s1 + $0x98] sm:$0xff] }
 0x1bc   :  { %4252 = vmatprep.subr.mxu1 %v5001_v54  ;;  %4223 = vmatpush3.msra.mxu0 %v6445_v27  ;;  %v5448_v16 = vand.u32 4294901760, %v1963_v8  ;;  %v5453_v27 = vand.u32 4294901760, %v1962_v37 }
 0x1bd   :  { %4253 = vmatpush3.msra.mxu1 %v5001_v54  ;;  %4224 = vmatprep.subr.mxu0 %v6446_v23 }
 0x1be   :  { %4255 = vmatmul.mubr.f32.vlgmr.msra.gmra.mxu1 %v5337_v15  ;;  %4225 = vmatpush3.msra.mxu0 %v6446_v23 }
 0x1bf   :  { %4257 = vmatprep.mubr.f32.mxu1 %v5339_v34  ;;  %4226 = vmatprep.subr.mxu0 %v6447_v39 }
 0x1c0   :  { %4227 = vmatpush3.msra.mxu0 %v6447_v39 }
 0x1c1   :  { %4228 = vmatprep.subr.mxu0 %v6448_v56 }
 0x1c2   :  { %4258 = vmatmul.mubr.f32.gmra.mxu1 %v5341_v60  ;;  %4229 = vmatpush3.msra.mxu0 %v6448_v56 }
 0x1c3   :  { %4230 = vmatprep.subr.mxu0 %v6449_v30 }
 0x1c4   :  { %4231 = vmatpush3.msra.mxu0 %v6449_v30  ;;  %v5456_v30 = vsub.f32 %v1963_v8, %v5448_v16 }
 0x1c5   :  { %4233 = vmatmul.mubr.f32.vlgmr.msra.gmra.mxu0 %v5337_v15  ;;  %4260 = vmatprep.subr.mxu0 %v5448_v16 }
 0x1c6   :  { %4235 = vmatprep.mubr.f32.mxu0 %v5339_v34  ;;  %6450 = vst [vmem:[#allocation2_spill] sm:$0xff] %v5456_v30  ;;  %4261 = vmatpush3.msra.mxu0 %v5448_v16 }
 0x1c7   :  { %4262 = vmatprep.subr.mxu0 %v5453_v27 }
 0x1c8   :  { %4263 = vmatpush3.msra.mxu0 %v5453_v27 }
 0x1c9   :  { %4236 = vmatmul.mubr.f32.gmra.mxu0 %v5341_v60 }
 0x258   :  { %v4168_v54 = vpop.f32.mrf.mxu1 }
 0x25a   :  { %v1013_v5 = vpop.f32.mrf.mxu1 }
 0x25c   :  { %v4171_v10 = vpop.f32.mrf.mxu1 }
 0x25e   :  { %v1025_v55 = vpop.f32.mrf.mxu1 }
 0x260   :  { %v4146_v20 = vpop.f32.mrf.mxu0 }
 0x261   :  { %v883_v15 = vadd.f32 %v4146_v20, %v3906_v29 }
 0x262   :  { %v872_v62 = vpop.f32.mrf.mxu0 }
 0x263   :  { %v873_v34 = vadd.f32 %v3906_v29, %v872_v62  ;;  %v1020_v28 = vadd.f32 %v4168_v54, %v883_v15  ;;  %v5458_v54 = vand.u32 4294901760, %v1961_v24  ;;  %v5461_v62 = vand.u32 4294901760, %v1960_v40 }
 0x265   :  { %v4149_v57 = vpop.f32.mrf.mxu0  ;;  %v1014_v12 = vadd.f32 %v1013_v5, %v873_v34  ;;  %6451 = vst [vmem:[#allocation16_spill] sm:$0xff] %v5461_v62  ;;  %4264 = vmatprep.subr.mxu0 %v5458_v54 }
 0x266   :  { %v903_v60 = vadd.f32 %v4149_v57, %v3906_v29  ;;  %4265 = vmatpush3.msra.mxu0 %v5458_v54 }
 0x267   :  { %v892_v13 = vpop.f32.mrf.mxu0  ;;  %4266 = vmatprep.subr.mxu0 %v5461_v62 }
 0x268   :  { %v893_v18 = vadd.f32 %v3906_v29, %v892_v13  ;;  %v1032_v25 = vadd.f32 %v4171_v10, %v903_v60  ;;  %v1959_v13 = vld [vmem:[%s6282_s1 + $0x78] sm:$0xff]  ;;  %v5486_v60 = vsub.f32 %v1961_v24, %v5458_v54  ;;  %v1957_v24 = vld [vmem:[%s6282_s1 + $0x68] sm:$0xff]  ;;  %4267 = vmatpush3.msra.mxu0 %v5461_v62 }
 0x26a   :  { %v4212_v17 = vpop.f32.mrf.mxu1  ;;  %v1026_v51 = vadd.f32 %v1025_v55, %v893_v18  ;;  %6454 = vst [vmem:[#allocation19_spill] sm:$0xff] %v5486_v60  ;;  %v5494_v18 = vand.u32 4294901760, %v1959_v13 }
 0x26c   :  { %v1221_v0 = vpop.f32.mrf.mxu1  ;;  %6456 = vst [vmem:[#allocation20_spill] sm:$0xff] %v5494_v18  ;;  %4268 = vmatprep.subr.mxu0 %v5494_v18 }
 0x26d   :  { %4269 = vmatpush3.msra.mxu0 %v5494_v18 }
 0x26f   :  { %v4215_v14 = vpop.f32.mrf.mxu1 }
 0x271   :  { %v1237_v48 = vpop.f32.mrf.mxu1 }
 0x273   :  { %v4190_v50 = vpop.f32.mrf.mxu0 }
 0x274   :  { %v1127_v9 = vadd.f32 %v4190_v50, %v1020_v28  ;;  %v5474_v50 = vsub.f32 %v1962_v37, %v5453_v27 }
 0x275   :  { %v1119_v33 = vpop.f32.mrf.mxu0 }
 0x276   :  { %v1120_v7 = vadd.f32 %v1119_v33, %v1014_v12  ;;  %v1230_v21 = vadd.f32 %v4212_v17, %v1127_v9  ;;  %v5467_v17 = vand.u32 4294901760, %v5456_v30  ;;  %6453 = vst [vmem:[#allocation18_spill] sm:$0xff] %v5474_v50  ;;  %v5492_v12 = vsub.f32 %v1960_v40, %v5461_v62 }
 0x277   :  { %v5509_v37 = vand.u32 4294901760, %v5474_v50 }
 0x278   :  { %v4193_v1 = vpop.f32.mrf.mxu0  ;;  %v1222_v56 = vadd.f32 %v1221_v0, %v1120_v7  ;;  %6452 = vst [vmem:[#allocation17_spill] sm:$0xff] %v5467_v17  ;;  %v1958_v0 = vld [vmem:[%s6282_s1 + $0x70] sm:$0xff]  ;;  %v2114_v9 = vsub.f32 %v5456_v30, %v5467_v17  ;;  %6455 = vst [vmem:[#allocation21_spill] sm:$0xff] %v5492_v12 }
 0x279   :  { %v1141_v42 = vadd.f32 %v4193_v1, %v1032_v25  ;;  %6458 = vst [vmem:[#allocation23_spill] sm:$0xff] %v5509_v37 }
 0x27a   :  { %v1133_v32 = vpop.f32.mrf.mxu0  ;;  %v2115_v8 = vand.u32 4294901760, %v2114_v9 }
 0x27b   :  { %v1134_v20 = vadd.f32 %v1133_v32, %v1026_v51  ;;  %v1246_v55 = vadd.f32 %v4215_v14, %v1141_v42  ;;  %v5520_v51 = vand.u32 4294901760, %v5486_v60 }
 0x27c   :  { %4282 = vmatprep.subr.mxu1 %v2115_v8 }
 0x27d   :  { %v1238_v28 = vadd.f32 %v1237_v48, %v1134_v20  ;;  %6459 = vst [vmem:[#allocation24_spill] sm:$0xff] %v5520_v51  ;;  %4283 = vmatpush3.msra.mxu1 %v2115_v8 }
 0x27e   :  { %v4256_v61 = vpop.f32.mrf.mxu1 }
 0x280   :  { %v1437_v23 = vpop.f32.mrf.mxu1 }
 0x282   :  { %v4259_v15 = vpop.f32.mrf.mxu1 }
 0x284   :  { %v1449_v42 = vpop.f32.mrf.mxu1 }
 0x285   :  { %v4234_v45 = vpop.f32.mrf.mxu0 }
 0x286   :  { %v1347_v39 = vadd.f32 %v4234_v45, %v1230_v21 }
 0x287   :  { %v1340_v5 = vpop.f32.mrf.mxu0 }
 0x288   :  { %v5464_v10 = vadd.f32 %v4256_v61, %v1347_v39  ;;  %v1341_v57 = vadd.f32 %v1340_v5, %v1222_v56  ;;  %v5503_v61 = vand.u32 4294901760, %v1958_v0  ;;  %v5529_v39 = vand.u32 4294901760, %v5492_v12 }
 0x289   :  { %v4237_v29 = vpop.f32.mrf.mxu0  ;;  %v5532_v56 = vsub.f32 %v1959_v13, %v5494_v18  ;;  %v2121_v13 = vsub.f32 %v5474_v50, %v5509_v37 }
 0x28a   :  { %v5481_v33 = vmul.f32 0.70710677, %v5464_v10  ;;  %v5483_v34 = vadd.f32 %v1437_v23, %v1341_v57  ;;  %v1359_v14 = vadd.f32 %v4237_v29, %v1246_v55  ;;  %6457 = vst [vmem:[#allocation22_spill] sm:$0xff] %v5503_v61  ;;  %6460 = vst [vmem:[#allocation25_spill] sm:$0xff] %v5529_v39  ;;  %v5537_v57 = vsub.f32 %v1958_v0, %v5503_v61 }
 0x28b   :  { %v1352_v1 = vpop.f32.mrf.mxu0  ;;  %6461 = vst [vmem:[#allocation26_spill] sm:$0xff] %v5532_v56  ;;  %v5539_v55 = vand.u32 4294901760, %v1957_v24  ;;  %4270 = vmatprep.subr.mxu0 %v5503_v61  ;;  %v2128_v0 = vsub.f32 %v5486_v60, %v5520_v51  ;;  %v5555_v9 = vand.u32 4294901760, %v5532_v56  ;;  %v1956_v51 = vld [vmem:[%s6282_s1 + $0x60] sm:$0xff] }
 0x28c   :  { %v5498_v7 = vand.u32 2147483647, %v5481_v33  ;;  %v5501_v25 = vmul.f32 0.70710677, %v5483_v34  ;;  %v5506_v48 = vadd.f32 %v4259_v15, %v1359_v14  ;;  %v1353_v32 = vadd.f32 %v1352_v1, %v1238_v28  ;;  %6462 = vst [vmem:[#allocation30_spill] sm:$0xff] %v5537_v57  ;;  %4271 = vmatpush3.msra.mxu0 %v5503_v61 }
 0x28d   :  { %6463 = vst [vmem:[#allocation35_spill] sm:$0xff] %v5539_v55  ;;  %4272 = vmatprep.subr.mxu0 %v5539_v55  ;;  %v2135_v1 = vsub.f32 %v5492_v12, %v5529_v39  ;;  %6464 = vst [vmem:[#allocation27_spill] sm:$0xff] %v5555_v9  ;;  %v5560_v8 = vand.u32 4294901760, %v5537_v57  ;;  %v2142_v37 = vsub.f32 %v5532_v56, %v5555_v9  ;;  %vm1468_vm11 = vcmp.ge.f32.partialorder %v5481_v33, 0.0 }
 0x28e   :  { %v1480_v21 = vmul.f32 0.3275911, %v5498_v7  ;;  %v5517_v40 = vand.u32 2147483647, %v5501_v25  ;;  %v5524_v45 = vmul.f32 0.70710677, %v5506_v48  ;;  %v5526_v23 = vadd.f32 %v1449_v42, %v1353_v32  ;;  %4273 = vmatpush3.msra.mxu0 %v5539_v55 }
 0x28f   :  { %6465 = vst [vmem:[#allocation28_spill] sm:$0xff] %v5560_v8  ;;  %v2136_v39 = vand.u32 4294901760, %v2135_v1  ;;  %v1532_v17 = vsub.f32 0.0, %v5498_v7  ;;  %vm1467_vm12 = vcmp.ge.f32.partialorder %v5501_v25, 0.0 }
 0x290   :  { %v1484_v20 = vadd.f32 1.0, %v1480_v21  ;;  %v1479_v5 = vmul.f32 0.3275911, %v5517_v40  ;;  %v1478_v29 = vand.u32 2147483647, %v5524_v45  ;;  %v2122_v21 = vand.u32 4294901760, %v2121_v13 }
 0x291   :  { %v5544_v15 = vmul.f32 0.70710677, %v5526_v23  ;;  %v5571_v13 = vsub.f32 %v1957_v24, %v5539_v55  ;;  %v1536_v24 = vmul.f32 %v1532_v17, %v5498_v7  ;;  %vm1470_vm13 = vcmp.ge.f32.partialorder %v5524_v45, 0.0 }
 0x292   :  { %4639 = vrcp.f32 %v1484_v20  ;;  %v1483_v14 = vadd.f32 1.0, %v1479_v5  ;;  %v1482_v28 = vmul.f32 0.3275911, %v1478_v29  ;;  %v2129_v5 = vand.u32 4294901760, %v2128_v0  ;;  %4284 = vmatprep.subr.mxu1 %v2122_v21 }
 0x293   :  { %v1477_v32 = vand.u32 2147483647, %v5544_v15  ;;  %4285 = vmatpush3.msra.mxu1 %v2122_v21  ;;  %6466 = vst [vmem:[#allocation29_spill] sm:$0xff] %v5571_v13  ;;  %v2143_v0 = vand.u32 4294901760, %v2142_v37  ;;  %v5576_v1 = vand.u32 4294901760, %v5571_v13  ;;  %v1474_v25 = vsel %vm1470_vm13, 1.0, %v6427_v6 }
 0x294   :  { %4641 = vrcp.f32 %v1483_v14  ;;  %v1486_v42 = vadd.f32 1.0, %v1482_v28  ;;  %v2149_v14 = vsub.f32 %v5537_v57, %v5560_v8  ;;  %4286 = vmatprep.subr.mxu1 %v2129_v5  ;;  %v5573_v28 = vand.u32 4294901760, %v1956_v51 }
 0x295   :  { %v1481_v20 = vmul.f32 0.3275911, %v1477_v32  ;;  %4287 = vmatpush3.msra.mxu1 %v2129_v5  ;;  %6468 = vst [vmem:[#allocation32_spill] sm:$0xff] %v5576_v1  ;;  %v2156_v37 = vsub.f32 %v5571_v13, %v5576_v1  ;;  %v1533_v1 = vsub.f32 0.0, %v1477_v32  ;;  %vm1469_vm14 = vcmp.ge.f32.partialorder %v5544_v15, 0.0 }
 0x296   :  { %4643 = vrcp.f32 %v1486_v42  ;;  %6467 = vst [vmem:[#allocation31_spill] sm:$0xff] %v5573_v28  ;;  %v1531_v42 = vsub.f32 0.0, %v5517_v40  ;;  %4288 = vmatprep.subr.mxu1 %v2136_v39  ;;  %v5580_v21 = vsub.f32 %v1956_v51, %v5573_v28  ;;  %4274 = vmatprep.subr.mxu0 %v5573_v28 }
 0x297   :  { %v1485_v12 = vadd.f32 1.0, %v1481_v20  ;;  %v2150_v20 = vand.u32 4294901760, %v2149_v14  ;;  %4289 = vmatpush3.msra.mxu1 %v2136_v39  ;;  %4275 = vmatpush3.msra.mxu0 %v5573_v28  ;;  %v2157_v51 = vand.u32 4294901760, %v2156_v37  ;;  %v1541_v39 = vmul.f32 1.442695, %v1536_v24 }
 0x298   :  { %6469 = vst [vmem:[#allocation33_spill] sm:$0xff] %v5580_v21  ;;  %4290 = vmatprep.subr.mxu1 %v2143_v0  ;;  %v5588_v5 = vand.u32 4294901760, %v5580_v21  ;;  %4304 = vmatprep.subr.mxu0 %v5456_v30  ;;  %v1535_v8 = vmul.f32 %v1531_v42, %v5517_v40  ;;  %v1537_v40 = vmul.f32 %v1533_v1, %v1477_v32 }
 0x299   :  { %4645 = vrcp.f32 %v1485_v12  ;;  %v1534_v12 = vsub.f32 0.0, %v1478_v29  ;;  %4291 = vmatpush3.msra.mxu1 %v2143_v0 }
 0x29a   :  { %6470 = vst [vmem:[#allocation34_spill] sm:$0xff] %v5588_v5  ;;  %4292 = vmatprep.subr.mxu1 %v2150_v20  ;;  %v2163_v17 = vsub.f32 %v5580_v21, %v5588_v5  ;;  %v1539_v0 = vmul.f32 1.442695, %v1535_v8  ;;  %4647 = vpow2.f32 %v1541_v39 }
 0x29b   :  { %4293 = vmatpush3.msra.mxu1 %v2150_v20  ;;  %v1538_v9 = vmul.f32 %v1534_v12, %v1478_v29 }
 0x29c   :  { %4294 = vmatprep.subr.mxu1 %v2157_v51  ;;  %v2164_v13 = vand.u32 4294901760, %v2163_v17  ;;  %4649 = vpow2.f32 %v1539_v0 }
 0x29d   :  { %4295 = vmatpush3.msra.mxu1 %v2157_v51  ;;  %v1545_v21 = vmul.f32 1.442695, %v1538_v9 }
 0x29e   :  { %4296 = vmatprep.subr.mxu1 %v2164_v13 }
 0x29f   :  { %v4640_v14 = vpop.eup %4639  ;;  %4297 = vmatpush3.msra.mxu1 %v2164_v13  ;;  %4651 = vpow2.f32 %v1545_v21 }
 0x2a0   :  { %v1496_v7 = vmul.f32 1.0614054, %v4640_v14  ;;  %4326 = vmatprep.subr.mxu1 %v5448_v16 }
 0x2a1   :  { %v4642_v57 = vpop.eup %4641 }
 0x2a2   :  { %v1500_v56 = vadd.f32 -1.4531521, %v1496_v7  ;;  %v1495_v28 = vmul.f32 1.0614054, %v4642_v57  ;;  %v1543_v7 = vmul.f32 1.442695, %v1537_v40 }
 0x2a3   :  { %v4644_v37 = vpop.eup %4643 }
 0x2a4   :  { %v1504_v55 = vmul.f32 %v4640_v14, %v1500_v56  ;;  %v1499_v42 = vadd.f32 -1.4531521, %v1495_v28  ;;  %v1498_v5 = vmul.f32 1.0614054, %v4644_v37  ;;  %4653 = vpow2.f32 %v1543_v7 }
 0x2a6   :  { %v1508_v20 = vadd.f32 1.4214138, %v1504_v55  ;;  %v4646_v29 = vpop.eup %4645  ;;  %v1503_v24 = vmul.f32 %v4642_v57, %v1499_v42  ;;  %v1502_v12 = vadd.f32 -1.4531521, %v1498_v5 }
 0x2a7   :  { %v1497_v51 = vmul.f32 1.0614054, %v4646_v29  ;;  %v4648_v30 = vpop.eup %4647 }
 0x2a8   :  { %v1512_v17 = vmul.f32 %v4640_v14, %v1508_v20  ;;  %v1507_v8 = vadd.f32 1.4214138, %v1503_v24  ;;  %v1506_v60 = vmul.f32 %v4644_v37, %v1502_v12 }
 0x2a9   :  { %v1501_v39 = vadd.f32 -1.4531521, %v1497_v51  ;;  %v4650_v51 = vpop.eup %4649 }
 0x2aa   :  { %v1516_v56 = vadd.f32 -0.28449672, %v1512_v17  ;;  %v1511_v32 = vmul.f32 %v4642_v57, %v1507_v8  ;;  %v1510_v13 = vadd.f32 1.4214138, %v1506_v60 }
 0x2ab   :  { %v1505_v1 = vmul.f32 %v4646_v29, %v1501_v39 }
 0x2ac   :  { %v1520_v28 = vmul.f32 %v4640_v14, %v1516_v56  ;;  %v1515_v9 = vadd.f32 -0.28449672, %v1511_v32  ;;  %v1514_v61 = vmul.f32 %v4644_v37, %v1510_v13  ;;  %v1472_v56 = vsel %vm1468_vm11, 1.0, %v6427_v6 }
 0x2ad   :  { %v1509_v50 = vadd.f32 1.4214138, %v1505_v1  ;;  %vm3897_vm11 = vcmask 254976  }
 0x2ae   :  { %v1524_v55 = vadd.f32 0.2548296, %v1520_v28  ;;  %v1519_v42 = vmul.f32 %v4642_v57, %v1515_v9  ;;  %v1518_v0 = vadd.f32 -0.28449672, %v1514_v61 }
 0x2af   :  { %v1513_v20 = vmul.f32 %v4646_v29, %v1509_v50 }
 0x2b0   :  { %v1528_v5 = vmul.f32 %v4640_v14, %v1524_v55  ;;  %v1523_v40 = vadd.f32 0.2548296, %v1519_v42  ;;  %v1522_v24 = vmul.f32 %v4644_v37, %v1518_v0  ;;  %v4652_v14 = vpop.eup %4651  ;;  %v1460_v42 = vmul.f32 0.5, %v5464_v10 }
 0x2b1   :  { %v1517_v12 = vadd.f32 -0.28449672, %v1513_v20  ;;  %v4654_v1 = vpop.eup %4653  ;;  %v1459_v0 = vmul.f32 0.5, %v5483_v34  ;;  %v1461_v10 = vmul.f32 0.5, %v5526_v23 }
 0x2b2   :  { %v1548_v21 = vmul.f32 %v4648_v30, %v1528_v5  ;;  %v1527_v17 = vmul.f32 %v4642_v57, %v1523_v40  ;;  %v1526_v60 = vadd.f32 0.2548296, %v1522_v24  ;;  %v1471_v57 = vsel %vm1467_vm12, 1.0, %v6427_v6 }
 0x2b3   :  { %v1521_v7 = vmul.f32 %v4646_v29, %v1517_v12  ;;  %v1462_v12 = vmul.f32 0.5, %v5506_v48 }
 0x2b4   :  { %v1552_v8 = vsub.f32 1.0, %v1548_v21  ;;  %v1547_v39 = vmul.f32 %v4650_v51, %v1527_v17  ;;  %v1530_v61 = vmul.f32 %v4644_v37, %v1526_v60 }
 0x2b5   :  { %v1525_v32 = vadd.f32 0.2548296, %v1521_v7 }
 0x2b6   :  { %v1556_v50 = vmul.f32 %v1552_v8, %v1472_v56  ;;  %v1551_v13 = vsub.f32 1.0, %v1547_v39  ;;  %v1550_v33 = vmul.f32 %v4652_v14, %v1530_v61 }
 0x2b7   :  { %v1529_v28 = vmul.f32 %v4646_v29, %v1525_v32  ;;  %v1473_v29 = vsel %vm1469_vm14, 1.0, %v6427_v6 }
 0x2b8   :  { %v1560_v30 = vadd.f32 1.0, %v1556_v50  ;;  %v1555_v9 = vmul.f32 %v1551_v13, %v1471_v57  ;;  %v1554_v55 = vsub.f32 1.0, %v1550_v33 }
 0x2b9   :  { %v1549_v37 = vmul.f32 %v4654_v1, %v1529_v28 }
 0x2ba   :  { %v1559_v5 = vadd.f32 1.0, %v1555_v9  ;;  %v1558_v20 = vmul.f32 %v1554_v55, %v1474_v25  ;;  %v1564_v45 = vmul.f32 %v1560_v30, %v1460_v42 }
 0x2bb   :  { %v1553_v40 = vsub.f32 1.0, %v1549_v37 }
 0x2bc   :  { %v1563_v24 = vmul.f32 %v1559_v5, %v1459_v0  ;;  %v1562_v21 = vadd.f32 1.0, %v1558_v20  ;;  %v1584_v51 = vmul.f32 %v1564_v45, %v1564_v45  ;;  %v1570_v34 = vsel %vm247_vm4, %v1564_v45, 0.0 }
 0x2bd   :  { %v1557_v17 = vmul.f32 %v1553_v40, %v1473_v29 }
 0x2be   :  { %v1583_v60 = vmul.f32 %v1563_v24, %v1563_v24  ;;  %v1569_v15 = vsel %vm247_vm4, %v1563_v24, 0.0  ;;  %v1566_v8 = vmul.f32 %v1562_v21, %v1462_v12  ;;  %v1588_v14 = vsel %vm247_vm4, %v1584_v51, 0.0 }
 0x2bf   :  { %v1561_v7 = vadd.f32 1.0, %v1557_v17  ;;  %v1571_v61 = vadd.f32 %v1570_v34, %v1569_v15  ;;  %v1567_v34 = vld [vmem:[%s6282_s1 + $0xa2] sm:$0x1] }
 0x2c0   :  { %v1587_v56 = vsel %vm247_vm4, %v1583_v60, 0.0  ;;  %v1586_v50 = vmul.f32 %v1566_v8, %v1566_v8  ;;  %v1574_v23 = vsel %vm247_vm4, %v1566_v8, 0.0 }
 0x2c1   :  { %v1565_v39 = vmul.f32 %v1561_v7, %v1461_v10  ;;  %v1589_v13 = vadd.f32 %v1588_v14, %v1587_v56  ;;  %v1568_v14 = vld [vmem:[%s6282_s1 + $0xa4] sm:$0x1] }
 0x2c2   :  { %v1592_v1 = vsel %vm247_vm4, %v1586_v50, 0.0  ;;  %v1624_v50 = vld [vmem:[%s6282_s1 + $0x11] sm:$0xff] }
 0x2c3   :  { %v1572_v48 = vsel %vm247_vm4, %v1565_v39, 0.0  ;;  %v1585_v32 = vmul.f32 %v1565_v39, %v1565_v39 }
 0x2c4   :  { %v1573_v33 = vadd.f32 %v1572_v48, %v1571_v61 }
 0x2c5   :  { %v1590_v30 = vsel %vm247_vm4, %v1585_v32, 0.0 }
 0x2c6   :  { %v1575_v57 = vadd.f32 %v1574_v23, %v1573_v33  ;;  %v1591_v28 = vadd.f32 %v1590_v30, %v1589_v13  ;;  %v6471_v33 = vsub.s32 4, %v4789_v19 }
 0x2c8   :  { %v1576_v9 = vrot.slane %v1575_v57, 4  ;;  %v1593_v55 = vadd.f32 %v1592_v1, %v1591_v28  ;;  %v1629_v23 = vrot.slane %v1624_v50, %v6471_v33 }
 0x2ca   :  { %v1577_v42 = vadd.f32 %v1576_v9, %v1575_v57  ;;  %v1594_v25 = vrot.slane %v1593_v55, 4 }
 0x2cc   :  { %v1578_v37 = vrot.slane %v1577_v42, 2  ;;  %v1595_v0 = vadd.f32 %v1594_v25, %v1593_v55  ;;  %v6472_v55 = vld [vmem:[#allocation3_spill] sm:$0xff]  ;;  %v6473_v25 = vld [vmem:[#allocation4_spill] sm:$0xff] }
 0x2ce   :  { %v1579_v5 = vadd.f32 %v1578_v37, %v1577_v42  ;;  %v1596_v20 = vrot.slane %v1595_v0, 2  ;;  %v1665_v42 = vrot.slane %v1624_v50, %v6472_v55  ;;  %v5630_v37 = vrot.slane %v1624_v50, %v6473_v25  ;;  %v6480_v55 = vld [vmem:[#allocation6_spill] sm:$0xff] }
 0x2d0   :  { %v1580_v40 = vrot.slane %v1579_v5, 1  ;;  %v1597_v21 = vadd.f32 %v1596_v20, %v1595_v0  ;;  %v6474_v0 = vld [vmem:[#allocation5_spill] sm:$0xff] }
 0x2d2   :  { %v1581_v29 = vadd.f32 %v1580_v40, %v1579_v5  ;;  %v1598_v12 = vrot.slane %v1597_v21, 1  ;;  %v5633_v5 = vrot.slane %v1624_v50, %v6474_v0  ;;  %v6481_v0 = vld [vmem:[#allocation9_spill] sm:$0xff] }
 0x2d4   :  { %v1582_v17 = vmul.f32 0.03125, %v1581_v29  ;;  %v1599_v60 = vadd.f32 %v1598_v12, %v1597_v21  ;;  %v6477_v12 = vsub.s32 7, %v4789_v19 }
 0x2d6   :  { %v1600_v10 = vmul.f32 0.03125, %v1599_v60  ;;  %v1601_v51 = vmul.f32 %v1582_v17, %v1582_v17  ;;  %v1649_v60 = vrot.slane %v1624_v50, %v6428_v53 }
 0x2d8   :  { %v1602_v15 = vsub.f32 %v1600_v10, %v1601_v51 }
 0x2da   :  { %v1603_v7 = vadd.f32 1e-05, %v1602_v15 }
 0x2dc   :  { %4655 = vrsqrt.f32 %v1603_v7 }
 0x2e9   :  { %v4656_v56 = vpop.eup %4655 }
 0x2ea   :  { %v1605_v61 = vmul.f32 %v4656_v56, %v1567_v34 }
 0x2ec   :  { %v1606_v48 = vmul.f32 %v1605_v61, %v1582_v17  ;;  %v1611_v32 = vrot.slane %v1605_v61, %v6428_v53  ;;  %v5653_v17 = vrot.slane %v1624_v50, %v6477_v12  ;;  %v6478_v61 = vld [vmem:[#allocation10_spill] sm:$0xff] }
 0x2ee   :  { %v1607_v13 = vsub.f32 %v1568_v14, %v1606_v48  ;;  %v1612_v30 = vmul.f32 %v1611_v32, %v1563_v24  ;;  %v1613_v57 = vmul.f32 %v1611_v32, %v1564_v45  ;;  %v1614_v28 = vmul.f32 %v1611_v32, %v1565_v39  ;;  %v6479_v48 = vld [vmem:[#allocation12_spill] sm:$0xff] }
 0x2ef   :  { %v1615_v1 = vmul.f32 %v1611_v32, %v1566_v8  ;;  %v6475_v45 = vsub.s32 5, %v4789_v19  ;;  %v6476_v39 = vsub.s32 6, %v4789_v19 }
 0x2f0   :  { %v1619_v9 = vrot.slane %v1607_v13, %v6428_v53 }
 0x2f1   :  { %v5645_v8 = vrot.slane %v1624_v50, %v6475_v45  ;;  %v5649_v29 = vrot.slane %v1624_v50, %v6476_v39 }
 0x2f2   :  { %v5635_v20 = vadd.f32 %v1619_v9, %v1613_v57  ;;  %v5637_v40 = vadd.f32 %v1619_v9, %v1614_v28  ;;  %v5639_v21 = vadd.f32 %v1619_v9, %v1615_v1  ;;  %v5641_v24 = vadd.f32 %v1619_v9, %v1612_v30 }
 0x2f4   :  { %v1631_v10 = vmul.f32 %v1629_v23, %v5635_v20  ;;  %v1632_v51 = vmul.f32 %v1629_v23, %v5637_v40  ;;  %v1633_v15 = vmul.f32 %v1629_v23, %v5639_v21  ;;  %v1635_v7 = vrot.slane %v5635_v20, 7 }
 0x2f5   :  { %v1636_v34 = vrot.slane %v5637_v40, 7  ;;  %v1637_v56 = vrot.slane %v5639_v21, 7  ;;  %v1660_v14 = vmul.f32 %v5635_v20, %v6478_v61  ;;  %v1661_v32 = vmul.f32 %v5637_v40, %v6479_v48 }
 0x2f6   :  { %v1676_v50 = vrot.slane %v5637_v40, 1  ;;  %v1677_v13 = vrot.slane %v5639_v21, 1  ;;  %v1747_v33 = vmul.f32 %v5637_v40, %v5112_v44  ;;  %v1630_v30 = vmul.f32 %v1629_v23, %v5641_v24 }
 0x2f7   :  { %v1638_v57 = vsel %vm448_vm5, %v1636_v34, %v1637_v56  ;;  %v1639_v28 = vsel %vm448_vm5, %v1635_v7, %v1636_v34  ;;  %v1669_v1 = vmul.f32 %v1665_v42, %v1661_v32  ;;  %v1634_v9 = vrot.slane %v5641_v24, 7 }
 0x2f8   :  { %v1642_v25 = vmul.f32 %v1638_v57, %v6480_v55  ;;  %v1645_v45 = vmul.f32 %v1639_v28, %v6481_v0  ;;  %v5680_v39 = vsel %vm489_vm6, %v1676_v50, %v1677_v13  ;;  %v1700_v44 = vmul.f32 %v1639_v28, %v4901_v49 }
 0x2f9   :  { %v1685_v23 = vmul.f32 %v5680_v39, %v4897_v41  ;;  %v1701_v12 = vmul.f32 %v1638_v57, %v4913_v63  ;;  %v1716_v34 = vmul.f32 %v5680_v39, %v5066_v38  ;;  %v1731_v61 = vmul.f32 %v1639_v28, %v5114_v59 }
 0x2fa   :  { %v1650_v48 = vmul.f32 %v1649_v60, %v1642_v25  ;;  %v1653_v32 = vmul.f32 %v1649_v60, %v1645_v45  ;;  %v1708_v55 = vmul.f32 %v5633_v5, %v1700_v44  ;;  %v1732_v0 = vmul.f32 %v1638_v57, %v5064_v35  ;;  %v6482_v35 = vld [vmem:[#allocation7_spill] sm:$0xff]  ;;  %v6483_v45 = vld [vmem:[#allocation8_spill] sm:$0xff] }
 0x2fb   :  { %v1693_v18 = vmul.f32 %v5630_v37, %v1685_v23  ;;  %v1709_v49 = vmul.f32 %v5633_v5, %v1701_v12  ;;  %v1724_v62 = vmul.f32 %v5645_v8, %v1716_v34  ;;  %v5695_v41 = vmul.f32 %v5653_v17, %v1747_v33 }
 0x2fc   :  { %v1657_v63 = vadd.f32 %v1653_v32, %v1633_v15  ;;  %v1640_v38 = vsel %vm448_vm5, %v1634_v9, %v1635_v7  ;;  %v1641_v59 = vsel %vm448_vm5, %v1637_v56, %v1634_v9  ;;  %v1654_v28 = vadd.f32 %v1650_v48, %v1630_v30 }
 0x2fd   :  { %v1643_v25 = vmul.f32 %v1641_v59, %v4899_v43  ;;  %v1644_v57 = vmul.f32 %v1640_v38, %v6482_v35  ;;  %v1658_v44 = vmul.f32 %v5639_v21, %v6483_v45  ;;  %v1659_v23 = vmul.f32 %v5641_v24, %v4903_v4 }
 0x2fe   :  { %v1673_v33 = vadd.f32 %v1669_v1, %v1657_v63  ;;  %v1668_v12 = vmul.f32 %v1665_v42, %v1660_v14  ;;  %v1674_v15 = vrot.slane %v5641_v24, 1  ;;  %v1675_v7 = vrot.slane %v5635_v20, 1 }
 0x2ff   :  { %v1651_v34 = vmul.f32 %v1649_v60, %v1643_v25  ;;  %v1652_v32 = vmul.f32 %v1649_v60, %v1644_v57  ;;  %v1666_v56 = vmul.f32 %v1665_v42, %v1658_v44  ;;  %v1667_v30 = vmul.f32 %v1665_v42, %v1659_v23  ;;  %v6484_v25 = vld [vmem:[#allocation11_spill] sm:$0xff] }
 0x300   :  { %v1697_v9 = vadd.f32 %v1693_v18, %v1673_v33  ;;  %v1679_v43 = vsel %vm489_vm6, %v1675_v7, %v1676_v50  ;;  %v1680_v48 = vsel %vm489_vm6, %v1674_v15, %v1675_v7  ;;  %v1681_v4 = vsel %vm489_vm6, %v1677_v13, %v1674_v15  ;;  %v6485_v18 = vld [vmem:[#allocation13_spill] sm:$0xff] }
 0x301   :  { %v1655_v1 = vadd.f32 %v1651_v34, %v1631_v10  ;;  %v1656_v14 = vadd.f32 %v1652_v32, %v1632_v51  ;;  %v1670_v63 = vadd.f32 %v1666_v56, %v1654_v28  ;;  %v1682_v35 = vmul.f32 %v1681_v4, %v4909_v58 }
 0x302   :  { %v1713_v45 = vadd.f32 %v1709_v49, %v1697_v9  ;;  %v1683_v60 = vmul.f32 %v1680_v48, %v6484_v25  ;;  %v1684_v42 = vmul.f32 %v1679_v43, %v4915_v3  ;;  %v1698_v57 = vmul.f32 %v1641_v59, %v6485_v18  ;;  %v6486_v3 = vld [vmem:[#allocation14_spill] sm:$0xff] }
 0x303   :  { %v1671_v44 = vadd.f32 %v1667_v30, %v1655_v1  ;;  %v1672_v50 = vadd.f32 %v1668_v12, %v1656_v14  ;;  %v1690_v23 = vmul.f32 %v5630_v37, %v1682_v35  ;;  %v1699_v33 = vmul.f32 %v1640_v38, %v4925_v26  ;;  %v6487_v26 = vld [vmem:[#allocation15_spill] sm:$0xff] }
 0x304   :  { %v1691_v19 = vmul.f32 %v5630_v37, %v1683_v60  ;;  %v1692_v10 = vmul.f32 %v5630_v37, %v1684_v42  ;;  %v1706_v51 = vmul.f32 %v5633_v5, %v1698_v57  ;;  %v1714_v58 = vmul.f32 %v1680_v48, %v4989_v47  ;;  %v6488_v57 = vld [vmem:[#allocation37_spill] sm:$0xff] }
 0x305   :  { %v1694_v13 = vadd.f32 %v1690_v23, %v1670_v63  ;;  %v1707_v49 = vmul.f32 %v5633_v5, %v1699_v33  ;;  %v1715_v28 = vmul.f32 %v1679_v43, %v6486_v3  ;;  %v1717_v15 = vmul.f32 %v1681_v4, %v4987_v52 }
 0x306   :  { %v1695_v12 = vadd.f32 %v1691_v19, %v1671_v44  ;;  %v1696_v7 = vadd.f32 %v1692_v10, %v1672_v50  ;;  %v1722_v34 = vmul.f32 %v5645_v8, %v1714_v58  ;;  %v1730_v32 = vmul.f32 %v1640_v38, %v6487_v26  ;;  %v6489_v50 = vld [vmem:[#allocation38_spill] sm:$0xff] }
 0x307   :  { %v1710_v56 = vadd.f32 %v1706_v51, %v1694_v13  ;;  %v1723_v37 = vmul.f32 %v5645_v8, %v1715_v28  ;;  %v1725_v30 = vmul.f32 %v5645_v8, %v1717_v15  ;;  %v1733_v47 = vmul.f32 %v1641_v59, %v5166_v36  ;;  %v3907_v8 = vld [vmem:[%s6282_s1 + $0x19] ss:$0 sm:$0xff] }
 0x308   :  { %v1711_v9 = vadd.f32 %v1707_v49, %v1695_v12  ;;  %v1712_v1 = vadd.f32 %v1708_v55, %v1696_v7  ;;  %v1738_v5 = vmul.f32 %v5649_v29, %v1730_v32  ;;  %v1739_v14 = vmul.f32 %v5649_v29, %v1731_v61 }
 0x309   :  { %v1726_v52 = vadd.f32 %v1722_v34, %v1710_v56  ;;  %v1729_v63 = vadd.f32 %v1725_v30, %v1713_v45  ;;  %v1740_v35 = vmul.f32 %v5649_v29, %v1732_v0  ;;  %v1741_v25 = vmul.f32 %v5649_v29, %v1733_v47 }
 0x30a   :  { %v1727_v38 = vadd.f32 %v1723_v37, %v1711_v9  ;;  %v1728_v60 = vadd.f32 %v1724_v62, %v1712_v1  ;;  %v1746_v42 = vmul.f32 %v5635_v20, %v5168_v11  ;;  %v1748_v36 = vmul.f32 %v5639_v21, %v5206_v22 }
 0x30b   :  { %v1742_v55 = vadd.f32 %v1738_v5, %v1726_v52  ;;  %v1745_v61 = vadd.f32 %v1741_v25, %v1729_v63  ;;  %v1749_v59 = vmul.f32 %v5641_v24, %v5230_v2  ;;  %v1762_v0 = vmul.f32 %v1679_v43, %v5204_v31 }
 0x30c   :  { %v1743_v29 = vadd.f32 %v1739_v14, %v1727_v38  ;;  %v1744_v45 = vadd.f32 %v1740_v35, %v1728_v60  ;;  %v1754_v62 = vmul.f32 %v5653_v17, %v1746_v42  ;;  %v1756_v11 = vmul.f32 %v5653_v17, %v1748_v36 }
 0x30d   :  { %v1757_v18 = vmul.f32 %v5653_v17, %v1749_v59  ;;  %v1763_v22 = vmul.f32 %v5680_v39, %v5232_v46  ;;  %v1764_v44 = vmul.f32 %v1681_v4, %v6488_v57  ;;  %v1765_v23 = vmul.f32 %v1680_v48, %v6489_v50  ;;  %v3908_v17 = vld [vmem:[%s6282_s1 + $0x1b] ss:$0 sm:$0xff] }
 0x30e   :  { %v1758_v33 = vadd.f32 %v1754_v62, %v1742_v55  ;;  %v1759_v2 = vadd.f32 %v5695_v41, %v1743_v29  ;;  %v1760_v19 = vadd.f32 %v1756_v11, %v1744_v45  ;;  %v1770_v31 = vmul.f32 %v3907_v8, %v1762_v0 }
 0x30f   :  { %v1761_v43 = vadd.f32 %v1757_v18, %v1745_v61  ;;  %v1771_v10 = vmul.f32 %v3907_v8, %v1763_v22  ;;  %v1772_v51 = vmul.f32 %v3907_v8, %v1764_v44  ;;  %v1773_v58 = vmul.f32 %v3907_v8, %v1765_v23 }
 0x310   :  { %v1774_v13 = vadd.f32 %v1770_v31, %v1758_v33 }
 0x311   :  { %v1775_v49 = vadd.f32 %v1771_v10, %v1759_v2  ;;  %v1776_v46 = vadd.f32 %v1772_v51, %v1760_v19  ;;  %v1777_v39 = vadd.f32 %v1773_v58, %v1761_v43 }
 0x312   :  { %v5758_v4 = vadd.f32 %v3908_v17, %v1774_v13 }
 0x313   :  { %v5760_v48 = vadd.f32 %v3908_v17, %v1775_v49  ;;  %v5762_v3 = vadd.f32 %v3908_v17, %v1776_v46  ;;  %v5764_v41 = vadd.f32 %v3908_v17, %v1777_v39 }
 0x314   :  { %v5767_v28 = vmul.f32 0.70710677, %v5758_v4 }
 0x315   :  { %v5770_v15 = vmul.f32 0.70710677, %v5760_v48  ;;  %v5773_v12 = vmul.f32 0.70710677, %v5762_v3  ;;  %v5776_v7 = vmul.f32 0.70710677, %v5764_v41 }
 0x316   :  { %v1803_v34 = vand.u32 2147483647, %v5767_v28  ;;  %vm1795_vm15 = vcmp.ge.f32.partialorder %v5767_v28, 0.0 }
 0x317   :  { %v1804_v26 = vand.u32 2147483647, %v5770_v15  ;;  %v1805_v32 = vand.u32 2147483647, %v5773_v12  ;;  %v1806_v56 = vand.u32 2147483647, %v5776_v7 }
 0x318   :  { %v1807_v37 = vmul.f32 0.3275911, %v1803_v34  ;;  %v1859_v63 = vsub.f32 0.0, %v1803_v34  ;;  %vm1796_vm0 = vcmp.ge.f32.partialorder %v5770_v15, 0.0  ;;  %vm1797_vm1 = vcmp.ge.f32.partialorder %v5773_v12, 0.0 }
 0x319   :  { %v1808_v30 = vmul.f32 0.3275911, %v1804_v26  ;;  %v1809_v47 = vmul.f32 0.3275911, %v1805_v32  ;;  %v1810_v9 = vmul.f32 0.3275911, %v1806_v56 }
 0x31a   :  { %v1811_v1 = vadd.f32 1.0, %v1807_v37  ;;  %v1860_v35 = vsub.f32 0.0, %v1804_v26  ;;  %v1861_v25 = vsub.f32 0.0, %v1805_v32  ;;  %v1862_v38 = vsub.f32 0.0, %v1806_v56 }
 0x31b   :  { %v1812_v5 = vadd.f32 1.0, %v1808_v30  ;;  %v1813_v14 = vadd.f32 1.0, %v1809_v47  ;;  %v1814_v52 = vadd.f32 1.0, %v1810_v9  ;;  %v1863_v60 = vmul.f32 %v1859_v63, %v1803_v34 }
 0x31c   :  { %4657 = vrcp.f32 %v1811_v1  ;;  %v1864_v42 = vmul.f32 %v1860_v35, %v1804_v26  ;;  %v1865_v36 = vmul.f32 %v1861_v25, %v1805_v32  ;;  %v1866_v55 = vmul.f32 %v1862_v38, %v1806_v56 }
 0x31d   :  { %4659 = vrcp.f32 %v1812_v5  ;;  %v1867_v0 = vmul.f32 1.442695, %v1863_v60  ;;  %vm1798_vm2 = vcmp.ge.f32.partialorder %v5776_v7, 0.0  ;;  %v1800_v28 = vsel %vm1796_vm0, 1.0, %v6427_v6 }
 0x31e   :  { %4661 = vrcp.f32 %v1813_v14  ;;  %v1869_v62 = vmul.f32 1.442695, %v1864_v42  ;;  %v1871_v57 = vmul.f32 1.442695, %v1865_v36  ;;  %v1873_v23 = vmul.f32 1.442695, %v1866_v55 }
 0x31f   :  { %4663 = vrcp.f32 %v1814_v52  ;;  %v1802_v12 = vsel %vm1798_vm2, 1.0, %v6427_v6  ;;  %v1788_v7 = vmul.f32 0.5, %v5760_v48 }
 0x320   :  { %4665 = vpow2.f32 %v1867_v0 }
 0x321   :  { %4667 = vpow2.f32 %v1869_v62 }
 0x322   :  { %4669 = vpow2.f32 %v1871_v57 }
 0x323   :  { %4671 = vpow2.f32 %v1873_v23 }
 0x329   :  { %v4658_v8 = vpop.eup %4657 }
 0x32a   :  { %v4660_v61 = vpop.eup %4659  ;;  %v1823_v59 = vmul.f32 1.0614054, %v4658_v8 }
 0x32b   :  { %v4662_v29 = vpop.eup %4661  ;;  %v1824_v45 = vmul.f32 1.0614054, %v4660_v61 }
 0x32c   :  { %v4664_v11 = vpop.eup %4663  ;;  %v1825_v18 = vmul.f32 1.0614054, %v4662_v29  ;;  %v1827_v22 = vadd.f32 -1.4531521, %v1823_v59 }
 0x32d   :  { %v1826_v44 = vmul.f32 1.0614054, %v4664_v11  ;;  %v1828_v50 = vadd.f32 -1.4531521, %v1824_v45  ;;  %v4666_v35 = vpop.eup %4665 }
 0x32e   :  { %v1829_v33 = vadd.f32 -1.4531521, %v1825_v18  ;;  %v1831_v2 = vmul.f32 %v4658_v8, %v1827_v22  ;;  %v4668_v60 = vpop.eup %4667 }
 0x32f   :  { %v1830_v19 = vadd.f32 -1.4531521, %v1826_v44  ;;  %v1832_v31 = vmul.f32 %v4660_v61, %v1828_v50  ;;  %v4670_v55 = vpop.eup %4669  ;;  %v1801_v44 = vsel %vm1797_vm1, 1.0, %v6427_v6  ;;  %v1787_v50 = vmul.f32 0.5, %v5758_v4 }
 0x330   :  { %v1833_v43 = vmul.f32 %v4662_v29, %v1829_v33  ;;  %v1835_v10 = vadd.f32 1.4214138, %v1831_v2  ;;  %v4672_v45 = vpop.eup %4671 }
 0x331   :  { %v1834_v51 = vmul.f32 %v4664_v11, %v1830_v19  ;;  %v1836_v58 = vadd.f32 1.4214138, %v1832_v31  ;;  %v1789_v31 = vmul.f32 0.5, %v5762_v3 }
 0x332   :  { %v1837_v17 = vadd.f32 1.4214138, %v1833_v43  ;;  %v1839_v13 = vmul.f32 %v4658_v8, %v1835_v10 }
 0x333   :  { %v1838_v49 = vadd.f32 1.4214138, %v1834_v51  ;;  %v1840_v46 = vmul.f32 %v4660_v61, %v1836_v58  ;;  %v1790_v51 = vmul.f32 0.5, %v5764_v41 }
 0x334   :  { %v1841_v39 = vmul.f32 %v4662_v29, %v1837_v17  ;;  %v1843_v34 = vadd.f32 -0.28449672, %v1839_v13 }
 0x335   :  { %v1842_v26 = vmul.f32 %v4664_v11, %v1838_v49  ;;  %v1844_v32 = vadd.f32 -0.28449672, %v1840_v46 }
 0x336   :  { %v1845_v56 = vadd.f32 -0.28449672, %v1841_v39  ;;  %v1847_v37 = vmul.f32 %v4658_v8, %v1843_v34 }
 0x337   :  { %v1846_v30 = vadd.f32 -0.28449672, %v1842_v26  ;;  %v1848_v47 = vmul.f32 %v4660_v61, %v1844_v32 }
 0x338   :  { %v1849_v9 = vmul.f32 %v4662_v29, %v1845_v56  ;;  %v1851_v1 = vadd.f32 0.2548296, %v1847_v37 }
 0x339   :  { %v1850_v5 = vmul.f32 %v4664_v11, %v1846_v30  ;;  %v1852_v14 = vadd.f32 0.2548296, %v1848_v47 }
 0x33a   :  { %v1853_v52 = vadd.f32 0.2548296, %v1849_v9  ;;  %v1855_v63 = vmul.f32 %v4658_v8, %v1851_v1  ;;  %v1799_v8 = vsel %vm1795_vm15, 1.0, %v6427_v6 }
 0x33b   :  { %v1854_v25 = vadd.f32 0.2548296, %v1850_v5  ;;  %v1856_v38 = vmul.f32 %v4660_v61, %v1852_v14 }
 0x33c   :  { %v1857_v42 = vmul.f32 %v4662_v29, %v1853_v52  ;;  %v1875_v36 = vmul.f32 %v4666_v35, %v1855_v63 }
 0x33d   :  { %v1858_v59 = vmul.f32 %v4664_v11, %v1854_v25  ;;  %v1876_v0 = vmul.f32 %v4668_v60, %v1856_v38 }
 0x33e   :  { %v1877_v62 = vmul.f32 %v4670_v55, %v1857_v42  ;;  %v1879_v18 = vsub.f32 1.0, %v1875_v36 }
 0x33f   :  { %v1878_v61 = vmul.f32 %v4672_v45, %v1858_v59  ;;  %v1880_v22 = vsub.f32 1.0, %v1876_v0 }
 0x340   :  { %v1881_v29 = vsub.f32 1.0, %v1877_v62  ;;  %v1883_v57 = vmul.f32 %v1879_v18, %v1799_v8 }
 0x341   :  { %v1882_v15 = vsub.f32 1.0, %v1878_v61  ;;  %v1884_v11 = vmul.f32 %v1880_v22, %v1800_v28 }
 0x342   :  { %v1885_v23 = vmul.f32 %v1881_v29, %v1801_v44  ;;  %v1887_v33 = vadd.f32 1.0, %v1883_v57  ;;  %v1895_v29 = vld [vmem:[%s6282_s1 + $0x1d] sm:$0x1] }
 0x343   :  { %v1886_v2 = vmul.f32 %v1882_v15, %v1802_v12  ;;  %v1888_v19 = vadd.f32 1.0, %v1884_v11  ;;  %v1896_v15 = vld [vmem:[%s6282_s1 + $0x1f] sm:$0x1] }
 0x344   :  { %v1889_v43 = vadd.f32 1.0, %v1885_v23  ;;  %v1891_v10 = vmul.f32 %v1887_v33, %v1787_v50 }
 0x345   :  { %v1890_v58 = vadd.f32 1.0, %v1886_v2  ;;  %v1892_v17 = vmul.f32 %v1888_v19, %v1788_v7 }
 0x346   :  { %v1893_v13 = vmul.f32 %v1889_v43, %v1789_v31  ;;  %v1897_v49 = vsel %vm247_vm4, %v1891_v10, 0.0  ;;  %v1911_v4 = vmul.f32 %v1891_v10, %v1891_v10 }
 0x347   :  { %v1894_v46 = vmul.f32 %v1890_v58, %v1790_v51  ;;  %v1898_v39 = vsel %vm247_vm4, %v1892_v17, 0.0  ;;  %v1912_v34 = vmul.f32 %v1892_v17, %v1892_v17 }
 0x348   :  { %v1899_v26 = vadd.f32 %v1898_v39, %v1897_v49  ;;  %v1913_v48 = vmul.f32 %v1893_v13, %v1893_v13  ;;  %v1915_v32 = vsel %vm247_vm4, %v1911_v4, 0.0  ;;  %v1900_v3 = vsel %vm247_vm4, %v1893_v13, 0.0 }
 0x349   :  { %v1914_v56 = vmul.f32 %v1894_v46, %v1894_v46  ;;  %v1916_v37 = vsel %vm247_vm4, %v1912_v34, 0.0  ;;  %v1902_v47 = vsel %vm247_vm4, %v1894_v46, 0.0 }
 0x34a   :  { %v1901_v41 = vadd.f32 %v1900_v3, %v1899_v26  ;;  %v1917_v30 = vadd.f32 %v1916_v37, %v1915_v32  ;;  %v1918_v9 = vsel %vm247_vm4, %v1913_v48, 0.0 }
 0x34b   :  { %v1920_v14 = vsel %vm247_vm4, %v1914_v56, 0.0 }
 0x34c   :  { %v1903_v1 = vadd.f32 %v1902_v47, %v1901_v41  ;;  %v1919_v5 = vadd.f32 %v1918_v9, %v1917_v30 }
 0x34e   :  { %v1904_v52 = vrot.slane %v1903_v1, 4  ;;  %v1921_v63 = vadd.f32 %v1920_v14, %v1919_v5 }
 0x350   :  { %v1905_v35 = vadd.f32 %v1904_v52, %v1903_v1  ;;  %v1922_v25 = vrot.slane %v1921_v63, 4  ;;  %v6490_v52 = vld [vmem:[#allocation16_spill] sm:$0xff] }
 0x352   :  { %v1906_v38 = vrot.slane %v1905_v35, 2  ;;  %v1923_v60 = vadd.f32 %v1922_v25, %v1921_v63 }
 0x354   :  { %v1907_v42 = vadd.f32 %v1906_v38, %v1905_v35  ;;  %v1924_v36 = vrot.slane %v1923_v60, 2  ;;  %v6491_v35 = vld [vmem:[#allocation20_spill] sm:$0xff]  ;;  %v6492_v38 = vld [vmem:[#allocation2_spill] sm:$0xff] }
 0x356   :  { %v1908_v55 = vrot.slane %v1907_v42, 1  ;;  %v1925_v59 = vadd.f32 %v1924_v36, %v1923_v60  ;;  %v6493_v60 = vld [vmem:[#allocation18_spill] sm:$0xff] }
 0x358   :  { %v1909_v0 = vadd.f32 %v1908_v55, %v1907_v42  ;;  %v1926_v45 = vrot.slane %v1925_v59, 1  ;;  %v6494_v42 = vld [vmem:[#allocation22_spill] sm:$0xff]  ;;  %v6495_v55 = vld [vmem:[#allocation19_spill] sm:$0xff] }
 0x35a   :  { %v1910_v62 = vmul.f32 0.03125, %v1909_v0  ;;  %v1927_v18 = vadd.f32 %v1926_v45, %v1925_v59  ;;  %v6496_v59 = vld [vmem:[#allocation35_spill] sm:$0xff]  ;;  %v6497_v0 = vld [vmem:[#allocation21_spill] sm:$0xff] }
 0x35b   :  { %v6498_v45 = vld [vmem:[#allocation31_spill] sm:$0xff] }
 0x35c   :  { %v1928_v8 = vmul.f32 0.03125, %v1927_v18  ;;  %v1929_v61 = vmul.f32 %v1910_v62, %v1910_v62  ;;  %v6500_v18 = vld [vmem:[#allocation30_spill] sm:$0xff] }
 0x35e   :  { %v1930_v22 = vsub.f32 %v1928_v8, %v1929_v61  ;;  %v6501_v8 = vld [vmem:[#allocation29_spill] sm:$0xff]  ;;  %v6505_v61 = vld [vmem:[#allocation24_spill] sm:$0xff] }
 0x360   :  { %v1931_v28 = vadd.f32 1e-05, %v1930_v22  ;;  %v6506_v22 = vld [vmem:[#allocation25_spill] sm:$0xff] }
 0x362   :  { %4673 = vrsqrt.f32 %v1931_v28  ;;  %v6507_v28 = vld [vmem:[#allocation27_spill] sm:$0xff] }
 0x36f   :  { %v4674_v57 = vpop.eup %4673 }
 0x370   :  { %v1933_v44 = vmul.f32 %v4674_v57, %v1895_v29  ;;  %v6508_v29 = vld [vmem:[#allocation28_spill] sm:$0xff] }
 0x371   :  { %v6509_v57 = vld [vmem:[#allocation32_spill] sm:$0xff] }
 0x372   :  { %v1934_v11 = vmul.f32 %v1933_v44, %v1910_v62  ;;  %v1939_v50 = vrot.slane %v1933_v44, %v6428_v53  ;;  %v6499_v62 = vld [vmem:[#allocation26_spill] sm:$0xff] }
 0x373   :  { %v6510_v44 = vld [vmem:[#allocation34_spill] sm:$0xff] }
 0x374   :  { %v1935_v12 = vsub.f32 %v1896_v15, %v1934_v11  ;;  %v1940_v23 = vmul.f32 %v1939_v50, %v1891_v10  ;;  %v1941_v33 = vmul.f32 %v1939_v50, %v1892_v17  ;;  %v1942_v7 = vmul.f32 %v1939_v50, %v1893_v13 }
 0x375   :  { %v1943_v2 = vmul.f32 %v1939_v50, %v1894_v46 }
 0x376   :  { %v1947_v19 = vrot.slane %v1935_v12, %v6428_v53 }
 0x378   :  { %v1948_v31 = vadd.f32 %v1947_v19, %v1940_v23  ;;  %v1949_v43 = vadd.f32 %v1947_v19, %v1941_v33  ;;  %v1950_v51 = vadd.f32 %v1947_v19, %v1942_v7  ;;  %v1951_v58 = vadd.f32 %v1947_v19, %v1943_v2 }
 0x37a   :  { %v1952_v49 = vadd.f32 %v1948_v31, %v5641_v24  ;;  %v1953_v4 = vadd.f32 %v1949_v43, %v5635_v20  ;;  %v1954_v39 = vadd.f32 %v1950_v51, %v5637_v40  ;;  %v1955_v34 = vadd.f32 %v1951_v58, %v5639_v21  ;;  %v2840_v31 = vld [vmem:[%s6282_s1 + $0xe0] sm:$0xff] }
 0x37b   :  { %v3909_v43 = vld [vmem:[%s6282_s1 + $0xa1] ss:$0 sm:$0xff]  ;;  %v5929_v51 = vand.u32 4294901760, %v2840_v31 }
 0x37c   :  { %v1970_v26 = vsel %vm247_vm4, %v1952_v49, 0  ;;  %v1973_v10 = vsel %vm247_vm4, %v1953_v4, 0  ;;  %v1976_v17 = vsel %vm247_vm4, %v1954_v39, 0  ;;  %v1979_v13 = vsel %vm247_vm4, %v1955_v34, 0  ;;  %v2839_v49 = vld [vmem:[%s6282_s1 + $0xd8] sm:$0xff] }
 0x37d   :  { %v5818_v46 = vand.u32 4294901760, %v1970_v26  ;;  %v5820_v48 = vand.u32 4294901760, %v1973_v10  ;;  %v5822_v32 = vand.u32 4294901760, %v1976_v17  ;;  %v5824_v24 = vand.u32 4294901760, %v1979_v13 }
 0x37e   :  { %v5937_v39 = vsub.f32 %v2840_v31, %v5929_v51  ;;  %v5939_v34 = vand.u32 4294901760, %v2839_v49 }
 0x37f   :  { %4298 = vmatprep.mubr.f32.mxu1 %v5818_v46  ;;  %v5828_v20 = vsub.f32 %v1973_v10, %v5820_v48  ;;  %v2055_v40 = vsub.f32 %v1970_v26, %v5818_v46  ;;  %v5832_v21 = vsub.f32 %v1976_v17, %v5822_v32  ;;  %v5835_v3 = vsub.f32 %v1979_v13, %v5824_v24  ;;  %v2838_v13 = vld [vmem:[%s6282_s1 + $0xd0] sm:$0xff] }
 0x380   :  { %4299 = vmatmul.mubr.f32.vlgmr.msra.gmra.mxu1 %v5820_v48 }
 0x381   :  { %4327 = vmatpush3.msra.mxu1 %v5448_v16  ;;  %4301 = vmatprep.mubr.f32.mxu1 %v5822_v32  ;;  %v2056_v56 = vand.u32 4294901760, %v2055_v40  ;;  %v2066_v37 = vand.u32 4294901760, %v5828_v20  ;;  %v2076_v41 = vand.u32 4294901760, %v5832_v21  ;;  %v2086_v9 = vand.u32 4294901760, %v5835_v3 }
 0x382   :  { %4328 = vmatprep.subr.mxu1 %v5453_v27 }
 0x383   :  { %4329 = vmatpush3.msra.mxu1 %v5453_v27  ;;  %v2057_v30 = vsub.f32 %v2055_v40, %v2056_v56  ;;  %v2067_v47 = vsub.f32 %v5828_v20, %v2066_v37  ;;  %v2077_v1 = vsub.f32 %v5832_v21, %v2076_v41  ;;  %v2087_v63 = vsub.f32 %v5835_v3, %v2086_v9 }
 0x384   :  { %4330 = vmatprep.subr.mxu1 %v5458_v54  ;;  %4302 = vmatmul.mubr.f32.gmra.mxu1 %v5824_v24 }
 0x385   :  { %4331 = vmatpush3.msra.mxu1 %v5458_v54  ;;  %4342 = vmatprep.mubr.f32.mxu1 %v2056_v56  ;;  %v2058_v5 = vand.u32 4294901760, %v2057_v30  ;;  %v2068_v14 = vand.u32 4294901760, %v2067_v47  ;;  %v2078_v25 = vand.u32 4294901760, %v2077_v1  ;;  %v2088_v36 = vand.u32 4294901760, %v2087_v63  ;;  %v2836_v1 = vld [vmem:[%s6282_s1 + $0xc0] sm:$0xff]  ;;  %v2835_v63 = vld [vmem:[%s6282_s1 + $0xb8] sm:$0xff] }
 0x386   :  { %4332 = vmatprep.subr.mxu1 %v6490_v52 }
 0x387   :  { %4333 = vmatpush3.msra.mxu1 %v6490_v52  ;;  %4276 = vmatprep.mubr.f32.mxu0 %v2058_v5 }
 0x388   :  { %4334 = vmatprep.subr.mxu1 %v6491_v35  ;;  %4277 = vmatmul.mubr.f32.vlgmr.msra.gmra.mxu0 %v2068_v14 }
 0x389   :  { %4305 = vmatpush3.msra.mxu0 %v6492_v38  ;;  %4335 = vmatpush3.msra.mxu1 %v6491_v35 }
 0x38a   :  { %4279 = vmatprep.mubr.f32.mxu0 %v2078_v25  ;;  %4306 = vmatprep.subr.mxu0 %v6493_v60  ;;  %v2833_v25 = vld [vmem:[%s6282_s1 + $0xa8] sm:$0xff] }
 0x38b   :  { %4336 = vmatprep.subr.mxu1 %v6494_v42  ;;  %4307 = vmatpush3.msra.mxu0 %v6493_v60  ;;  %v4708_v60 = vmov 0.0  }
 0x38c   :  { %4337 = vmatpush3.msra.mxu1 %v6494_v42  ;;  %4308 = vmatprep.subr.mxu0 %v6495_v55 }
 0x38d   :  { %4338 = vmatprep.subr.mxu1 %v6496_v59  ;;  %4280 = vmatmul.mubr.f32.gmra.mxu0 %v2088_v36  ;;  %v5985_v36 = vand.u32 4294901760, %v2836_v1 }
 0x38e   :  { %4309 = vmatpush3.msra.mxu0 %v6495_v55  ;;  %4339 = vmatpush3.msra.mxu1 %v6496_v59  ;;  %v5987_v55 = vand.u32 4294901760, %v2835_v63 }
 0x38f   :  { %4310 = vmatprep.subr.mxu0 %v6497_v0  ;;  %4320 = vmatprep.mubr.f32.mxu0 %v2055_v40 }
 0x390   :  { %4340 = vmatprep.subr.mxu1 %v6498_v45  ;;  %4311 = vmatpush3.msra.mxu0 %v6497_v0 }
 0x391   :  { %4341 = vmatpush3.msra.mxu1 %v6498_v45  ;;  %4312 = vmatprep.subr.mxu0 %v6499_v62 }
 0x392   :  { %4343 = vmatmul.mubr.f32.vlgmr.msra.gmra.mxu1 %v2066_v37  ;;  %4370 = vmatprep.subr.mxu1 %v5448_v16 }
 0x393   :  { %4313 = vmatpush3.msra.mxu0 %v6499_v62  ;;  %4345 = vmatprep.mubr.f32.mxu1 %v2076_v41 }
 0x394   :  { %4371 = vmatpush3.msra.mxu1 %v5448_v16  ;;  %4314 = vmatprep.subr.mxu0 %v6500_v18  ;;  %v6502_v16 = vld [vmem:[#allocation33_spill] sm:$0xff] }
 0x395   :  { %4372 = vmatprep.subr.mxu1 %v5453_v27  ;;  %4315 = vmatpush3.msra.mxu0 %v6500_v18 }
 0x396   :  { %4373 = vmatpush3.msra.mxu1 %v5453_v27  ;;  %4316 = vmatprep.subr.mxu0 %v6501_v8  ;;  %v6503_v27 = vld [vmem:[#allocation17_spill] sm:$0xff] }
 0x397   :  { %4346 = vmatmul.mubr.f32.gmra.mxu1 %v2086_v9  ;;  %4374 = vmatprep.subr.mxu1 %v5458_v54 }
 0x398   :  { %4317 = vmatpush3.msra.mxu0 %v6501_v8  ;;  %4375 = vmatpush3.msra.mxu1 %v5458_v54  ;;  %v6504_v54 = vld [vmem:[#allocation23_spill] sm:$0xff]  ;;  %v5997_v8 = vand.u32 4294901760, %v2833_v25 }
 0x399   :  { %4386 = vmatprep.mubr.f32.mxu1 %v5818_v46  ;;  %4318 = vmatprep.subr.mxu0 %v6502_v16 }
 0x39a   :  { %4376 = vmatprep.subr.mxu1 %v6490_v52  ;;  %4319 = vmatpush3.msra.mxu0 %v6502_v16 }
 0x39b   :  { %4377 = vmatpush3.msra.mxu1 %v6490_v52  ;;  %4321 = vmatmul.mubr.f32.vlgmr.msra.gmra.mxu0 %v5828_v20  ;;  %v2837_v20 = vld [vmem:[%s6282_s1 + $0xc8] sm:$0xff] }
 0x39c   :  { %4348 = vmatprep.subr.mxu0 %v6503_v27  ;;  %4378 = vmatprep.subr.mxu1 %v6491_v35  ;;  %v5962_v37 = vand.u32 4294901760, %v2837_v20 }
 0x39d   :  { %4323 = vmatprep.mubr.f32.mxu0 %v5832_v21  ;;  %4349 = vmatpush3.msra.mxu0 %v6503_v27  ;;  %v6002_v27 = vsub.f32 %v2836_v1, %v5985_v36 }
 0x39e   :  { %4379 = vmatpush3.msra.mxu1 %v6491_v35  ;;  %4350 = vmatprep.subr.mxu0 %v6504_v54  ;;  %v2834_v35 = vld [vmem:[%s6282_s1 + $0xb0] sm:$0xff] }
 0x39f   :  { %4380 = vmatprep.subr.mxu1 %v6494_v42  ;;  %4351 = vmatpush3.msra.mxu0 %v6504_v54  ;;  %v6006_v54 = vsub.f32 %v2835_v63, %v5987_v55 }
 0x3a0   :  { %4381 = vmatpush3.msra.mxu1 %v6494_v42  ;;  %4324 = vmatmul.mubr.f32.gmra.mxu0 %v5835_v3  ;;  %v5982_v42 = vsub.f32 %v2837_v20, %v5962_v37 }
 0x3a1   :  { %4352 = vmatprep.subr.mxu0 %v6505_v61  ;;  %4382 = vmatprep.subr.mxu1 %v6496_v59 }
 0x3a2   :  { %4353 = vmatpush3.msra.mxu0 %v6505_v61  ;;  %4364 = vmatprep.mubr.f32.mxu0 %v5818_v46  ;;  %v2954_v46 = vand.u32 4294901760, %v5937_v39  ;;  %v2975_v16 = vand.u32 4294901760, %v5982_v42 }
 0x3a3   :  { %4383 = vmatpush3.msra.mxu1 %v6496_v59  ;;  %4354 = vmatprep.subr.mxu0 %v6506_v22  ;;  %v5989_v59 = vand.u32 4294901760, %v2834_v35 }
 0x3a4   :  { %4384 = vmatprep.subr.mxu1 %v6498_v45  ;;  %4355 = vmatpush3.msra.mxu0 %v6506_v22  ;;  %v2955_v21 = vsub.f32 %v5937_v39, %v2954_v46 }
 0x3a5   :  { %4385 = vmatpush3.msra.mxu1 %v6498_v45  ;;  %4356 = vmatprep.subr.mxu0 %v6507_v28  ;;  %v6009_v61 = vsub.f32 %v2834_v35, %v5989_v59 }
 0x3a6   :  { %4387 = vmatmul.mubr.f32.vlgmr.msra.gmra.mxu1 %v5820_v48  ;;  %4357 = vmatpush3.msra.mxu0 %v6507_v28  ;;  %v2956_v5 = vand.u32 4294901760, %v2955_v21 }
 0x3a7   :  { %4389 = vmatprep.mubr.f32.mxu1 %v5822_v32  ;;  %4358 = vmatprep.subr.mxu0 %v6508_v29 }
 0x3a8   :  { %4359 = vmatpush3.msra.mxu0 %v6508_v29  ;;  %4411 = vmatprep.subr.mxu1 %v4708_v60 }
 0x3a9   :  { %4360 = vmatprep.subr.mxu0 %v6509_v57  ;;  %4412 = vmatpush3.msra.mxu1 %v2956_v5 }
 0x3aa   :  { %4390 = vmatmul.mubr.f32.gmra.mxu1 %v5824_v24  ;;  %4361 = vmatpush3.msra.mxu0 %v6509_v57  ;;  %v6013_v57 = vsub.f32 %v2833_v25, %v5997_v8 }
 0x3ab   :  { %4362 = vmatprep.subr.mxu0 %v6510_v44  ;;  %4413 = vmatprep.subr.mxu1 %v4708_v60 }
 0x3ac   :  { %4363 = vmatpush3.msra.mxu0 %v6510_v44  ;;  %v3003_v31 = vand.u32 4294901760, %v6013_v57  ;;  %4427 = vmatprep.mubr.msk.f32.mxu1 %vm4709_vm3, %v4708_v60 }
 0x3ad   :  { %4365 = vmatmul.mubr.f32.vlgmr.msra.gmra.mxu0 %v5820_v48  ;;  %v5946_v48 = vsub.f32 %v2839_v49, %v5939_v34  ;;  %4392 = vmatprep.subr.mxu0 %v4708_v60 }
 0x3ae   :  { %4367 = vmatprep.mubr.f32.mxu0 %v5822_v32  ;;  %v5948_v32 = vand.u32 4294901760, %v2838_v13  ;;  %4393 = vmatpush3.msra.mxu0 %v5929_v51 }
 0x3af   :  { %v2961_v3 = vand.u32 4294901760, %v5946_v48  ;;  %4394 = vmatprep.subr.mxu0 %v4708_v60 }
 0x3b0   :  { %v5960_v56 = vsub.f32 %v2838_v13, %v5948_v32  ;;  %4395 = vmatpush3.msra.mxu0 %v5939_v34 }
 0x3b1   :  { %4368 = vmatmul.mubr.f32.gmra.mxu0 %v5824_v24  ;;  %v2962_v14 = vsub.f32 %v5946_v48, %v2961_v3  ;;  %4396 = vmatprep.subr.mxu0 %v4708_v60 }
 0x3b2   :  { %v2968_v52 = vand.u32 4294901760, %v5960_v56  ;;  %4397 = vmatpush3.msra.mxu0 %v5948_v32  ;;  %4408 = vmatprep.mubr.msk.f32.mxu0 %vm4709_vm3, %v4708_v60 }
 0x3b3   :  { %v2963_v62 = vand.u32 4294901760, %v2962_v14  ;;  %4398 = vmatprep.subr.mxu0 %v4708_v60 }
 0x3b4   :  { %v2969_v18 = vsub.f32 %v5960_v56, %v2968_v52  ;;  %4399 = vmatpush3.msra.mxu0 %v5962_v37 }
 0x3b5   :  { %4414 = vmatpush3.msra.mxu1 %v2963_v62  ;;  %4400 = vmatprep.subr.mxu0 %v4708_v60 }
 0x3b6   :  { %v2970_v29 = vand.u32 4294901760, %v2969_v18  ;;  %4415 = vmatprep.subr.mxu1 %v4708_v60  ;;  %4401 = vmatpush3.msra.mxu0 %v5985_v36 }
 0x3b7   :  { %4402 = vmatprep.subr.mxu0 %v4708_v60 }
 0x3b8   :  { %4416 = vmatpush3.msra.mxu1 %v2970_v29  ;;  %4403 = vmatpush3.msra.mxu0 %v5987_v55 }
 0x3b9   :  { %4417 = vmatprep.subr.mxu1 %v4708_v60  ;;  %4404 = vmatprep.subr.mxu0 %v4708_v60 }
 0x3ba   :  { %4405 = vmatpush3.msra.mxu0 %v5989_v59 }
 0x3bb   :  { %4406 = vmatprep.subr.mxu0 %v4708_v60 }
 0x3bc   :  { %4407 = vmatpush3.msra.mxu0 %v5997_v8 }
 0x3bd   :  { %4430 = vmatprep.subr.mxu0 %v4708_v60 }
 0x440   :  { %v4300_v15 = vpop.f32.mrf.mxu1 }
 0x442   :  { %v2201_v50 = vpop.f32.mrf.mxu1 }
 0x444   :  { %v4303_v23 = vpop.f32.mrf.mxu1 }
 0x446   :  { %v5919_v7 = vpop.f32.mrf.mxu1 }
 0x448   :  { %v4278_v11 = vpop.f32.mrf.mxu0 }
 0x449   :  { %v2071_v26 = vadd.f32 %v4278_v11, %v3909_v43  ;;  %v2982_v11 = vand.u32 4294901760, %v6002_v27 }
 0x44a   :  { %v2060_v12 = vpop.f32.mrf.mxu0 }
 0x44b   :  { %v2061_v10 = vadd.f32 %v3909_v43, %v2060_v12  ;;  %v2208_v30 = vadd.f32 %v4300_v15, %v2071_v26  ;;  %v2976_v15 = vsub.f32 %v5982_v42, %v2975_v16  ;;  %v2996_v12 = vand.u32 4294901760, %v6009_v61 }
 0x44c   :  { %v2983_v49 = vsub.f32 %v6002_v27, %v2982_v11 }
 0x44d   :  { %v4281_v33 = vpop.f32.mrf.mxu0  ;;  %v2202_v47 = vadd.f32 %v2201_v50, %v2061_v10  ;;  %v2989_v50 = vand.u32 4294901760, %v6006_v54 }
 0x44e   :  { %v2091_v17 = vadd.f32 %v4281_v33, %v3909_v43  ;;  %v2984_v20 = vand.u32 4294901760, %v2983_v49 }
 0x44f   :  { %v2080_v19 = vpop.f32.mrf.mxu0  ;;  %v2990_v26 = vsub.f32 %v6006_v54, %v2989_v50 }
 0x450   :  { %v2081_v41 = vadd.f32 %v3909_v43, %v2080_v19  ;;  %v2220_v9 = vadd.f32 %v4303_v23, %v2091_v17 }
 0x451   :  { %v2991_v21 = vand.u32 4294901760, %v2990_v26 }
 0x452   :  { %v5921_v2 = vpop.f32.mrf.mxu1  ;;  %v2214_v33 = vadd.f32 %v5919_v7, %v2081_v41  ;;  %v2997_v7 = vsub.f32 %v6009_v61, %v2996_v12  ;;  %v3004_v41 = vsub.f32 %v6013_v57, %v3003_v31 }
 0x454   :  { %v5934_v4 = vpop.f32.mrf.mxu1  ;;  %v2998_v1 = vand.u32 4294901760, %v2997_v7 }
 0x457   :  { %v5953_v40 = vpop.f32.mrf.mxu1 }
 0x459   :  { %v5991_v0 = vpop.f32.mrf.mxu1 }
 0x45b   :  { %v4322_v58 = vpop.f32.mrf.mxu0 }
 0x45c   :  { %v2315_v45 = vadd.f32 %v4322_v58, %v2208_v30  ;;  %v2977_v58 = vand.u32 4294901760, %v2976_v15 }
 0x45d   :  { %v2307_v24 = vpop.f32.mrf.mxu0 }
 0x45e   :  { %v2308_v22 = vadd.f32 %v2307_v24, %v2202_v47  ;;  %v2418_v19 = vadd.f32 %v5921_v2, %v2315_v45  ;;  %4418 = vmatpush3.msra.mxu1 %v2977_v58 }
 0x45f   :  { %4419 = vmatprep.subr.mxu1 %v4708_v60 }
 0x460   :  { %v4325_v38 = vpop.f32.mrf.mxu0  ;;  %v2410_v17 = vadd.f32 %v5934_v4, %v2308_v22  ;;  %4420 = vmatpush3.msra.mxu1 %v2984_v20 }
 0x461   :  { %v2329_v23 = vadd.f32 %v4325_v38, %v2220_v9  ;;  %4421 = vmatprep.subr.mxu1 %v4708_v60  ;;  %v3005_v38 = vand.u32 4294901760, %v3004_v41 }
 0x462   :  { %v2321_v44 = vpop.f32.mrf.mxu0  ;;  %4422 = vmatpush3.msra.mxu1 %v2991_v21 }
 0x463   :  { %v2322_v13 = vadd.f32 %v2321_v44, %v2214_v33  ;;  %v2434_v47 = vadd.f32 %v5953_v40, %v2329_v23  ;;  %4423 = vmatprep.subr.mxu1 %v4708_v60 }
 0x464   :  { %4424 = vmatpush3.msra.mxu1 %v2998_v1 }
 0x465   :  { %v2426_v40 = vadd.f32 %v5991_v0, %v2322_v13  ;;  %4425 = vmatprep.subr.mxu1 %v4708_v60 }
 0x466   :  { %v4388_v28 = vpop.f32.mrf.mxu1  ;;  %4426 = vmatpush3.msra.mxu1 %v3005_v38 }
 0x467   :  { %4449 = vmatprep.subr.mxu1 %v4708_v60 }
 0x468   :  { %v2625_v2 = vpop.f32.mrf.mxu1 }
 0x46a   :  { %v4391_v5 = vpop.f32.mrf.mxu1 }
 0x46c   :  { %v2637_v0 = vpop.f32.mrf.mxu1 }
 0x46d   :  { %v4366_v43 = vpop.f32.mrf.mxu0 }
 0x46e   :  { %v2535_v10 = vadd.f32 %v4366_v43, %v2418_v19 }
 0x46f   :  { %v2528_v24 = vpop.f32.mrf.mxu0 }
 0x470   :  { %v6046_v30 = vadd.f32 %v4388_v28, %v2535_v10  ;;  %v2529_v4 = vadd.f32 %v2528_v24, %v2410_v17 }
 0x471   :  { %v4369_v9 = vpop.f32.mrf.mxu0 }
 0x472   :  { %v6053_v14 = vmul.f32 0.70710677, %v6046_v30  ;;  %v6055_v63 = vadd.f32 %v2625_v2, %v2529_v4  ;;  %v2547_v35 = vadd.f32 %v4369_v9, %v2434_v47 }
 0x473   :  { %v2540_v25 = vpop.f32.mrf.mxu0 }
 0x474   :  { %v2664_v45 = vand.u32 2147483647, %v6053_v14  ;;  %v6063_v62 = vmul.f32 0.70710677, %v6055_v63  ;;  %v6067_v18 = vadd.f32 %v4391_v5, %v2547_v35  ;;  %v2541_v22 = vadd.f32 %v2540_v25, %v2426_v40 }
 0x475   :  { %vm2656_vm5 = vcmp.ge.f32.partialorder %v6053_v14, 0.0 }
 0x476   :  { %v2668_v28 = vmul.f32 0.3275911, %v2664_v45  ;;  %v2663_v29 = vand.u32 2147483647, %v6063_v62  ;;  %v6074_v44 = vmul.f32 0.70710677, %v6067_v18  ;;  %v6076_v15 = vadd.f32 %v2637_v0, %v2541_v22 }
 0x477   :  { %v2720_v10 = vsub.f32 0.0, %v2664_v45  ;;  %vm2655_vm6 = vcmp.ge.f32.partialorder %v6063_v62, 0.0 }
 0x478   :  { %v2672_v23 = vadd.f32 1.0, %v2668_v28  ;;  %v2667_v33 = vmul.f32 0.3275911, %v2663_v29  ;;  %v2666_v19 = vand.u32 2147483647, %v6074_v44  ;;  %v2719_v13 = vsub.f32 0.0, %v2663_v29 }
 0x479   :  { %v6084_v43 = vmul.f32 0.70710677, %v6076_v15  ;;  %v2724_v24 = vmul.f32 %v2720_v10, %v2664_v45  ;;  %vm2658_vm7 = vcmp.ge.f32.partialorder %v6074_v44, 0.0 }
 0x47a   :  { %4675 = vrcp.f32 %v2672_v23  ;;  %v2671_v58 = vadd.f32 1.0, %v2667_v33  ;;  %v2670_v49 = vmul.f32 0.3275911, %v2666_v19  ;;  %v2722_v20 = vsub.f32 0.0, %v2666_v19 }
 0x47b   :  { %v2665_v26 = vand.u32 2147483647, %v6084_v43  ;;  %v2723_v41 = vmul.f32 %v2719_v13, %v2663_v29  ;;  %v2729_v47 = vmul.f32 1.442695, %v2724_v24  ;;  %v2662_v62 = vsel %vm2658_vm7, 1.0, %v6427_v6 }
 0x47c   :  { %4677 = vrcp.f32 %v2671_v58  ;;  %v2674_v7 = vadd.f32 1.0, %v2670_v49  ;;  %v2726_v1 = vmul.f32 %v2722_v20, %v2666_v19  ;;  %vm2657_vm8 = vcmp.ge.f32.partialorder %v6084_v43, 0.0 }
 0x47d   :  { %v2669_v2 = vmul.f32 0.3275911, %v2665_v26  ;;  %v2721_v9 = vsub.f32 0.0, %v2665_v26  ;;  %v2727_v25 = vmul.f32 1.442695, %v2723_v41 }
 0x47e   :  { %4679 = vrcp.f32 %v2674_v7  ;;  %v2733_v33 = vmul.f32 1.442695, %v2726_v1 }
 0x47f   :  { %v2673_v17 = vadd.f32 1.0, %v2669_v2  ;;  %v2725_v0 = vmul.f32 %v2721_v9, %v2665_v26 }
 0x481   :  { %4681 = vrcp.f32 %v2673_v17  ;;  %v2731_v10 = vmul.f32 1.442695, %v2725_v0 }
 0x482   :  { %4683 = vpow2.f32 %v2729_v47 }
 0x483   :  { %4685 = vpow2.f32 %v2727_v25 }
 0x484   :  { %4687 = vpow2.f32 %v2733_v33 }
 0x485   :  { %4689 = vpow2.f32 %v2731_v10 }
 0x487   :  { %v4676_v21 = vpop.eup %4675 }
 0x488   :  { %v2684_v4 = vmul.f32 1.0614054, %v4676_v21 }
 0x489   :  { %v4678_v5 = vpop.eup %4677 }
 0x48a   :  { %v2688_v35 = vadd.f32 -1.4531521, %v2684_v4  ;;  %v2683_v40 = vmul.f32 1.0614054, %v4678_v5 }
 0x48b   :  { %v4680_v38 = vpop.eup %4679 }
 0x48c   :  { %v2692_v22 = vmul.f32 %v4676_v21, %v2688_v35  ;;  %v2687_v28 = vadd.f32 -1.4531521, %v2683_v40  ;;  %v2686_v23 = vmul.f32 1.0614054, %v4680_v38 }
 0x48e   :  { %v2696_v58 = vadd.f32 1.4214138, %v2692_v22  ;;  %v4682_v45 = vpop.eup %4681  ;;  %v2691_v49 = vmul.f32 %v4678_v5, %v2687_v28  ;;  %v2690_v29 = vadd.f32 -1.4531521, %v2686_v23 }
 0x48f   :  { %v2685_v2 = vmul.f32 1.0614054, %v4682_v45  ;;  %v4684_v23 = vpop.eup %4683 }
 0x490   :  { %v2700_v7 = vmul.f32 %v4676_v21, %v2696_v58  ;;  %v2695_v19 = vadd.f32 1.4214138, %v2691_v49  ;;  %v2694_v17 = vmul.f32 %v4680_v38, %v2690_v29 }
 0x491   :  { %v2689_v24 = vadd.f32 -1.4531521, %v2685_v2  ;;  %v4686_v2 = vpop.eup %4685 }
 0x492   :  { %v2704_v13 = vadd.f32 -0.28449672, %v2700_v7  ;;  %v2699_v20 = vmul.f32 %v4678_v5, %v2695_v19  ;;  %v2698_v41 = vadd.f32 1.4214138, %v2694_v17  ;;  %v2660_v17 = vsel %vm2656_vm5, 1.0, %v6427_v6 }
 0x493   :  { %v2693_v26 = vmul.f32 %v4682_v45, %v2689_v24 }
 0x494   :  { %v2708_v4 = vmul.f32 %v4676_v21, %v2704_v13  ;;  %v2703_v47 = vadd.f32 -0.28449672, %v2699_v20  ;;  %v2702_v9 = vmul.f32 %v4680_v38, %v2698_v41 }
 0x495   :  { %v2697_v35 = vadd.f32 1.4214138, %v2693_v26 }
 0x496   :  { %v2712_v1 = vadd.f32 0.2548296, %v2708_v4  ;;  %v2707_v40 = vmul.f32 %v4678_v5, %v2703_v47  ;;  %v2706_v25 = vadd.f32 -0.28449672, %v2702_v9 }
 0x497   :  { %v2701_v28 = vmul.f32 %v4682_v45, %v2697_v35 }
 0x498   :  { %v2716_v22 = vmul.f32 %v4676_v21, %v2712_v1  ;;  %v2711_v0 = vadd.f32 0.2548296, %v2707_v40  ;;  %v2710_v58 = vmul.f32 %v4680_v38, %v2706_v25  ;;  %v4688_v21 = vpop.eup %4687  ;;  %v2648_v40 = vmul.f32 0.5, %v6046_v30 }
 0x499   :  { %v2705_v49 = vadd.f32 -0.28449672, %v2701_v28  ;;  %v4690_v9 = vpop.eup %4689  ;;  %v2647_v25 = vmul.f32 0.5, %v6055_v63  ;;  %v2649_v30 = vmul.f32 0.5, %v6076_v15 }
 0x49a   :  { %v2736_v33 = vmul.f32 %v4684_v23, %v2716_v22  ;;  %v2715_v29 = vmul.f32 %v4678_v5, %v2711_v0  ;;  %v2714_v7 = vadd.f32 0.2548296, %v2710_v58  ;;  %v2659_v5 = vsel %vm2655_vm6, 1.0, %v6427_v6 }
 0x49b   :  { %v2709_v10 = vmul.f32 %v4682_v45, %v2705_v49 }
 0x49c   :  { %v2740_v19 = vsub.f32 1.0, %v2736_v33  ;;  %v2735_v13 = vmul.f32 %v4686_v2, %v2715_v29  ;;  %v2718_v24 = vmul.f32 %v4680_v38, %v2714_v7  ;;  %v2650_v33 = vmul.f32 0.5, %v6067_v18 }
 0x49d   :  { %v2713_v41 = vadd.f32 0.2548296, %v2709_v10 }
 0x49e   :  { %v2744_v20 = vmul.f32 %v2740_v19, %v2660_v17  ;;  %v2739_v4 = vsub.f32 1.0, %v2735_v13  ;;  %v2738_v14 = vmul.f32 %v4688_v21, %v2718_v24 }
 0x49f   :  { %v2717_v47 = vmul.f32 %v4682_v45, %v2713_v41  ;;  %v2661_v45 = vsel %vm2657_vm8, 1.0, %v6427_v6 }
 0x4a0   :  { %v2748_v26 = vadd.f32 1.0, %v2744_v20  ;;  %v2743_v1 = vmul.f32 %v2739_v4, %v2659_v5  ;;  %v2742_v35 = vsub.f32 1.0, %v2738_v14 }
 0x4a1   :  { %v2737_v38 = vmul.f32 %v4690_v9, %v2717_v47 }
 0x4a2   :  { %v2747_v22 = vadd.f32 1.0, %v2743_v1  ;;  %v2746_v28 = vmul.f32 %v2742_v35, %v2662_v62  ;;  %v2752_v44 = vmul.f32 %v2748_v26, %v2648_v40 }
 0x4a3   :  { %v2741_v23 = vsub.f32 1.0, %v2737_v38 }
 0x4a4   :  { %v2751_v0 = vmul.f32 %v2747_v22, %v2647_v25  ;;  %v2750_v58 = vadd.f32 1.0, %v2746_v28  ;;  %v2772_v7 = vmul.f32 %v2752_v44, %v2752_v44  ;;  %v2758_v63 = vsel %vm247_vm4, %v2752_v44, 0.0 }
 0x4a5   :  { %v2745_v49 = vmul.f32 %v2741_v23, %v2661_v45 }
 0x4a6   :  { %v2771_v29 = vmul.f32 %v2751_v0, %v2751_v0  ;;  %v2757_v43 = vsel %vm247_vm4, %v2751_v0, 0.0  ;;  %v2754_v2 = vmul.f32 %v2750_v58, %v2650_v33  ;;  %v2776_v24 = vsel %vm247_vm4, %v2772_v7, 0.0 }
 0x4a7   :  { %v2749_v19 = vadd.f32 1.0, %v2745_v49  ;;  %v2759_v13 = vadd.f32 %v2758_v63, %v2757_v43  ;;  %v2755_v43 = vld [vmem:[%s6282_s1 + $0xa3] sm:$0x1] }
 0x4a8   :  { %v2775_v10 = vsel %vm247_vm4, %v2771_v29, 0.0  ;;  %v2774_v6 = vmul.f32 %v2754_v2, %v2754_v2  ;;  %v2762_v15 = vsel %vm247_vm4, %v2754_v2, 0.0 }
 0x4a9   :  { %v2753_v17 = vmul.f32 %v2749_v19, %v2649_v30  ;;  %v2777_v20 = vadd.f32 %v2776_v24, %v2775_v10  ;;  %v2756_v10 = vld [vmem:[%s6282_s1 + $0xa5] sm:$0x1] }
 0x4aa   :  { %v2780_v5 = vsel %vm247_vm4, %v2774_v6, 0.0 }
 0x4ab   :  { %v2760_v18 = vsel %vm247_vm4, %v2753_v17, 0.0  ;;  %v2773_v21 = vmul.f32 %v2753_v17, %v2753_v17 }
 0x4ac   :  { %v2761_v41 = vadd.f32 %v2760_v18, %v2759_v13 }
 0x4ad   :  { %v2778_v4 = vsel %vm247_vm4, %v2773_v21, 0.0 }
 0x4ae   :  { %v2763_v14 = vadd.f32 %v2762_v15, %v2761_v41  ;;  %v2779_v26 = vadd.f32 %v2778_v4, %v2777_v20 }
 0x4b0   :  { %v2764_v47 = vrot.slane %v2763_v14, 4  ;;  %v2781_v9 = vadd.f32 %v2780_v5, %v2779_v26 }
 0x4b2   :  { %v2765_v1 = vadd.f32 %v2764_v47, %v2763_v14  ;;  %v2782_v35 = vrot.slane %v2781_v9, 4 }
 0x4b4   :  { %v2766_v40 = vrot.slane %v2765_v1, 2  ;;  %v2783_v62 = vadd.f32 %v2782_v35, %v2781_v9 }
 0x4b6   :  { %v2767_v38 = vadd.f32 %v2766_v40, %v2765_v1  ;;  %v2784_v25 = vrot.slane %v2783_v62, 2 }
 0x4b8   :  { %v2768_v22 = vrot.slane %v2767_v38, 1  ;;  %v2785_v28 = vadd.f32 %v2784_v25, %v2783_v62 }
 0x4ba   :  { %v2769_v23 = vadd.f32 %v2768_v22, %v2767_v38  ;;  %v2786_v58 = vrot.slane %v2785_v28, 1 }
 0x4bc   :  { %v2770_v45 = vmul.f32 0.03125, %v2769_v23  ;;  %v2787_v33 = vadd.f32 %v2786_v58, %v2785_v28 }
 0x4be   :  { %v2788_v49 = vmul.f32 0.03125, %v2787_v33  ;;  %v2789_v29 = vmul.f32 %v2770_v45, %v2770_v45 }
 0x4c0   :  { %v2790_v30 = vsub.f32 %v2788_v49, %v2789_v29 }
 0x4c2   :  { %v2791_v7 = vadd.f32 1e-05, %v2790_v30 }
 0x4c4   :  { %4691 = vrsqrt.f32 %v2791_v7 }
 0x4d1   :  { %v4692_v19 = vpop.eup %4691 }
 0x4d2   :  { %v2793_v63 = vmul.f32 %v4692_v19, %v2755_v43 }
 0x4d4   :  { %v2794_v13 = vmul.f32 %v2793_v63, %v2770_v45  ;;  %v2799_v24 = vrot.slane %v2793_v63, %v6428_v53 }
 0x4d6   :  { %v2795_v6 = vsub.f32 %v2756_v10, %v2794_v13  ;;  %v2800_v18 = vmul.f32 %v2799_v24, %v2751_v0  ;;  %v2801_v21 = vmul.f32 %v2799_v24, %v2752_v44  ;;  %v2802_v20 = vmul.f32 %v2799_v24, %v2753_v17 }
 0x4d7   :  { %v2803_v41 = vmul.f32 %v2799_v24, %v2754_v2 }
 0x4d8   :  { %v2807_v15 = vrot.slane %v2795_v6, %v6428_v53 }
 0x4da   :  { %v2810_v4 = vadd.f32 %v2807_v15, %v2802_v20  ;;  %v2811_v14 = vadd.f32 %v2807_v15, %v2803_v41  ;;  %v2808_v26 = vadd.f32 %v2807_v15, %v2800_v18  ;;  %v2809_v5 = vadd.f32 %v2807_v15, %v2801_v21 }
 0x4dc   :  { %v2821_v47 = vsel %vm247_vm4, %v2810_v4, 0.0  ;;  %v2822_v9 = vsel %vm247_vm4, %v2811_v14, 0.0  ;;  %v2812_v1 = vsel %vm247_vm4, %v2808_v26, 0.0  ;;  %v2813_v35 = vsel %vm247_vm4, %v2809_v5, 0.0 }
 0x4dd   :  { %v2823_v40 = vadd.f32 %v2822_v9, %v2821_v47  ;;  %v2814_v62 = vadd.f32 %v2813_v35, %v2812_v1 }
 0x4df   :  { %v2824_v0 = vrot.slane %v2823_v40, 4  ;;  %v2815_v44 = vrot.slane %v2814_v62, 4 }
 0x4e1   :  { %v2825_v17 = vadd.f32 %v2824_v0, %v2823_v40  ;;  %v2816_v2 = vadd.f32 %v2815_v44, %v2814_v62 }
 0x4e3   :  { %v2826_v38 = vrot.slane %v2825_v17, 2  ;;  %v2817_v25 = vrot.slane %v2816_v2, 2 }
 0x4e5   :  { %v2827_v22 = vadd.f32 %v2826_v38, %v2825_v17  ;;  %v2818_v28 = vadd.f32 %v2817_v25, %v2816_v2 }
 0x4e7   :  { %v2819_v23 = vrot.slane %v2818_v28, 1  ;;  %v2828_v58 = vrot.slane %v2827_v22, 1 }
 0x4e9   :  { %v2820_v45 = vadd.f32 %v2819_v23, %v2818_v28  ;;  %v2829_v33 = vadd.f32 %v2828_v58, %v2827_v22 }
 0x4eb   :  { %v2831_v49 = vmul.f32 0.0625, %v2820_v45  ;;  %v2832_v29 = vmul.f32 0.0625, %v2829_v33  ;;  %v3389_v45 = vld [vmem:[%s6282_s1 + $0xe9] sm:$0x1] }
 0x4ed   :  { %v2849_v30 = vsel %vm2848_vm9, %v2832_v29, %v2831_v49  ;;  %v3390_v29 = vld [vmem:[%s6282_s1 + $0xea] sm:$0x1] }
 0x4ee   :  { %v2850_v7 = vsel %vm247_vm4, %v2849_v30, 0  ;;  %vm3391_vm4 = vcmask 123904  }
 0x4ef   :  { %v6120_v43 = vand.u32 4294901760, %v2850_v7 }
 0x4f1   :  { %v2926_v19 = vsub.f32 %v2850_v7, %v6120_v43  ;;  %4428 = vmatmul.mubr.f32.vlgmr.msra.gmra.mxu1 %v6120_v43 }
 0x4f2   :  { %4450 = vmatpush3.msra.mxu1 %v5929_v51  ;;  %4465 = vmatprep.mubr.msk.f32.mxu1 %vm4709_vm3, %v4708_v60 }
 0x4f3   :  { %4451 = vmatprep.subr.mxu1 %v4708_v60  ;;  %v2927_v63 = vand.u32 4294901760, %v2926_v19 }
 0x4f4   :  { %4452 = vmatpush3.msra.mxu1 %v5939_v34 }
 0x4f5   :  { %4453 = vmatprep.subr.mxu1 %v4708_v60  ;;  %v2928_v10 = vsub.f32 %v2926_v19, %v2927_v63 }
 0x4f6   :  { %4454 = vmatpush3.msra.mxu1 %v5948_v32 }
 0x4f7   :  { %4455 = vmatprep.subr.mxu1 %v4708_v60  ;;  %v2929_v13 = vand.u32 4294901760, %v2928_v10 }
 0x4f8   :  { %4456 = vmatpush3.msra.mxu1 %v5962_v37 }
 0x4f9   :  { %4457 = vmatprep.subr.mxu1 %v4708_v60  ;;  %4409 = vmatmul.mubr.f32.vlgmr.msra.gmra.mxu0 %v2929_v13 }
 0x4fa   :  { %4431 = vmatpush3.msra.mxu0 %v5937_v39  ;;  %4458 = vmatpush3.msra.mxu1 %v5985_v36 }
 0x4fb   :  { %4432 = vmatprep.subr.mxu0 %v4708_v60  ;;  %4459 = vmatprep.subr.mxu1 %v4708_v60 }
 0x4fc   :  { %4433 = vmatpush3.msra.mxu0 %v5946_v48  ;;  %4460 = vmatpush3.msra.mxu1 %v5987_v55 }
 0x4fd   :  { %4434 = vmatprep.subr.mxu0 %v4708_v60  ;;  %4461 = vmatprep.subr.mxu1 %v4708_v60 }
 0x4fe   :  { %4435 = vmatpush3.msra.mxu0 %v5960_v56  ;;  %4462 = vmatpush3.msra.mxu1 %v5989_v59 }
 0x4ff   :  { %4436 = vmatprep.subr.mxu0 %v4708_v60  ;;  %4463 = vmatprep.subr.mxu1 %v4708_v60 }
 0x500   :  { %4437 = vmatpush3.msra.mxu0 %v5982_v42  ;;  %4464 = vmatpush3.msra.mxu1 %v5997_v8 }
 0x501   :  { %4438 = vmatprep.subr.mxu0 %v4708_v60  ;;  %4466 = vmatmul.mubr.f32.vlgmr.msra.gmra.mxu1 %v2927_v63 }
 0x502   :  { %4487 = vmatprep.subr.mxu1 %v4708_v60  ;;  %4439 = vmatpush3.msra.mxu0 %v6002_v27 }
 0x503   :  { %4488 = vmatpush3.msra.mxu1 %v5929_v51  ;;  %4440 = vmatprep.subr.mxu0 %v4708_v60  ;;  %v3428_v51 = vld [vmem:[%s6282_s1 + $0xf8] sm:$0xff] }
 0x504   :  { %4489 = vmatprep.subr.mxu1 %v4708_v60  ;;  %4441 = vmatpush3.msra.mxu0 %v6006_v54  ;;  %v6213_v39 = vand.u32 4294901760, %v3428_v51 }
 0x505   :  { %4490 = vmatpush3.msra.mxu1 %v5939_v34  ;;  %4442 = vmatprep.subr.mxu0 %v4708_v60  ;;  %v3427_v34 = vld [vmem:[%s6282_s1 + $0xf0] sm:$0xff] }
 0x506   :  { %4491 = vmatprep.subr.mxu1 %v4708_v60  ;;  %4443 = vmatpush3.msra.mxu0 %v6009_v61  ;;  %v6221_v48 = vand.u32 4294901760, %v3427_v34 }
 0x507   :  { %4492 = vmatpush3.msra.mxu1 %v5948_v32  ;;  %4444 = vmatprep.subr.mxu0 %v4708_v60 }
 0x508   :  { %4493 = vmatprep.subr.mxu1 %v4708_v60  ;;  %4445 = vmatpush3.msra.mxu0 %v6013_v57 }
 0x509   :  { %4446 = vmatprep.mubr.msk.f32.mxu0 %vm4709_vm3, %v4708_v60  ;;  %4494 = vmatpush3.msra.mxu1 %v5962_v37 }
 0x50a   :  { %4447 = vmatmul.mubr.f32.vlgmr.msra.gmra.mxu0 %v2926_v19  ;;  %4468 = vmatprep.subr.mxu0 %v4708_v60 }
 0x50b   :  { %4495 = vmatprep.subr.mxu1 %v4708_v60  ;;  %4469 = vmatpush3.msra.mxu0 %v2954_v46  ;;  %v6219_v46 = vsub.f32 %v3428_v51, %v6213_v39 }
 0x50c   :  { %4496 = vmatpush3.msra.mxu1 %v5985_v36  ;;  %4470 = vmatprep.subr.mxu0 %v4708_v60 }
 0x50d   :  { %4497 = vmatprep.subr.mxu1 %v4708_v60  ;;  %4471 = vmatpush3.msra.mxu0 %v2961_v3  ;;  %v3546_v32 = vand.u32 4294901760, %v6219_v46  ;;  %v6227_v3 = vsub.f32 %v3427_v34, %v6221_v48 }
 0x50e   :  { %4498 = vmatpush3.msra.mxu1 %v5987_v55  ;;  %4472 = vmatprep.subr.mxu0 %v4708_v60 }
 0x50f   :  { %4499 = vmatprep.subr.mxu1 %v4708_v60  ;;  %4473 = vmatpush3.msra.mxu0 %v2968_v52  ;;  %v3547_v56 = vsub.f32 %v6219_v46, %v3546_v32  ;;  %v3553_v37 = vand.u32 4294901760, %v6227_v3 }
 0x510   :  { %4500 = vmatpush3.msra.mxu1 %v5989_v59  ;;  %4474 = vmatprep.subr.mxu0 %v4708_v60 }
 0x511   :  { %4501 = vmatprep.subr.mxu1 %v4708_v60  ;;  %4475 = vmatpush3.msra.mxu0 %v2975_v16  ;;  %v3548_v52 = vand.u32 4294901760, %v3547_v56  ;;  %v3554_v42 = vsub.f32 %v6227_v3, %v3553_v37 }
 0x512   :  { %4502 = vmatpush3.msra.mxu1 %v5997_v8  ;;  %4503 = vmatprep.mubr.msk.f32.mxu1 %vm4709_vm3, %v4708_v60 }
 0x513   :  { %4476 = vmatprep.subr.mxu0 %v4708_v60  ;;  %4504 = vmatmul.mubr.f32.vlgmr.msra.gmra.mxu1 %v6120_v43  ;;  %v3555_v36 = vand.u32 4294901760, %v3554_v42 }
 0x514   :  { %4477 = vmatpush3.msra.mxu0 %v2982_v11  ;;  %4484 = vmatprep.mubr.msk.f32.mxu0 %vm4709_vm3, %v4708_v60  ;;  %v3910_v11 = vld [vmem:[%s6282_s1 + $0xe8] ss:$0 sm:$0xff] }
 0x515   :  { %4478 = vmatprep.subr.mxu0 %v4708_v60  ;;  %4513 = vmatprep.subr.mxu1 %v4708_v60 }
 0x516   :  { %4479 = vmatpush3.msra.mxu0 %v2989_v50  ;;  %4517 = vmatprep.mubr.msk.f32.mxu1 %vm4709_vm3, %v4708_v60 }
 0x517   :  { %4480 = vmatprep.subr.mxu0 %v4708_v60  ;;  %4514 = vmatpush3.msra.mxu1 %v3548_v52 }
 0x518   :  { %4481 = vmatpush3.msra.mxu0 %v2996_v12  ;;  %4515 = vmatprep.subr.mxu1 %v4708_v60 }
 0x519   :  { %4482 = vmatprep.subr.mxu0 %v4708_v60  ;;  %4516 = vmatpush3.msra.mxu1 %v3555_v36 }
 0x51a   :  { %4483 = vmatpush3.msra.mxu0 %v3003_v31  ;;  %4527 = vmatprep.subr.mxu1 %v4708_v60 }
 0x51b   :  { %4485 = vmatmul.mubr.f32.vlgmr.msra.gmra.mxu0 %v6120_v43  ;;  %4506 = vmatprep.subr.mxu0 %v4708_v60 }
 0x51c   :  { %4510 = vmatprep.mubr.msk.f32.mxu0 %vm4709_vm3, %v4708_v60  ;;  %4507 = vmatpush3.msra.mxu0 %v6213_v39 }
 0x51d   :  { %4508 = vmatprep.subr.mxu0 %v4708_v60 }
 0x51e   :  { %4509 = vmatpush3.msra.mxu0 %v6221_v48 }
 0x51f   :  { %4520 = vmatprep.subr.mxu0 %v4708_v60 }
 0x5b1   :  { %v3042_v55 = vpop.f32.mrf.mxu1 }
 0x5b3   :  { %v4429_v59 = vpop.f32.mrf.mxu1 }
 0x5b9   :  { %v2931_v8 = vpop.f32.mrf.mxu0 }
 0x5ba   :  { %v2932_v50 = vadd.f32 %v3910_v11, %v2931_v8 }
 0x5bb   :  { %v4410_v16 = vpop.f32.mrf.mxu0 }
 0x5bc   :  { %v3043_v31 = vadd.f32 %v3042_v55, %v2932_v50  ;;  %v3911_v55 = vld [vmem:[%s6282_s1 + $0x100] ss:$0 sm:$0xff] }
 0x5c1   :  { %v3211_v27 = vpop.f32.mrf.mxu1 }
 0x5c3   :  { %v4467_v54 = vpop.f32.mrf.mxu1 }
 0x5ca   :  { %v3130_v61 = vpop.f32.mrf.mxu0 }
 0x5cb   :  { %v3131_v6 = vadd.f32 %v3130_v61, %v3043_v31 }
 0x5cc   :  { %v4448_v57 = vpop.f32.mrf.mxu0 }
 0x5cd   :  { %v3212_v18 = vadd.f32 %v3211_v27, %v3131_v6 }
 0x5d3   :  { %v3385_v12 = vpop.f32.mrf.mxu1 }
 0x5d5   :  { %v4505_v24 = vpop.f32.mrf.mxu1 }
 0x5db   :  { %v3306_v21 = vpop.f32.mrf.mxu0 }
 0x5dc   :  { %v3307_v20 = vadd.f32 %v3306_v21, %v3212_v18 }
 0x5dd   :  { %v4486_v41 = vpop.f32.mrf.mxu0 }
 0x5de   :  { %v3386_v15 = vadd.f32 %v3385_v12, %v3307_v20 }
 0x5e0   :  { %v3392_v4 = vsel %vm3391_vm4, %v3386_v15, 0.0  ;;  %v3401_v14 = vmul.f32 %v3386_v15, %v3386_v15 }
 0x5e1   :  { %v3393_v26 = vrot.slane %v3392_v4, 4 }
 0x5e2   :  { %v3402_v5 = vsel %vm3391_vm4, %v3401_v14, 0.0 }
 0x5e3   :  { %v3394_v47 = vadd.f32 %v3393_v26, %v3392_v4  ;;  %v3403_v9 = vrot.slane %v3402_v5, 4 }
 0x5e5   :  { %v3395_v1 = vrot.slane %v3394_v47, 2  ;;  %v3404_v35 = vadd.f32 %v3403_v9, %v3402_v5 }
 0x5e7   :  { %v3396_v40 = vadd.f32 %v3395_v1, %v3394_v47  ;;  %v3405_v62 = vrot.slane %v3404_v35, 2 }
 0x5e9   :  { %v3397_v0 = vrot.slane %v3396_v40, 1  ;;  %v3406_v44 = vadd.f32 %v3405_v62, %v3404_v35 }
 0x5eb   :  { %v3398_v17 = vadd.f32 %v3397_v0, %v3396_v40  ;;  %v3407_v2 = vrot.slane %v3406_v44, 1 }
 0x5ed   :  { %v3400_v38 = vmul.f32 0.5, %v3398_v17  ;;  %v3408_v25 = vadd.f32 %v3407_v2, %v3406_v44 }
 0x5ef   :  { %v3409_v22 = vmul.f32 0.5, %v3408_v25  ;;  %v3410_v28 = vmul.f32 %v3400_v38, %v3400_v38 }
 0x5f1   :  { %v3411_v23 = vsub.f32 %v3409_v22, %v3410_v28 }
 0x5f3   :  { %v3412_v58 = vadd.f32 1e-05, %v3411_v23 }
 0x5f5   :  { %4693 = vrsqrt.f32 %v3412_v58 }
 0x602   :  { %v4694_v33 = vpop.eup %4693 }
 0x603   :  { %v3414_v49 = vmul.f32 %v4694_v33, %v3389_v45 }
 0x605   :  { %v3415_v30 = vmul.f32 %v3414_v49, %v3400_v38  ;;  %v3420_v7 = vrot.slane %v3414_v49, %v6428_v53 }
 0x607   :  { %v3416_v43 = vsub.f32 %v3390_v29, %v3415_v30  ;;  %v3421_v19 = vmul.f32 %v3420_v7, %v3386_v15 }
 0x609   :  { %v3425_v63 = vrot.slane %v3416_v43, %v6428_v53 }
 0x60b   :  { %v3426_v10 = vadd.f32 %v3425_v63, %v3421_v19 }
 0x60d   :  { %v3436_v13 = vsel %vm3434_vm10, %v3426_v10, 0 }
 0x60e   :  { %v3505_v51 = vand.u32 4294901760, %v3436_v13 }
 0x610   :  { %v3506_v34 = vsub.f32 %v3436_v13, %v3505_v51  ;;  %4518 = vmatmul.mubr.f32.vlgmr.msra.gmra.mxu1 %v3505_v51 }
 0x611   :  { %4528 = vmatpush3.msra.mxu1 %v6213_v39  ;;  %4531 = vmatprep.mubr.msk.f32.mxu1 %vm4709_vm3, %v4708_v60 }
 0x612   :  { %4529 = vmatprep.subr.mxu1 %v4708_v60  ;;  %v3507_v56 = vand.u32 4294901760, %v3506_v34 }
 0x613   :  { %4530 = vmatpush3.msra.mxu1 %v6221_v48 }
 0x614   :  { %4532 = vmatmul.mubr.f32.vlgmr.msra.gmra.mxu1 %v3507_v56  ;;  %4541 = vmatprep.subr.mxu1 %v4708_v60  ;;  %v3508_v53 = vsub.f32 %v3506_v34, %v3507_v56 }
 0x615   :  { %4542 = vmatpush3.msra.mxu1 %v6213_v39  ;;  %4545 = vmatprep.mubr.msk.f32.mxu1 %vm4709_vm3, %v4708_v60 }
 0x616   :  { %4543 = vmatprep.subr.mxu1 %v4708_v60  ;;  %v3509_v52 = vand.u32 4294901760, %v3508_v53 }
 0x617   :  { %4544 = vmatpush3.msra.mxu1 %v6221_v48 }
 0x618   :  { %4511 = vmatmul.mubr.f32.vlgmr.msra.gmra.mxu0 %v3509_v52  ;;  %4546 = vmatmul.mubr.f32.vlgmr.msra.gmra.mxu1 %v3505_v51 }
 0x619   :  { %4521 = vmatpush3.msra.mxu0 %v6219_v46  ;;  %4524 = vmatprep.mubr.msk.f32.mxu0 %vm4709_vm3, %v4708_v60 }
 0x61a   :  { %4522 = vmatprep.subr.mxu0 %v4708_v60 }
 0x61b   :  { %4523 = vmatpush3.msra.mxu0 %v6227_v3 }
 0x61c   :  { %4534 = vmatprep.subr.mxu0 %v4708_v60  ;;  %4525 = vmatmul.mubr.f32.vlgmr.msra.gmra.mxu0 %v3506_v34 }
 0x61d   :  { %4535 = vmatpush3.msra.mxu0 %v3546_v32  ;;  %4538 = vmatprep.mubr.msk.f32.mxu0 %vm4709_vm3, %v4708_v60 }
 0x61e   :  { %4536 = vmatprep.subr.mxu0 %v4708_v60 }
 0x61f   :  { %4537 = vmatpush3.msra.mxu0 %v3553_v37 }
 0x620   :  { %4539 = vmatmul.mubr.f32.vlgmr.msra.gmra.mxu0 %v3505_v51 }
 0x6d0   :  { %v3592_v39 = vpop.f32.mrf.mxu1 }
 0x6d2   :  { %v4519_v48 = vpop.f32.mrf.mxu1 }
 0x6d4   :  { %v3743_v42 = vpop.f32.mrf.mxu1 }
 0x6d6   :  { %v4533_v36 = vpop.f32.mrf.mxu1 }
 0x6d8   :  { %v3511_v59 = vpop.f32.mrf.mxu0  ;;  %v3893_v46 = vpop.f32.mrf.mxu1 }
 0x6d9   :  { %v3512_v32 = vadd.f32 %v3911_v55, %v3511_v59 }
 0x6da   :  { %v4512_v8 = vpop.f32.mrf.mxu0  ;;  %v4547_v16 = vpop.f32.mrf.mxu1 }
 0x6db   :  { %v3593_v27 = vadd.f32 %v3592_v39, %v3512_v32 }
 0x6dc   :  { %v3668_v54 = vpop.f32.mrf.mxu0 }
 0x6dd   :  { %v3669_v60 = vadd.f32 %v3668_v54, %v3593_v27 }
 0x6de   :  { %v4526_v61 = vpop.f32.mrf.mxu0 }
 0x6df   :  { %v3744_v3 = vadd.f32 %v3743_v42, %v3669_v60 }
 0x6e0   :  { %v3820_v37 = vpop.f32.mrf.mxu0 }
 0x6e1   :  { %v3821_v57 = vadd.f32 %v3820_v37, %v3744_v3 }
 0x6e2   :  { %v4540_v11 = vpop.f32.mrf.mxu0 }
 0x6e3   :  { %v3894_v50 = vadd.f32 %v3893_v46, %v3821_v57 }
 0x6e5   :  { %3898 = vst.msk [vmem:[%s6283_s2] sm:$0x3] %vm3897_vm11, %v3894_v50 }

// kernel: conv_mixer_forward.1
= control target key start
LH: loop header
LB: loop body
LE: loop exit
PB: predicated region body
PF: predicated region fallthrough
CT: control target
= control target key end

     0   :  { %v4719_v0 = vmov 0   ;;  %v4720_v4 = vmov 1   ;;  %v4721_v6 = vmov 2   ;;  %v4722_v7 = vmov 3   ;;  %s6288_s0 = inlined_call_operand.vmem [shape: f32[32,13], index: 0, kind: input, shape index: {}]   ;;  %s6289_s1 = inlined_call_operand.vmem [shape: f32[264,64], index: 1, kind: input, shape index: {}]   ;;  %s6290_s2 = inlined_call_operand.vmem [shape: f32[2,32], index: 2, kind: output, shape index: {}]  }
   0x1   :  { %4588 = vset.pattern.permute.xlu1 %v4719_v0  ;;  %4587 = vset.pattern.permute.xlu0 %v4719_v0  ;;  %v4752_v1 = vld [vmem:[%s6288_s0 + $0x10] sm:$0xff]  ;;  %v4757_v2 = vld [vmem:[%s6288_s0] sm:$0xff]  ;;  %v4764_v3 = vld [vmem:[%s6288_s0 + $0x8] sm:$0xff]  ;;  %v4723_v8 = vmov 4   ;;  %v4724_v9 = vmov 5   ;;  %v4725_v10 = vmov 6   ;;  %v37_v16 = vlaneseq }
   0x2   :  { %29 = vperm.xlu1 %4588, %v4752_v1   ;;  %19 = vperm.xlu0 %4587, %v4757_v2   ;;  %v4771_v5 = vld [vmem:[%s6288_s0 + $0x18] sm:$0xff]  ;;  %v4726_v11 = vmov 7   ;;  %v4727_v12 = vmov 9   ;;  %v4728_v13 = vmov 10   ;;  %v4729_v14 = vmov 11  }
   0x3   :  { %v4730_v15 = vmov 12   ;;  %v4813_v19 = vshrl.u32 %v37_v16, 7  ;;  %v15_v23 = vld [vmem:[%s6289_s1] sm:$0xf]  ;;  %v3927_v30 = vld [vmem:[%s6289_s1 + $0x4] ss:$0 sm:$0xff] }
   0x4   :  { %vm247_vm4 = vcmask 523264   ;;  %vm444_vm5 = vcmask 1040384   ;;  %vm494_vm6 = vcmask 1046528  }
   0x5   :  { %6396 = vst [vmem:[#allocation2_spill] sm:$0xff] %v4813_v19  ;;  %v4817_v21 = vsub.s32 0, %v4813_v19  ;;  %v4825_v25 = vsub.s32 1, %v4813_v19  ;;  %v4833_v34 = vsub.s32 2, %v4813_v19  ;;  %v4837_v36 = vsub.s32 3, %v4813_v19 }
   0x6   :  { %4589 = vset.pattern.permute.xlu1 %v4720_v4  ;;  %24 = vperm.xlu0 %4587, %v4764_v3  }
   0x7   :  { %54 = vperm.xlu1 %4589, %v4757_v2   ;;  %v40_v24 = vrot.slane %v15_v23, %v4817_v21  ;;  %6397 = vst [vmem:[#allocation3_spill] sm:$0xff] %v4825_v25  ;;  %v72_v29 = vrot.slane %v15_v23, %v4825_v25  ;;  %6398 = vst [vmem:[#allocation4_spill] sm:$0xff] %v4833_v34  ;;  %v100_v39 = vrot.slane %v15_v23, %v4833_v34 }
   0x8   :  { %6399 = vst [vmem:[#allocation5_spill] sm:$0xff] %v4837_v36  ;;  %v128_v41 = vrot.slane %v15_v23, %v4837_v36 }
   0xa   :  { %4590 = vset.pattern.permute.xlu0 %v4720_v4 }
   0xb   :  { %4591 = vset.pattern.permute.xlu1 %v4719_v0  ;;  %58 = vperm.xlu0 %4590, %v4764_v3  }
   0xc   :  { %34 = vperm.xlu1 %4591, %v4771_v5  }
   0xf   :  { %4593 = vset.pattern.permute.xlu0 %v4721_v6 }
  0x10   :  { %4592 = vset.pattern.permute.xlu1 %v4720_v4  ;;  %82 = vperm.xlu0 %4593, %v4757_v2  }
  0x11   :  { %62 = vperm.xlu1 %4592, %v4752_v1  }
  0x14   :  { %90 = vperm.xlu0 %4593, %v4752_v1  }
  0x15   :  { %4594 = vset.pattern.permute.xlu1 %v4721_v6 }
  0x16   :  { %86 = vperm.xlu1 %4594, %v4764_v3  }
  0x18   :  { %4597 = vset.pattern.permute.xlu0 %v4722_v7 }
  0x19   :  { %114 = vperm.xlu0 %4597, %v4764_v3  }
  0x1a   :  { %4595 = vset.pattern.permute.xlu1 %v4720_v4 }
  0x1b   :  { %66 = vperm.xlu1 %4595, %v4771_v5  }
  0x1d   :  { %122 = vperm.xlu0 %4597, %v4771_v5  }
  0x1f   :  { %4596 = vset.pattern.permute.xlu1 %v4722_v7 }
  0x20   :  { %110 = vperm.xlu1 %4596, %v4757_v2  }
  0x21   :  { %4601 = vset.pattern.permute.xlu0 %v4723_v8 }
  0x22   :  { %309 = vperm.xlu0 %4601, %v4764_v3  }
  0x24   :  { %4598 = vset.pattern.permute.xlu1 %v4721_v6 }
  0x25   :  { %94 = vperm.xlu1 %4598, %v4771_v5  }
  0x26   :  { %4603 = vset.pattern.permute.xlu0 %v4724_v9 }
  0x27   :  { %325 = vperm.xlu0 %4603, %v4764_v3  }
  0x29   :  { %4599 = vset.pattern.permute.xlu1 %v4722_v7 }
  0x2a   :  { %118 = vperm.xlu1 %4599, %v4752_v1  }
  0x2b   :  { %4606 = vset.pattern.permute.xlu0 %v4725_v10 }
  0x2c   :  { %337 = vperm.xlu0 %4606, %v4757_v2  }
  0x2e   :  { %4600 = vset.pattern.permute.xlu1 %v4723_v8 }
  0x2f   :  { %305 = vperm.xlu1 %4600, %v4757_v2  }
  0x30   :  { %345 = vperm.xlu0 %4606, %v4752_v1  }
  0x33   :  { %313 = vperm.xlu1 %4600, %v4752_v1  }
  0x34   :  { %4610 = vset.pattern.permute.xlu0 %v4726_v11 }
  0x35   :  { %357 = vperm.xlu0 %4610, %v4764_v3  }
  0x37   :  { %4602 = vset.pattern.permute.xlu1 %v4724_v9 }
  0x38   :  { %321 = vperm.xlu1 %4602, %v4757_v2  }
  0x39   :  { %4613 = vset.pattern.permute.xlu0 %v4727_v12 }
  0x3a   :  { %369 = vperm.xlu0 %4613, %v4757_v2  }
  0x3c   :  { %4604 = vset.pattern.permute.xlu1 %v4723_v8 }
  0x3d   :  { %317 = vperm.xlu1 %4604, %v4771_v5  }
  0x3e   :  { %377 = vperm.xlu0 %4613, %v4752_v1  }
  0x41   :  { %4605 = vset.pattern.permute.xlu1 %v4724_v9 }
  0x42   :  { %329 = vperm.xlu1 %4605, %v4752_v1   ;;  %4617 = vset.pattern.permute.xlu0 %v4728_v13 }
  0x43   :  { %389 = vperm.xlu0 %4617, %v4764_v3  }
  0x46   :  { %4607 = vset.pattern.permute.xlu1 %v4725_v10 }
  0x47   :  { %341 = vperm.xlu1 %4607, %v4764_v3   ;;  %4620 = vset.pattern.permute.xlu0 %v4729_v14 }
  0x48   :  { %401 = vperm.xlu0 %4620, %v4757_v2  }
  0x4b   :  { %4608 = vset.pattern.permute.xlu1 %v4724_v9 }
  0x4c   :  { %333 = vperm.xlu1 %4608, %v4771_v5   ;;  %409 = vperm.xlu0 %4620, %v4752_v1  }
  0x50   :  { %4609 = vset.pattern.permute.xlu1 %v4726_v11  ;;  %4624 = vset.pattern.permute.xlu0 %v4730_v15 }
  0x51   :  { %353 = vperm.xlu1 %4609, %v4757_v2   ;;  %421 = vperm.xlu0 %4624, %v4764_v3  }
  0x55   :  { %4611 = vset.pattern.permute.xlu1 %v4725_v10  ;;  %429 = vperm.xlu0 %4624, %v4771_v5  }
  0x56   :  { %349 = vperm.xlu1 %4611, %v4771_v5  }
  0x5a   :  { %4612 = vset.pattern.permute.xlu1 %v4726_v11 }
  0x5b   :  { %361 = vperm.xlu1 %4612, %v4752_v1  }
  0x5f   :  { %4614 = vset.pattern.permute.xlu1 %v4727_v12 }
  0x60   :  { %373 = vperm.xlu1 %4614, %v4764_v3  }
  0x64   :  { %4615 = vset.pattern.permute.xlu1 %v4726_v11 }
  0x65   :  { %365 = vperm.xlu1 %4615, %v4771_v5  }
  0x69   :  { %4616 = vset.pattern.permute.xlu1 %v4728_v13 }
  0x6a   :  { %385 = vperm.xlu1 %4616, %v4757_v2  }
  0x6e   :  { %4618 = vset.pattern.permute.xlu1 %v4727_v12 }
  0x6f   :  { %381 = vperm.xlu1 %4618, %v4771_v5  }
  0x73   :  { %4619 = vset.pattern.permute.xlu1 %v4728_v13 }
  0x74   :  { %393 = vperm.xlu1 %4619, %v4752_v1  }
  0x78   :  { %4621 = vset.pattern.permute.xlu1 %v4729_v14 }
  0x79   :  { %405 = vperm.xlu1 %4621, %v4764_v3  }
  0x7d   :  { %v30_v17 = vpop.permute.xlu1 %29  ;;  %v20_v18 = vpop.permute.xlu0 %19  ;;  %4622 = vset.pattern.permute.xlu1 %v4728_v13 }
  0x7e   :  { %397 = vperm.xlu1 %4622, %v4771_v5   ;;  %v41_v42 = vmul.f32 %v40_v24, %v20_v18  ;;  %v43_v57 = vmul.f32 %v40_v24, %v30_v17 }
  0x80   :  { %v49_v47 = vadd.f32 %v3927_v30, %v41_v42  ;;  %v51_v3 = vadd.f32 %v3927_v30, %v43_v57 }
  0x81   :  { %v25_v20 = vpop.permute.xlu0 %24 }
  0x82   :  { %v55_v22 = vpop.permute.xlu1 %54  ;;  %4623 = vset.pattern.permute.xlu1 %v4730_v15  ;;  %v42_v28 = vmul.f32 %v40_v24, %v25_v20 }
  0x83   :  { %417 = vperm.xlu1 %4623, %v4757_v2   ;;  %v73_v48 = vmul.f32 %v72_v29, %v55_v22 }
  0x84   :  { %v50_v32 = vadd.f32 %v3927_v30, %v42_v28 }
  0x85   :  { %v77_v53 = vadd.f32 %v73_v48, %v49_v47 }
  0x86   :  { %v59_v26 = vpop.permute.xlu0 %58 }
  0x87   :  { %v35_v27 = vpop.permute.xlu1 %34  ;;  %4625 = vset.pattern.permute.xlu1 %v4729_v14  ;;  %v74_v33 = vmul.f32 %v72_v29, %v59_v26 }
  0x88   :  { %413 = vperm.xlu1 %4625, %v4771_v5   ;;  %v44_v54 = vmul.f32 %v40_v24, %v35_v27 }
  0x89   :  { %v78_v38 = vadd.f32 %v74_v33, %v50_v32 }
  0x8b   :  { %v83_v31 = vpop.permute.xlu0 %82 }
  0x8c   :  { %v63_v35 = vpop.permute.xlu1 %62  ;;  %4626 = vset.pattern.permute.xlu1 %v4730_v15  ;;  %v101_v51 = vmul.f32 %v100_v39, %v83_v31 }
  0x8d   :  { %425 = vperm.xlu1 %4626, %v4752_v1   ;;  %v75_v62 = vmul.f32 %v72_v29, %v63_v35  ;;  %v52_v1 = vadd.f32 %v3927_v30, %v44_v54 }
  0x8e   :  { %v105_v58 = vadd.f32 %v101_v51, %v77_v53 }
  0x8f   :  { %v91_v37 = vpop.permute.xlu0 %90  ;;  %v79_v9 = vadd.f32 %v75_v62, %v51_v3 }
  0x90   :  { %v103_v10 = vmul.f32 %v100_v39, %v91_v37 }
  0x91   :  { %v87_v40 = vpop.permute.xlu1 %86 }
  0x92   :  { %v102_v43 = vmul.f32 %v100_v39, %v87_v40  ;;  %v107_v16 = vadd.f32 %v103_v10, %v79_v9 }
  0x94   :  { %v106_v44 = vadd.f32 %v102_v43, %v78_v38  ;;  %v115_v45 = vpop.permute.xlu0 %114 }
  0x95   :  { %v130_v46 = vmul.f32 %v128_v41, %v115_v45 }
  0x96   :  { %v67_v49 = vpop.permute.xlu1 %66 }
  0x97   :  { %v4841_v50 = vadd.f32 %v130_v46, %v106_v44  ;;  %v76_v61 = vmul.f32 %v72_v29, %v67_v49 }
  0x98   :  { %v123_v0 = vpop.permute.xlu0 %122 }
  0x99   :  { %v4844_v52 = vmul.f32 0.70710677, %v4841_v50  ;;  %v80_v6 = vadd.f32 %v76_v61, %v52_v1  ;;  %v132_v8 = vmul.f32 %v128_v41, %v123_v0 }
  0x9b   :  { %v154_v55 = vand.u32 2147483647, %v4844_v52  ;;  %v111_v56 = vpop.permute.xlu1 %110  ;;  %vm146_vm0 = vcmp.ge.f32.partialorder %v4844_v52, 0.0 }
  0x9c   :  { %v129_v59 = vmul.f32 %v128_v41, %v111_v56 }
  0x9d   :  { %v158_v60 = vmul.f32 0.3275911, %v154_v55  ;;  %v210_v24 = vsub.f32 0.0, %v154_v55 }
  0x9e   :  { %v4847_v63 = vadd.f32 %v129_v59, %v105_v58 }
  0x9f   :  { %v162_v2 = vadd.f32 1.0, %v158_v60  ;;  %v214_v31 = vmul.f32 %v210_v24, %v154_v55 }
  0xa0   :  { %v4850_v4 = vmul.f32 0.70710677, %v4847_v63  ;;  %v95_v5 = vpop.permute.xlu1 %94 }
  0xa1   :  { %4627 = vrcp.f32 %v162_v2  ;;  %v104_v7 = vmul.f32 %v100_v39, %v95_v5  ;;  %v219_v39 = vmul.f32 1.442695, %v214_v31 }
  0xa2   :  { %v153_v11 = vand.u32 2147483647, %v4850_v4  ;;  %vm145_vm1 = vcmp.ge.f32.partialorder %v4850_v4, 0.0 }
  0xa3   :  { %v108_v12 = vadd.f32 %v104_v7, %v80_v6 }
  0xa4   :  { %v157_v13 = vmul.f32 0.3275911, %v153_v11  ;;  %v209_v32 = vsub.f32 0.0, %v153_v11 }
  0xa5   :  { %v4853_v14 = vadd.f32 %v132_v8, %v108_v12  ;;  %v119_v15 = vpop.permute.xlu1 %118 }
  0xa6   :  { %v161_v17 = vadd.f32 1.0, %v157_v13  ;;  %v131_v18 = vmul.f32 %v128_v41, %v119_v15  ;;  %v213_v40 = vmul.f32 %v209_v32, %v153_v11 }
  0xa7   :  { %v4856_v20 = vmul.f32 0.70710677, %v4853_v14 }
  0xa8   :  { %4629 = vrcp.f32 %v161_v17  ;;  %v4858_v22 = vadd.f32 %v131_v18, %v107_v16  ;;  %v217_v47 = vmul.f32 1.442695, %v213_v40  ;;  %v6292_v40 = vmov -1.0  }
  0xa9   :  { %v156_v23 = vand.u32 2147483647, %v4856_v20  ;;  %vm148_vm2 = vcmp.ge.f32.partialorder %v4856_v20, 0.0 }
  0xaa   :  { %v4862_v26 = vmul.f32 0.70710677, %v4858_v22  ;;  %v4865_v42 = vpop.permute.xlu1 %305 }
  0xab   :  { %v160_v27 = vmul.f32 0.3275911, %v156_v23  ;;  %6400 = vst [vmem:[#allocation6_spill] sm:$0xff] %v4865_v42  ;;  %v212_v45 = vsub.f32 0.0, %v156_v23 }
  0xac   :  { %v155_v28 = vand.u32 2147483647, %v4862_v26  ;;  %vm147_vm3 = vcmp.ge.f32.partialorder %v4862_v26, 0.0 }
  0xad   :  { %v164_v29 = vadd.f32 1.0, %v160_v27  ;;  %v216_v54 = vmul.f32 %v212_v45, %v156_v23 }
  0xae   :  { %v4628_v30 = vpop.eup %4627  ;;  %v159_v33 = vmul.f32 0.3275911, %v155_v28  ;;  %v211_v51 = vsub.f32 0.0, %v155_v28  ;;  %v4867_v56 = vpop.permute.xlu1 %313 }
  0xaf   :  { %v174_v35 = vmul.f32 1.0614054, %v4628_v30  ;;  %4631 = vrcp.f32 %v164_v29  ;;  %6401 = vst [vmem:[#allocation7_spill] sm:$0xff] %v4867_v56  ;;  %v223_v0 = vmul.f32 1.442695, %v216_v54  ;;  %v137_v54 = vmul.f32 0.5, %v4847_v63 }
  0xb0   :  { %v163_v37 = vadd.f32 1.0, %v159_v33  ;;  %v215_v60 = vmul.f32 %v211_v51, %v155_v28  ;;  %v151_v63 = vsel %vm147_vm3, 1.0, %v6292_v40  ;;  %vm4733_vm3 = vmmov 0  }
  0xb1   :  { %v178_v38 = vadd.f32 -1.4531521, %v174_v35 }
  0xb2   :  { %4633 = vrcp.f32 %v163_v37  ;;  %v221_v9 = vmul.f32 1.442695, %v215_v60  ;;  %v138_v60 = vmul.f32 0.5, %v4841_v50  ;;  %v140_v50 = vmul.f32 0.5, %v4853_v14 }
  0xb3   :  { %v182_v41 = vmul.f32 %v4628_v30, %v178_v38  ;;  %4635 = vpow2.f32 %v219_v39  ;;  %v4869_v2 = vpop.permute.xlu1 %321 }
  0xb4   :  { %4637 = vpow2.f32 %v217_v47  ;;  %6402 = vst [vmem:[#allocation8_spill] sm:$0xff] %v4869_v2 }
  0xb5   :  { %v4630_v43 = vpop.eup %4629  ;;  %v186_v44 = vadd.f32 1.4214138, %v182_v41  ;;  %4639 = vpow2.f32 %v223_v0  ;;  %v150_v41 = vsel %vm146_vm0, 1.0, %v6292_v40 }
  0xb6   :  { %v173_v46 = vmul.f32 1.0614054, %v4630_v43  ;;  %4641 = vpow2.f32 %v221_v9  ;;  %v139_v9 = vmul.f32 0.5, %v4858_v22 }
  0xb7   :  { %v190_v48 = vmul.f32 %v4628_v30, %v186_v44 }
  0xb8   :  { %v177_v49 = vadd.f32 -1.4531521, %v173_v46  ;;  %v4871_v23 = vpop.permute.xlu1 %317 }
  0xb9   :  { %v194_v53 = vadd.f32 -0.28449672, %v190_v48  ;;  %6403 = vst [vmem:[#allocation9_spill] sm:$0xff] %v4871_v23 }
  0xba   :  { %v181_v55 = vmul.f32 %v4630_v43, %v177_v49 }
  0xbb   :  { %v198_v57 = vmul.f32 %v4628_v30, %v194_v53 }
  0xbc   :  { %v4632_v58 = vpop.eup %4631  ;;  %v185_v59 = vadd.f32 1.4214138, %v181_v55 }
  0xbd   :  { %v202_v61 = vadd.f32 0.2548296, %v198_v57  ;;  %v176_v62 = vmul.f32 1.0614054, %v4632_v58  ;;  %v4875_v39 = vpop.permute.xlu1 %329 }
  0xbe   :  { %v189_v1 = vmul.f32 %v4630_v43, %v185_v59  ;;  %6404 = vst [vmem:[#allocation10_spill] sm:$0xff] %v4875_v39 }
  0xbf   :  { %v4634_v3 = vpop.eup %4633  ;;  %v180_v5 = vadd.f32 -1.4531521, %v176_v62  ;;  %v206_v6 = vmul.f32 %v4628_v30, %v202_v61 }
  0xc0   :  { %v193_v7 = vadd.f32 -0.28449672, %v189_v1  ;;  %v175_v8 = vmul.f32 1.0614054, %v4634_v3  ;;  %v4636_v13 = vpop.eup %4635 }
  0xc1   :  { %v184_v10 = vmul.f32 %v4632_v58, %v180_v5  ;;  %v226_v16 = vmul.f32 %v4636_v13, %v206_v6  ;;  %v4638_v29 = vpop.eup %4637 }
  0xc2   :  { %v197_v11 = vmul.f32 %v4630_v43, %v193_v7  ;;  %v179_v12 = vadd.f32 -1.4531521, %v175_v8  ;;  %v4640_v48 = vpop.eup %4639  ;;  %v4881_v57 = vpop.permute.xlu1 %341 }
  0xc3   :  { %v188_v15 = vadd.f32 1.4214138, %v184_v10  ;;  %v230_v31 = vsub.f32 1.0, %v226_v16  ;;  %6405 = vst [vmem:[#allocation11_spill] sm:$0xff] %v4881_v57  ;;  %v4642_v59 = vpop.eup %4641 }
  0xc4   :  { %v201_v17 = vadd.f32 0.2548296, %v197_v11  ;;  %v183_v18 = vmul.f32 %v4634_v3, %v179_v12 }
  0xc5   :  { %v192_v24 = vmul.f32 %v4632_v58, %v188_v15  ;;  %v234_v45 = vmul.f32 %v230_v31, %v150_v41 }
  0xc6   :  { %v205_v27 = vmul.f32 %v4630_v43, %v201_v17  ;;  %v187_v28 = vadd.f32 1.4214138, %v183_v18  ;;  %v149_v43 = vsel %vm145_vm1, 1.0, %v6292_v40 }
  0xc7   :  { %v196_v30 = vadd.f32 -0.28449672, %v192_v24  ;;  %v238_v53 = vadd.f32 1.0, %v234_v45  ;;  %v4894_v8 = vpop.permute.xlu1 %333 }
  0xc8   :  { %v225_v32 = vmul.f32 %v4638_v29, %v205_v27  ;;  %v191_v33 = vmul.f32 %v4634_v3, %v187_v28  ;;  %6406 = vst [vmem:[#allocation12_spill] sm:$0xff] %v4894_v8 }
  0xc9   :  { %v200_v35 = vmul.f32 %v4632_v58, %v196_v30  ;;  %v4888_v20 = vmul.f32 %v238_v53, %v138_v60 }
  0xca   :  { %v229_v37 = vsub.f32 1.0, %v225_v32  ;;  %v195_v38 = vadd.f32 -0.28449672, %v191_v33 }
  0xcb   :  { %v204_v44 = vadd.f32 0.2548296, %v200_v35  ;;  %v264_v26 = vmul.f32 %v4888_v20, %v4888_v20  ;;  %v249_v13 = vsel %vm247_vm4, %v4888_v20, 0.0 }
  0xcc   :  { %v233_v46 = vmul.f32 %v229_v37, %v149_v43  ;;  %v199_v52 = vmul.f32 %v4634_v3, %v195_v38  ;;  %v4915_v27 = vpop.permute.xlu1 %353  ;;  %v4923_v43 = vpop.permute.xlu0 %309 }
  0xcd   :  { %v208_v47 = vmul.f32 %v4632_v58, %v204_v44  ;;  %v152_v58 = vsel %vm148_vm2, 1.0, %v6292_v40  ;;  %v268_v17 = vsel %vm247_vm4, %v264_v26, 0.0  ;;  %6407 = vst [vmem:[#allocation13_spill] sm:$0xff] %v4915_v27 }
  0xce   :  { %v237_v49 = vadd.f32 1.0, %v233_v46  ;;  %v203_v4 = vadd.f32 0.2548296, %v199_v52 }
  0xcf   :  { %v228_v51 = vmul.f32 %v4640_v48, %v208_v47 }
  0xd0   :  { %v207_v55 = vmul.f32 %v4634_v3, %v203_v4  ;;  %v4884_v62 = vmul.f32 %v237_v49, %v137_v54  ;;  %v4927_v4 = vpop.permute.xlu0 %325 }
  0xd1   :  { %v232_v61 = vsub.f32 1.0, %v228_v51  ;;  %v4921_v41 = vpop.permute.xlu1 %349 }
  0xd2   :  { %v227_v0 = vmul.f32 %v4642_v59, %v207_v55  ;;  %v263_v3 = vmul.f32 %v4884_v62, %v4884_v62  ;;  %v248_v10 = vsel %vm247_vm4, %v4884_v62, 0.0 }
  0xd3   :  { %v236_v1 = vmul.f32 %v232_v61, %v152_v58  ;;  %v250_v16 = vadd.f32 %v249_v13, %v248_v10  ;;  %v787_v10 = vld [vmem:[%s6289_s1 + $0x58] sm:$0xff]  ;;  %v785_v13 = vld [vmem:[%s6289_s1 + $0x48] sm:$0xff] }
  0xd4   :  { %v231_v5 = vsub.f32 1.0, %v227_v0  ;;  %v267_v14 = vsel %vm247_vm4, %v263_v3, 0.0  ;;  %v4933_v58 = vpop.permute.xlu0 %337 }
  0xd5   :  { %v240_v6 = vadd.f32 1.0, %v236_v1  ;;  %v269_v28 = vadd.f32 %v268_v17, %v267_v14 }
  0xd6   :  { %v235_v7 = vmul.f32 %v231_v5, %v151_v63  ;;  %v4925_v49 = vpop.permute.xlu1 %361 }
  0xd7   :  { %v4901_v11 = vmul.f32 %v240_v6, %v140_v50  ;;  %v6291_v50 = vsub.s32 4, %v4813_v19 }
  0xd8   :  { %v239_v12 = vadd.f32 1.0, %v235_v7  ;;  %v4939_v3 = vpop.permute.xlu0 %345  ;;  %v4945_v7 = vld [vmem:[%s6289_s1 + $0x8] sm:$0xff] }
  0xd9   :  { %v266_v22 = vmul.f32 %v4901_v11, %v4901_v11  ;;  %v253_v30 = vsel %vm247_vm4, %v4901_v11, 0.0  ;;  %v4963_v14 = vrot.slane %v4945_v7, %v6291_v50  ;;  %v246_v50 = vld [vmem:[%s6289_s1 + $0x6] sm:$0x1]  ;;  %v5066_v40 = vrot.slane %v4945_v7, %v4833_v34 }
  0xda   :  { %v4906_v15 = vmul.f32 %v239_v12, %v139_v9  ;;  %v786_v12 = vld [vmem:[%s6289_s1 + $0x50] sm:$0xff]  ;;  %v5082_v34 = vrot.slane %v4945_v7, %v4837_v36 }
  0xdb   :  { %v272_v35 = vsel %vm247_vm4, %v266_v22, 0.0  ;;  %v4931_v61 = vpop.permute.xlu1 %373  ;;  %v4967_v17 = vand.u32 4294901760, %v786_v12  ;;  %v4969_v22 = vand.u32 4294901760, %v785_v13 }
  0xdc   :  { %v251_v18 = vsel %vm247_vm4, %v4906_v15, 0.0  ;;  %v265_v24 = vmul.f32 %v4906_v15, %v4906_v15  ;;  %6408 = vst [vmem:[#allocation14_spill] sm:$0xff] %v4931_v61  ;;  %v4949_v26 = vpop.permute.xlu0 %357 }
  0xdd   :  { %v252_v29 = vadd.f32 %v251_v18, %v250_v16  ;;  %v4965_v16 = vand.u32 4294901760, %v787_v10  ;;  %6410 = vst [vmem:[#allocation16_spill] sm:$0xff] %v4967_v17  ;;  %6411 = vst [vmem:[#allocation17_spill] sm:$0xff] %v4969_v22  ;;  %v784_v18 = vld [vmem:[%s6289_s1 + $0x40] sm:$0xff] }
  0xde   :  { %v270_v31 = vsel %vm247_vm4, %v265_v24, 0.0  ;;  %v783_v24 = vld [vmem:[%s6289_s1 + $0x38] sm:$0xff] }
  0xdf   :  { %v254_v32 = vadd.f32 %v253_v30, %v252_v29  ;;  %v271_v33 = vadd.f32 %v270_v31, %v269_v28  ;;  %v782_v28 = vld [vmem:[%s6289_s1 + $0x30] sm:$0xff]  ;;  %v4982_v29 = vrot.slane %v4945_v7, %v4817_v21  ;;  %v4984_v30 = vand.u32 4294901760, %v784_v18  ;;  %4152 = vmatprep.subr.mxu0 %v4965_v16 }
  0xe0   :  { %v4937_v63 = vpop.permute.xlu1 %365  ;;  %v4986_v31 = vand.u32 4294901760, %v783_v24  ;;  %4153 = vmatpush3.msra.mxu0 %v4965_v16 }
  0xe1   :  { %v255_v37 = vrot.slane %v254_v32, 4  ;;  %v273_v38 = vadd.f32 %v272_v35, %v271_v33  ;;  %6412 = vst [vmem:[#allocation18_spill] sm:$0xff] %v4984_v30  ;;  %v781_v33 = vld [vmem:[%s6289_s1 + $0x28] sm:$0xff]  ;;  %v780_v35 = vld [vmem:[%s6289_s1 + $0x20] sm:$0xff]  ;;  %4154 = vmatprep.subr.mxu0 %v4967_v17 }
  0xe2   :  { %6413 = vst [vmem:[#allocation19_spill] sm:$0xff] %v4986_v31  ;;  %4155 = vmatpush3.msra.mxu0 %v4967_v17 }
  0xe3   :  { %v256_v44 = vadd.f32 %v255_v37, %v254_v32  ;;  %v274_v45 = vrot.slane %v273_v38, 4  ;;  %v4988_v32 = vand.u32 4294901760, %v782_v28  ;;  %v4997_v37 = vsub.f32 %v787_v10, %v4965_v16  ;;  %4156 = vmatprep.subr.mxu0 %v4969_v22 }
  0xe4   :  { %4157 = vmatpush3.msra.mxu0 %v4969_v22 }
  0xe5   :  { %v257_v46 = vrot.slane %v256_v44, 2  ;;  %v275_v52 = vadd.f32 %v274_v45, %v273_v38  ;;  %v4947_v9 = vpop.permute.xlu1 %385  ;;  %6414 = vst [vmem:[#allocation20_spill] sm:$0xff] %v4988_v32  ;;  %v5000_v38 = vsub.f32 %v786_v12, %v4967_v17  ;;  %v5006_v45 = vand.u32 4294901760, %v781_v33  ;;  %4158 = vmatprep.subr.mxu0 %v4984_v30 }
  0xe6   :  { %6409 = vst [vmem:[#allocation15_spill] sm:$0xff] %v4947_v9  ;;  %4159 = vmatpush3.msra.mxu0 %v4984_v30 }
  0xe7   :  { %v258_v47 = vadd.f32 %v257_v46, %v256_v44  ;;  %v276_v48 = vrot.slane %v275_v52, 2  ;;  %6415 = vst [vmem:[#allocation21_spill] sm:$0xff] %v5000_v38  ;;  %v5003_v44 = vsub.f32 %v785_v13, %v4969_v22  ;;  %6417 = vst [vmem:[#allocation23_spill] sm:$0xff] %v5006_v45  ;;  %v245_v46 = vld [vmem:[%s6289_s1 + $0x5] sm:$0x1]  ;;  %4160 = vmatprep.subr.mxu0 %v4986_v31 }
  0xe8   :  { %4161 = vmatpush3.msra.mxu0 %v4986_v31 }
  0xe9   :  { %v259_v51 = vrot.slane %v258_v47, 1  ;;  %v277_v53 = vadd.f32 %v276_v48, %v275_v52  ;;  %6416 = vst [vmem:[#allocation22_spill] sm:$0xff] %v5003_v44  ;;  %v5016_v48 = vsub.f32 %v784_v18, %v4984_v30  ;;  %4162 = vmatprep.subr.mxu0 %v4988_v32 }
  0xea   :  { %v5011_v52 = vpop.permute.xlu1 %381  ;;  %4163 = vmatpush3.msra.mxu0 %v4988_v32 }
  0xeb   :  { %v260_v54 = vadd.f32 %v259_v51, %v258_v47  ;;  %v278_v55 = vrot.slane %v277_v53, 1  ;;  %v5013_v47 = vpop.permute.xlu0 %369  ;;  %6418 = vst [vmem:[#allocation24_spill] sm:$0xff] %v5016_v48  ;;  %v5019_v51 = vsub.f32 %v783_v24, %v4986_v31  ;;  %v5045_v10 = vand.u32 4294901760, %v5016_v48  ;;  %4164 = vmatprep.subr.mxu0 %v5006_v45 }
  0xec   :  { %4165 = vmatpush3.msra.mxu0 %v5006_v45 }
  0xed   :  { %v4929_v59 = vmul.f32 0.03125, %v260_v54  ;;  %v279_v60 = vadd.f32 %v278_v55, %v277_v53  ;;  %6419 = vst [vmem:[#allocation25_spill] sm:$0xff] %v5019_v51  ;;  %v5023_v53 = vsub.f32 %v782_v28, %v4988_v32  ;;  %v5025_v54 = vand.u32 4294901760, %v780_v35  ;;  %6425 = vst [vmem:[#allocation31_spill] sm:$0xff] %v5045_v10 }
  0xee   :  { %v5028_v55 = vand.u32 4294901760, %v4997_v37  ;;  %v5048_v12 = vand.u32 4294901760, %v5019_v51 }
  0xef   :  { %v280_v0 = vmul.f32 0.03125, %v279_v60  ;;  %v281_v1 = vmul.f32 %v4929_v59, %v4929_v59  ;;  %6420 = vst [vmem:[#allocation26_spill] sm:$0xff] %v5023_v53  ;;  %v5031_v60 = vand.u32 4294901760, %v5000_v38  ;;  %v5051_v13 = vand.u32 4294901760, %v5023_v53  ;;  %4166 = vmatprep.subr.mxu0 %v5025_v54 }
  0xf0   :  { %6421 = vst [vmem:[#allocation27_spill] sm:$0xff] %v5028_v55  ;;  %6426 = vst [vmem:[#allocation32_spill] sm:$0xff] %v5048_v12  ;;  %v938_v24 = vsub.f32 %v4997_v37, %v5028_v55  ;;  %4167 = vmatpush3.msra.mxu0 %v5025_v54 }
  0xf1   :  { %v282_v5 = vsub.f32 %v280_v0, %v281_v1  ;;  %6422 = vst [vmem:[#allocation28_spill] sm:$0xff] %v5031_v60  ;;  %v5034_v0 = vand.u32 4294901760, %v5003_v44  ;;  %v5038_v1 = vsub.f32 %v781_v33, %v5006_v45  ;;  %6427 = vst [vmem:[#allocation33_spill] sm:$0xff] %v5051_v13  ;;  %v945_v28 = vsub.f32 %v5000_v38, %v5031_v60  ;;  %v5086_v38 = vpop.permute.xlu1 %393 }
  0xf2   :  { %v939_v55 = vand.u32 4294901760, %v938_v24  ;;  %v973_v36 = vsub.f32 %v5023_v53, %v5051_v13  ;;  %v6433_v13 = vsub.s32 7, %v4813_v19  ;;  %4196 = vmatprep.subr.mxu0 %v4997_v37 }
  0xf3   :  { %v283_v6 = vadd.f32 1e-05, %v282_v5  ;;  %6423 = vst [vmem:[#allocation29_spill] sm:$0xff] %v5034_v0  ;;  %6424 = vst [vmem:[#allocation30_spill] sm:$0xff] %v5038_v1  ;;  %v952_v33 = vsub.f32 %v5003_v44, %v5034_v0  ;;  %v946_v44 = vand.u32 4294901760, %v945_v28 }
  0xf4   :  { %4174 = vmatprep.subr.mxu1 %v939_v55 }
  0xf5   :  { %4643 = vrsqrt.f32 %v283_v6  ;;  %v5042_v6 = vrot.slane %v4945_v7, %v4825_v25  ;;  %v5075_v25 = vsub.f32 %v780_v35, %v5025_v54  ;;  %v5088_v35 = vpop.permute.xlu0 %377  ;;  %v953_v28 = vand.u32 4294901760, %v952_v33  ;;  %4175 = vmatpush3.msra.mxu1 %v939_v55 }
  0xf6   :  { %4176 = vmatprep.subr.mxu1 %v946_v44  ;;  %v6432_v55 = vsub.s32 6, %v4813_v19 }
  0xf7   :  { %6429 = vst [vmem:[#allocation35_spill] sm:$0xff] %v5075_v25  ;;  %4177 = vmatpush3.msra.mxu1 %v946_v44  ;;  %v5134_v44 = vpop.permute.xlu1 %405 }
  0xf8   :  { %4178 = vmatprep.subr.mxu1 %v953_v28 }
  0xf9   :  { %4179 = vmatpush3.msra.mxu1 %v953_v28 }
 0x102   :  { %v4644_v5 = vpop.eup %4643 }
 0x103   :  { %v285_v18 = vmul.f32 %v4644_v5, %v245_v46  ;;  %v959_v46 = vsub.f32 %v5016_v48, %v5045_v10  ;;  %v5071_v5 = vand.u32 4294901760, %v5038_v1 }
 0x105   :  { %6428 = vst [vmem:[#allocation34_spill] sm:$0xff] %v5071_v5  ;;  %v286_v0 = vmul.f32 %v285_v18, %v4929_v59  ;;  %v291_v60 = vrot.slane %v285_v18, %v4817_v21  ;;  %v966_v59 = vsub.f32 %v5019_v51, %v5048_v12  ;;  %v980_v22 = vsub.f32 %v5038_v1, %v5071_v5 }
 0x106   :  { %v5101_v12 = vand.u32 4294901760, %v5075_v25  ;;  %v960_v24 = vand.u32 4294901760, %v959_v46  ;;  %v5116_v5 = vrot.slane %v4945_v7, %v6432_v55  ;;  %v5132_v55 = vrot.slane %v4945_v7, %v6433_v13 }
 0x107   :  { %v287_v18 = vsub.f32 %v246_v50, %v286_v0  ;;  %v294_v10 = vmul.f32 %v291_v60, %v4906_v15  ;;  %v292_v48 = vmul.f32 %v291_v60, %v4884_v62  ;;  %v295_v0 = vmul.f32 %v291_v60, %v4901_v11 }
 0x108   :  { %6430 = vst [vmem:[#allocation36_spill] sm:$0xff] %v5101_v12  ;;  %v293_v33 = vmul.f32 %v291_v60, %v4888_v20  ;;  %v6431_v62 = vsub.s32 5, %v4813_v19  ;;  %v987_v11 = vsub.f32 %v5075_v25, %v5101_v12  ;;  %v974_v12 = vand.u32 4294901760, %v973_v36  ;;  %4180 = vmatprep.subr.mxu1 %v960_v24 }
 0x109   :  { %v299_v50 = vrot.slane %v287_v18, %v4817_v21  ;;  %v967_v18 = vand.u32 4294901760, %v966_v59  ;;  %v5136_v59 = vpop.permute.xlu0 %389  ;;  %4181 = vmatpush3.msra.mxu1 %v960_v24 }
 0x10a   :  { %v5111_v15 = vrot.slane %v4945_v7, %v6431_v62  ;;  %v988_v25 = vand.u32 4294901760, %v987_v11 }
 0x10b   :  { %v5121_v20 = vadd.f32 %v299_v50, %v294_v10  ;;  %v5123_v60 = vadd.f32 %v299_v50, %v292_v48  ;;  %v5125_v46 = vadd.f32 %v299_v50, %v295_v0  ;;  %v5127_v62 = vadd.f32 %v299_v50, %v293_v33  ;;  %4182 = vmatprep.subr.mxu1 %v967_v18 }
 0x10c   :  { %v981_v10 = vand.u32 4294901760, %v980_v22  ;;  %4183 = vmatpush3.msra.mxu1 %v967_v18 }
 0x10d   :  { %v438_v48 = vmul.f32 %v4963_v14, %v5123_v60  ;;  %v445_v50 = vrot.slane %v5121_v20, 7  ;;  %v446_v0 = vrot.slane %v5125_v46, 7  ;;  %v440_v7 = vmul.f32 %v4963_v14, %v5121_v20  ;;  %4184 = vmatprep.subr.mxu1 %v974_v12 }
 0x10e   :  { %v452_v13 = vrot.slane %v5123_v60, 7  ;;  %v453_v36 = vrot.slane %v5127_v62, 7  ;;  %v476_v22 = vmul.f32 %v4869_v2, %v5125_v46  ;;  %v441_v28 = vmul.f32 %v4963_v14, %v5125_v46  ;;  %4185 = vmatpush3.msra.mxu1 %v974_v12 }
 0x10f   :  { %v5154_v33 = vsel %vm444_vm5, %v445_v50, %v446_v0  ;;  %v478_v11 = vmul.f32 %v4875_v39, %v5127_v62  ;;  %v495_v19 = vrot.slane %v5123_v60, 1  ;;  %v496_v1 = vrot.slane %v5127_v62, 1  ;;  %4186 = vmatprep.subr.mxu1 %v981_v10 }
 0x110   :  { %v460_v2 = vmul.f32 %v5154_v33, %v4865_v42  ;;  %v454_v24 = vsel %vm444_vm5, %v452_v13, %v453_v36  ;;  %v484_v53 = vmul.f32 %v5042_v6, %v476_v22  ;;  %v5166_v51 = vsel %vm444_vm5, %v453_v36, %v445_v50  ;;  %v5183_v36 = vpop.permute.xlu1 %397  ;;  %4187 = vmatpush3.msra.mxu1 %v981_v10 }
 0x111   :  { %v462_v39 = vmul.f32 %v454_v24, %v4867_v56  ;;  %v463_v45 = vmul.f32 %v5166_v51, %v4871_v23  ;;  %v486_v32 = vmul.f32 %v5042_v6, %v478_v11  ;;  %v5173_v31 = vsel %vm494_vm6, %v495_v19, %v496_v1  ;;  %v5185_v56 = vpop.permute.xlu0 %401  ;;  %4188 = vmatprep.subr.mxu1 %v988_v25 }
 0x112   :  { %v468_v42 = vmul.f32 %v4982_v29, %v460_v2  ;;  %v507_v22 = vmul.f32 %v5173_v31, %v4881_v57  ;;  %v479_v50 = vmul.f32 %v4894_v8, %v5121_v20  ;;  %v5181_v18 = vsel %vm444_vm5, %v446_v0, %v452_v13  ;;  %4189 = vmatpush3.msra.mxu1 %v988_v25 }
 0x113   :  { %v470_v11 = vmul.f32 %v4982_v29, %v462_v39  ;;  %v471_v23 = vmul.f32 %v4982_v29, %v463_v45  ;;  %v522_v2 = vmul.f32 %v5181_v18, %v4915_v27  ;;  %v492_v57 = vrot.slane %v5125_v46, 1  ;;  %4218 = vmatprep.subr.mxu1 %v4965_v16 }
 0x114   :  { %v472_v8 = vadd.f32 %v468_v42, %v438_v48  ;;  %v515_v0 = vmul.f32 %v5066_v40, %v507_v22  ;;  %v487_v13 = vmul.f32 %v5042_v6, %v479_v50  ;;  %v498_v30 = vrot.slane %v5121_v20, 1  ;;  %v5218_v25 = vpop.permute.xlu1 %417 }
 0x115   :  { %v474_v39 = vadd.f32 %v470_v11, %v440_v7  ;;  %v475_v45 = vadd.f32 %v471_v23, %v441_v28  ;;  %v530_v12 = vmul.f32 %v5082_v34, %v522_v2  ;;  %v439_v27 = vmul.f32 %v4963_v14, %v5127_v62 }
 0x116   :  { %v488_v17 = vadd.f32 %v484_v53, %v472_v8  ;;  %v5201_v42 = vsel %vm494_vm6, %v498_v30, %v492_v57  ;;  %v461_v48 = vmul.f32 %v5181_v18, %v4923_v43  ;;  %v524_v10 = vmul.f32 %v5166_v51, %v4925_v49 }
 0x117   :  { %v490_v22 = vadd.f32 %v486_v32, %v474_v39  ;;  %v491_v7 = vadd.f32 %v487_v13, %v475_v45  ;;  %v509_v23 = vmul.f32 %v5201_v42, %v4921_v41  ;;  %v477_v14 = vmul.f32 %v4927_v4, %v5123_v60  ;;  %v5220_v32 = vpop.permute.xlu0 %409 }
 0x118   :  { %v469_v8 = vmul.f32 %v4982_v29, %v461_v48  ;;  %v532_v53 = vmul.f32 %v5082_v34, %v524_v10  ;;  %v499_v28 = vsel %vm494_vm6, %v496_v1, %v498_v30  ;;  %v5216_v50 = vsel %vm494_vm6, %v492_v57, %v495_v19 }
 0x119   :  { %v517_v11 = vmul.f32 %v5066_v40, %v509_v23  ;;  %v485_v2 = vmul.f32 %v5042_v6, %v477_v14  ;;  %v539_v13 = vmul.f32 %v499_v28, %v4931_v61  ;;  %v506_v29 = vmul.f32 %v5216_v50, %v4933_v58 }
 0x11a   :  { %v473_v39 = vadd.f32 %v469_v8, %v439_v27  ;;  %v525_v30 = vmul.f32 %v5154_v33, %v4937_v63  ;;  %v508_v19 = vmul.f32 %v499_v28, %v4939_v3  ;;  %v554_v57 = vmul.f32 %v454_v24, %v4947_v9 }
 0x11b   :  { %v521_v1 = vadd.f32 %v517_v11, %v491_v7  ;;  %v547_v45 = vmul.f32 %v5111_v15, %v539_v13  ;;  %v514_v48 = vmul.f32 %v5066_v40, %v506_v29  ;;  %v523_v6 = vmul.f32 %v454_v24, %v4949_v26 }
 0x11c   :  { %v489_v10 = vadd.f32 %v485_v2, %v473_v39  ;;  %v533_v23 = vmul.f32 %v5082_v34, %v525_v30  ;;  %v516_v14 = vmul.f32 %v5066_v40, %v508_v19  ;;  %v562_v27 = vmul.f32 %v5116_v5, %v554_v57  ;;  %v5244_v2 = vpop.permute.xlu1 %413  ;;  %v5246_v40 = vpop.permute.xlu0 %421 }
 0x11d   :  { %v518_v8 = vadd.f32 %v514_v48, %v488_v17  ;;  %v531_v61 = vmul.f32 %v5082_v34, %v523_v6  ;;  %v541_v9 = vmul.f32 %v5216_v50, %v5011_v52  ;;  %v538_v7 = vmul.f32 %v5173_v31, %v5013_v47 }
 0x11e   :  { %v537_v11 = vadd.f32 %v533_v23, %v521_v1  ;;  %v520_v13 = vadd.f32 %v516_v14, %v490_v22  ;;  %v519_v29 = vadd.f32 %v515_v0, %v489_v10  ;;  %v556_v24 = vmul.f32 %v5154_v33, %v5086_v38 }
 0x11f   :  { %v549_v17 = vmul.f32 %v5111_v15, %v541_v9  ;;  %v534_v39 = vadd.f32 %v530_v12, %v518_v8  ;;  %v546_v34 = vmul.f32 %v5111_v15, %v538_v7  ;;  %v540_v30 = vmul.f32 %v5201_v42, %v5088_v35 }
 0x120   :  { %v535_v19 = vadd.f32 %v531_v61, %v519_v29  ;;  %v564_v57 = vmul.f32 %v5116_v5, %v556_v24  ;;  %v536_v22 = vadd.f32 %v532_v53, %v520_v13  ;;  %v571_v0 = vmul.f32 %v5134_v44, %v5121_v20  ;;  %v3928_v53 = vld [vmem:[%s6289_s1 + $0x10] ss:$0 sm:$0xff]  ;;  %v5276_v13 = vpop.permute.xlu0 %429 }
 0x121   :  { %v553_v33 = vadd.f32 %v549_v17, %v537_v11  ;;  %v550_v1 = vadd.f32 %v546_v34, %v534_v39  ;;  %v548_v48 = vmul.f32 %v5111_v15, %v540_v30  ;;  %v555_v9 = vmul.f32 %v5166_v51, %v5136_v59  ;;  %v5274_v11 = vpop.permute.xlu1 %425  ;;  %6435 = vst [vmem:[#allocation38_spill] sm:$0xff] %v5276_v13  ;;  %v3929_v30 = vld [vmem:[%s6289_s1 + $0x1a] ss:$0 sm:$0xff] }
 0x122   :  { %v579_v12 = vmul.f32 %v5132_v55, %v571_v0  ;;  %v551_v6 = vadd.f32 %v547_v45, %v535_v19  ;;  %v557_v10 = vmul.f32 %v5181_v18, %v5183_v36  ;;  %v570_v61 = vmul.f32 %v5185_v56, %v5127_v62  ;;  %6434 = vst [vmem:[#allocation37_spill] sm:$0xff] %v5274_v11 }
 0x123   :  { %v552_v23 = vadd.f32 %v548_v48, %v536_v22  ;;  %v563_v14 = vmul.f32 %v5116_v5, %v555_v9  ;;  %v566_v15 = vadd.f32 %v562_v27, %v550_v1  ;;  %v586_v8 = vmul.f32 %v499_v28, %v5218_v25 }
 0x124   :  { %v565_v51 = vmul.f32 %v5116_v5, %v557_v10  ;;  %v578_v45 = vmul.f32 %v5132_v55, %v570_v61  ;;  %v572_v18 = vmul.f32 %v5220_v32, %v5125_v46  ;;  %v573_v7 = vmul.f32 %v5244_v2, %v5123_v60 }
 0x125   :  { %v567_v29 = vadd.f32 %v563_v14, %v551_v6  ;;  %v594_v24 = vmul.f32 %v3928_v53, %v586_v8  ;;  %v568_v17 = vadd.f32 %v564_v57, %v552_v23  ;;  %v587_v28 = vmul.f32 %v5201_v42, %v5246_v40 }
 0x126   :  { %v569_v27 = vadd.f32 %v565_v51, %v553_v33  ;;  %v582_v5 = vadd.f32 %v578_v45, %v566_v15  ;;  %v580_v39 = vmul.f32 %v5132_v55, %v572_v18  ;;  %v581_v34 = vmul.f32 %v5132_v55, %v573_v7 }
 0x127   :  { %v583_v19 = vadd.f32 %v579_v12, %v567_v29  ;;  %v595_v22 = vmul.f32 %v3928_v53, %v587_v28  ;;  %v588_v0 = vmul.f32 %v5216_v50, %v5274_v11  ;;  %v589_v57 = vmul.f32 %v5173_v31, %v5276_v13 }
 0x128   :  { %v598_v1 = vadd.f32 %v594_v24, %v582_v5  ;;  %v584_v42 = vadd.f32 %v580_v39, %v568_v17  ;;  %v585_v33 = vadd.f32 %v581_v34, %v569_v27 }
 0x129   :  { %v599_v48 = vadd.f32 %v595_v22, %v583_v19  ;;  %v596_v9 = vmul.f32 %v3928_v53, %v588_v0  ;;  %v597_v6 = vmul.f32 %v3928_v53, %v589_v57 }
 0x12a   :  { %v5289_v10 = vadd.f32 %v3929_v30, %v598_v1 }
 0x12b   :  { %v5291_v55 = vadd.f32 %v3929_v30, %v599_v48  ;;  %v600_v61 = vadd.f32 %v596_v9, %v584_v42  ;;  %v601_v23 = vadd.f32 %v597_v6, %v585_v33 }
 0x12c   :  { %v5294_v12 = vmul.f32 0.70710677, %v5289_v10 }
 0x12d   :  { %v5297_v50 = vmul.f32 0.70710677, %v5291_v55  ;;  %v5299_v14 = vadd.f32 %v3929_v30, %v600_v61  ;;  %v5301_v31 = vadd.f32 %v3929_v30, %v601_v23 }
 0x12e   :  { %v627_v15 = vand.u32 2147483647, %v5294_v12  ;;  %vm619_vm7 = vcmp.ge.f32.partialorder %v5294_v12, 0.0 }
 0x12f   :  { %v628_v53 = vand.u32 2147483647, %v5297_v50  ;;  %v5306_v51 = vmul.f32 0.70710677, %v5299_v14  ;;  %v5309_v18 = vmul.f32 0.70710677, %v5301_v31 }
 0x130   :  { %v631_v8 = vmul.f32 0.3275911, %v627_v15  ;;  %v683_v34 = vsub.f32 0.0, %v627_v15  ;;  %vm620_vm8 = vcmp.ge.f32.partialorder %v5297_v50, 0.0  ;;  %v611_v50 = vmul.f32 0.5, %v5289_v10 }
 0x131   :  { %v632_v45 = vmul.f32 0.3275911, %v628_v53  ;;  %v629_v29 = vand.u32 2147483647, %v5306_v51  ;;  %v630_v28 = vand.u32 2147483647, %v5309_v18 }
 0x132   :  { %v635_v7 = vadd.f32 1.0, %v631_v8  ;;  %v684_v30 = vsub.f32 0.0, %v628_v53  ;;  %v687_v19 = vmul.f32 %v683_v34, %v627_v15  ;;  %vm621_vm9 = vcmp.ge.f32.partialorder %v5306_v51, 0.0 }
 0x133   :  { %v636_v24 = vadd.f32 1.0, %v632_v45  ;;  %v633_v17 = vmul.f32 0.3275911, %v629_v29  ;;  %v634_v5 = vmul.f32 0.3275911, %v630_v28  ;;  %v685_v22 = vsub.f32 0.0, %v629_v29 }
 0x134   :  { %4645 = vrcp.f32 %v635_v7  ;;  %v688_v0 = vmul.f32 %v684_v30, %v628_v53  ;;  %v686_v1 = vsub.f32 0.0, %v630_v28  ;;  %v691_v48 = vmul.f32 1.442695, %v687_v19 }
 0x135   :  { %4647 = vrcp.f32 %v636_v24  ;;  %v637_v27 = vadd.f32 1.0, %v633_v17  ;;  %v638_v39 = vadd.f32 1.0, %v634_v5  ;;  %v689_v9 = vmul.f32 %v685_v22, %v629_v29 }
 0x136   :  { %v693_v61 = vmul.f32 1.442695, %v688_v0  ;;  %v690_v7 = vmul.f32 %v686_v1, %v630_v28  ;;  %vm622_vm10 = vcmp.ge.f32.partialorder %v5309_v18, 0.0  ;;  %v613_v51 = vmul.f32 0.5, %v5299_v14 }
 0x137   :  { %4649 = vrcp.f32 %v637_v27  ;;  %v695_v27 = vmul.f32 1.442695, %v689_v9 }
 0x138   :  { %4651 = vrcp.f32 %v638_v39  ;;  %v697_v13 = vmul.f32 1.442695, %v690_v7 }
 0x139   :  { %4653 = vpow2.f32 %v691_v48 }
 0x13a   :  { %4655 = vpow2.f32 %v693_v61 }
 0x13b   :  { %4657 = vpow2.f32 %v695_v27 }
 0x13c   :  { %4659 = vpow2.f32 %v697_v13 }
 0x141   :  { %v4646_v57 = vpop.eup %4645 }
 0x142   :  { %v4648_v42 = vpop.eup %4647  ;;  %v647_v33 = vmul.f32 1.0614054, %v4646_v57 }
 0x143   :  { %v648_v6 = vmul.f32 1.0614054, %v4648_v42 }
 0x144   :  { %v651_v23 = vadd.f32 -1.4531521, %v647_v33  ;;  %v4650_v8 = vpop.eup %4649 }
 0x145   :  { %v652_v45 = vadd.f32 -1.4531521, %v648_v6  ;;  %v649_v17 = vmul.f32 1.0614054, %v4650_v8  ;;  %v4652_v15 = vpop.eup %4651 }
 0x146   :  { %v655_v24 = vmul.f32 %v4646_v57, %v651_v23  ;;  %v650_v30 = vmul.f32 1.0614054, %v4652_v15 }
 0x147   :  { %v656_v5 = vmul.f32 %v4648_v42, %v652_v45  ;;  %v653_v39 = vadd.f32 -1.4531521, %v649_v17 }
 0x148   :  { %v659_v53 = vadd.f32 1.4214138, %v655_v24  ;;  %v654_v0 = vadd.f32 -1.4531521, %v650_v30 }
 0x149   :  { %v660_v34 = vadd.f32 1.4214138, %v656_v5  ;;  %v657_v29 = vmul.f32 %v4650_v8, %v653_v39 }
 0x14a   :  { %v663_v19 = vmul.f32 %v4646_v57, %v659_v53  ;;  %v658_v1 = vmul.f32 %v4652_v15, %v654_v0  ;;  %v4654_v53 = vpop.eup %4653 }
 0x14b   :  { %v664_v22 = vmul.f32 %v4648_v42, %v660_v34  ;;  %v661_v6 = vadd.f32 1.4214138, %v657_v29  ;;  %v4656_v34 = vpop.eup %4655 }
 0x14c   :  { %v667_v33 = vadd.f32 -0.28449672, %v663_v19  ;;  %v662_v61 = vadd.f32 1.4214138, %v658_v1 }
 0x14d   :  { %v668_v28 = vadd.f32 -0.28449672, %v664_v22  ;;  %v665_v9 = vmul.f32 %v4650_v8, %v661_v6  ;;  %v6436_v6 = vmov -1.0  }
 0x14e   :  { %v671_v48 = vmul.f32 %v4646_v57, %v667_v33  ;;  %v666_v5 = vmul.f32 %v4652_v15, %v662_v61  ;;  %v4658_v33 = vpop.eup %4657 }
 0x14f   :  { %v672_v23 = vmul.f32 %v4648_v42, %v668_v28  ;;  %v669_v24 = vadd.f32 -0.28449672, %v665_v9  ;;  %v623_v28 = vsel %vm619_vm7, 1.0, %v6436_v6 }
 0x150   :  { %v675_v45 = vadd.f32 0.2548296, %v671_v48  ;;  %v670_v27 = vadd.f32 -0.28449672, %v666_v5 }
 0x151   :  { %v676_v17 = vadd.f32 0.2548296, %v672_v23  ;;  %v673_v7 = vmul.f32 %v4650_v8, %v669_v24  ;;  %v4660_v23 = vpop.eup %4659 }
 0x152   :  { %v679_v11 = vmul.f32 %v4646_v57, %v675_v45  ;;  %v674_v29 = vmul.f32 %v4652_v15, %v670_v27  ;;  %v612_v45 = vmul.f32 0.5, %v5291_v55 }
 0x153   :  { %v680_v39 = vmul.f32 %v4648_v42, %v676_v17  ;;  %v677_v19 = vadd.f32 0.2548296, %v673_v7  ;;  %v624_v42 = vsel %vm620_vm8, 1.0, %v6436_v6  ;;  %v625_v17 = vsel %vm621_vm9, 1.0, %v6436_v6 }
 0x154   :  { %v699_v30 = vmul.f32 %v4654_v53, %v679_v11  ;;  %v678_v57 = vadd.f32 0.2548296, %v674_v29 }
 0x155   :  { %v700_v13 = vmul.f32 %v4656_v34, %v680_v39  ;;  %v681_v0 = vmul.f32 %v4650_v8, %v677_v19 }
 0x156   :  { %v703_v22 = vsub.f32 1.0, %v699_v30  ;;  %v682_v11 = vmul.f32 %v4652_v15, %v678_v57  ;;  %v626_v30 = vsel %vm622_vm10, 1.0, %v6436_v6  ;;  %vm3921_vm10 = vcmask 254976  }
 0x157   :  { %v704_v1 = vsub.f32 1.0, %v700_v13  ;;  %v701_v9 = vmul.f32 %v4658_v33, %v681_v0  ;;  %v614_v33 = vmul.f32 0.5, %v5301_v31 }
 0x158   :  { %v707_v48 = vmul.f32 %v703_v22, %v623_v28  ;;  %v702_v5 = vmul.f32 %v4660_v23, %v682_v11 }
 0x159   :  { %v708_v12 = vmul.f32 %v704_v1, %v624_v42  ;;  %v705_v8 = vsub.f32 1.0, %v701_v9 }
 0x15a   :  { %v711_v61 = vadd.f32 1.0, %v707_v48  ;;  %v706_v27 = vsub.f32 1.0, %v702_v5 }
 0x15b   :  { %v712_v24 = vadd.f32 1.0, %v708_v12  ;;  %v709_v53 = vmul.f32 %v705_v8, %v625_v17 }
 0x15c   :  { %v715_v7 = vmul.f32 %v711_v61, %v611_v50  ;;  %v710_v13 = vmul.f32 %v706_v27, %v626_v30 }
 0x15d   :  { %v716_v39 = vmul.f32 %v712_v24, %v612_v45  ;;  %v713_v10 = vadd.f32 1.0, %v709_v53 }
 0x15e   :  { %v721_v15 = vsel %vm247_vm4, %v715_v7, 0.0  ;;  %v735_v34 = vmul.f32 %v715_v7, %v715_v7  ;;  %v714_v14 = vadd.f32 1.0, %v710_v13 }
 0x15f   :  { %v722_v55 = vsel %vm247_vm4, %v716_v39, 0.0  ;;  %v736_v19 = vmul.f32 %v716_v39, %v716_v39  ;;  %v717_v22 = vmul.f32 %v713_v10, %v613_v51 }
 0x160   :  { %v739_v29 = vsel %vm247_vm4, %v735_v34, 0.0  ;;  %v723_v18 = vadd.f32 %v722_v55, %v721_v15  ;;  %v718_v42 = vmul.f32 %v714_v14, %v614_v33 }
 0x161   :  { %v740_v0 = vsel %vm247_vm4, %v736_v19, 0.0  ;;  %v724_v1 = vsel %vm247_vm4, %v717_v22, 0.0  ;;  %v737_v57 = vmul.f32 %v717_v22, %v717_v22 }
 0x162   :  { %v741_v28 = vadd.f32 %v740_v0, %v739_v29  ;;  %v725_v48 = vadd.f32 %v724_v1, %v723_v18  ;;  %v726_v11 = vsel %vm247_vm4, %v718_v42, 0.0  ;;  %v738_v23 = vmul.f32 %v718_v42, %v718_v42  ;;  %v719_v0 = vld [vmem:[%s6289_s1 + $0x1c] sm:$0x1] }
 0x163   :  { %v742_v9 = vsel %vm247_vm4, %v737_v57, 0.0 }
 0x164   :  { %v743_v12 = vadd.f32 %v742_v9, %v741_v28  ;;  %v727_v50 = vadd.f32 %v726_v11, %v725_v48  ;;  %v744_v61 = vsel %vm247_vm4, %v738_v23, 0.0  ;;  %v720_v28 = vld [vmem:[%s6289_s1 + $0x1e] sm:$0x1] }
 0x166   :  { %v728_v45 = vrot.slane %v727_v50, 4  ;;  %v745_v8 = vadd.f32 %v744_v61, %v743_v12 }
 0x168   :  { %v729_v24 = vadd.f32 %v728_v45, %v727_v50  ;;  %v746_v31 = vrot.slane %v745_v8, 4 }
 0x16a   :  { %v730_v17 = vrot.slane %v729_v24, 2  ;;  %v747_v5 = vadd.f32 %v746_v31, %v745_v8 }
 0x16c   :  { %v731_v53 = vadd.f32 %v730_v17, %v729_v24  ;;  %v748_v51 = vrot.slane %v747_v5, 2 }
 0x16e   :  { %v732_v27 = vrot.slane %v731_v53, 1  ;;  %v749_v15 = vadd.f32 %v748_v51, %v747_v5 }
 0x170   :  { %v733_v34 = vadd.f32 %v732_v27, %v731_v53  ;;  %v750_v10 = vrot.slane %v749_v15, 1 }
 0x172   :  { %v734_v30 = vmul.f32 0.03125, %v733_v34  ;;  %v751_v55 = vadd.f32 %v750_v10, %v749_v15 }
 0x174   :  { %v752_v19 = vmul.f32 0.03125, %v751_v55  ;;  %v753_v13 = vmul.f32 %v734_v30, %v734_v30 }
 0x176   :  { %v754_v29 = vsub.f32 %v752_v19, %v753_v13  ;;  %v6437_v19 = vld [vmem:[#allocation16_spill] sm:$0xff] }
 0x178   :  { %v755_v18 = vadd.f32 1e-05, %v754_v29 }
 0x17a   :  { %4661 = vrsqrt.f32 %v755_v18 }
 0x187   :  { %v4662_v33 = vpop.eup %4661 }
 0x188   :  { %v757_v14 = vmul.f32 %v4662_v33, %v719_v0  ;;  %v6438_v0 = vld [vmem:[#allocation17_spill] sm:$0xff] }
 0x18a   :  { %v758_v1 = vmul.f32 %v757_v14, %v734_v30  ;;  %v763_v57 = vrot.slane %v757_v14, %v4817_v21 }
 0x18c   :  { %v759_v48 = vsub.f32 %v720_v28, %v758_v1  ;;  %v764_v9 = vmul.f32 %v763_v57, %v715_v7  ;;  %v765_v11 = vmul.f32 %v763_v57, %v716_v39  ;;  %v766_v23 = vmul.f32 %v763_v57, %v717_v22  ;;  %v6439_v1 = vld [vmem:[#allocation18_spill] sm:$0xff] }
 0x18d   :  { %v767_v50 = vmul.f32 %v763_v57, %v718_v42 }
 0x18e   :  { %v771_v12 = vrot.slane %v759_v48, %v4817_v21  ;;  %v6440_v48 = vld [vmem:[#allocation19_spill] sm:$0xff] }
 0x190   :  { %v772_v61 = vadd.f32 %v771_v12, %v764_v9  ;;  %v773_v45 = vadd.f32 %v771_v12, %v765_v11  ;;  %v774_v8 = vadd.f32 %v771_v12, %v766_v23  ;;  %v775_v24 = vadd.f32 %v771_v12, %v767_v50  ;;  %v6441_v12 = vld [vmem:[#allocation21_spill] sm:$0xff]  ;;  %v6442_v11 = vld [vmem:[#allocation20_spill] sm:$0xff]  ;;  %v6443_v50 = vld [vmem:[#allocation22_spill] sm:$0xff] }
 0x192   :  { %v776_v31 = vadd.f32 %v772_v61, %v5123_v60  ;;  %v777_v17 = vadd.f32 %v773_v45, %v5127_v62  ;;  %v778_v5 = vadd.f32 %v774_v8, %v5121_v20  ;;  %v779_v53 = vadd.f32 %v775_v24, %v5125_v46  ;;  %v6444_v61 = vld [vmem:[#allocation23_spill] sm:$0xff]  ;;  %v6446_v45 = vld [vmem:[#allocation25_spill] sm:$0xff]  ;;  %v6447_v8 = vld [vmem:[#allocation26_spill] sm:$0xff] }
 0x193   :  { %v6448_v24 = vld [vmem:[#allocation30_spill] sm:$0xff] }
 0x194   :  { %v794_v51 = vsel %vm247_vm4, %v776_v31, 0  ;;  %v797_v7 = vsel %vm247_vm4, %v777_v17, 0  ;;  %v800_v39 = vsel %vm247_vm4, %v778_v5, 0  ;;  %v803_v22 = vsel %vm247_vm4, %v779_v53, 0  ;;  %v6450_v31 = vld [vmem:[#allocation27_spill] sm:$0xff]  ;;  %v6451_v17 = vld [vmem:[#allocation28_spill] sm:$0xff] }
 0x195   :  { %v5349_v42 = vand.u32 4294901760, %v794_v51  ;;  %v5351_v27 = vand.u32 4294901760, %v797_v7  ;;  %v5353_v15 = vand.u32 4294901760, %v800_v39  ;;  %v5355_v60 = vand.u32 4294901760, %v803_v22  ;;  %v6452_v5 = vld [vmem:[#allocation29_spill] sm:$0xff]  ;;  %v6453_v53 = vld [vmem:[#allocation31_spill] sm:$0xff] }
 0x197   :  { %4190 = vmatprep.mubr.f32.mxu1 %v5349_v42  ;;  %v879_v20 = vsub.f32 %v794_v51, %v5349_v42  ;;  %v5360_v46 = vsub.f32 %v797_v7, %v5351_v27  ;;  %v5363_v62 = vsub.f32 %v800_v39, %v5353_v15  ;;  %v5366_v34 = vsub.f32 %v803_v22, %v5355_v60  ;;  %v6454_v51 = vld [vmem:[#allocation32_spill] sm:$0xff]  ;;  %v6455_v7 = vld [vmem:[#allocation33_spill] sm:$0xff]  ;;  %v6456_v39 = vld [vmem:[#allocation34_spill] sm:$0xff] }
 0x198   :  { %4191 = vmatmul.mubr.f32.vlgmr.msra.gmra.mxu1 %v5351_v27  ;;  %v6457_v22 = vld [vmem:[#allocation36_spill] sm:$0xff] }
 0x199   :  { %4219 = vmatpush3.msra.mxu1 %v4965_v16  ;;  %4193 = vmatprep.mubr.f32.mxu1 %v5353_v15  ;;  %v880_v10 = vand.u32 4294901760, %v879_v20  ;;  %v890_v30 = vand.u32 4294901760, %v5360_v46  ;;  %v900_v55 = vand.u32 4294901760, %v5363_v62  ;;  %v910_v18 = vand.u32 4294901760, %v5366_v34 }
 0x19a   :  { %4220 = vmatprep.subr.mxu1 %v6437_v19 }
 0x19b   :  { %4221 = vmatpush3.msra.mxu1 %v6437_v19  ;;  %v881_v13 = vsub.f32 %v879_v20, %v880_v10  ;;  %v891_v29 = vsub.f32 %v5360_v46, %v890_v30  ;;  %v901_v33 = vsub.f32 %v5363_v62, %v900_v55  ;;  %v911_v57 = vsub.f32 %v5366_v34, %v910_v18 }
 0x19c   :  { %4222 = vmatprep.subr.mxu1 %v6438_v0  ;;  %4194 = vmatmul.mubr.f32.gmra.mxu1 %v5355_v60 }
 0x19d   :  { %4223 = vmatpush3.msra.mxu1 %v6438_v0  ;;  %4234 = vmatprep.mubr.f32.mxu1 %v880_v10  ;;  %v882_v14 = vand.u32 4294901760, %v881_v13  ;;  %v892_v28 = vand.u32 4294901760, %v891_v29  ;;  %v902_v9 = vand.u32 4294901760, %v901_v33  ;;  %v912_v23 = vand.u32 4294901760, %v911_v57 }
 0x19e   :  { %4224 = vmatprep.subr.mxu1 %v6439_v1 }
 0x19f   :  { %4225 = vmatpush3.msra.mxu1 %v6439_v1  ;;  %4168 = vmatprep.mubr.f32.mxu0 %v882_v14 }
 0x1a0   :  { %4226 = vmatprep.subr.mxu1 %v6440_v48  ;;  %4169 = vmatmul.mubr.f32.vlgmr.msra.gmra.mxu0 %v892_v28 }
 0x1a1   :  { %4197 = vmatpush3.msra.mxu0 %v4997_v37  ;;  %4227 = vmatpush3.msra.mxu1 %v6440_v48  ;;  %v6445_v37 = vld [vmem:[#allocation24_spill] sm:$0xff] }
 0x1a2   :  { %4171 = vmatprep.mubr.f32.mxu0 %v902_v9  ;;  %4198 = vmatprep.subr.mxu0 %v6441_v12 }
 0x1a3   :  { %4228 = vmatprep.subr.mxu1 %v6442_v11  ;;  %4199 = vmatpush3.msra.mxu0 %v6441_v12 }
 0x1a4   :  { %4229 = vmatpush3.msra.mxu1 %v6442_v11  ;;  %4200 = vmatprep.subr.mxu0 %v6443_v50 }
 0x1a5   :  { %4230 = vmatprep.subr.mxu1 %v6444_v61  ;;  %4172 = vmatmul.mubr.f32.gmra.mxu0 %v912_v23 }
 0x1a6   :  { %4201 = vmatpush3.msra.mxu0 %v6443_v50  ;;  %4231 = vmatpush3.msra.mxu1 %v6444_v61  ;;  %v1989_v50 = vld [vmem:[%s6289_s1 + $0x98] sm:$0xff] }
 0x1a7   :  { %4202 = vmatprep.subr.mxu0 %v6445_v37  ;;  %4212 = vmatprep.mubr.f32.mxu0 %v879_v20 }
 0x1a8   :  { %4232 = vmatprep.subr.mxu1 %v5025_v54  ;;  %4203 = vmatpush3.msra.mxu0 %v6445_v37  ;;  %v1987_v37 = vld [vmem:[%s6289_s1 + $0x88] sm:$0xff] }
 0x1a9   :  { %4233 = vmatpush3.msra.mxu1 %v5025_v54  ;;  %4204 = vmatprep.subr.mxu0 %v6446_v45 }
 0x1aa   :  { %4235 = vmatmul.mubr.f32.vlgmr.msra.gmra.mxu1 %v890_v30  ;;  %4262 = vmatprep.subr.mxu1 %v4965_v16 }
 0x1ab   :  { %4205 = vmatpush3.msra.mxu0 %v6446_v45  ;;  %4237 = vmatprep.mubr.f32.mxu1 %v900_v55 }
 0x1ac   :  { %4263 = vmatpush3.msra.mxu1 %v4965_v16  ;;  %4206 = vmatprep.subr.mxu0 %v6447_v8  ;;  %v6449_v16 = vld [vmem:[#allocation35_spill] sm:$0xff] }
 0x1ad   :  { %4264 = vmatprep.subr.mxu1 %v6437_v19  ;;  %4207 = vmatpush3.msra.mxu0 %v6447_v8 }
 0x1ae   :  { %4265 = vmatpush3.msra.mxu1 %v6437_v19  ;;  %4208 = vmatprep.subr.mxu0 %v6448_v24  ;;  %v3930_v19 = vld [vmem:[%s6289_s1 + $0xa0] ss:$0 sm:$0xff] }
 0x1af   :  { %4238 = vmatmul.mubr.f32.gmra.mxu1 %v910_v18  ;;  %4266 = vmatprep.subr.mxu1 %v6438_v0 }
 0x1b0   :  { %4209 = vmatpush3.msra.mxu0 %v6448_v24  ;;  %4267 = vmatpush3.msra.mxu1 %v6438_v0  ;;  %v5462_v24 = vand.u32 4294901760, %v1989_v50 }
 0x1b1   :  { %4278 = vmatprep.mubr.f32.mxu1 %v5349_v42  ;;  %4210 = vmatprep.subr.mxu0 %v6449_v16 }
 0x1b2   :  { %4268 = vmatprep.subr.mxu1 %v6439_v1  ;;  %4211 = vmatpush3.msra.mxu0 %v6449_v16  ;;  %v1986_v16 = vld [vmem:[%s6289_s1 + $0x80] sm:$0xff] }
 0x1b3   :  { %4269 = vmatpush3.msra.mxu1 %v6439_v1  ;;  %4213 = vmatmul.mubr.f32.vlgmr.msra.gmra.mxu0 %v5360_v46 }
 0x1b4   :  { %4240 = vmatprep.subr.mxu0 %v6450_v31  ;;  %4270 = vmatprep.subr.mxu1 %v6440_v48 }
 0x1b5   :  { %4215 = vmatprep.mubr.f32.mxu0 %v5363_v62  ;;  %4241 = vmatpush3.msra.mxu0 %v6450_v31 }
 0x1b6   :  { %4271 = vmatpush3.msra.mxu1 %v6440_v48  ;;  %4242 = vmatprep.subr.mxu0 %v6451_v17 }
 0x1b7   :  { %4272 = vmatprep.subr.mxu1 %v6442_v11  ;;  %4243 = vmatpush3.msra.mxu0 %v6451_v17 }
 0x1b8   :  { %4273 = vmatpush3.msra.mxu1 %v6442_v11  ;;  %4216 = vmatmul.mubr.f32.gmra.mxu0 %v5366_v34 }
 0x1b9   :  { %4244 = vmatprep.subr.mxu0 %v6452_v5  ;;  %4274 = vmatprep.subr.mxu1 %v6444_v61 }
 0x1ba   :  { %4245 = vmatpush3.msra.mxu0 %v6452_v5  ;;  %4256 = vmatprep.mubr.f32.mxu0 %v5349_v42 }
 0x1bb   :  { %4275 = vmatpush3.msra.mxu1 %v6444_v61  ;;  %4246 = vmatprep.subr.mxu0 %v6453_v53  ;;  %v1988_v61 = vld [vmem:[%s6289_s1 + $0x90] sm:$0xff] }
 0x1bc   :  { %4276 = vmatprep.subr.mxu1 %v5025_v54  ;;  %4247 = vmatpush3.msra.mxu0 %v6453_v53  ;;  %v5467_v5 = vand.u32 4294901760, %v1988_v61 }
 0x1bd   :  { %4277 = vmatpush3.msra.mxu1 %v5025_v54  ;;  %4248 = vmatprep.subr.mxu0 %v6454_v51 }
 0x1be   :  { %4279 = vmatmul.mubr.f32.vlgmr.msra.gmra.mxu1 %v5351_v27  ;;  %4249 = vmatpush3.msra.mxu0 %v6454_v51 }
 0x1bf   :  { %4281 = vmatprep.mubr.f32.mxu1 %v5353_v15  ;;  %4250 = vmatprep.subr.mxu0 %v6455_v7 }
 0x1c0   :  { %4251 = vmatpush3.msra.mxu0 %v6455_v7 }
 0x1c1   :  { %4252 = vmatprep.subr.mxu0 %v6456_v39 }
 0x1c2   :  { %4282 = vmatmul.mubr.f32.gmra.mxu1 %v5355_v60  ;;  %4253 = vmatpush3.msra.mxu0 %v6456_v39  ;;  %v5470_v39 = vsub.f32 %v1989_v50, %v5462_v24 }
 0x1c3   :  { %4254 = vmatprep.subr.mxu0 %v6457_v22 }
 0x1c4   :  { %4255 = vmatpush3.msra.mxu0 %v6457_v22  ;;  %6458 = vst [vmem:[#allocation16_spill] sm:$0xff] %v5470_v39  ;;  %v5472_v22 = vand.u32 4294901760, %v1987_v37 }
 0x1c5   :  { %4257 = vmatmul.mubr.f32.vlgmr.msra.gmra.mxu0 %v5351_v27  ;;  %4284 = vmatprep.subr.mxu0 %v5462_v24 }
 0x1c6   :  { %4259 = vmatprep.mubr.f32.mxu0 %v5353_v15  ;;  %6459 = vst [vmem:[#allocation17_spill] sm:$0xff] %v5472_v22  ;;  %4285 = vmatpush3.msra.mxu0 %v5462_v24 }
 0x1c7   :  { %4286 = vmatprep.subr.mxu0 %v5467_v5 }
 0x1c8   :  { %4287 = vmatpush3.msra.mxu0 %v5467_v5 }
 0x1c9   :  { %4260 = vmatmul.mubr.f32.gmra.mxu0 %v5355_v60  ;;  %4288 = vmatprep.subr.mxu0 %v5472_v22 }
 0x1ca   :  { %4289 = vmatpush3.msra.mxu0 %v5472_v22 }
 0x258   :  { %v4192_v54 = vpop.f32.mrf.mxu1 }
 0x25a   :  { %v1025_v20 = vpop.f32.mrf.mxu1 }
 0x25c   :  { %v4195_v62 = vpop.f32.mrf.mxu1 }
 0x25e   :  { %v1037_v10 = vpop.f32.mrf.mxu1 }
 0x260   :  { %v4170_v42 = vpop.f32.mrf.mxu0 }
 0x261   :  { %v895_v27 = vadd.f32 %v4170_v42, %v3930_v19 }
 0x262   :  { %v884_v46 = vpop.f32.mrf.mxu0 }
 0x263   :  { %v885_v15 = vadd.f32 %v3930_v19, %v884_v46  ;;  %v1032_v33 = vadd.f32 %v4192_v54, %v895_v27 }
 0x265   :  { %v4173_v34 = vpop.f32.mrf.mxu0  ;;  %v1026_v57 = vadd.f32 %v1025_v20, %v885_v15  ;;  %v5475_v20 = vand.u32 4294901760, %v1986_v16 }
 0x266   :  { %v915_v60 = vadd.f32 %v4173_v34, %v3930_v19 }
 0x267   :  { %v904_v55 = vpop.f32.mrf.mxu0  ;;  %6460 = vst [vmem:[#allocation18_spill] sm:$0xff] %v5475_v20  ;;  %4290 = vmatprep.subr.mxu0 %v5475_v20 }
 0x268   :  { %v905_v48 = vadd.f32 %v3930_v19, %v904_v55  ;;  %v1044_v12 = vadd.f32 %v4195_v62, %v915_v60  ;;  %v5488_v19 = vsub.f32 %v1988_v61, %v5467_v5  ;;  %v1983_v61 = vld [vmem:[%s6289_s1 + $0x68] sm:$0xff]  ;;  %4291 = vmatpush3.msra.mxu0 %v5475_v20 }
 0x26a   :  { %v4236_v30 = vpop.f32.mrf.mxu1  ;;  %v1038_v31 = vadd.f32 %v1037_v10, %v905_v48  ;;  %v5481_v10 = vand.u32 4294901760, %v5470_v39  ;;  %6462 = vst [vmem:[#allocation21_spill] sm:$0xff] %v5488_v19  ;;  %v5523_v50 = vand.u32 4294901760, %v5488_v19 }
 0x26c   :  { %v1233_v29 = vpop.f32.mrf.mxu1  ;;  %6461 = vst [vmem:[#allocation19_spill] sm:$0xff] %v5481_v10  ;;  %6467 = vst [vmem:[#allocation25_spill] sm:$0xff] %v5523_v50 }
 0x26f   :  { %v4239_v0 = vpop.f32.mrf.mxu1 }
 0x271   :  { %v1249_v28 = vpop.f32.mrf.mxu1 }
 0x273   :  { %v4214_v13 = vpop.f32.mrf.mxu0 }
 0x274   :  { %v1139_v1 = vadd.f32 %v4214_v13, %v1032_v33  ;;  %v1984_v13 = vld [vmem:[%s6289_s1 + $0x70] sm:$0xff] }
 0x275   :  { %v1131_v18 = vpop.f32.mrf.mxu0 }
 0x276   :  { %v1132_v9 = vadd.f32 %v1131_v18, %v1026_v57  ;;  %v1242_v8 = vadd.f32 %v4236_v30, %v1139_v1  ;;  %v1985_v30 = vld [vmem:[%s6289_s1 + $0x78] sm:$0xff]  ;;  %v5506_v1 = vsub.f32 %v1986_v16, %v5475_v20 }
 0x277   :  { %v5508_v57 = vand.u32 4294901760, %v1985_v30 }
 0x278   :  { %v4217_v14 = vpop.f32.mrf.mxu0  ;;  %v1234_v7 = vadd.f32 %v1233_v29, %v1132_v9  ;;  %6464 = vst [vmem:[#allocation22_spill] sm:$0xff] %v5506_v1 }
 0x279   :  { %v1153_v45 = vadd.f32 %v4217_v14, %v1044_v12  ;;  %v2140_v14 = vsub.f32 %v5470_v39, %v5481_v10  ;;  %6465 = vst [vmem:[#allocation23_spill] sm:$0xff] %v5508_v57  ;;  %v5517_v12 = vand.u32 4294901760, %v1984_v13  ;;  %4292 = vmatprep.subr.mxu0 %v5508_v57 }
 0x27a   :  { %v1145_v23 = vpop.f32.mrf.mxu0  ;;  %4293 = vmatpush3.msra.mxu0 %v5508_v57 }
 0x27b   :  { %v1146_v54 = vadd.f32 %v1145_v23, %v1038_v31  ;;  %v1258_v34 = vadd.f32 %v4239_v0, %v1153_v45  ;;  %v5500_v0 = vsub.f32 %v1987_v37, %v5472_v22  ;;  %6466 = vst [vmem:[#allocation24_spill] sm:$0xff] %v5517_v12  ;;  %v2141_v23 = vand.u32 4294901760, %v2140_v14  ;;  %4294 = vmatprep.subr.mxu0 %v5517_v12 }
 0x27c   :  { %4295 = vmatpush3.msra.mxu0 %v5517_v12 }
 0x27d   :  { %6463 = vst [vmem:[#allocation20_spill] sm:$0xff] %v5500_v0  ;;  %v1250_v60 = vadd.f32 %v1249_v28, %v1146_v54  ;;  %v5534_v16 = vand.u32 4294901760, %v5500_v0  ;;  %4306 = vmatprep.subr.mxu1 %v2141_v23 }
 0x27e   :  { %v4280_v11 = vpop.f32.mrf.mxu1  ;;  %4307 = vmatpush3.msra.mxu1 %v2141_v23 }
 0x27f   :  { %6468 = vst [vmem:[#allocation26_spill] sm:$0xff] %v5534_v16 }
 0x280   :  { %v1449_v53 = vpop.f32.mrf.mxu1 }
 0x282   :  { %v4283_v29 = vpop.f32.mrf.mxu1 }
 0x284   :  { %v1461_v37 = vpop.f32.mrf.mxu1 }
 0x285   :  { %v4258_v17 = vpop.f32.mrf.mxu0 }
 0x286   :  { %v1359_v51 = vadd.f32 %v4258_v17, %v1242_v8 }
 0x287   :  { %v1352_v42 = vpop.f32.mrf.mxu0 }
 0x288   :  { %v5478_v46 = vadd.f32 %v4280_v11, %v1359_v51  ;;  %v1353_v62 = vadd.f32 %v1352_v42, %v1234_v7  ;;  %v5546_v51 = vsub.f32 %v1985_v30, %v5508_v57  ;;  %v5551_v42 = vsub.f32 %v1984_v13, %v5517_v12 }
 0x289   :  { %v4261_v55 = vpop.f32.mrf.mxu0  ;;  %v2147_v30 = vsub.f32 %v5488_v19, %v5523_v50  ;;  %v2154_v13 = vsub.f32 %v5500_v0, %v5534_v16 }
 0x28a   :  { %v5495_v27 = vmul.f32 0.70710677, %v5478_v46  ;;  %v5497_v18 = vadd.f32 %v1449_v53, %v1353_v62  ;;  %v1371_v15 = vadd.f32 %v4261_v55, %v1258_v34  ;;  %v5543_v53 = vand.u32 4294901760, %v5506_v1  ;;  %6470 = vst [vmem:[#allocation35_spill] sm:$0xff] %v5546_v51  ;;  %6471 = vst [vmem:[#allocation27_spill] sm:$0xff] %v5551_v42 }
 0x28b   :  { %v1364_v33 = vpop.f32.mrf.mxu0  ;;  %v5553_v62 = vand.u32 4294901760, %v1983_v61 }
 0x28c   :  { %v5512_v48 = vand.u32 2147483647, %v5495_v27  ;;  %v5515_v9 = vmul.f32 0.70710677, %v5497_v18  ;;  %v5520_v28 = vadd.f32 %v4283_v29, %v1371_v15  ;;  %v1365_v11 = vadd.f32 %v1364_v33, %v1250_v60  ;;  %6469 = vst [vmem:[#allocation30_spill] sm:$0xff] %v5543_v53 }
 0x28d   :  { %6472 = vst [vmem:[#allocation28_spill] sm:$0xff] %v5553_v62  ;;  %4296 = vmatprep.subr.mxu0 %v5553_v62  ;;  %v2161_v60 = vsub.f32 %v5506_v1, %v5543_v53  ;;  %v5569_v33 = vand.u32 4294901760, %v5546_v51  ;;  %vm1480_vm11 = vcmp.ge.f32.partialorder %v5495_v27, 0.0 }
 0x28e   :  { %v1492_v45 = vmul.f32 0.3275911, %v5512_v48  ;;  %v5531_v8 = vand.u32 2147483647, %v5515_v9  ;;  %v5538_v31 = vmul.f32 0.70710677, %v5520_v28  ;;  %v5540_v17 = vadd.f32 %v1461_v37, %v1365_v11  ;;  %4297 = vmatpush3.msra.mxu0 %v5553_v62 }
 0x28f   :  { %6473 = vst [vmem:[#allocation29_spill] sm:$0xff] %v5569_v33  ;;  %v5574_v11 = vand.u32 4294901760, %v5551_v42  ;;  %v2148_v37 = vand.u32 4294901760, %v2147_v30  ;;  %v2162_v53 = vand.u32 4294901760, %v2161_v60  ;;  %v2168_v16 = vsub.f32 %v5546_v51, %v5569_v33 }
 0x290   :  { %v1496_v7 = vadd.f32 1.0, %v1492_v45  ;;  %v1491_v54 = vmul.f32 0.3275911, %v5531_v8  ;;  %v1490_v34 = vand.u32 2147483647, %v5538_v31  ;;  %v1544_v50 = vsub.f32 0.0, %v5512_v48 }
 0x291   :  { %v5558_v55 = vmul.f32 0.70710677, %v5540_v17  ;;  %6474 = vst [vmem:[#allocation31_spill] sm:$0xff] %v5574_v11  ;;  %4308 = vmatprep.subr.mxu1 %v2148_v37  ;;  %v5585_v30 = vsub.f32 %v1983_v61, %v5553_v62  ;;  %vm1479_vm12 = vcmp.ge.f32.partialorder %v5515_v9, 0.0  ;;  %vm1482_vm13 = vcmp.ge.f32.partialorder %v5538_v31, 0.0 }
 0x292   :  { %4663 = vrcp.f32 %v1496_v7  ;;  %v1495_v29 = vadd.f32 1.0, %v1491_v54  ;;  %v1494_v15 = vmul.f32 0.3275911, %v1490_v34  ;;  %v2155_v7 = vand.u32 4294901760, %v2154_v13  ;;  %v1982_v54 = vld [vmem:[%s6289_s1 + $0x60] sm:$0xff]  ;;  %4309 = vmatpush3.msra.mxu1 %v2148_v37 }
 0x293   :  { %v1489_v14 = vand.u32 2147483647, %v5558_v55  ;;  %6475 = vst [vmem:[#allocation32_spill] sm:$0xff] %v5585_v30  ;;  %v2169_v13 = vand.u32 4294901760, %v2168_v16  ;;  %v5590_v60 = vand.u32 4294901760, %v5585_v30  ;;  %v1548_v61 = vmul.f32 %v1544_v50, %v5512_v48 }
 0x294   :  { %4665 = vrcp.f32 %v1495_v29  ;;  %v1498_v23 = vadd.f32 1.0, %v1494_v15  ;;  %v2175_v29 = vsub.f32 %v5551_v42, %v5574_v11  ;;  %4310 = vmatprep.subr.mxu1 %v2155_v7  ;;  %v5587_v15 = vand.u32 4294901760, %v1982_v54 }
 0x295   :  { %v1493_v45 = vmul.f32 0.3275911, %v1489_v14  ;;  %4311 = vmatpush3.msra.mxu1 %v2155_v7  ;;  %6477 = vst [vmem:[#allocation34_spill] sm:$0xff] %v5590_v60  ;;  %v2182_v16 = vsub.f32 %v5585_v30, %v5590_v60  ;;  %v1545_v60 = vsub.f32 0.0, %v1489_v14  ;;  %v1486_v9 = vsel %vm1482_vm13, 1.0, %v6436_v6 }
 0x296   :  { %4667 = vrcp.f32 %v1498_v23  ;;  %6476 = vst [vmem:[#allocation33_spill] sm:$0xff] %v5587_v15  ;;  %v1543_v23 = vsub.f32 0.0, %v5531_v8  ;;  %4312 = vmatprep.subr.mxu1 %v2162_v53  ;;  %v5594_v37 = vsub.f32 %v1982_v54, %v5587_v15  ;;  %4298 = vmatprep.subr.mxu0 %v5587_v15  ;;  %vm1481_vm14 = vcmp.ge.f32.partialorder %v5558_v55, 0.0 }
 0x297   :  { %v1497_v10 = vadd.f32 1.0, %v1493_v45  ;;  %v2176_v45 = vand.u32 4294901760, %v2175_v29  ;;  %4313 = vmatpush3.msra.mxu1 %v2162_v53  ;;  %4299 = vmatpush3.msra.mxu0 %v5587_v15  ;;  %v2183_v54 = vand.u32 4294901760, %v2182_v16  ;;  %v1553_v53 = vmul.f32 1.442695, %v1548_v61 }
 0x298   :  { %6478 = vst [vmem:[#allocation36_spill] sm:$0xff] %v5594_v37  ;;  %4314 = vmatprep.subr.mxu1 %v2169_v13  ;;  %v5602_v7 = vand.u32 4294901760, %v5594_v37  ;;  %4328 = vmatprep.subr.mxu0 %v5470_v39  ;;  %v1547_v11 = vmul.f32 %v1543_v23, %v5531_v8  ;;  %v1549_v8 = vmul.f32 %v1545_v60, %v1489_v14 }
 0x299   :  { %4669 = vrcp.f32 %v1497_v10  ;;  %v1546_v10 = vsub.f32 0.0, %v1490_v34  ;;  %4315 = vmatpush3.msra.mxu1 %v2169_v13 }
 0x29a   :  { %6479 = vst [vmem:[#allocation39_spill] sm:$0xff] %v5602_v7  ;;  %4316 = vmatprep.subr.mxu1 %v2176_v45  ;;  %v2189_v48 = vsub.f32 %v5594_v37, %v5602_v7  ;;  %v1551_v13 = vmul.f32 1.442695, %v1547_v11  ;;  %4671 = vpow2.f32 %v1553_v53 }
 0x29b   :  { %4317 = vmatpush3.msra.mxu1 %v2176_v45  ;;  %v1550_v33 = vmul.f32 %v1546_v10, %v1490_v34 }
 0x29c   :  { %4318 = vmatprep.subr.mxu1 %v2183_v54  ;;  %v2190_v30 = vand.u32 4294901760, %v2189_v48  ;;  %4673 = vpow2.f32 %v1551_v13 }
 0x29d   :  { %4319 = vmatpush3.msra.mxu1 %v2183_v54  ;;  %v1557_v37 = vmul.f32 1.442695, %v1550_v33 }
 0x29e   :  { %4320 = vmatprep.subr.mxu1 %v2190_v30 }
 0x29f   :  { %v4664_v29 = vpop.eup %4663  ;;  %4321 = vmatpush3.msra.mxu1 %v2190_v30  ;;  %4675 = vpow2.f32 %v1557_v37 }
 0x2a0   :  { %v1508_v50 = vmul.f32 1.0614054, %v4664_v29  ;;  %4350 = vmatprep.subr.mxu1 %v5462_v24 }
 0x2a1   :  { %v4666_v42 = vpop.eup %4665 }
 0x2a2   :  { %v1512_v51 = vadd.f32 -1.4531521, %v1508_v50  ;;  %v1507_v15 = vmul.f32 1.0614054, %v4666_v42  ;;  %v1555_v50 = vmul.f32 1.442695, %v1549_v8 }
 0x2a3   :  { %v4668_v16 = vpop.eup %4667 }
 0x2a4   :  { %v1516_v1 = vmul.f32 %v4664_v29, %v1512_v51  ;;  %v1511_v23 = vadd.f32 -1.4531521, %v1507_v15  ;;  %v1510_v7 = vmul.f32 1.0614054, %v4668_v16  ;;  %4677 = vpow2.f32 %v1555_v50 }
 0x2a6   :  { %v1520_v45 = vadd.f32 1.4214138, %v1516_v1  ;;  %v4670_v34 = vpop.eup %4669  ;;  %v1515_v61 = vmul.f32 %v4666_v42, %v1511_v23  ;;  %v1514_v10 = vadd.f32 -1.4531521, %v1510_v7 }
 0x2a7   :  { %v1509_v54 = vmul.f32 1.0614054, %v4670_v34  ;;  %v4672_v19 = vpop.eup %4671 }
 0x2a8   :  { %v1524_v48 = vmul.f32 %v4664_v29, %v1520_v45  ;;  %v1519_v11 = vadd.f32 1.4214138, %v1515_v61  ;;  %v1518_v62 = vmul.f32 %v4668_v16, %v1514_v10 }
 0x2a9   :  { %v1513_v53 = vadd.f32 -1.4531521, %v1509_v54  ;;  %v4674_v54 = vpop.eup %4673 }
 0x2aa   :  { %v1528_v51 = vadd.f32 -0.28449672, %v1524_v48  ;;  %v1523_v14 = vmul.f32 %v4666_v42, %v1519_v11  ;;  %v1522_v30 = vadd.f32 1.4214138, %v1518_v62 }
 0x2ab   :  { %v1517_v60 = vmul.f32 %v4670_v34, %v1513_v53 }
 0x2ac   :  { %v1532_v15 = vmul.f32 %v4664_v29, %v1528_v51  ;;  %v1527_v33 = vadd.f32 -0.28449672, %v1523_v14  ;;  %v1526_v0 = vmul.f32 %v4668_v16, %v1522_v30  ;;  %v1484_v51 = vsel %vm1480_vm11, 1.0, %v6436_v6 }
 0x2ad   :  { %v1521_v12 = vadd.f32 1.4214138, %v1517_v60 }
 0x2ae   :  { %v1536_v1 = vadd.f32 0.2548296, %v1532_v15  ;;  %v1531_v23 = vmul.f32 %v4666_v42, %v1527_v33  ;;  %v1530_v13 = vadd.f32 -0.28449672, %v1526_v0 }
 0x2af   :  { %v1525_v45 = vmul.f32 %v4670_v34, %v1521_v12 }
 0x2b0   :  { %v1540_v7 = vmul.f32 %v4664_v29, %v1536_v1  ;;  %v1535_v8 = vadd.f32 0.2548296, %v1531_v23  ;;  %v1534_v61 = vmul.f32 %v4668_v16, %v1530_v13  ;;  %v4676_v29 = vpop.eup %4675  ;;  %v1472_v23 = vmul.f32 0.5, %v5478_v46 }
 0x2b1   :  { %v1529_v10 = vadd.f32 -0.28449672, %v1525_v45  ;;  %v4678_v60 = vpop.eup %4677  ;;  %v1471_v13 = vmul.f32 0.5, %v5497_v18  ;;  %v1473_v46 = vmul.f32 0.5, %v5540_v17 }
 0x2b2   :  { %v1560_v37 = vmul.f32 %v4672_v19, %v1540_v7  ;;  %v1539_v48 = vmul.f32 %v4666_v42, %v1535_v8  ;;  %v1538_v62 = vadd.f32 0.2548296, %v1534_v61  ;;  %v1483_v42 = vsel %vm1479_vm12, 1.0, %v6436_v6 }
 0x2b3   :  { %v1533_v50 = vmul.f32 %v4670_v34, %v1529_v10  ;;  %v1474_v10 = vmul.f32 0.5, %v5520_v28 }
 0x2b4   :  { %v1564_v11 = vsub.f32 1.0, %v1560_v37  ;;  %v1559_v53 = vmul.f32 %v4674_v54, %v1539_v48  ;;  %v1542_v0 = vmul.f32 %v4668_v16, %v1538_v62 }
 0x2b5   :  { %v1537_v14 = vadd.f32 0.2548296, %v1533_v50 }
 0x2b6   :  { %v1568_v12 = vmul.f32 %v1564_v11, %v1484_v51  ;;  %v1563_v30 = vsub.f32 1.0, %v1559_v53  ;;  %v1562_v27 = vmul.f32 %v4676_v29, %v1542_v0 }
 0x2b7   :  { %v1541_v15 = vmul.f32 %v4670_v34, %v1537_v14  ;;  %v1485_v34 = vsel %vm1481_vm14, 1.0, %v6436_v6 }
 0x2b8   :  { %v1572_v19 = vadd.f32 1.0, %v1568_v12  ;;  %v1567_v33 = vmul.f32 %v1563_v30, %v1483_v42  ;;  %v1566_v1 = vsub.f32 1.0, %v1562_v27 }
 0x2b9   :  { %v1561_v16 = vmul.f32 %v4678_v60, %v1541_v15 }
 0x2ba   :  { %v1571_v7 = vadd.f32 1.0, %v1567_v33  ;;  %v1570_v45 = vmul.f32 %v1566_v1, %v1486_v9  ;;  %v1576_v31 = vmul.f32 %v1572_v19, %v1472_v23 }
 0x2bb   :  { %v1565_v8 = vsub.f32 1.0, %v1561_v16 }
 0x2bc   :  { %v1575_v61 = vmul.f32 %v1571_v7, %v1471_v13  ;;  %v1574_v37 = vadd.f32 1.0, %v1570_v45  ;;  %v1596_v54 = vmul.f32 %v1576_v31, %v1576_v31  ;;  %v1582_v18 = vsel %vm247_vm4, %v1576_v31, 0.0 }
 0x2bd   :  { %v1569_v48 = vmul.f32 %v1565_v8, %v1485_v34 }
 0x2be   :  { %v1595_v62 = vmul.f32 %v1575_v61, %v1575_v61  ;;  %v1581_v55 = vsel %vm247_vm4, %v1575_v61, 0.0  ;;  %v1578_v11 = vmul.f32 %v1574_v37, %v1474_v10  ;;  %v1600_v29 = vsel %vm247_vm4, %v1596_v54, 0.0 }
 0x2bf   :  { %v1573_v50 = vadd.f32 1.0, %v1569_v48  ;;  %v1583_v0 = vadd.f32 %v1582_v18, %v1581_v55  ;;  %v1579_v18 = vld [vmem:[%s6289_s1 + $0xa2] sm:$0x1] }
 0x2c0   :  { %v1599_v51 = vsel %vm247_vm4, %v1595_v62, 0.0  ;;  %v1598_v12 = vmul.f32 %v1578_v11, %v1578_v11  ;;  %v1586_v17 = vsel %vm247_vm4, %v1578_v11, 0.0 }
 0x2c1   :  { %v1577_v53 = vmul.f32 %v1573_v50, %v1473_v46  ;;  %v1601_v30 = vadd.f32 %v1600_v29, %v1599_v51  ;;  %v1580_v29 = vld [vmem:[%s6289_s1 + $0xa4] sm:$0x1] }
 0x2c2   :  { %v1604_v60 = vsel %vm247_vm4, %v1598_v12, 0.0  ;;  %v1636_v12 = vld [vmem:[%s6289_s1 + $0x11] sm:$0xff] }
 0x2c3   :  { %v1584_v28 = vsel %vm247_vm4, %v1577_v53, 0.0  ;;  %v1597_v14 = vmul.f32 %v1577_v53, %v1577_v53 }
 0x2c4   :  { %v1585_v27 = vadd.f32 %v1584_v28, %v1583_v0 }
 0x2c5   :  { %v1602_v19 = vsel %vm247_vm4, %v1597_v14, 0.0 }
 0x2c6   :  { %v1587_v42 = vadd.f32 %v1586_v17, %v1585_v27  ;;  %v1603_v15 = vadd.f32 %v1602_v19, %v1601_v30  ;;  %v6480_v27 = vld [vmem:[#allocation2_spill] sm:$0xff] }
 0x2c7   :  { %v6481_v17 = vsub.s32 4, %v6480_v27 }
 0x2c8   :  { %v1588_v33 = vrot.slane %v1587_v42, 4  ;;  %v1605_v1 = vadd.f32 %v1604_v60, %v1603_v15 }
 0x2c9   :  { %v1641_v19 = vrot.slane %v1636_v12, %v6481_v17 }
 0x2ca   :  { %v1589_v23 = vadd.f32 %v1588_v33, %v1587_v42  ;;  %v1606_v9 = vrot.slane %v1605_v1, 4 }
 0x2cc   :  { %v1590_v16 = vrot.slane %v1589_v23, 2  ;;  %v1607_v13 = vadd.f32 %v1606_v9, %v1605_v1 }
 0x2ce   :  { %v1591_v7 = vadd.f32 %v1590_v16, %v1589_v23  ;;  %v1608_v45 = vrot.slane %v1607_v13, 2  ;;  %v6482_v23 = vld [vmem:[#allocation3_spill] sm:$0xff]  ;;  %v6483_v16 = vld [vmem:[#allocation4_spill] sm:$0xff] }
 0x2cf   :  { %v1686_v9 = vrot.slane %v1636_v12, %v6482_v23  ;;  %v6490_v23 = vld [vmem:[#allocation6_spill] sm:$0xff] }
 0x2d0   :  { %v1592_v8 = vrot.slane %v1591_v7, 1  ;;  %v1609_v37 = vadd.f32 %v1608_v45, %v1607_v13  ;;  %v5644_v13 = vrot.slane %v1636_v12, %v6483_v16 }
 0x2d2   :  { %v1593_v34 = vadd.f32 %v1592_v8, %v1591_v7  ;;  %v1610_v10 = vrot.slane %v1609_v37, 1  ;;  %v6484_v7 = vld [vmem:[#allocation5_spill] sm:$0xff] }
 0x2d3   :  { %v5647_v45 = vrot.slane %v1636_v12, %v6484_v7  ;;  %v6491_v7 = vld [vmem:[#allocation9_spill] sm:$0xff] }
 0x2d4   :  { %v1594_v48 = vmul.f32 0.03125, %v1593_v34  ;;  %v1611_v62 = vadd.f32 %v1610_v10, %v1609_v37 }
 0x2d6   :  { %v1612_v46 = vmul.f32 0.03125, %v1611_v62  ;;  %v1613_v54 = vmul.f32 %v1594_v48, %v1594_v48 }
 0x2d8   :  { %v1614_v55 = vsub.f32 %v1612_v46, %v1613_v54  ;;  %v1670_v46 = vrot.slane %v1636_v12, %v4817_v21 }
 0x2da   :  { %v1615_v50 = vadd.f32 1e-05, %v1614_v55 }
 0x2dc   :  { %4679 = vrsqrt.f32 %v1615_v50 }
 0x2e9   :  { %v4680_v51 = vpop.eup %4679 }
 0x2ea   :  { %v1617_v0 = vmul.f32 %v4680_v51, %v1579_v18 }
 0x2ec   :  { %v1618_v28 = vmul.f32 %v1617_v0, %v1594_v48  ;;  %v1623_v14 = vrot.slane %v1617_v0, %v4817_v21  ;;  %v6487_v48 = vsub.s32 7, %v6480_v27 }
 0x2ee   :  { %v1619_v30 = vsub.f32 %v1580_v29, %v1618_v28  ;;  %v1624_v42 = vmul.f32 %v1623_v14, %v1575_v61  ;;  %v1625_v15 = vmul.f32 %v1623_v14, %v1576_v31  ;;  %v1626_v60 = vmul.f32 %v1623_v14, %v1577_v53  ;;  %v6488_v29 = vld [vmem:[#allocation10_spill] sm:$0xff] }
 0x2ef   :  { %v1627_v33 = vmul.f32 %v1623_v14, %v1578_v11  ;;  %v6485_v31 = vsub.s32 5, %v6480_v27  ;;  %v6486_v53 = vsub.s32 6, %v6480_v27  ;;  %v5667_v62 = vrot.slane %v1636_v12, %v6487_v48  ;;  %v6489_v14 = vld [vmem:[#allocation12_spill] sm:$0xff] }
 0x2f0   :  { %v1631_v1 = vrot.slane %v1619_v30, %v4817_v21 }
 0x2f1   :  { %v5659_v11 = vrot.slane %v1636_v12, %v6485_v31  ;;  %v5663_v10 = vrot.slane %v1636_v12, %v6486_v53 }
 0x2f2   :  { %v5649_v8 = vadd.f32 %v1631_v1, %v1625_v15  ;;  %v5651_v37 = vadd.f32 %v1631_v1, %v1626_v60  ;;  %v5653_v34 = vadd.f32 %v1631_v1, %v1627_v33  ;;  %v5655_v61 = vadd.f32 %v1631_v1, %v1624_v42 }
 0x2f4   :  { %v1643_v54 = vmul.f32 %v1641_v19, %v5649_v8  ;;  %v1644_v55 = vmul.f32 %v1641_v19, %v5651_v37  ;;  %v1645_v50 = vmul.f32 %v1641_v19, %v5653_v34  ;;  %v1648_v18 = vrot.slane %v5651_v37, 7 }
 0x2f5   :  { %v1649_v51 = vrot.slane %v5653_v34, 7  ;;  %v1656_v0 = vrot.slane %v5649_v8, 7  ;;  %v1681_v28 = vmul.f32 %v5649_v8, %v6488_v29  ;;  %v1682_v30 = vmul.f32 %v5651_v37, %v6489_v14 }
 0x2f6   :  { %v1695_v12 = vrot.slane %v5653_v34, 1  ;;  %v1700_v27 = vrot.slane %v5651_v37, 1  ;;  %v1773_v17 = vmul.f32 %v5651_v37, %v5134_v44  ;;  %v1642_v42 = vmul.f32 %v1641_v19, %v5655_v61 }
 0x2f7   :  { %v1650_v15 = vsel %vm444_vm5, %v1648_v18, %v1649_v51  ;;  %v1658_v60 = vsel %vm444_vm5, %v1656_v0, %v1648_v18  ;;  %v1690_v33 = vmul.f32 %v1686_v9, %v1682_v30  ;;  %v1655_v1 = vrot.slane %v5655_v61, 7 }
 0x2f8   :  { %v1663_v16 = vmul.f32 %v1650_v15, %v6490_v23  ;;  %v1666_v31 = vmul.f32 %v1658_v60, %v6491_v7  ;;  %v5691_v53 = vsel %vm494_vm6, %v1700_v27, %v1695_v12  ;;  %v1726_v48 = vmul.f32 %v1658_v60, %v4925_v49 }
 0x2f9   :  { %v1711_v44 = vmul.f32 %v5691_v53, %v4921_v41  ;;  %v1727_v19 = vmul.f32 %v1650_v15, %v4937_v63  ;;  %v1742_v18 = vmul.f32 %v5691_v53, %v5088_v35  ;;  %v1757_v29 = vmul.f32 %v1658_v60, %v5136_v59 }
 0x2fa   :  { %v1671_v14 = vmul.f32 %v1670_v46, %v1663_v16  ;;  %v1674_v30 = vmul.f32 %v1670_v46, %v1666_v31  ;;  %v1734_v23 = vmul.f32 %v5647_v45, %v1726_v48  ;;  %v1758_v7 = vmul.f32 %v1650_v15, %v5086_v38  ;;  %v6492_v31 = vld [vmem:[#allocation7_spill] sm:$0xff]  ;;  %v6493_v38 = vld [vmem:[#allocation8_spill] sm:$0xff] }
 0x2fb   :  { %v1719_v39 = vmul.f32 %v5644_v13, %v1711_v44  ;;  %v1735_v49 = vmul.f32 %v5647_v45, %v1727_v19  ;;  %v1750_v57 = vmul.f32 %v5659_v11, %v1742_v18  ;;  %v5706_v41 = vmul.f32 %v5667_v62, %v1773_v17 }
 0x2fc   :  { %v1678_v63 = vadd.f32 %v1674_v30, %v1645_v50  ;;  %v1657_v35 = vsel %vm444_vm5, %v1655_v1, %v1656_v0  ;;  %v1662_v59 = vsel %vm444_vm5, %v1649_v51, %v1655_v1  ;;  %v1675_v60 = vadd.f32 %v1671_v14, %v1642_v42 }
 0x2fd   :  { %v1664_v16 = vmul.f32 %v1662_v59, %v4923_v43  ;;  %v1665_v48 = vmul.f32 %v1657_v35, %v6492_v31  ;;  %v1679_v15 = vmul.f32 %v5653_v34, %v6493_v38  ;;  %v1680_v44 = vmul.f32 %v5655_v61, %v4927_v4 }
 0x2fe   :  { %v1694_v19 = vadd.f32 %v1690_v33, %v1678_v63  ;;  %v1689_v18 = vmul.f32 %v1686_v9, %v1681_v28  ;;  %v1697_v17 = vrot.slane %v5655_v61, 1  ;;  %v1698_v50 = vrot.slane %v5649_v8, 1  ;;  %v6494_v63 = vld [vmem:[#allocation11_spill] sm:$0xff] }
 0x2ff   :  { %v1672_v0 = vmul.f32 %v1670_v46, %v1664_v16  ;;  %v1673_v30 = vmul.f32 %v1670_v46, %v1665_v48  ;;  %v1687_v51 = vmul.f32 %v1686_v9, %v1679_v15  ;;  %v1688_v42 = vmul.f32 %v1686_v9, %v1680_v44  ;;  %v6495_v46 = vld [vmem:[#allocation13_spill] sm:$0xff] }
 0x300   :  { %v1723_v1 = vadd.f32 %v1719_v39, %v1694_v19  ;;  %v1699_v43 = vsel %vm494_vm6, %v1697_v17, %v1698_v50  ;;  %v1701_v14 = vsel %vm494_vm6, %v1698_v50, %v1700_v27  ;;  %v1707_v31 = vsel %vm494_vm6, %v1695_v12, %v1697_v17 }
 0x301   :  { %v1676_v38 = vadd.f32 %v1672_v0, %v1643_v54  ;;  %v1677_v20 = vadd.f32 %v1673_v30, %v1644_v55  ;;  %v1691_v4 = vadd.f32 %v1687_v51, %v1675_v60  ;;  %v1708_v28 = vmul.f32 %v1707_v31, %v4933_v58 }
 0x302   :  { %v1739_v33 = vadd.f32 %v1735_v49, %v1723_v1  ;;  %v1709_v22 = vmul.f32 %v1699_v43, %v6494_v63  ;;  %v1710_v16 = vmul.f32 %v1701_v14, %v4939_v3  ;;  %v1724_v48 = vmul.f32 %v1662_v59, %v6495_v46  ;;  %v6496_v3 = vld [vmem:[#allocation14_spill] sm:$0xff]  ;;  %v6498_v46 = vld [vmem:[#allocation37_spill] sm:$0xff] }
 0x303   :  { %v1692_v9 = vadd.f32 %v1688_v42, %v1676_v38  ;;  %v1693_v39 = vadd.f32 %v1689_v18, %v1677_v20  ;;  %v1716_v15 = vmul.f32 %v5644_v13, %v1708_v28  ;;  %v1725_v27 = vmul.f32 %v1657_v35, %v4949_v26  ;;  %v6497_v26 = vld [vmem:[#allocation15_spill] sm:$0xff] }
 0x304   :  { %v1717_v12 = vmul.f32 %v5644_v13, %v1709_v22  ;;  %v1718_v54 = vmul.f32 %v5644_v13, %v1710_v16  ;;  %v1732_v55 = vmul.f32 %v5647_v45, %v1724_v48  ;;  %v1740_v58 = vmul.f32 %v1699_v43, %v5013_v47 }
 0x305   :  { %v1720_v49 = vadd.f32 %v1716_v15, %v1691_v4  ;;  %v1733_v60 = vmul.f32 %v5647_v45, %v1725_v27  ;;  %v1741_v44 = vmul.f32 %v1701_v14, %v6496_v3  ;;  %v1743_v19 = vmul.f32 %v1707_v31, %v5011_v52 }
 0x306   :  { %v1721_v20 = vadd.f32 %v1717_v12, %v1692_v9  ;;  %v1722_v18 = vadd.f32 %v1718_v54, %v1693_v39  ;;  %v1748_v17 = vmul.f32 %v5659_v11, %v1740_v58  ;;  %v1756_v50 = vmul.f32 %v1657_v35, %v6497_v26  ;;  %v6499_v9 = vld [vmem:[#allocation38_spill] sm:$0xff] }
 0x307   :  { %v1736_v22 = vadd.f32 %v1732_v55, %v1720_v49  ;;  %v1749_v13 = vmul.f32 %v5659_v11, %v1741_v44  ;;  %v1751_v0 = vmul.f32 %v5659_v11, %v1743_v19  ;;  %v1759_v47 = vmul.f32 %v1662_v59, %v5183_v36  ;;  %v3931_v11 = vld [vmem:[%s6289_s1 + $0x19] ss:$0 sm:$0xff] }
 0x308   :  { %v1737_v30 = vadd.f32 %v1733_v60, %v1721_v20  ;;  %v1738_v51 = vadd.f32 %v1734_v23, %v1722_v18  ;;  %v1764_v45 = vmul.f32 %v5663_v10, %v1756_v50  ;;  %v1765_v42 = vmul.f32 %v5663_v10, %v1757_v29 }
 0x309   :  { %v1752_v52 = vadd.f32 %v1748_v17, %v1736_v22  ;;  %v1755_v1 = vadd.f32 %v1751_v0, %v1739_v33  ;;  %v1766_v38 = vmul.f32 %v5663_v10, %v1758_v7  ;;  %v1767_v4 = vmul.f32 %v5663_v10, %v1759_v47 }
 0x30a   :  { %v1753_v35 = vadd.f32 %v1749_v13, %v1737_v30  ;;  %v1754_v28 = vadd.f32 %v1750_v57, %v1738_v51  ;;  %v1772_v63 = vmul.f32 %v5649_v8, %v5185_v56  ;;  %v1774_v36 = vmul.f32 %v5653_v34, %v5220_v32 }
 0x30b   :  { %v1768_v23 = vadd.f32 %v1764_v45, %v1752_v52  ;;  %v1771_v29 = vadd.f32 %v1767_v4, %v1755_v1  ;;  %v1775_v59 = vmul.f32 %v5655_v61, %v5244_v2  ;;  %v1788_v7 = vmul.f32 %v1701_v14, %v5218_v25 }
 0x30c   :  { %v1769_v10 = vadd.f32 %v1765_v42, %v1753_v35  ;;  %v1770_v33 = vadd.f32 %v1766_v38, %v1754_v28  ;;  %v1780_v57 = vmul.f32 %v5667_v62, %v1772_v63  ;;  %v1782_v56 = vmul.f32 %v5667_v62, %v1774_v36 }
 0x30d   :  { %v1783_v16 = vmul.f32 %v5667_v62, %v1775_v59  ;;  %v1789_v32 = vmul.f32 %v5691_v53, %v5246_v40  ;;  %v1790_v48 = vmul.f32 %v1707_v31, %v6498_v46  ;;  %v1791_v39 = vmul.f32 %v1699_v43, %v6499_v9  ;;  %v3932_v62 = vld [vmem:[%s6289_s1 + $0x1b] ss:$0 sm:$0xff] }
 0x30e   :  { %v1784_v15 = vadd.f32 %v1780_v57, %v1768_v23  ;;  %v1785_v2 = vadd.f32 %v5706_v41, %v1769_v10  ;;  %v1786_v27 = vadd.f32 %v1782_v56, %v1770_v33  ;;  %v1796_v25 = vmul.f32 %v3931_v11, %v1788_v7 }
 0x30f   :  { %v1787_v14 = vadd.f32 %v1783_v16, %v1771_v29  ;;  %v1797_v12 = vmul.f32 %v3931_v11, %v1789_v32  ;;  %v1798_v54 = vmul.f32 %v3931_v11, %v1790_v48  ;;  %v1799_v55 = vmul.f32 %v3931_v11, %v1791_v39 }
 0x310   :  { %v1800_v58 = vadd.f32 %v1796_v25, %v1784_v15 }
 0x311   :  { %v1801_v49 = vadd.f32 %v1797_v12, %v1785_v2  ;;  %v1802_v40 = vadd.f32 %v1798_v54, %v1786_v27  ;;  %v1803_v53 = vadd.f32 %v1799_v55, %v1787_v14 }
 0x312   :  { %v5764_v31 = vadd.f32 %v3932_v62, %v1800_v58 }
 0x313   :  { %v5766_v43 = vadd.f32 %v3932_v62, %v1801_v49  ;;  %v5768_v60 = vadd.f32 %v3932_v62, %v1802_v40  ;;  %v5770_v41 = vadd.f32 %v3932_v62, %v1803_v53 }
 0x314   :  { %v5773_v3 = vmul.f32 0.70710677, %v5764_v31 }
 0x315   :  { %v5776_v44 = vmul.f32 0.70710677, %v5766_v43  ;;  %v5779_v19 = vmul.f32 0.70710677, %v5768_v60  ;;  %v5782_v20 = vmul.f32 0.70710677, %v5770_v41 }
 0x316   :  { %v1829_v18 = vand.u32 2147483647, %v5773_v3  ;;  %vm1821_vm15 = vcmp.ge.f32.partialorder %v5773_v3, 0.0 }
 0x317   :  { %v1830_v17 = vand.u32 2147483647, %v5776_v44  ;;  %v1831_v26 = vand.u32 2147483647, %v5779_v19  ;;  %v1832_v50 = vand.u32 2147483647, %v5782_v20 }
 0x318   :  { %v1833_v22 = vmul.f32 0.3275911, %v1829_v18  ;;  %v1885_v52 = vsub.f32 0.0, %v1829_v18  ;;  %vm1822_vm0 = vcmp.ge.f32.partialorder %v5776_v44, 0.0  ;;  %vm1823_vm1 = vcmp.ge.f32.partialorder %v5779_v19, 0.0 }
 0x319   :  { %v1834_v13 = vmul.f32 0.3275911, %v1830_v17  ;;  %v1835_v0 = vmul.f32 0.3275911, %v1831_v26  ;;  %v1836_v47 = vmul.f32 0.3275911, %v1832_v50 }
 0x31a   :  { %v1837_v30 = vadd.f32 1.0, %v1833_v22  ;;  %v1886_v1 = vsub.f32 0.0, %v1830_v17  ;;  %v1887_v38 = vsub.f32 0.0, %v1831_v26  ;;  %v1888_v4 = vsub.f32 0.0, %v1832_v50 }
 0x31b   :  { %v1838_v51 = vadd.f32 1.0, %v1834_v13  ;;  %v1839_v45 = vadd.f32 1.0, %v1835_v0  ;;  %v1840_v42 = vadd.f32 1.0, %v1836_v47  ;;  %v1889_v35 = vmul.f32 %v1885_v52, %v1829_v18 }
 0x31c   :  { %4681 = vrcp.f32 %v1837_v30  ;;  %v1890_v28 = vmul.f32 %v1886_v1, %v1830_v17  ;;  %v1891_v63 = vmul.f32 %v1887_v38, %v1831_v26  ;;  %v1892_v11 = vmul.f32 %v1888_v4, %v1832_v50 }
 0x31d   :  { %4683 = vrcp.f32 %v1838_v51  ;;  %v1893_v59 = vmul.f32 1.442695, %v1889_v35  ;;  %vm1824_vm2 = vcmp.ge.f32.partialorder %v5782_v20, 0.0  ;;  %v1826_v3 = vsel %vm1822_vm0, 1.0, %v6436_v6 }
 0x31e   :  { %4685 = vrcp.f32 %v1839_v45  ;;  %v1895_v33 = vmul.f32 1.442695, %v1890_v28  ;;  %v1897_v32 = vmul.f32 1.442695, %v1891_v63  ;;  %v1899_v9 = vmul.f32 1.442695, %v1892_v11 }
 0x31f   :  { %4687 = vrcp.f32 %v1840_v42  ;;  %v1828_v19 = vsel %vm1824_vm2, 1.0, %v6436_v6  ;;  %v1814_v20 = vmul.f32 0.5, %v5766_v43 }
 0x320   :  { %4689 = vpow2.f32 %v1893_v59 }
 0x321   :  { %4691 = vpow2.f32 %v1895_v33 }
 0x322   :  { %4693 = vpow2.f32 %v1897_v32  ;;  %v1827_v32 = vsel %vm1823_vm1, 1.0, %v6436_v6 }
 0x323   :  { %4695 = vpow2.f32 %v1899_v9 }
 0x329   :  { %v4682_v36 = vpop.eup %4681 }
 0x32a   :  { %v4684_v23 = vpop.eup %4683  ;;  %v1849_v29 = vmul.f32 1.0614054, %v4682_v36 }
 0x32b   :  { %v4686_v7 = vpop.eup %4685  ;;  %v1850_v10 = vmul.f32 1.0614054, %v4684_v23 }
 0x32c   :  { %v4688_v57 = vpop.eup %4687  ;;  %v1851_v56 = vmul.f32 1.0614054, %v4686_v7  ;;  %v1853_v16 = vadd.f32 -1.4531521, %v1849_v29 }
 0x32d   :  { %v1852_v46 = vmul.f32 1.0614054, %v4688_v57  ;;  %v1854_v48 = vadd.f32 -1.4531521, %v1850_v10  ;;  %v4690_v52 = vpop.eup %4689 }
 0x32e   :  { %v1855_v39 = vadd.f32 -1.4531521, %v1851_v56  ;;  %v1857_v15 = vmul.f32 %v4682_v36, %v1853_v16  ;;  %v4692_v4 = vpop.eup %4691 }
 0x32f   :  { %v1856_v2 = vadd.f32 -1.4531521, %v1852_v46  ;;  %v1858_v27 = vmul.f32 %v4684_v23, %v1854_v48  ;;  %v4694_v63 = vpop.eup %4693  ;;  %v1813_v46 = vmul.f32 0.5, %v5764_v31 }
 0x330   :  { %v1859_v25 = vmul.f32 %v4686_v7, %v1855_v39  ;;  %v1861_v14 = vadd.f32 1.4214138, %v1857_v15  ;;  %v4696_v59 = vpop.eup %4695 }
 0x331   :  { %v1860_v12 = vmul.f32 %v4688_v57, %v1856_v2  ;;  %v1862_v54 = vadd.f32 1.4214138, %v1858_v27  ;;  %v1815_v2 = vmul.f32 0.5, %v5768_v60 }
 0x332   :  { %v1863_v55 = vadd.f32 1.4214138, %v1859_v25  ;;  %v1865_v62 = vmul.f32 %v4682_v36, %v1861_v14  ;;  %v1816_v14 = vmul.f32 0.5, %v5770_v41 }
 0x333   :  { %v1864_v58 = vadd.f32 1.4214138, %v1860_v12  ;;  %v1866_v49 = vmul.f32 %v4684_v23, %v1862_v54 }
 0x334   :  { %v1867_v40 = vmul.f32 %v4686_v7, %v1863_v55  ;;  %v1869_v53 = vadd.f32 -0.28449672, %v1865_v62 }
 0x335   :  { %v1868_v18 = vmul.f32 %v4688_v57, %v1864_v58  ;;  %v1870_v17 = vadd.f32 -0.28449672, %v1866_v49 }
 0x336   :  { %v1871_v26 = vadd.f32 -0.28449672, %v1867_v40  ;;  %v1873_v50 = vmul.f32 %v4682_v36, %v1869_v53 }
 0x337   :  { %v1872_v22 = vadd.f32 -0.28449672, %v1868_v18  ;;  %v1874_v13 = vmul.f32 %v4684_v23, %v1870_v17 }
 0x338   :  { %v1875_v0 = vmul.f32 %v4686_v7, %v1871_v26  ;;  %v1877_v47 = vadd.f32 0.2548296, %v1873_v50 }
 0x339   :  { %v1876_v30 = vmul.f32 %v4688_v57, %v1872_v22  ;;  %v1878_v51 = vadd.f32 0.2548296, %v1874_v13 }
 0x33a   :  { %v1879_v45 = vadd.f32 0.2548296, %v1875_v0  ;;  %v1881_v42 = vmul.f32 %v4682_v36, %v1877_v47  ;;  %v1825_v36 = vsel %vm1821_vm15, 1.0, %v6436_v6 }
 0x33b   :  { %v1880_v1 = vadd.f32 0.2548296, %v1876_v30  ;;  %v1882_v38 = vmul.f32 %v4684_v23, %v1878_v51 }
 0x33c   :  { %v1883_v35 = vmul.f32 %v4686_v7, %v1879_v45  ;;  %v1901_v28 = vmul.f32 %v4690_v52, %v1881_v42 }
 0x33d   :  { %v1884_v11 = vmul.f32 %v4688_v57, %v1880_v1  ;;  %v1902_v29 = vmul.f32 %v4692_v4, %v1882_v38 }
 0x33e   :  { %v1903_v10 = vmul.f32 %v4694_v63, %v1883_v35  ;;  %v1905_v33 = vsub.f32 1.0, %v1901_v28 }
 0x33f   :  { %v1904_v23 = vmul.f32 %v4696_v59, %v1884_v11  ;;  %v1906_v56 = vsub.f32 1.0, %v1902_v29 }
 0x340   :  { %v1907_v7 = vsub.f32 1.0, %v1903_v10  ;;  %v1909_v16 = vmul.f32 %v1905_v33, %v1825_v36 }
 0x341   :  { %v1908_v44 = vsub.f32 1.0, %v1904_v23  ;;  %v1910_v57 = vmul.f32 %v1906_v56, %v1826_v3  ;;  %v1921_v3 = vld [vmem:[%s6289_s1 + $0x1d] sm:$0x1] }
 0x342   :  { %v1911_v48 = vmul.f32 %v1907_v7, %v1827_v32  ;;  %v1913_v9 = vadd.f32 1.0, %v1909_v16  ;;  %v1922_v32 = vld [vmem:[%s6289_s1 + $0x1f] sm:$0x1] }
 0x343   :  { %v1912_v39 = vmul.f32 %v1908_v44, %v1828_v19  ;;  %v1914_v15 = vadd.f32 1.0, %v1910_v57 }
 0x344   :  { %v1915_v27 = vadd.f32 1.0, %v1911_v48  ;;  %v1917_v25 = vmul.f32 %v1913_v9, %v1813_v46 }
 0x345   :  { %v1916_v12 = vadd.f32 1.0, %v1912_v39  ;;  %v1918_v54 = vmul.f32 %v1914_v15, %v1814_v20 }
 0x346   :  { %v1919_v55 = vmul.f32 %v1915_v27, %v1815_v2  ;;  %v1923_v62 = vsel %vm247_vm4, %v1917_v25, 0.0  ;;  %v1937_v31 = vmul.f32 %v1917_v25, %v1917_v25 }
 0x347   :  { %v1920_v58 = vmul.f32 %v1916_v12, %v1816_v14  ;;  %v1924_v49 = vsel %vm247_vm4, %v1918_v54, 0.0  ;;  %v1938_v40 = vmul.f32 %v1918_v54, %v1918_v54 }
 0x348   :  { %v1925_v53 = vadd.f32 %v1924_v49, %v1923_v62  ;;  %v1939_v43 = vmul.f32 %v1919_v55, %v1919_v55  ;;  %v1941_v18 = vsel %vm247_vm4, %v1937_v31, 0.0  ;;  %v1926_v60 = vsel %vm247_vm4, %v1919_v55, 0.0 }
 0x349   :  { %v1940_v17 = vmul.f32 %v1920_v58, %v1920_v58  ;;  %v1942_v26 = vsel %vm247_vm4, %v1938_v40, 0.0  ;;  %v1928_v22 = vsel %vm247_vm4, %v1920_v58, 0.0 }
 0x34a   :  { %v1927_v41 = vadd.f32 %v1926_v60, %v1925_v53  ;;  %v1943_v50 = vadd.f32 %v1942_v26, %v1941_v18  ;;  %v1944_v13 = vsel %vm247_vm4, %v1939_v43, 0.0 }
 0x34b   :  { %v1946_v30 = vsel %vm247_vm4, %v1940_v17, 0.0 }
 0x34c   :  { %v1929_v0 = vadd.f32 %v1928_v22, %v1927_v41  ;;  %v1945_v47 = vadd.f32 %v1944_v13, %v1943_v50  ;;  %v6500_v13 = vld [vmem:[#allocation17_spill] sm:$0xff] }
 0x34e   :  { %v1930_v51 = vrot.slane %v1929_v0, 4  ;;  %v1947_v45 = vadd.f32 %v1946_v30, %v1945_v47 }
 0x350   :  { %v1931_v42 = vadd.f32 %v1930_v51, %v1929_v0  ;;  %v1948_v52 = vrot.slane %v1947_v45, 4  ;;  %v6501_v51 = vld [vmem:[#allocation18_spill] sm:$0xff] }
 0x352   :  { %v1932_v1 = vrot.slane %v1931_v42, 2  ;;  %v1949_v38 = vadd.f32 %v1948_v52, %v1947_v45 }
 0x354   :  { %v1933_v4 = vadd.f32 %v1932_v1, %v1931_v42  ;;  %v1950_v35 = vrot.slane %v1949_v38, 2  ;;  %v6502_v42 = vld [vmem:[#allocation23_spill] sm:$0xff]  ;;  %v6503_v1 = vld [vmem:[#allocation16_spill] sm:$0xff] }
 0x356   :  { %v1934_v28 = vrot.slane %v1933_v4, 1  ;;  %v1951_v63 = vadd.f32 %v1950_v35, %v1949_v38  ;;  %v6504_v38 = vld [vmem:[#allocation21_spill] sm:$0xff] }
 0x358   :  { %v1935_v11 = vadd.f32 %v1934_v28, %v1933_v4  ;;  %v1952_v29 = vrot.slane %v1951_v63, 1  ;;  %v6505_v4 = vld [vmem:[#allocation24_spill] sm:$0xff] }
 0x359   :  { %v6506_v28 = vld [vmem:[#allocation20_spill] sm:$0xff] }
 0x35a   :  { %v1936_v59 = vmul.f32 0.03125, %v1935_v11  ;;  %v1953_v10 = vadd.f32 %v1952_v29, %v1951_v63  ;;  %v6507_v63 = vld [vmem:[#allocation28_spill] sm:$0xff]  ;;  %v6508_v11 = vld [vmem:[#allocation22_spill] sm:$0xff]  ;;  %v6509_v29 = vld [vmem:[#allocation33_spill] sm:$0xff] }
 0x35c   :  { %v1954_v33 = vmul.f32 0.03125, %v1953_v10  ;;  %v1955_v36 = vmul.f32 %v1936_v59, %v1936_v59  ;;  %v6511_v10 = vld [vmem:[#allocation27_spill] sm:$0xff] }
 0x35e   :  { %v1956_v23 = vsub.f32 %v1954_v33, %v1955_v36  ;;  %v6512_v33 = vld [vmem:[#allocation32_spill] sm:$0xff]  ;;  %v6515_v36 = vld [vmem:[#allocation25_spill] sm:$0xff] }
 0x360   :  { %v1957_v56 = vadd.f32 1e-05, %v1956_v23  ;;  %v6516_v23 = vld [vmem:[#allocation26_spill] sm:$0xff] }
 0x362   :  { %4697 = vrsqrt.f32 %v1957_v56  ;;  %v6517_v56 = vld [vmem:[#allocation30_spill] sm:$0xff] }
 0x36f   :  { %v4698_v7 = vpop.eup %4697 }
 0x370   :  { %v1959_v16 = vmul.f32 %v4698_v7, %v1921_v3  ;;  %v6518_v3 = vld [vmem:[#allocation29_spill] sm:$0xff]  ;;  %v6519_v7 = vld [vmem:[#allocation31_spill] sm:$0xff] }
 0x372   :  { %v1960_v44 = vmul.f32 %v1959_v16, %v1936_v59  ;;  %v1965_v57 = vrot.slane %v1959_v16, %v4817_v21  ;;  %v6510_v59 = vld [vmem:[#allocation35_spill] sm:$0xff]  ;;  %v6520_v16 = vld [vmem:[#allocation34_spill] sm:$0xff] }
 0x374   :  { %v1961_v46 = vsub.f32 %v1922_v32, %v1960_v44  ;;  %v1966_v19 = vmul.f32 %v1965_v57, %v1917_v25  ;;  %v1967_v48 = vmul.f32 %v1965_v57, %v1918_v54  ;;  %v1968_v9 = vmul.f32 %v1965_v57, %v1919_v55  ;;  %v6521_v32 = vld [vmem:[#allocation39_spill] sm:$0xff] }
 0x375   :  { %v1969_v20 = vmul.f32 %v1965_v57, %v1920_v58 }
 0x376   :  { %v1973_v39 = vrot.slane %v1961_v46, %v4817_v21 }
 0x378   :  { %v1974_v15 = vadd.f32 %v1973_v39, %v1966_v19  ;;  %v1975_v2 = vadd.f32 %v1973_v39, %v1967_v48  ;;  %v1976_v27 = vadd.f32 %v1973_v39, %v1968_v9  ;;  %v1977_v14 = vadd.f32 %v1973_v39, %v1969_v20 }
 0x37a   :  { %v1978_v12 = vadd.f32 %v1974_v15, %v5655_v61  ;;  %v1979_v62 = vadd.f32 %v1975_v2, %v5649_v8  ;;  %v1980_v31 = vadd.f32 %v1976_v27, %v5651_v37  ;;  %v1981_v49 = vadd.f32 %v1977_v14, %v5653_v34  ;;  %v2867_v2 = vld [vmem:[%s6289_s1 + $0xe0] sm:$0xff] }
 0x37b   :  { %v3933_v27 = vld [vmem:[%s6289_s1 + $0xa1] ss:$0 sm:$0xff]  ;;  %v5935_v14 = vand.u32 4294901760, %v2867_v2 }
 0x37c   :  { %v1996_v40 = vsel %vm247_vm4, %v1978_v12, 0  ;;  %v1999_v25 = vsel %vm247_vm4, %v1979_v62, 0  ;;  %v2002_v54 = vsel %vm247_vm4, %v1980_v31, 0  ;;  %v2005_v55 = vsel %vm247_vm4, %v1981_v49, 0  ;;  %v2866_v62 = vld [vmem:[%s6289_s1 + $0xd8] sm:$0xff] }
 0x37d   :  { %v5824_v58 = vand.u32 4294901760, %v1996_v40  ;;  %v5826_v53 = vand.u32 4294901760, %v1999_v25  ;;  %v5828_v43 = vand.u32 4294901760, %v2002_v54  ;;  %v5830_v61 = vand.u32 4294901760, %v2005_v55 }
 0x37e   :  { %v5943_v49 = vsub.f32 %v2867_v2, %v5935_v14 }
 0x37f   :  { %4322 = vmatprep.mubr.f32.mxu1 %v5824_v58  ;;  %v5834_v8 = vsub.f32 %v1999_v25, %v5826_v53  ;;  %v2081_v37 = vsub.f32 %v1996_v40, %v5824_v58  ;;  %v5838_v34 = vsub.f32 %v2002_v54, %v5828_v43  ;;  %v5841_v18 = vsub.f32 %v2005_v55, %v5830_v61 }
 0x380   :  { %4323 = vmatmul.mubr.f32.vlgmr.msra.gmra.mxu1 %v5826_v53  ;;  %v5945_v40 = vand.u32 4294901760, %v2866_v62 }
 0x381   :  { %4351 = vmatpush3.msra.mxu1 %v5462_v24  ;;  %4325 = vmatprep.mubr.f32.mxu1 %v5828_v43  ;;  %v2082_v60 = vand.u32 4294901760, %v2081_v37  ;;  %v2092_v17 = vand.u32 4294901760, %v5834_v8  ;;  %v2102_v26 = vand.u32 4294901760, %v5838_v34  ;;  %v2112_v22 = vand.u32 4294901760, %v5841_v18 }
 0x382   :  { %4352 = vmatprep.subr.mxu1 %v5467_v5 }
 0x383   :  { %4353 = vmatpush3.msra.mxu1 %v5467_v5  ;;  %v2083_v41 = vsub.f32 %v2081_v37, %v2082_v60  ;;  %v2093_v50 = vsub.f32 %v5834_v8, %v2092_v17  ;;  %v2103_v0 = vsub.f32 %v5838_v34, %v2102_v26  ;;  %v2113_v45 = vsub.f32 %v5841_v18, %v2112_v22 }
 0x384   :  { %4354 = vmatprep.subr.mxu1 %v6500_v13  ;;  %4326 = vmatmul.mubr.f32.gmra.mxu1 %v5830_v61 }
 0x385   :  { %4355 = vmatpush3.msra.mxu1 %v6500_v13  ;;  %4366 = vmatprep.mubr.f32.mxu1 %v2082_v60  ;;  %v2084_v47 = vand.u32 4294901760, %v2083_v41  ;;  %v2094_v30 = vand.u32 4294901760, %v2093_v50  ;;  %v2104_v52 = vand.u32 4294901760, %v2103_v0  ;;  %v2114_v35 = vand.u32 4294901760, %v2113_v45  ;;  %v2863_v0 = vld [vmem:[%s6289_s1 + $0xc0] sm:$0xff]  ;;  %v2862_v45 = vld [vmem:[%s6289_s1 + $0xb8] sm:$0xff] }
 0x386   :  { %4356 = vmatprep.subr.mxu1 %v6501_v51 }
 0x387   :  { %4357 = vmatpush3.msra.mxu1 %v6501_v51  ;;  %4300 = vmatprep.mubr.f32.mxu0 %v2084_v47 }
 0x388   :  { %4358 = vmatprep.subr.mxu1 %v6502_v42  ;;  %4301 = vmatmul.mubr.f32.vlgmr.msra.gmra.mxu0 %v2094_v30 }
 0x389   :  { %4329 = vmatpush3.msra.mxu0 %v6503_v1  ;;  %4359 = vmatpush3.msra.mxu1 %v6502_v42 }
 0x38a   :  { %4303 = vmatprep.mubr.f32.mxu0 %v2104_v52  ;;  %4330 = vmatprep.subr.mxu0 %v6504_v38  ;;  %v2860_v52 = vld [vmem:[%s6289_s1 + $0xa8] sm:$0xff] }
 0x38b   :  { %4360 = vmatprep.subr.mxu1 %v6505_v4  ;;  %4331 = vmatpush3.msra.mxu0 %v6504_v38  ;;  %v4732_v38 = vmov 0.0  }
 0x38c   :  { %4361 = vmatpush3.msra.mxu1 %v6505_v4  ;;  %4332 = vmatprep.subr.mxu0 %v6506_v28 }
 0x38d   :  { %4362 = vmatprep.subr.mxu1 %v6507_v63  ;;  %4304 = vmatmul.mubr.f32.gmra.mxu0 %v2114_v35  ;;  %v5991_v35 = vand.u32 4294901760, %v2863_v0 }
 0x38e   :  { %4333 = vmatpush3.msra.mxu0 %v6506_v28  ;;  %4363 = vmatpush3.msra.mxu1 %v6507_v63  ;;  %v5993_v28 = vand.u32 4294901760, %v2862_v45 }
 0x38f   :  { %4334 = vmatprep.subr.mxu0 %v6508_v11  ;;  %4344 = vmatprep.mubr.f32.mxu0 %v2081_v37  ;;  %v2864_v37 = vld [vmem:[%s6289_s1 + $0xc8] sm:$0xff] }
 0x390   :  { %4364 = vmatprep.subr.mxu1 %v6509_v29  ;;  %4335 = vmatpush3.msra.mxu0 %v6508_v11 }
 0x391   :  { %4365 = vmatpush3.msra.mxu1 %v6509_v29  ;;  %4336 = vmatprep.subr.mxu0 %v6510_v59 }
 0x392   :  { %4367 = vmatmul.mubr.f32.vlgmr.msra.gmra.mxu1 %v2092_v17  ;;  %4394 = vmatprep.subr.mxu1 %v5462_v24 }
 0x393   :  { %4337 = vmatpush3.msra.mxu0 %v6510_v59  ;;  %4369 = vmatprep.mubr.f32.mxu1 %v2102_v26  ;;  %v5968_v26 = vand.u32 4294901760, %v2864_v37 }
 0x394   :  { %4395 = vmatpush3.msra.mxu1 %v5462_v24  ;;  %4338 = vmatprep.subr.mxu0 %v6511_v10  ;;  %v6513_v24 = vld [vmem:[#allocation36_spill] sm:$0xff] }
 0x395   :  { %4396 = vmatprep.subr.mxu1 %v5467_v5  ;;  %4339 = vmatpush3.msra.mxu0 %v6511_v10 }
 0x396   :  { %4397 = vmatpush3.msra.mxu1 %v5467_v5  ;;  %4340 = vmatprep.subr.mxu0 %v6512_v33  ;;  %v6514_v5 = vld [vmem:[#allocation19_spill] sm:$0xff] }
 0x397   :  { %4370 = vmatmul.mubr.f32.gmra.mxu1 %v2112_v22  ;;  %4398 = vmatprep.subr.mxu1 %v6500_v13 }
 0x398   :  { %4341 = vmatpush3.msra.mxu0 %v6512_v33  ;;  %4399 = vmatpush3.msra.mxu1 %v6500_v13  ;;  %v6003_v33 = vand.u32 4294901760, %v2860_v52 }
 0x399   :  { %4410 = vmatprep.mubr.f32.mxu1 %v5824_v58  ;;  %4342 = vmatprep.subr.mxu0 %v6513_v24 }
 0x39a   :  { %4400 = vmatprep.subr.mxu1 %v6501_v51  ;;  %4343 = vmatpush3.msra.mxu0 %v6513_v24 }
 0x39b   :  { %4401 = vmatpush3.msra.mxu1 %v6501_v51  ;;  %4345 = vmatmul.mubr.f32.vlgmr.msra.gmra.mxu0 %v5834_v8 }
 0x39c   :  { %4372 = vmatprep.subr.mxu0 %v6514_v5  ;;  %4402 = vmatprep.subr.mxu1 %v6502_v42 }
 0x39d   :  { %4347 = vmatprep.mubr.f32.mxu0 %v5838_v34  ;;  %4373 = vmatpush3.msra.mxu0 %v6514_v5  ;;  %v6008_v5 = vsub.f32 %v2863_v0, %v5991_v35 }
 0x39e   :  { %4403 = vmatpush3.msra.mxu1 %v6502_v42  ;;  %4374 = vmatprep.subr.mxu0 %v6515_v36  ;;  %v2861_v42 = vld [vmem:[%s6289_s1 + $0xb0] sm:$0xff] }
 0x39f   :  { %4404 = vmatprep.subr.mxu1 %v6505_v4  ;;  %4375 = vmatpush3.msra.mxu0 %v6515_v36  ;;  %v6012_v36 = vsub.f32 %v2862_v45, %v5993_v28 }
 0x3a0   :  { %4405 = vmatpush3.msra.mxu1 %v6505_v4  ;;  %4348 = vmatmul.mubr.f32.gmra.mxu0 %v5841_v18  ;;  %v5988_v4 = vsub.f32 %v2864_v37, %v5968_v26 }
 0x3a1   :  { %4376 = vmatprep.subr.mxu0 %v6516_v23  ;;  %4406 = vmatprep.subr.mxu1 %v6507_v63 }
 0x3a2   :  { %4377 = vmatpush3.msra.mxu0 %v6516_v23  ;;  %4388 = vmatprep.mubr.f32.mxu0 %v5824_v58  ;;  %v2865_v58 = vld [vmem:[%s6289_s1 + $0xd0] sm:$0xff]  ;;  %v2999_v24 = vand.u32 4294901760, %v5988_v4 }
 0x3a3   :  { %4407 = vmatpush3.msra.mxu1 %v6507_v63  ;;  %4378 = vmatprep.subr.mxu0 %v6517_v56  ;;  %v5995_v63 = vand.u32 4294901760, %v2861_v42 }
 0x3a4   :  { %4408 = vmatprep.subr.mxu1 %v6509_v29  ;;  %4379 = vmatpush3.msra.mxu0 %v6517_v56 }
 0x3a5   :  { %4409 = vmatpush3.msra.mxu1 %v6509_v29  ;;  %4380 = vmatprep.subr.mxu0 %v6518_v3  ;;  %v6015_v23 = vsub.f32 %v2861_v42, %v5995_v63 }
 0x3a6   :  { %4411 = vmatmul.mubr.f32.vlgmr.msra.gmra.mxu1 %v5826_v53  ;;  %4381 = vmatpush3.msra.mxu0 %v6518_v3 }
 0x3a7   :  { %4413 = vmatprep.mubr.f32.mxu1 %v5828_v43  ;;  %4382 = vmatprep.subr.mxu0 %v6519_v7 }
 0x3a8   :  { %4383 = vmatpush3.msra.mxu0 %v6519_v7  ;;  %4435 = vmatprep.subr.mxu1 %v4732_v38 }
 0x3a9   :  { %4384 = vmatprep.subr.mxu0 %v6520_v16 }
 0x3aa   :  { %4414 = vmatmul.mubr.f32.gmra.mxu1 %v5830_v61  ;;  %4385 = vmatpush3.msra.mxu0 %v6520_v16  ;;  %v6019_v16 = vsub.f32 %v2860_v52, %v6003_v33 }
 0x3ab   :  { %4386 = vmatprep.subr.mxu0 %v6521_v32  ;;  %4451 = vmatprep.mubr.msk.f32.mxu1 %vm4733_vm3, %v4732_v38 }
 0x3ac   :  { %4387 = vmatpush3.msra.mxu0 %v6521_v32  ;;  %v3027_v2 = vand.u32 4294901760, %v6019_v16 }
 0x3ad   :  { %4389 = vmatmul.mubr.f32.vlgmr.msra.gmra.mxu0 %v5826_v53  ;;  %v2978_v53 = vand.u32 4294901760, %v5943_v49  ;;  %4416 = vmatprep.subr.mxu0 %v4732_v38 }
 0x3ae   :  { %4391 = vmatprep.mubr.f32.mxu0 %v5828_v43  ;;  %v5952_v43 = vsub.f32 %v2866_v62, %v5945_v40  ;;  %4417 = vmatpush3.msra.mxu0 %v5935_v14 }
 0x3af   :  { %v2979_v18 = vsub.f32 %v5943_v49, %v2978_v53  ;;  %4418 = vmatprep.subr.mxu0 %v4732_v38 }
 0x3b0   :  { %v2985_v60 = vand.u32 4294901760, %v5952_v43  ;;  %4419 = vmatpush3.msra.mxu0 %v5945_v40 }
 0x3b1   :  { %4392 = vmatmul.mubr.f32.gmra.mxu0 %v5830_v61  ;;  %v5954_v61 = vand.u32 4294901760, %v2865_v58  ;;  %v2980_v47 = vand.u32 4294901760, %v2979_v18  ;;  %4420 = vmatprep.subr.mxu0 %v4732_v38 }
 0x3b2   :  { %v2986_v30 = vsub.f32 %v5952_v43, %v2985_v60  ;;  %4432 = vmatprep.mubr.msk.f32.mxu0 %vm4733_vm3, %v4732_v38 }
 0x3b3   :  { %v5966_v17 = vsub.f32 %v2865_v58, %v5954_v61  ;;  %4436 = vmatpush3.msra.mxu1 %v2980_v47  ;;  %4421 = vmatpush3.msra.mxu0 %v5954_v61 }
 0x3b4   :  { %v2987_v59 = vand.u32 4294901760, %v2986_v30  ;;  %4437 = vmatprep.subr.mxu1 %v4732_v38  ;;  %4422 = vmatprep.subr.mxu0 %v4732_v38 }
 0x3b5   :  { %v2992_v51 = vand.u32 4294901760, %v5966_v17  ;;  %4423 = vmatpush3.msra.mxu0 %v5968_v26 }
 0x3b6   :  { %4438 = vmatpush3.msra.mxu1 %v2987_v59  ;;  %4424 = vmatprep.subr.mxu0 %v4732_v38 }
 0x3b7   :  { %v2993_v10 = vsub.f32 %v5966_v17, %v2992_v51  ;;  %4439 = vmatprep.subr.mxu1 %v4732_v38  ;;  %4425 = vmatpush3.msra.mxu0 %v5991_v35 }
 0x3b8   :  { %4426 = vmatprep.subr.mxu0 %v4732_v38 }
 0x3b9   :  { %v2994_v7 = vand.u32 4294901760, %v2993_v10  ;;  %4427 = vmatpush3.msra.mxu0 %v5993_v28 }
 0x3ba   :  { %4428 = vmatprep.subr.mxu0 %v4732_v38 }
 0x3bb   :  { %4440 = vmatpush3.msra.mxu1 %v2994_v7  ;;  %4429 = vmatpush3.msra.mxu0 %v5995_v63 }
 0x3bc   :  { %4441 = vmatprep.subr.mxu1 %v4732_v38  ;;  %4430 = vmatprep.subr.mxu0 %v4732_v38 }
 0x3bd   :  { %4431 = vmatpush3.msra.mxu0 %v6003_v33 }
 0x3be   :  { %4454 = vmatprep.subr.mxu0 %v4732_v38 }
 0x440   :  { %v4324_v44 = vpop.f32.mrf.mxu1 }
 0x442   :  { %v2227_v46 = vpop.f32.mrf.mxu1 }
 0x444   :  { %v4327_v48 = vpop.f32.mrf.mxu1 }
 0x446   :  { %v5925_v20 = vpop.f32.mrf.mxu1 }
 0x448   :  { %v4302_v57 = vpop.f32.mrf.mxu0 }
 0x449   :  { %v2097_v25 = vadd.f32 %v4302_v57, %v3933_v27  ;;  %v3006_v57 = vand.u32 4294901760, %v6008_v5 }
 0x44a   :  { %v2086_v19 = vpop.f32.mrf.mxu0 }
 0x44b   :  { %v2087_v54 = vadd.f32 %v3933_v27, %v2086_v19  ;;  %v2234_v50 = vadd.f32 %v4324_v44, %v2097_v25  ;;  %v3000_v44 = vsub.f32 %v5988_v4, %v2999_v24  ;;  %v3020_v19 = vand.u32 4294901760, %v6015_v23 }
 0x44c   :  { %v3007_v62 = vsub.f32 %v6008_v5, %v3006_v57 }
 0x44d   :  { %v4305_v9 = vpop.f32.mrf.mxu0  ;;  %v2228_v22 = vadd.f32 %v2227_v46, %v2087_v54  ;;  %v3013_v46 = vand.u32 4294901760, %v6012_v36 }
 0x44e   :  { %v2117_v55 = vadd.f32 %v4305_v9, %v3933_v27  ;;  %v3008_v37 = vand.u32 4294901760, %v3007_v62 }
 0x44f   :  { %v2106_v15 = vpop.f32.mrf.mxu0  ;;  %v3014_v25 = vsub.f32 %v6012_v36, %v3013_v46 }
 0x450   :  { %v2107_v41 = vadd.f32 %v3933_v27, %v2106_v15  ;;  %v2246_v13 = vadd.f32 %v4327_v48, %v2117_v55 }
 0x451   :  { %v3015_v18 = vand.u32 4294901760, %v3014_v25 }
 0x452   :  { %v5927_v39 = vpop.f32.mrf.mxu1  ;;  %v2240_v9 = vadd.f32 %v5925_v20, %v2107_v41  ;;  %v3021_v20 = vsub.f32 %v6015_v23, %v3020_v19  ;;  %v3028_v41 = vsub.f32 %v6019_v16, %v3027_v2 }
 0x454   :  { %v5940_v31 = vpop.f32.mrf.mxu1  ;;  %v3022_v0 = vand.u32 4294901760, %v3021_v20 }
 0x457   :  { %v5959_v34 = vpop.f32.mrf.mxu1 }
 0x459   :  { %v5997_v11 = vpop.f32.mrf.mxu1 }
 0x45b   :  { %v4346_v12 = vpop.f32.mrf.mxu0 }
 0x45c   :  { %v2341_v29 = vadd.f32 %v4346_v12, %v2234_v50  ;;  %v3001_v12 = vand.u32 4294901760, %v3000_v44 }
 0x45d   :  { %v2333_v8 = vpop.f32.mrf.mxu0 }
 0x45e   :  { %v2334_v56 = vadd.f32 %v2333_v8, %v2228_v22  ;;  %v2444_v15 = vadd.f32 %v5927_v39, %v2341_v29  ;;  %4442 = vmatpush3.msra.mxu1 %v3001_v12 }
 0x45f   :  { %4443 = vmatprep.subr.mxu1 %v4732_v38 }
 0x460   :  { %v4349_v1 = vpop.f32.mrf.mxu0  ;;  %v2436_v55 = vadd.f32 %v5940_v31, %v2334_v56  ;;  %4444 = vmatpush3.msra.mxu1 %v3008_v37 }
 0x461   :  { %v2355_v48 = vadd.f32 %v4349_v1, %v2246_v13  ;;  %4445 = vmatprep.subr.mxu1 %v4732_v38  ;;  %v3029_v1 = vand.u32 4294901760, %v3028_v41 }
 0x462   :  { %v2347_v32 = vpop.f32.mrf.mxu0  ;;  %4446 = vmatpush3.msra.mxu1 %v3015_v18 }
 0x463   :  { %v2348_v58 = vadd.f32 %v2347_v32, %v2240_v9  ;;  %v2460_v22 = vadd.f32 %v5959_v34, %v2355_v48  ;;  %4447 = vmatprep.subr.mxu1 %v4732_v38 }
 0x464   :  { %4448 = vmatpush3.msra.mxu1 %v3022_v0 }
 0x465   :  { %v2452_v34 = vadd.f32 %v5997_v11, %v2348_v58  ;;  %4449 = vmatprep.subr.mxu1 %v4732_v38 }
 0x466   :  { %v4412_v3 = vpop.f32.mrf.mxu1  ;;  %4450 = vmatpush3.msra.mxu1 %v3029_v1 }
 0x467   :  { %4473 = vmatprep.subr.mxu1 %v4732_v38 }
 0x468   :  { %v2651_v39 = vpop.f32.mrf.mxu1 }
 0x46a   :  { %v4415_v47 = vpop.f32.mrf.mxu1 }
 0x46c   :  { %v2663_v11 = vpop.f32.mrf.mxu1 }
 0x46d   :  { %v4390_v27 = vpop.f32.mrf.mxu0 }
 0x46e   :  { %v2561_v54 = vadd.f32 %v4390_v27, %v2444_v15 }
 0x46f   :  { %v2554_v8 = vpop.f32.mrf.mxu0 }
 0x470   :  { %v6052_v50 = vadd.f32 %v4412_v3, %v2561_v54  ;;  %v2555_v31 = vadd.f32 %v2554_v8, %v2436_v55 }
 0x471   :  { %v4393_v13 = vpop.f32.mrf.mxu0 }
 0x472   :  { %v6059_v30 = vmul.f32 0.70710677, %v6052_v50  ;;  %v6061_v45 = vadd.f32 %v2651_v39, %v2555_v31  ;;  %v2573_v42 = vadd.f32 %v4393_v13, %v2460_v22 }
 0x473   :  { %v2566_v52 = vpop.f32.mrf.mxu0 }
 0x474   :  { %v2690_v29 = vand.u32 2147483647, %v6059_v30  ;;  %v6069_v59 = vmul.f32 0.70710677, %v6061_v45  ;;  %v6073_v10 = vadd.f32 %v4415_v47, %v2573_v42  ;;  %v2567_v56 = vadd.f32 %v2566_v52, %v2452_v34 }
 0x475   :  { %vm2682_vm6 = vcmp.ge.f32.partialorder %v6059_v30, 0.0 }
 0x476   :  { %v2694_v3 = vmul.f32 0.3275911, %v2690_v29  ;;  %v2689_v7 = vand.u32 2147483647, %v6069_v59  ;;  %v6080_v32 = vmul.f32 0.70710677, %v6073_v10  ;;  %v6082_v44 = vadd.f32 %v2663_v11, %v2567_v56 }
 0x477   :  { %v2746_v54 = vsub.f32 0.0, %v2690_v29  ;;  %vm2681_vm7 = vcmp.ge.f32.partialorder %v6069_v59, 0.0 }
 0x478   :  { %v2698_v48 = vadd.f32 1.0, %v2694_v3  ;;  %v2693_v9 = vmul.f32 0.3275911, %v2689_v7  ;;  %v2692_v15 = vand.u32 2147483647, %v6080_v32  ;;  %v2745_v58 = vsub.f32 0.0, %v2689_v7 }
 0x479   :  { %v6090_v27 = vmul.f32 0.70710677, %v6082_v44  ;;  %v2750_v8 = vmul.f32 %v2746_v54, %v2690_v29  ;;  %vm2684_vm8 = vcmp.ge.f32.partialorder %v6080_v32, 0.0 }
 0x47a   :  { %4699 = vrcp.f32 %v2698_v48  ;;  %v2697_v12 = vadd.f32 1.0, %v2693_v9  ;;  %v2696_v62 = vmul.f32 0.3275911, %v2692_v15  ;;  %v2748_v37 = vsub.f32 0.0, %v2692_v15 }
 0x47b   :  { %v2691_v25 = vand.u32 2147483647, %v6090_v27  ;;  %v2749_v41 = vmul.f32 %v2745_v58, %v2689_v7  ;;  %v2755_v22 = vmul.f32 1.442695, %v2750_v8  ;;  %v2688_v59 = vsel %vm2684_vm8, 1.0, %v6436_v6 }
 0x47c   :  { %4701 = vrcp.f32 %v2697_v12  ;;  %v2700_v20 = vadd.f32 1.0, %v2696_v62  ;;  %v2752_v0 = vmul.f32 %v2748_v37, %v2692_v15  ;;  %vm2683_vm9 = vcmp.ge.f32.partialorder %v6090_v27, 0.0 }
 0x47d   :  { %v2695_v39 = vmul.f32 0.3275911, %v2691_v25  ;;  %v2747_v13 = vsub.f32 0.0, %v2691_v25  ;;  %v2753_v52 = vmul.f32 1.442695, %v2749_v41 }
 0x47e   :  { %4703 = vrcp.f32 %v2700_v20  ;;  %v2759_v9 = vmul.f32 1.442695, %v2752_v0 }
 0x47f   :  { %v2699_v55 = vadd.f32 1.0, %v2695_v39  ;;  %v2751_v11 = vmul.f32 %v2747_v13, %v2691_v25 }
 0x481   :  { %4705 = vrcp.f32 %v2699_v55  ;;  %v2757_v54 = vmul.f32 1.442695, %v2751_v11 }
 0x482   :  { %4707 = vpow2.f32 %v2755_v22 }
 0x483   :  { %4709 = vpow2.f32 %v2753_v52 }
 0x484   :  { %4711 = vpow2.f32 %v2759_v9 }
 0x485   :  { %4713 = vpow2.f32 %v2757_v54 }
 0x487   :  { %v4700_v18 = vpop.eup %4699 }
 0x488   :  { %v2710_v31 = vmul.f32 1.0614054, %v4700_v18 }
 0x489   :  { %v4702_v47 = vpop.eup %4701 }
 0x48a   :  { %v2714_v42 = vadd.f32 -1.4531521, %v2710_v31  ;;  %v2709_v34 = vmul.f32 1.0614054, %v4702_v47 }
 0x48b   :  { %v4704_v1 = vpop.eup %4703 }
 0x48c   :  { %v2718_v56 = vmul.f32 %v4700_v18, %v2714_v42  ;;  %v2713_v3 = vadd.f32 -1.4531521, %v2709_v34  ;;  %v2712_v48 = vmul.f32 1.0614054, %v4704_v1 }
 0x48e   :  { %v2722_v12 = vadd.f32 1.4214138, %v2718_v56  ;;  %v4706_v29 = vpop.eup %4705  ;;  %v2717_v62 = vmul.f32 %v4702_v47, %v2713_v3  ;;  %v2716_v7 = vadd.f32 -1.4531521, %v2712_v48 }
 0x48f   :  { %v2711_v39 = vmul.f32 1.0614054, %v4706_v29  ;;  %v4708_v48 = vpop.eup %4707 }
 0x490   :  { %v2726_v20 = vmul.f32 %v4700_v18, %v2722_v12  ;;  %v2721_v15 = vadd.f32 1.4214138, %v2717_v62  ;;  %v2720_v55 = vmul.f32 %v4704_v1, %v2716_v7 }
 0x491   :  { %v2715_v8 = vadd.f32 -1.4531521, %v2711_v39  ;;  %v4710_v39 = vpop.eup %4709 }
 0x492   :  { %v2730_v58 = vadd.f32 -0.28449672, %v2726_v20  ;;  %v2725_v37 = vmul.f32 %v4702_v47, %v2721_v15  ;;  %v2724_v41 = vadd.f32 1.4214138, %v2720_v55  ;;  %v2686_v55 = vsel %vm2682_vm6, 1.0, %v6436_v6 }
 0x493   :  { %v2719_v25 = vmul.f32 %v4706_v29, %v2715_v8 }
 0x494   :  { %v2734_v31 = vmul.f32 %v4700_v18, %v2730_v58  ;;  %v2729_v22 = vadd.f32 -0.28449672, %v2725_v37  ;;  %v2728_v13 = vmul.f32 %v4704_v1, %v2724_v41 }
 0x495   :  { %v2723_v42 = vadd.f32 1.4214138, %v2719_v25 }
 0x496   :  { %v2738_v0 = vadd.f32 0.2548296, %v2734_v31  ;;  %v2733_v34 = vmul.f32 %v4702_v47, %v2729_v22  ;;  %v2732_v52 = vadd.f32 -0.28449672, %v2728_v13 }
 0x497   :  { %v2727_v3 = vmul.f32 %v4706_v29, %v2723_v42 }
 0x498   :  { %v2742_v56 = vmul.f32 %v4700_v18, %v2738_v0  ;;  %v2737_v11 = vadd.f32 0.2548296, %v2733_v34  ;;  %v2736_v12 = vmul.f32 %v4704_v1, %v2732_v52  ;;  %v4712_v18 = vpop.eup %4711  ;;  %v2674_v34 = vmul.f32 0.5, %v6052_v50 }
 0x499   :  { %v2731_v62 = vadd.f32 -0.28449672, %v2727_v3  ;;  %v4714_v13 = vpop.eup %4713  ;;  %v2673_v52 = vmul.f32 0.5, %v6061_v45  ;;  %v2675_v50 = vmul.f32 0.5, %v6082_v44 }
 0x49a   :  { %v2762_v9 = vmul.f32 %v4708_v48, %v2742_v56  ;;  %v2741_v7 = vmul.f32 %v4702_v47, %v2737_v11  ;;  %v2740_v20 = vadd.f32 0.2548296, %v2736_v12  ;;  %v2685_v47 = vsel %vm2681_vm7, 1.0, %v6436_v6 }
 0x49b   :  { %v2735_v54 = vmul.f32 %v4706_v29, %v2731_v62 }
 0x49c   :  { %v2766_v15 = vsub.f32 1.0, %v2762_v9  ;;  %v2761_v58 = vmul.f32 %v4710_v39, %v2741_v7  ;;  %v2744_v8 = vmul.f32 %v4704_v1, %v2740_v20  ;;  %v2676_v9 = vmul.f32 0.5, %v6073_v10 }
 0x49d   :  { %v2739_v41 = vadd.f32 0.2548296, %v2735_v54 }
 0x49e   :  { %v2770_v37 = vmul.f32 %v2766_v15, %v2686_v55  ;;  %v2765_v31 = vsub.f32 1.0, %v2761_v58  ;;  %v2764_v30 = vmul.f32 %v4712_v18, %v2744_v8 }
 0x49f   :  { %v2743_v22 = vmul.f32 %v4706_v29, %v2739_v41  ;;  %v2687_v29 = vsel %vm2683_vm9, 1.0, %v6436_v6 }
 0x4a0   :  { %v2774_v25 = vadd.f32 1.0, %v2770_v37  ;;  %v2769_v0 = vmul.f32 %v2765_v31, %v2685_v47  ;;  %v2768_v42 = vsub.f32 1.0, %v2764_v30 }
 0x4a1   :  { %v2763_v1 = vmul.f32 %v4714_v13, %v2743_v22 }
 0x4a2   :  { %v2773_v56 = vadd.f32 1.0, %v2769_v0  ;;  %v2772_v3 = vmul.f32 %v2768_v42, %v2688_v59  ;;  %v2778_v32 = vmul.f32 %v2774_v25, %v2674_v34 }
 0x4a3   :  { %v2767_v48 = vsub.f32 1.0, %v2763_v1 }
 0x4a4   :  { %v2777_v11 = vmul.f32 %v2773_v56, %v2673_v52  ;;  %v2776_v12 = vadd.f32 1.0, %v2772_v3  ;;  %v2798_v20 = vmul.f32 %v2778_v32, %v2778_v32  ;;  %v2784_v45 = vsel %vm247_vm4, %v2778_v32, 0.0 }
 0x4a5   :  { %v2771_v62 = vmul.f32 %v2767_v48, %v2687_v29 }
 0x4a6   :  { %v2797_v7 = vmul.f32 %v2777_v11, %v2777_v11  ;;  %v2783_v27 = vsel %vm247_vm4, %v2777_v11, 0.0  ;;  %v2780_v39 = vmul.f32 %v2776_v12, %v2676_v9  ;;  %v2802_v8 = vsel %vm247_vm4, %v2798_v20, 0.0 }
 0x4a7   :  { %v2775_v15 = vadd.f32 1.0, %v2771_v62  ;;  %v2785_v58 = vadd.f32 %v2784_v45, %v2783_v27  ;;  %v2781_v27 = vld [vmem:[%s6289_s1 + $0xa3] sm:$0x1] }
 0x4a8   :  { %v2801_v54 = vsel %vm247_vm4, %v2797_v7, 0.0  ;;  %v2800_v6 = vmul.f32 %v2780_v39, %v2780_v39  ;;  %v2788_v44 = vsel %vm247_vm4, %v2780_v39, 0.0 }
 0x4a9   :  { %v2779_v55 = vmul.f32 %v2775_v15, %v2675_v50  ;;  %v2803_v37 = vadd.f32 %v2802_v8, %v2801_v54  ;;  %v2782_v54 = vld [vmem:[%s6289_s1 + $0xa5] sm:$0x1] }
 0x4aa   :  { %v2806_v47 = vsel %vm247_vm4, %v2800_v6, 0.0 }
 0x4ab   :  { %v2786_v10 = vsel %vm247_vm4, %v2779_v55, 0.0  ;;  %v2799_v18 = vmul.f32 %v2779_v55, %v2779_v55 }
 0x4ac   :  { %v2787_v41 = vadd.f32 %v2786_v10, %v2785_v58 }
 0x4ad   :  { %v2804_v31 = vsel %vm247_vm4, %v2799_v18, 0.0 }
 0x4ae   :  { %v2789_v30 = vadd.f32 %v2788_v44, %v2787_v41  ;;  %v2805_v25 = vadd.f32 %v2804_v31, %v2803_v37 }
 0x4b0   :  { %v2790_v22 = vrot.slane %v2789_v30, 4  ;;  %v2807_v13 = vadd.f32 %v2806_v47, %v2805_v25 }
 0x4b2   :  { %v2791_v0 = vadd.f32 %v2790_v22, %v2789_v30  ;;  %v2808_v42 = vrot.slane %v2807_v13, 4 }
 0x4b4   :  { %v2792_v34 = vrot.slane %v2791_v0, 2  ;;  %v2809_v59 = vadd.f32 %v2808_v42, %v2807_v13 }
 0x4b6   :  { %v2793_v1 = vadd.f32 %v2792_v34, %v2791_v0  ;;  %v2810_v52 = vrot.slane %v2809_v59, 2 }
 0x4b8   :  { %v2794_v56 = vrot.slane %v2793_v1, 1  ;;  %v2811_v3 = vadd.f32 %v2810_v52, %v2809_v59 }
 0x4ba   :  { %v2795_v48 = vadd.f32 %v2794_v56, %v2793_v1  ;;  %v2812_v12 = vrot.slane %v2811_v3, 1 }
 0x4bc   :  { %v2796_v29 = vmul.f32 0.03125, %v2795_v48  ;;  %v2813_v9 = vadd.f32 %v2812_v12, %v2811_v3 }
 0x4be   :  { %v2814_v62 = vmul.f32 0.03125, %v2813_v9  ;;  %v2815_v7 = vmul.f32 %v2796_v29, %v2796_v29 }
 0x4c0   :  { %v2816_v50 = vsub.f32 %v2814_v62, %v2815_v7 }
 0x4c2   :  { %v2817_v20 = vadd.f32 1e-05, %v2816_v50 }
 0x4c4   :  { %4715 = vrsqrt.f32 %v2817_v20 }
 0x4d1   :  { %v4716_v15 = vpop.eup %4715 }
 0x4d2   :  { %v2819_v45 = vmul.f32 %v4716_v15, %v2781_v27 }
 0x4d4   :  { %v2820_v58 = vmul.f32 %v2819_v45, %v2796_v29  ;;  %v2825_v8 = vrot.slane %v2819_v45, %v4817_v21 }
 0x4d6   :  { %v2821_v6 = vsub.f32 %v2782_v54, %v2820_v58  ;;  %v2826_v10 = vmul.f32 %v2825_v8, %v2777_v11  ;;  %v2827_v18 = vmul.f32 %v2825_v8, %v2778_v32  ;;  %v2828_v37 = vmul.f32 %v2825_v8, %v2779_v55 }
 0x4d7   :  { %v2829_v41 = vmul.f32 %v2825_v8, %v2780_v39 }
 0x4d8   :  { %v2833_v44 = vrot.slane %v2821_v6, %v4817_v21 }
 0x4da   :  { %v2836_v31 = vadd.f32 %v2833_v44, %v2828_v37  ;;  %v2837_v30 = vadd.f32 %v2833_v44, %v2829_v41  ;;  %v2834_v25 = vadd.f32 %v2833_v44, %v2826_v10  ;;  %v2835_v47 = vadd.f32 %v2833_v44, %v2827_v18 }
 0x4dc   :  { %v2849_v22 = vsel %vm247_vm4, %v2836_v31, 0.0  ;;  %v2850_v13 = vsel %vm247_vm4, %v2837_v30, 0.0  ;;  %v2838_v0 = vsel %vm247_vm4, %v2834_v25, 0.0  ;;  %v2839_v42 = vsel %vm247_vm4, %v2835_v47, 0.0 }
 0x4dd   :  { %v2851_v34 = vadd.f32 %v2850_v13, %v2849_v22  ;;  %v2840_v59 = vadd.f32 %v2839_v42, %v2838_v0 }
 0x4df   :  { %v2852_v11 = vrot.slane %v2851_v34, 4  ;;  %v2841_v32 = vrot.slane %v2840_v59, 4 }
 0x4e1   :  { %v2853_v55 = vadd.f32 %v2852_v11, %v2851_v34  ;;  %v2842_v39 = vadd.f32 %v2841_v32, %v2840_v59 }
 0x4e3   :  { %v2854_v1 = vrot.slane %v2853_v55, 2  ;;  %v2843_v52 = vrot.slane %v2842_v39, 2 }
 0x4e5   :  { %v2855_v56 = vadd.f32 %v2854_v1, %v2853_v55  ;;  %v2844_v3 = vadd.f32 %v2843_v52, %v2842_v39 }
 0x4e7   :  { %v2845_v48 = vrot.slane %v2844_v3, 1  ;;  %v2856_v12 = vrot.slane %v2855_v56, 1 }
 0x4e9   :  { %v2846_v29 = vadd.f32 %v2845_v48, %v2844_v3  ;;  %v2857_v9 = vadd.f32 %v2856_v12, %v2855_v56 }
 0x4eb   :  { %v2848_v62 = vmul.f32 0.0625, %v2846_v29  ;;  %v2858_v7 = vmul.f32 0.0625, %v2857_v9  ;;  %v3413_v29 = vld [vmem:[%s6289_s1 + $0xe9] sm:$0x1] }
 0x4ed   :  { %v2859_v50 = vsel %vm444_vm5, %v2848_v62, %v2858_v7  ;;  %v3414_v7 = vld [vmem:[%s6289_s1 + $0xea] sm:$0x1]  ;;  %vm3458_vm5 = vcmask 130048  }
 0x4ee   :  { %v2874_v20 = vsel %vm247_vm4, %v2859_v50, 0  ;;  %vm3415_vm4 = vcmask 123904  }
 0x4ef   :  { %v6127_v27 = vand.u32 4294901760, %v2874_v20 }
 0x4f1   :  { %v2950_v15 = vsub.f32 %v2874_v20, %v6127_v27  ;;  %4452 = vmatmul.mubr.f32.vlgmr.msra.gmra.mxu1 %v6127_v27 }
 0x4f2   :  { %4474 = vmatpush3.msra.mxu1 %v5935_v14  ;;  %4489 = vmatprep.mubr.msk.f32.mxu1 %vm4733_vm3, %v4732_v38 }
 0x4f3   :  { %4475 = vmatprep.subr.mxu1 %v4732_v38  ;;  %v2951_v45 = vand.u32 4294901760, %v2950_v15 }
 0x4f4   :  { %4476 = vmatpush3.msra.mxu1 %v5945_v40 }
 0x4f5   :  { %4477 = vmatprep.subr.mxu1 %v4732_v38  ;;  %v2952_v54 = vsub.f32 %v2950_v15, %v2951_v45 }
 0x4f6   :  { %4478 = vmatpush3.msra.mxu1 %v5954_v61 }
 0x4f7   :  { %4479 = vmatprep.subr.mxu1 %v4732_v38  ;;  %v2953_v58 = vand.u32 4294901760, %v2952_v54 }
 0x4f8   :  { %4480 = vmatpush3.msra.mxu1 %v5968_v26 }
 0x4f9   :  { %4481 = vmatprep.subr.mxu1 %v4732_v38  ;;  %4433 = vmatmul.mubr.f32.vlgmr.msra.gmra.mxu0 %v2953_v58 }
 0x4fa   :  { %4455 = vmatpush3.msra.mxu0 %v5943_v49  ;;  %4482 = vmatpush3.msra.mxu1 %v5991_v35 }
 0x4fb   :  { %4456 = vmatprep.subr.mxu0 %v4732_v38  ;;  %4483 = vmatprep.subr.mxu1 %v4732_v38 }
 0x4fc   :  { %4457 = vmatpush3.msra.mxu0 %v5952_v43  ;;  %4484 = vmatpush3.msra.mxu1 %v5993_v28 }
 0x4fd   :  { %4458 = vmatprep.subr.mxu0 %v4732_v38  ;;  %4485 = vmatprep.subr.mxu1 %v4732_v38 }
 0x4fe   :  { %4459 = vmatpush3.msra.mxu0 %v5966_v17  ;;  %4486 = vmatpush3.msra.mxu1 %v5995_v63 }
 0x4ff   :  { %4460 = vmatprep.subr.mxu0 %v4732_v38  ;;  %4487 = vmatprep.subr.mxu1 %v4732_v38 }
 0x500   :  { %4461 = vmatpush3.msra.mxu0 %v5988_v4  ;;  %4488 = vmatpush3.msra.mxu1 %v6003_v33 }
 0x501   :  { %4462 = vmatprep.subr.mxu0 %v4732_v38  ;;  %4490 = vmatmul.mubr.f32.vlgmr.msra.gmra.mxu1 %v2951_v45 }
 0x502   :  { %4511 = vmatprep.subr.mxu1 %v4732_v38  ;;  %4463 = vmatpush3.msra.mxu0 %v6008_v5 }
 0x503   :  { %4512 = vmatpush3.msra.mxu1 %v5935_v14  ;;  %4464 = vmatprep.subr.mxu0 %v4732_v38  ;;  %v3452_v14 = vld [vmem:[%s6289_s1 + $0xf8] sm:$0xff] }
 0x504   :  { %4513 = vmatprep.subr.mxu1 %v4732_v38  ;;  %4465 = vmatpush3.msra.mxu0 %v6012_v36  ;;  %v6220_v49 = vand.u32 4294901760, %v3452_v14 }
 0x505   :  { %4514 = vmatpush3.msra.mxu1 %v5945_v40  ;;  %4466 = vmatprep.subr.mxu0 %v4732_v38  ;;  %v3451_v40 = vld [vmem:[%s6289_s1 + $0xf0] sm:$0xff] }
 0x506   :  { %4515 = vmatprep.subr.mxu1 %v4732_v38  ;;  %4467 = vmatpush3.msra.mxu0 %v6015_v23  ;;  %v6228_v43 = vand.u32 4294901760, %v3451_v40 }
 0x507   :  { %4516 = vmatpush3.msra.mxu1 %v5954_v61  ;;  %4468 = vmatprep.subr.mxu0 %v4732_v38 }
 0x508   :  { %4517 = vmatprep.subr.mxu1 %v4732_v38  ;;  %4469 = vmatpush3.msra.mxu0 %v6019_v16 }
 0x509   :  { %4470 = vmatprep.mubr.msk.f32.mxu0 %vm4733_vm3, %v4732_v38  ;;  %4518 = vmatpush3.msra.mxu1 %v5968_v26 }
 0x50a   :  { %4471 = vmatmul.mubr.f32.vlgmr.msra.gmra.mxu0 %v2950_v15  ;;  %4492 = vmatprep.subr.mxu0 %v4732_v38 }
 0x50b   :  { %4519 = vmatprep.subr.mxu1 %v4732_v38  ;;  %4493 = vmatpush3.msra.mxu0 %v2978_v53  ;;  %v6226_v53 = vsub.f32 %v3452_v14, %v6220_v49 }
 0x50c   :  { %4520 = vmatpush3.msra.mxu1 %v5991_v35  ;;  %4494 = vmatprep.subr.mxu0 %v4732_v38 }
 0x50d   :  { %4521 = vmatprep.subr.mxu1 %v4732_v38  ;;  %4495 = vmatpush3.msra.mxu0 %v2985_v60  ;;  %v3570_v61 = vand.u32 4294901760, %v6226_v53  ;;  %v6234_v60 = vsub.f32 %v3451_v40, %v6228_v43 }
 0x50e   :  { %4522 = vmatpush3.msra.mxu1 %v5993_v28  ;;  %4496 = vmatprep.subr.mxu0 %v4732_v38 }
 0x50f   :  { %4523 = vmatprep.subr.mxu1 %v4732_v38  ;;  %4497 = vmatpush3.msra.mxu0 %v2992_v51  ;;  %v3571_v17 = vsub.f32 %v6226_v53, %v3570_v61  ;;  %v3577_v26 = vand.u32 4294901760, %v6234_v60 }
 0x510   :  { %4524 = vmatpush3.msra.mxu1 %v5995_v63  ;;  %4498 = vmatprep.subr.mxu0 %v4732_v38 }
 0x511   :  { %4525 = vmatprep.subr.mxu1 %v4732_v38  ;;  %4499 = vmatpush3.msra.mxu0 %v2999_v24  ;;  %v3572_v51 = vand.u32 4294901760, %v3571_v17  ;;  %v3578_v4 = vsub.f32 %v6234_v60, %v3577_v26 }
 0x512   :  { %4526 = vmatpush3.msra.mxu1 %v6003_v33  ;;  %4527 = vmatprep.mubr.msk.f32.mxu1 %vm4733_vm3, %v4732_v38 }
 0x513   :  { %4500 = vmatprep.subr.mxu0 %v4732_v38  ;;  %4528 = vmatmul.mubr.f32.vlgmr.msra.gmra.mxu1 %v6127_v27  ;;  %v3579_v35 = vand.u32 4294901760, %v3578_v4 }
 0x514   :  { %4501 = vmatpush3.msra.mxu0 %v3006_v57  ;;  %4508 = vmatprep.mubr.msk.f32.mxu0 %vm4733_vm3, %v4732_v38  ;;  %v3934_v57 = vld [vmem:[%s6289_s1 + $0xe8] ss:$0 sm:$0xff] }
 0x515   :  { %4502 = vmatprep.subr.mxu0 %v4732_v38  ;;  %4537 = vmatprep.subr.mxu1 %v4732_v38 }
 0x516   :  { %4503 = vmatpush3.msra.mxu0 %v3013_v46  ;;  %4541 = vmatprep.mubr.msk.f32.mxu1 %vm4733_vm3, %v4732_v38 }
 0x517   :  { %4504 = vmatprep.subr.mxu0 %v4732_v38  ;;  %4538 = vmatpush3.msra.mxu1 %v3572_v51 }
 0x518   :  { %4505 = vmatpush3.msra.mxu0 %v3020_v19  ;;  %4539 = vmatprep.subr.mxu1 %v4732_v38 }
 0x519   :  { %4506 = vmatprep.subr.mxu0 %v4732_v38  ;;  %4540 = vmatpush3.msra.mxu1 %v3579_v35 }
 0x51a   :  { %4507 = vmatpush3.msra.mxu0 %v3027_v2  ;;  %4551 = vmatprep.subr.mxu1 %v4732_v38 }
 0x51b   :  { %4509 = vmatmul.mubr.f32.vlgmr.msra.gmra.mxu0 %v6127_v27  ;;  %4530 = vmatprep.subr.mxu0 %v4732_v38 }
 0x51c   :  { %4534 = vmatprep.mubr.msk.f32.mxu0 %vm4733_vm3, %v4732_v38  ;;  %4531 = vmatpush3.msra.mxu0 %v6220_v49 }
 0x51d   :  { %4532 = vmatprep.subr.mxu0 %v4732_v38 }
 0x51e   :  { %4533 = vmatpush3.msra.mxu0 %v6228_v43 }
 0x51f   :  { %4544 = vmatprep.subr.mxu0 %v4732_v38 }
 0x5b1   :  { %v3066_v28 = vpop.f32.mrf.mxu1 }
 0x5b3   :  { %v4453_v63 = vpop.f32.mrf.mxu1 }
 0x5b9   :  { %v2955_v33 = vpop.f32.mrf.mxu0 }
 0x5ba   :  { %v2956_v46 = vadd.f32 %v3934_v57, %v2955_v33 }
 0x5bb   :  { %v4434_v24 = vpop.f32.mrf.mxu0 }
 0x5bc   :  { %v3067_v2 = vadd.f32 %v3066_v28, %v2956_v46  ;;  %v3935_v28 = vld [vmem:[%s6289_s1 + $0x100] ss:$0 sm:$0xff] }
 0x5c1   :  { %v3235_v5 = vpop.f32.mrf.mxu1 }
 0x5c3   :  { %v4491_v36 = vpop.f32.mrf.mxu1 }
 0x5ca   :  { %v3154_v23 = vpop.f32.mrf.mxu0 }
 0x5cb   :  { %v3155_v6 = vadd.f32 %v3154_v23, %v3067_v2 }
 0x5cc   :  { %v4472_v16 = vpop.f32.mrf.mxu0 }
 0x5cd   :  { %v3236_v10 = vadd.f32 %v3235_v5, %v3155_v6 }
 0x5d3   :  { %v3409_v19 = vpop.f32.mrf.mxu1 }
 0x5d5   :  { %v4529_v8 = vpop.f32.mrf.mxu1 }
 0x5db   :  { %v3330_v18 = vpop.f32.mrf.mxu0 }
 0x5dc   :  { %v3331_v37 = vadd.f32 %v3330_v18, %v3236_v10 }
 0x5dd   :  { %v4510_v41 = vpop.f32.mrf.mxu0 }
 0x5de   :  { %v3410_v44 = vadd.f32 %v3409_v19, %v3331_v37 }
 0x5e0   :  { %v3416_v31 = vsel %vm3415_vm4, %v3410_v44, 0.0  ;;  %v3425_v30 = vmul.f32 %v3410_v44, %v3410_v44 }
 0x5e1   :  { %v3417_v25 = vrot.slane %v3416_v31, 4 }
 0x5e2   :  { %v3426_v47 = vsel %vm3415_vm4, %v3425_v30, 0.0 }
 0x5e3   :  { %v3418_v22 = vadd.f32 %v3417_v25, %v3416_v31  ;;  %v3427_v13 = vrot.slane %v3426_v47, 4 }
 0x5e5   :  { %v3419_v0 = vrot.slane %v3418_v22, 2  ;;  %v3428_v42 = vadd.f32 %v3427_v13, %v3426_v47 }
 0x5e7   :  { %v3420_v34 = vadd.f32 %v3419_v0, %v3418_v22  ;;  %v3429_v59 = vrot.slane %v3428_v42, 2 }
 0x5e9   :  { %v3421_v11 = vrot.slane %v3420_v34, 1  ;;  %v3430_v32 = vadd.f32 %v3429_v59, %v3428_v42 }
 0x5eb   :  { %v3422_v55 = vadd.f32 %v3421_v11, %v3420_v34  ;;  %v3431_v39 = vrot.slane %v3430_v32, 1 }
 0x5ed   :  { %v3424_v1 = vmul.f32 0.5, %v3422_v55  ;;  %v3432_v52 = vadd.f32 %v3431_v39, %v3430_v32 }
 0x5ef   :  { %v3433_v56 = vmul.f32 0.5, %v3432_v52  ;;  %v3434_v3 = vmul.f32 %v3424_v1, %v3424_v1 }
 0x5f1   :  { %v3435_v48 = vsub.f32 %v3433_v56, %v3434_v3 }
 0x5f3   :  { %v3436_v12 = vadd.f32 1e-05, %v3435_v48 }
 0x5f5   :  { %4717 = vrsqrt.f32 %v3436_v12 }
 0x602   :  { %v4718_v9 = vpop.eup %4717 }
 0x603   :  { %v3438_v62 = vmul.f32 %v4718_v9, %v3413_v29 }
 0x605   :  { %v3439_v50 = vmul.f32 %v3438_v62, %v3424_v1  ;;  %v3444_v20 = vrot.slane %v3438_v62, %v4817_v21 }
 0x607   :  { %v3440_v27 = vsub.f32 %v3414_v7, %v3439_v50  ;;  %v3445_v15 = vmul.f32 %v3444_v20, %v3410_v44 }
 0x609   :  { %v3449_v45 = vrot.slane %v3440_v27, %v4817_v21 }
 0x60b   :  { %v3450_v54 = vadd.f32 %v3449_v45, %v3445_v15 }
 0x60d   :  { %v3460_v58 = vsel %vm3458_vm5, %v3450_v54, 0 }
 0x60e   :  { %v3529_v14 = vand.u32 4294901760, %v3460_v58 }
 0x610   :  { %v3530_v40 = vsub.f32 %v3460_v58, %v3529_v14  ;;  %4542 = vmatmul.mubr.f32.vlgmr.msra.gmra.mxu1 %v3529_v14 }
 0x611   :  { %4552 = vmatpush3.msra.mxu1 %v6220_v49  ;;  %4555 = vmatprep.mubr.msk.f32.mxu1 %vm4733_vm3, %v4732_v38 }
 0x612   :  { %4553 = vmatprep.subr.mxu1 %v4732_v38  ;;  %v3531_v17 = vand.u32 4294901760, %v3530_v40 }
 0x613   :  { %4554 = vmatpush3.msra.mxu1 %v6228_v43 }
 0x614   :  { %4556 = vmatmul.mubr.f32.vlgmr.msra.gmra.mxu1 %v3531_v17  ;;  %4565 = vmatprep.subr.mxu1 %v4732_v38  ;;  %v3532_v21 = vsub.f32 %v3530_v40, %v3531_v17 }
 0x615   :  { %4566 = vmatpush3.msra.mxu1 %v6220_v49  ;;  %4569 = vmatprep.mubr.msk.f32.mxu1 %vm4733_vm3, %v4732_v38 }
 0x616   :  { %4567 = vmatprep.subr.mxu1 %v4732_v38  ;;  %v3533_v51 = vand.u32 4294901760, %v3532_v21 }
 0x617   :  { %4568 = vmatpush3.msra.mxu1 %v6228_v43 }
 0x618   :  { %4535 = vmatmul.mubr.f32.vlgmr.msra.gmra.mxu0 %v3533_v51  ;;  %4570 = vmatmul.mubr.f32.vlgmr.msra.gmra.mxu1 %v3529_v14 }
 0x619   :  { %4545 = vmatpush3.msra.mxu0 %v6226_v53  ;;  %4548 = vmatprep.mubr.msk.f32.mxu0 %vm4733_vm3, %v4732_v38 }
 0x61a   :  { %4546 = vmatprep.subr.mxu0 %v4732_v38 }
 0x61b   :  { %4547 = vmatpush3.msra.mxu0 %v6234_v60 }
 0x61c   :  { %4558 = vmatprep.subr.mxu0 %v4732_v38  ;;  %4549 = vmatmul.mubr.f32.vlgmr.msra.gmra.mxu0 %v3530_v40 }
 0x61d   :  { %4559 = vmatpush3.msra.mxu0 %v3570_v61  ;;  %4562 = vmatprep.mubr.msk.f32.mxu0 %vm4733_vm3, %v4732_v38 }
 0x61e   :  { %4560 = vmatprep.subr.mxu0 %v4732_v38 }
 0x61f   :  { %4561 = vmatpush3.msra.mxu0 %v3577_v26 }
 0x620   :  { %4563 = vmatmul.mubr.f32.vlgmr.msra.gmra.mxu0 %v3529_v14 }
 0x6d0   :  { %v3616_v49 = vpop.f32.mrf.mxu1 }
 0x6d2   :  { %v4543_v43 = vpop.f32.mrf.mxu1 }
 0x6d4   :  { %v3767_v4 = vpop.f32.mrf.mxu1 }
 0x6d6   :  { %v4557_v35 = vpop.f32.mrf.mxu1 }
 0x6d8   :  { %v3535_v63 = vpop.f32.mrf.mxu0  ;;  %v3917_v53 = vpop.f32.mrf.mxu1 }
 0x6d9   :  { %v3536_v61 = vadd.f32 %v3935_v28, %v3535_v63 }
 0x6da   :  { %v4536_v33 = vpop.f32.mrf.mxu0  ;;  %v4571_v24 = vpop.f32.mrf.mxu1 }
 0x6db   :  { %v3617_v5 = vadd.f32 %v3616_v49, %v3536_v61 }
 0x6dc   :  { %v3692_v36 = vpop.f32.mrf.mxu0 }
 0x6dd   :  { %v3693_v38 = vadd.f32 %v3692_v36, %v3617_v5 }
 0x6de   :  { %v4550_v23 = vpop.f32.mrf.mxu0 }
 0x6df   :  { %v3768_v60 = vadd.f32 %v3767_v4, %v3693_v38 }
 0x6e0   :  { %v3844_v26 = vpop.f32.mrf.mxu0 }
 0x6e1   :  { %v3845_v16 = vadd.f32 %v3844_v26, %v3768_v60 }
 0x6e2   :  { %v4564_v57 = vpop.f32.mrf.mxu0 }
 0x6e3   :  { %v3918_v46 = vadd.f32 %v3917_v53, %v3845_v16 }
 0x6e5   :  { %3922 = vst.msk [vmem:[%s6290_s2] sm:$0x3] %vm3921_vm10, %v3918_v46 }

</bundles_post_ra>
